<compile_context>
chip_gen: v7x
topology: tpu7x:2x2x1
jax: 0.10.0
libtpu: 0.0.40
codegen_flags: <defaults>
</compile_context>

<pallas_src>
import functools

import jax
import jax.numpy as jnp
from jax.experimental import pallas as pl
from jax.experimental.pallas import tpu as pltpu

# Layer sizes of the PyTorch module.
DIMS = [28 * 28, 256, 128, 64, 128, 256, 28 * 28]
LANE = 128
D_PAD = ((DIMS[0] + LANE - 1) // LANE) * LANE  # 784 -> 896 (lane-dense)


def _ae_kernel(x_ref,
               w1_ref, b1_ref, w2_ref, b2_ref, w3_ref, b3_ref,
               w4_ref, b4_ref, w5_ref, b5_ref, w6_ref, b6_ref,
               o_ref):
    """Fused forward pass for one (batch_tile, 896) activation tile in VMEM."""

    def dense(h, w_ref, b_ref):
        # bf16 x bf16 on the MXU, f32 accumulation, f32 bias add.
        return jnp.dot(h.astype(jnp.bfloat16), w_ref[...],
                       preferred_element_type=jnp.float32) + b_ref[...]

    h = x_ref[...]  # (tile, 896) bf16

    # Encoder: Linear+ReLU x3
    h = jnp.maximum(dense(h, w1_ref, b1_ref), 0.0)
    h = jnp.maximum(dense(h, w2_ref, b2_ref), 0.0)
    h = jnp.maximum(dense(h, w3_ref, b3_ref), 0.0)
    # Decoder: Linear+ReLU x2, then Linear+Sigmoid
    h = jnp.maximum(dense(h, w4_ref, b4_ref), 0.0)
    h = jnp.maximum(dense(h, w5_ref, b5_ref), 0.0)
    h = dense(h, w6_ref, b6_ref)
    # Sigmoid: exp and (approx) reciprocal both run on the EUP slot.
    h = pl.reciprocal(1.0 + jnp.exp(-h), approx=True)

    o_ref[...] = h.astype(o_ref.dtype)


@functools.partial(jax.jit, static_argnames=("batch_tile",))
def denoising_model_forward(x, params, *, batch_tile=256):
    """x: (B, 784) float32. params: list of (W (in,out) f32, b (1,out) f32)."""
    B, D_in = x.shape
    assert D_in == DIMS[0]

    # Pad batch up to a multiple of the tile and features up to 896 lanes.
    b_pad = -(-B // batch_tile) * batch_tile
    xp = jnp.pad(x, ((0, b_pad - B), (0, D_PAD - D_in))).astype(jnp.bfloat16)

    ws = [w.astype(jnp.bfloat16) for (w, _) in params]
    bs = [b.astype(jnp.float32) for (_, b) in params]
    # Zero-pad first-layer rows and last-layer cols/bias to the padded width.
    ws[0] = jnp.pad(ws[0], ((0, D_PAD - DIMS[0]), (0, 0)))
    ws[-1] = jnp.pad(ws[-1], ((0, 0), (0, D_PAD - DIMS[-1])))
    bs[-1] = jnp.pad(bs[-1], ((0, 0), (0, D_PAD - DIMS[-1])))

    # x is tiled along the batch axis; all weights/biases are passed as full
    # (untiled) blocks — ~1 MB of bf16 params fits VMEM comfortably.
    in_specs = [pl.BlockSpec((batch_tile, D_PAD), lambda i: (i, 0))]
    flat_params = []
    for w, b in zip(ws, bs):
        in_specs.append(pl.BlockSpec(w.shape, lambda i: (0, 0)))
        in_specs.append(pl.BlockSpec(b.shape, lambda i: (0, 0)))
        flat_params.extend([w, b])

    out_specs = pl.BlockSpec((batch_tile, D_PAD), lambda i: (i, 0))

    out = pl.pallas_call(
        _ae_kernel,
        out_shape=jax.ShapeDtypeStruct((b_pad, D_PAD), jnp.float32),
        grid_spec=pltpu.PrefetchScalarGridSpec(
            num_scalar_prefetch=0,
            grid=(b_pad // batch_tile,),
            in_specs=in_specs,
            out_specs=out_specs,
        ),
        compiler_params=pltpu.CompilerParams(
            dimension_semantics=("parallel",),
        ),
    )(xp, *flat_params)

    # Strip batch/feature padding.
    return out[:B, :DIMS[-1]]


def init_params(key):
    """Deterministic init mimicking PyTorch nn.Linear default (U[-1/sqrt(fan_in), +])."""
    params = []
    for i in range(len(DIMS) - 1):
        fan_in, fan_out = DIMS[i], DIMS[i + 1]
        key, kw, kb = jax.random.split(key, 3)
        bound = 1.0 / jnp.sqrt(jnp.float32(fan_in))
        w = jax.random.uniform(kw, (fan_in, fan_out), jnp.float32, -bound, bound)
        b = jax.random.uniform(kb, (1, fan_out), jnp.float32, -bound, bound)
        params.append((w, b))
    return params


def reference_forward(x, params):
    """Pure f32 JAX reference matching the PyTorch forward."""
    h = x
    for i, (w, b) in enumerate(params):
        h = h @ w + b
        if i < len(params) - 1:
            h = jnp.maximum(h, 0.0)
        else:
            h = jax.nn.sigmoid(h)
    return h


if __name__ == "__main__":
    key = jax.random.PRNGKey(0)
    key, kx = jax.random.split(key)

    params = init_params(key)

    B = 512  # 2 grid steps of 256 rows -> keeps both v7x TensorCores busy
    x = jax.random.normal(kx, (B, 28 * 28), jnp.float32)

    out = denoising_model_forward(x, params, batch_tile=256)
    out = jax.block_until_ready(out)

    ref = reference_forward(x, params)
    assert out.shape == (B, 28 * 28)
    # bf16 matmul inputs + approx reciprocal vs. the f32 reference: the
    # sigmoid output lives in [0, 1], so a 2e-2 absolute tolerance is ample.
    err = float(jnp.max(jnp.abs(out - ref)))
    assert err < 2e-2, f"max abs error {err} vs f32 reference"

    print("KERNEL_OK")
</pallas_src>

<mosaic_0001>
module attributes {stable_mosaic.version = 11 : i64} {
  func.func @_ae_kernel(%arg0: i32, %arg1: memref<256x896xbf16, #tpu.memory_space<vmem>>, %arg2: memref<896x256xbf16, #tpu.memory_space<vmem>>, %arg3: memref<1x256xf32, #tpu.memory_space<vmem>>, %arg4: memref<256x128xbf16, #tpu.memory_space<vmem>>, %arg5: memref<1x128xf32, #tpu.memory_space<vmem>>, %arg6: memref<128x64xbf16, #tpu.memory_space<vmem>>, %arg7: memref<1x64xf32, #tpu.memory_space<vmem>>, %arg8: memref<64x128xbf16, #tpu.memory_space<vmem>>, %arg9: memref<1x128xf32, #tpu.memory_space<vmem>>, %arg10: memref<128x256xbf16, #tpu.memory_space<vmem>>, %arg11: memref<1x256xf32, #tpu.memory_space<vmem>>, %arg12: memref<256x896xbf16, #tpu.memory_space<vmem>>, %arg13: memref<1x896xf32, #tpu.memory_space<vmem>>, %arg14: memref<256x896xf32, #tpu.memory_space<vmem>>) attributes {dimension_semantics = [#tpu.dimension_semantics<parallel>], iteration_bounds = array<i64: 2>, scalar_prefetch = 0 : i64, scratch_operands = 0 : i64, tpu.core_type = #tpu.core_type<tc>, window_params = [{transform_indices = @transform_0, window_bounds = array<i64: 256, 896>}, {pipeline_mode = #tpu.pipeline_mode<synchronous>, transform_indices = @transform_1, window_bounds = array<i64: 896, 256>}, {pipeline_mode = #tpu.pipeline_mode<synchronous>, transform_indices = @transform_2, window_bounds = array<i64: 1, 256>}, {pipeline_mode = #tpu.pipeline_mode<synchronous>, transform_indices = @transform_3, window_bounds = array<i64: 256, 128>}, {pipeline_mode = #tpu.pipeline_mode<synchronous>, transform_indices = @transform_4, window_bounds = array<i64: 1, 128>}, {pipeline_mode = #tpu.pipeline_mode<synchronous>, transform_indices = @transform_5, window_bounds = array<i64: 128, 64>}, {pipeline_mode = #tpu.pipeline_mode<synchronous>, transform_indices = @transform_6, window_bounds = array<i64: 1, 64>}, {pipeline_mode = #tpu.pipeline_mode<synchronous>, transform_indices = @transform_7, window_bounds = array<i64: 64, 128>}, {pipeline_mode = #tpu.pipeline_mode<synchronous>, transform_indices = @transform_8, window_bounds = array<i64: 1, 128>}, {pipeline_mode = #tpu.pipeline_mode<synchronous>, transform_indices = @transform_9, window_bounds = array<i64: 128, 256>}, {pipeline_mode = #tpu.pipeline_mode<synchronous>, transform_indices = @transform_10, window_bounds = array<i64: 1, 256>}, {pipeline_mode = #tpu.pipeline_mode<synchronous>, transform_indices = @transform_11, window_bounds = array<i64: 256, 896>}, {pipeline_mode = #tpu.pipeline_mode<synchronous>, transform_indices = @transform_12, window_bounds = array<i64: 1, 896>}, {transform_indices = @transform_13, window_bounds = array<i64: 256, 896>}]} {
    %c0 = arith.constant 0 : index
    %c0_0 = arith.constant 0 : index
    %0 = vector.load %arg1[%c0, %c0_0] : memref<256x896xbf16, #tpu.memory_space<vmem>>, vector<256x896xbf16>
    %c0_1 = arith.constant 0 : index
    %c0_2 = arith.constant 0 : index
    %1 = vector.load %arg2[%c0_1, %c0_2] : memref<896x256xbf16, #tpu.memory_space<vmem>>, vector<896x256xbf16>
    %cst = arith.constant dense<0.000000e+00> : vector<256x256xf32>
    %2 = tpu.matmul %0, %1, %cst {dimension_numbers = #tpu.dot_dimension_numbers<[1], [0], [0], [1], [0, 0, 1, 1], [], []>} : vector<256x896xbf16>, vector<896x256xbf16>, vector<256x256xf32> -> vector<256x256xf32>
    %c0_3 = arith.constant 0 : index
    %c0_4 = arith.constant 0 : index
    %3 = vector.load %arg3[%c0_3, %c0_4] : memref<1x256xf32, #tpu.memory_space<vmem>>, vector<1x256xf32>
    %4 = vector.broadcast %3 : vector<1x256xf32> to vector<256x256xf32>
    %5 = arith.addf %2, %4 : vector<256x256xf32>
    %cst_5 = arith.constant 0.000000e+00 : f32
    %6 = vector.broadcast %cst_5 : f32 to vector<256x256xf32>
    %7 = arith.maximumf %5, %6 : vector<256x256xf32>
    %8 = arith.truncf %7 : vector<256x256xf32> to vector<256x256xbf16>
    %c0_6 = arith.constant 0 : index
    %c0_7 = arith.constant 0 : index
    %9 = vector.load %arg4[%c0_6, %c0_7] : memref<256x128xbf16, #tpu.memory_space<vmem>>, vector<256x128xbf16>
    %cst_8 = arith.constant dense<0.000000e+00> : vector<256x128xf32>
    %10 = tpu.matmul %8, %9, %cst_8 {dimension_numbers = #tpu.dot_dimension_numbers<[1], [0], [0], [1], [0, 0, 1, 1], [], []>} : vector<256x256xbf16>, vector<256x128xbf16>, vector<256x128xf32> -> vector<256x128xf32>
    %c0_9 = arith.constant 0 : index
    %c0_10 = arith.constant 0 : index
    %11 = vector.load %arg5[%c0_9, %c0_10] : memref<1x128xf32, #tpu.memory_space<vmem>>, vector<1x128xf32>
    %12 = vector.broadcast %11 : vector<1x128xf32> to vector<256x128xf32>
    %13 = arith.addf %10, %12 : vector<256x128xf32>
    %cst_11 = arith.constant 0.000000e+00 : f32
    %14 = vector.broadcast %cst_11 : f32 to vector<256x128xf32>
    %15 = arith.maximumf %13, %14 : vector<256x128xf32>
    %16 = arith.truncf %15 : vector<256x128xf32> to vector<256x128xbf16>
    %c0_12 = arith.constant 0 : index
    %c0_13 = arith.constant 0 : index
    %17 = vector.load %arg6[%c0_12, %c0_13] : memref<128x64xbf16, #tpu.memory_space<vmem>>, vector<128x64xbf16>
    %cst_14 = arith.constant dense<0.000000e+00> : vector<256x64xf32>
    %18 = tpu.matmul %16, %17, %cst_14 {dimension_numbers = #tpu.dot_dimension_numbers<[1], [0], [0], [1], [0, 0, 1, 1], [], []>} : vector<256x128xbf16>, vector<128x64xbf16>, vector<256x64xf32> -> vector<256x64xf32>
    %c0_15 = arith.constant 0 : index
    %c0_16 = arith.constant 0 : index
    %19 = vector.load %arg7[%c0_15, %c0_16] : memref<1x64xf32, #tpu.memory_space<vmem>>, vector<1x64xf32>
    %20 = vector.broadcast %19 : vector<1x64xf32> to vector<256x64xf32>
    %21 = arith.addf %18, %20 : vector<256x64xf32>
    %cst_17 = arith.constant 0.000000e+00 : f32
    %22 = vector.broadcast %cst_17 : f32 to vector<256x64xf32>
    %23 = arith.maximumf %21, %22 : vector<256x64xf32>
    %24 = arith.truncf %23 : vector<256x64xf32> to vector<256x64xbf16>
    %c0_18 = arith.constant 0 : index
    %c0_19 = arith.constant 0 : index
    %25 = vector.load %arg8[%c0_18, %c0_19] : memref<64x128xbf16, #tpu.memory_space<vmem>>, vector<64x128xbf16>
    %cst_20 = arith.constant dense<0.000000e+00> : vector<256x128xf32>
    %26 = tpu.matmul %24, %25, %cst_20 {dimension_numbers = #tpu.dot_dimension_numbers<[1], [0], [0], [1], [0, 0, 1, 1], [], []>} : vector<256x64xbf16>, vector<64x128xbf16>, vector<256x128xf32> -> vector<256x128xf32>
    %c0_21 = arith.constant 0 : index
    %c0_22 = arith.constant 0 : index
    %27 = vector.load %arg9[%c0_21, %c0_22] : memref<1x128xf32, #tpu.memory_space<vmem>>, vector<1x128xf32>
    %28 = vector.broadcast %27 : vector<1x128xf32> to vector<256x128xf32>
    %29 = arith.addf %26, %28 : vector<256x128xf32>
    %cst_23 = arith.constant 0.000000e+00 : f32
    %30 = vector.broadcast %cst_23 : f32 to vector<256x128xf32>
    %31 = arith.maximumf %29, %30 : vector<256x128xf32>
    %32 = arith.truncf %31 : vector<256x128xf32> to vector<256x128xbf16>
    %c0_24 = arith.constant 0 : index
    %c0_25 = arith.constant 0 : index
    %33 = vector.load %arg10[%c0_24, %c0_25] : memref<128x256xbf16, #tpu.memory_space<vmem>>, vector<128x256xbf16>
    %cst_26 = arith.constant dense<0.000000e+00> : vector<256x256xf32>
    %34 = tpu.matmul %32, %33, %cst_26 {dimension_numbers = #tpu.dot_dimension_numbers<[1], [0], [0], [1], [0, 0, 1, 1], [], []>} : vector<256x128xbf16>, vector<128x256xbf16>, vector<256x256xf32> -> vector<256x256xf32>
    %c0_27 = arith.constant 0 : index
    %c0_28 = arith.constant 0 : index
    %35 = vector.load %arg11[%c0_27, %c0_28] : memref<1x256xf32, #tpu.memory_space<vmem>>, vector<1x256xf32>
    %36 = vector.broadcast %35 : vector<1x256xf32> to vector<256x256xf32>
    %37 = arith.addf %34, %36 : vector<256x256xf32>
    %cst_29 = arith.constant 0.000000e+00 : f32
    %38 = vector.broadcast %cst_29 : f32 to vector<256x256xf32>
    %39 = arith.maximumf %37, %38 : vector<256x256xf32>
    %40 = arith.truncf %39 : vector<256x256xf32> to vector<256x256xbf16>
    %c0_30 = arith.constant 0 : index
    %c0_31 = arith.constant 0 : index
    %41 = vector.load %arg12[%c0_30, %c0_31] : memref<256x896xbf16, #tpu.memory_space<vmem>>, vector<256x896xbf16>
    %cst_32 = arith.constant dense<0.000000e+00> : vector<256x896xf32>
    %42 = tpu.matmul %40, %41, %cst_32 {dimension_numbers = #tpu.dot_dimension_numbers<[1], [0], [0], [1], [0, 0, 1, 1], [], []>} : vector<256x256xbf16>, vector<256x896xbf16>, vector<256x896xf32> -> vector<256x896xf32>
    %c0_33 = arith.constant 0 : index
    %c0_34 = arith.constant 0 : index
    %43 = vector.load %arg13[%c0_33, %c0_34] : memref<1x896xf32, #tpu.memory_space<vmem>>, vector<1x896xf32>
    %44 = vector.broadcast %43 : vector<1x896xf32> to vector<256x896xf32>
    %45 = arith.addf %42, %44 : vector<256x896xf32>
    %cst_35 = arith.constant 0.000000e+00 : f32
    %46 = vector.broadcast %cst_35 : f32 to vector<256x896xf32>
    %47 = arith.subf %46, %45 : vector<256x896xf32>
    %48 = math.exp %47 : vector<256x896xf32>
    %cst_36 = arith.constant 1.000000e+00 : f32
    %49 = vector.broadcast %cst_36 : f32 to vector<256x896xf32>
    %50 = arith.addf %49, %48 : vector<256x896xf32>
    %51 = tpu.reciprocal %50 {approx = true} : vector<256x896xf32> -> vector<256x896xf32>
    %c0_37 = arith.constant 0 : index
    %c0_38 = arith.constant 0 : index
    %52 = vector.load %arg14[%c0_37, %c0_38] : memref<256x896xf32, #tpu.memory_space<vmem>>, vector<256x896xf32>
    tpu.vector_store %arg14[%c0_37, %c0_38], %51 {strides = array<i32>} : memref<256x896xf32, #tpu.memory_space<vmem>>, vector<256x896xf32>,
    return
  }
  func.func @transform_0(%arg0: i32) -> (i32, i32) {
    %c0_i32 = arith.constant 0 : i32
    %c0_i32_0 = arith.constant 0 : i32
    return %arg0, %c0_i32 : i32, i32
  }
  func.func @transform_1(%arg0: i32) -> (i32, i32) {
    %c0_i32 = arith.constant 0 : i32
    %c0_i32_0 = arith.constant 0 : i32
    %c0_i32_1 = arith.constant 0 : i32
    return %c0_i32, %c0_i32_0 : i32, i32
  }
  func.func @transform_2(%arg0: i32) -> (i32, i32) {
    %c0_i32 = arith.constant 0 : i32
    %c0_i32_0 = arith.constant 0 : i32
    %c0_i32_1 = arith.constant 0 : i32
    return %c0_i32, %c0_i32_0 : i32, i32
  }
  func.func @transform_3(%arg0: i32) -> (i32, i32) {
    %c0_i32 = arith.constant 0 : i32
    %c0_i32_0 = arith.constant 0 : i32
    %c0_i32_1 = arith.constant 0 : i32
    return %c0_i32, %c0_i32_0 : i32, i32
  }
  func.func @transform_4(%arg0: i32) -> (i32, i32) {
    %c0_i32 = arith.constant 0 : i32
    %c0_i32_0 = arith.constant 0 : i32
    %c0_i32_1 = arith.constant 0 : i32
    return %c0_i32, %c0_i32_0 : i32, i32
  }
  func.func @transform_5(%arg0: i32) -> (i32, i32) {
    %c0_i32 = arith.constant 0 : i32
    %c0_i32_0 = arith.constant 0 : i32
    %c0_i32_1 = arith.constant 0 : i32
    return %c0_i32, %c0_i32_0 : i32, i32
  }
  func.func @transform_6(%arg0: i32) -> (i32, i32) {
    %c0_i32 = arith.constant 0 : i32
    %c0_i32_0 = arith.constant 0 : i32
    %c0_i32_1 = arith.constant 0 : i32
    return %c0_i32, %c0_i32_0 : i32, i32
  }
  func.func @transform_7(%arg0: i32) -> (i32, i32) {
    %c0_i32 = arith.constant 0 : i32
    %c0_i32_0 = arith.constant 0 : i32
    %c0_i32_1 = arith.constant 0 : i32
    return %c0_i32, %c0_i32_0 : i32, i32
  }
  func.func @transform_8(%arg0: i32) -> (i32, i32) {
    %c0_i32 = arith.constant 0 : i32
    %c0_i32_0 = arith.constant 0 : i32
    %c0_i32_1 = arith.constant 0 : i32
    return %c0_i32, %c0_i32_0 : i32, i32
  }
  func.func @transform_9(%arg0: i32) -> (i32, i32) {
    %c0_i32 = arith.constant 0 : i32
    %c0_i32_0 = arith.constant 0 : i32
    %c0_i32_1 = arith.constant 0 : i32
    return %c0_i32, %c0_i32_0 : i32, i32
  }
  func.func @transform_10(%arg0: i32) -> (i32, i32) {
    %c0_i32 = arith.constant 0 : i32
    %c0_i32_0 = arith.constant 0 : i32
    %c0_i32_1 = arith.constant 0 : i32
    return %c0_i32, %c0_i32_0 : i32, i32
  }
  func.func @transform_11(%arg0: i32) -> (i32, i32) {
    %c0_i32 = arith.constant 0 : i32
    %c0_i32_0 = arith.constant 0 : i32
    %c0_i32_1 = arith.constant 0 : i32
    return %c0_i32, %c0_i32_0 : i32, i32
  }
  func.func @transform_12(%arg0: i32) -> (i32, i32) {
    %c0_i32 = arith.constant 0 : i32
    %c0_i32_0 = arith.constant 0 : i32
    %c0_i32_1 = arith.constant 0 : i32
    return %c0_i32, %c0_i32_0 : i32, i32
  }
  func.func @transform_13(%arg0: i32) -> (i32, i32) {
    %c0_i32 = arith.constant 0 : i32
    %c0_i32_0 = arith.constant 0 : i32
    return %arg0, %c0_i32 : i32, i32
  }
}

</mosaic_0001>

<bundles_post_ra>
// kernel: denoising_model_forward.1
= control target key start
LH: loop header
LB: loop body
LE: loop exit
PB: predicated region body
PF: predicated region fallthrough
CT: control target
= control target key end

     0   :  { %s9472_s25 = smov 0   ;;  %s12119_s0 = inlined_call_operand.vmem [shape: bf16[512,896], index: 0, kind: input, shape index: {}]   ;;  %s12120_s1 = inlined_call_operand.vmem [shape: bf16[896,256], index: 1, kind: input, shape index: {}]   ;;  %s12121_s2 = inlined_call_operand.vmem [shape: f32[1,256], index: 2, kind: input, shape index: {}]   ;;  %s12122_s3 = inlined_call_operand.vmem [shape: bf16[256,128], index: 3, kind: input, shape index: {}]   ;;  %s12123_s4 = inlined_call_operand.vmem [shape: f32[1,128], index: 4, kind: input, shape index: {}]   ;;  %s12124_s5 = inlined_call_operand.vmem [shape: bf16[128,64], index: 5, kind: input, shape index: {}]   ;;  %s12125_s6 = inlined_call_operand.vmem [shape: f32[1,64], index: 6, kind: input, shape index: {}]   ;;  %s12126_s7 = inlined_call_operand.vmem [shape: bf16[64,128], index: 7, kind: input, shape index: {}]   ;;  %s12127_s8 = inlined_call_operand.vmem [shape: f32[1,128], index: 8, kind: input, shape index: {}]   ;;  %s12128_s9 = inlined_call_operand.vmem [shape: bf16[128,256], index: 9, kind: input, shape index: {}]   ;;  %s12129_s10 = inlined_call_operand.vmem [shape: f32[1,256], index: 10, kind: input, shape index: {}]   ;;  %s12130_s11 = inlined_call_operand.vmem [shape: bf16[256,896], index: 11, kind: input, shape index: {}]   ;;  %s12131_s12 = inlined_call_operand.vmem [shape: f32[1,896], index: 12, kind: input, shape index: {}]   ;;  %s12132_s13 = inlined_call_operand.vmem [shape: f32[512,896], index: 13, kind: output, shape index: {}]  }
   0x1 LB: > { %s6907_s26 = sadd.s32 4294967295, %s9399_s25   ;;  %p6911_p0 = scmp.ge.s32.totalorder %s9399_s25, 1  ;;  %s9399_s25 = sphi %s9472_s25, %s23_s25  }
   0x2   : > { %p389_p1 = scmp.lt.s32.totalorder %s9399_s25, 3 }
   0x4   : > { %p390_p2 = pnand %p6911_p0, %p389_p1 }
   0x6   : > { %393 = sbr.rel (%p390_p2) target bundleno = 2272 (0x8e0), region = 72 }
   0xd   : > { %v7956_v0 = vld [vmem:[%s12120_s1 + $0x4] ss:$8 sps:$4 sm:$0xff]   ;;  %v7958_v1 = vld [vmem:[%s12120_s1] ss:$8 sps:$4 sm:$0xff]   ;;  %v7959_v2 = vld [vmem:[%s12120_s1 + $0x14] ss:$8 sps:$4 sm:$0xff]  }
   0xe   : > { %1838 = vmatprep.subr.bf16.mxu0 %v7956_v0  ;;  %v7961_v3 = vld [vmem:[%s12120_s1 + $0x10] ss:$8 sps:$4 sm:$0xff]   ;;  %v7962_v4 = vld [vmem:[%s12120_s1 + $0x24] ss:$8 sps:$4 sm:$0xff]   ;;  %s6912_s20 = sshll.u32 %s6907_s26, 5  ;;  %vm3369_vm0 = vcmask 523264  }
   0xf   : > { %1839 = vmatpush1.bf16.msra.mxu0 %v7958_v1  ;;  %v7964_v5 = vld [vmem:[%s12120_s1 + $0x20] ss:$8 sps:$4 sm:$0xff]   ;;  %p436_p3 = scmp.lt.s32.totalorder %s6912_s20, 63  ;;  %v7965_v6 = vld [vmem:[%s12120_s1 + $0x34] ss:$8 sps:$4 sm:$0xff]  }
  0x10   : > { %1840 = vmatprep.subr.bf16.mxu0 %v7959_v2  ;;  %v7967_v7 = vld [vmem:[%s12120_s1 + $0x30] ss:$8 sps:$4 sm:$0xff]   ;;  %v7968_v8 = vld [vmem:[%s12120_s1 + $0x44] ss:$8 sps:$4 sm:$0xff]   ;;  %v7970_v9 = vld [vmem:[%s12120_s1 + $0x40] ss:$8 sps:$4 sm:$0xff]  }
  0x11   : > { %s12246_s20 = smov (!%p436_p3, %s6912_s20), 63  ;;  %v7971_v10 = vld [vmem:[%s12120_s1 + $0x54] ss:$8 sps:$4 sm:$0xff]   ;;  %v7973_v11 = vld [vmem:[%s12120_s1 + $0x50] ss:$8 sps:$4 sm:$0xff]  }
  0x12   : > { %s7945_s15 = smul.u32 28, %s12246_s20  ;;  %v7974_v12 = vld [vmem:[%s12120_s1 + $0x64] ss:$8 sps:$4 sm:$0xff]   ;;  %v7976_v14 = vld [vmem:[%s12120_s1 + $0x60] ss:$8 sps:$4 sm:$0xff]  }
  0x13   : > { %1841 = vmatpush1.bf16.msra.mxu0 %v7961_v3  ;;  %v7977_v15 = vld [vmem:[%s12120_s1 + $0x74] ss:$8 sps:$4 sm:$0xff]   ;;  %v7979_v16 = vld [vmem:[%s12120_s1 + $0x70] ss:$8 sps:$4 sm:$0xff]   ;;  %v7980_v17 = vld [vmem:[%s12120_s1 + $0x84] ss:$8 sps:$4 sm:$0xff]  }
  0x14   : > { %1842 = vmatprep.subr.bf16.mxu0 %v7962_v4  ;;  %s9522_s23 = scalar_lea.vmem %s12119_s0, %s7945_s15  ;;  %v7982_v18 = vld [vmem:[%s12120_s1 + $0x80] ss:$8 sps:$4 sm:$0xff]   ;;  %v7983_v19 = vld [vmem:[%s12120_s1 + $0x94] ss:$8 sps:$4 sm:$0xff]   ;;  %v7985_v20 = vld [vmem:[%s12120_s1 + $0x90] ss:$8 sps:$4 sm:$0xff]  }
  0x15   : > { %v8006_v13 = vld [vmem:[%s9522_s23 + $0x4] ss:$28 sps:$4 sm:$0xff]   ;;  %v7989_v23 = vld [vmem:[%s12120_s1 + $0xb4] ss:$8 sps:$4 sm:$0xff]   ;;  %v7991_v24 = vld [vmem:[%s12120_s1 + $0xb0] ss:$8 sps:$4 sm:$0xff]  }
  0x16   : > { %1870 = vmatprep.mubr.bf16.mxu0 %v8006_v13  ;;  %v7986_v21 = vld [vmem:[%s12120_s1 + $0xa4] ss:$8 sps:$4 sm:$0xff]   ;;  %v7988_v22 = vld [vmem:[%s12120_s1 + $0xa0] ss:$8 sps:$4 sm:$0xff]   ;;  %v7995_v27 = vld [vmem:[%s12120_s1 + $0xd4] ss:$8 sps:$4 sm:$0xff]  }
  0x17   : > { %1843 = vmatpush1.bf16.msra.mxu0 %v7964_v5  ;;  %v7992_v25 = vld [vmem:[%s12120_s1 + $0xc4] ss:$8 sps:$4 sm:$0xff]   ;;  %v7994_v26 = vld [vmem:[%s12120_s1 + $0xc0] ss:$8 sps:$4 sm:$0xff]   ;;  %v7997_v28 = vld [vmem:[%s12120_s1 + $0xd0] ss:$8 sps:$4 sm:$0xff]  }
  0x18   : > { %1844 = vmatprep.subr.bf16.mxu0 %v7965_v6  ;;  %v7998_v29 = vld [vmem:[%s12120_s1 + $0xe4] ss:$8 sps:$4 sm:$0xff]   ;;  %v8000_v30 = vld [vmem:[%s12120_s1 + $0xe0] ss:$8 sps:$4 sm:$0xff]   ;;  %v8001_v31 = vld [vmem:[%s12120_s1 + $0xf4] ss:$8 sps:$4 sm:$0xff]  }
  0x19   : > { %v8003_v32 = vld [vmem:[%s12120_s1 + $0xf0] ss:$8 sps:$4 sm:$0xff]   ;;  %v8009_v33 = vld [vmem:[%s12120_s1 + $0x104] ss:$8 sps:$4 sm:$0xff]   ;;  %v8004_v34 = vld [vmem:[%s9522_s23] ss:$28 sps:$4 sm:$0xff]  }
  0x1a   : > { %v8007_v35 = vld [vmem:[%s12120_s1 + $0x100] ss:$8 sps:$4 sm:$0xff]   ;;  %v8010_v36 = vld [vmem:[%s9522_s23 + $0x3c] ss:$28 sps:$4 sm:$0xff]   ;;  %v8021_v39 = vld [vmem:[%s12120_s1 + $0x124] ss:$8 sps:$4 sm:$0xff]  }
  0x1b   : > { %1845 = vmatpush1.bf16.msra.mxu0 %v7967_v7  ;;  %v8015_v37 = vld [vmem:[%s12120_s1 + $0x114] ss:$8 sps:$4 sm:$0xff]   ;;  %v8013_v38 = vld [vmem:[%s12120_s1 + $0x110] ss:$8 sps:$4 sm:$0xff]   ;;  %v8019_v42 = vld [vmem:[%s12120_s1 + $0x120] ss:$8 sps:$4 sm:$0xff]  }
  0x1c   : > { %1846 = vmatprep.subr.bf16.mxu0 %v7968_v8  ;;  %v8012_v40 = vld [vmem:[%s9522_s23 + $0x38] ss:$28 sps:$4 sm:$0xff]   ;;  %v8033_v45 = vld [vmem:[%s12120_s1 + $0x144] ss:$8 sps:$4 sm:$0xff]   ;;  %v8031_v48 = vld [vmem:[%s12120_s1 + $0x140] ss:$8 sps:$4 sm:$0xff]  }
  0x1d   : > { %v8016_v41 = vld [vmem:[%s9522_s23 + $0x74] ss:$28 sps:$4 sm:$0xff]   ;;  %v8022_v47 = vld [vmem:[%s9522_s23 + $0xac] ss:$28 sps:$4 sm:$0xff]   ;;  %v8028_v53 = vld [vmem:[%s9522_s23 + $0xe4] ss:$28 sps:$4 sm:$0xff]  }
  0x1e   : > { %v8027_v43 = vld [vmem:[%s12120_s1 + $0x134] ss:$8 sps:$4 sm:$0xff]   ;;  %v8025_v44 = vld [vmem:[%s12120_s1 + $0x130] ss:$8 sps:$4 sm:$0xff]   ;;  %v8045_v51 = vld [vmem:[%s12120_s1 + $0x164] ss:$8 sps:$4 sm:$0xff]  }
  0x1f   : > { %1847 = vmatpush1.bf16.msra.mxu0 %v7970_v9  ;;  %v8018_v46 = vld [vmem:[%s9522_s23 + $0x70] ss:$28 sps:$4 sm:$0xff]   ;;  %v8039_v49 = vld [vmem:[%s12120_s1 + $0x154] ss:$8 sps:$4 sm:$0xff]   ;;  %v8024_v52 = vld [vmem:[%s9522_s23 + $0xa8] ss:$28 sps:$4 sm:$0xff]  }
  0x20   : > { %1848 = vmatprep.subr.bf16.mxu0 %v7971_v10  ;;  %v8037_v50 = vld [vmem:[%s12120_s1 + $0x150] ss:$8 sps:$4 sm:$0xff]   ;;  %v8043_v54 = vld [vmem:[%s12120_s1 + $0x160] ss:$8 sps:$4 sm:$0xff]   ;;  %v8051_v55 = vld [vmem:[%s12120_s1 + $0x174] ss:$8 sps:$4 sm:$0xff]  }
  0x21   : > { %v8049_v56 = vld [vmem:[%s12120_s1 + $0x170] ss:$8 sps:$4 sm:$0xff]   ;;  %v8057_v57 = vld [vmem:[%s12120_s1 + $0x184] ss:$8 sps:$4 sm:$0xff]   ;;  %v8030_v58 = vld [vmem:[%s9522_s23 + $0xe0] ss:$28 sps:$4 sm:$0xff]  }
  0x22   : > { %v8034_v59 = vld [vmem:[%s9522_s23 + $0x11c] ss:$28 sps:$4 sm:$0xff]   ;;  %v8055_v60 = vld [vmem:[%s12120_s1 + $0x180] ss:$8 sps:$4 sm:$0xff]   ;;  %v8069_v63 = vld [vmem:[%s12120_s1 + $0x1a4] ss:$8 sps:$4 sm:$0xff]  }
  0x23   : > { %1849 = vmatpush1.bf16.msra.mxu0 %v7973_v11  ;;  %v8063_v61 = vld [vmem:[%s12120_s1 + $0x194] ss:$8 sps:$4 sm:$0xff]   ;;  %v8061_v62 = vld [vmem:[%s12120_s1 + $0x190] ss:$8 sps:$4 sm:$0xff]   ;;  %v8067_v2 = vld [vmem:[%s12120_s1 + $0x1a0] ss:$8 sps:$4 sm:$0xff]  }
  0x24   : > { %1850 = vmatprep.subr.bf16.mxu0 %v7974_v12  ;;  %v8036_v0 = vld [vmem:[%s9522_s23 + $0x118] ss:$28 sps:$4 sm:$0xff]   ;;  %v8081_v5 = vld [vmem:[%s12120_s1 + $0x1c4] ss:$8 sps:$4 sm:$0xff]   ;;  %v8079_v8 = vld [vmem:[%s12120_s1 + $0x1c0] ss:$8 sps:$4 sm:$0xff]  }
  0x25   : > { %v8040_v1 = vld [vmem:[%s9522_s23 + $0x154] ss:$28 sps:$4 sm:$0xff]   ;;  %v8046_v7 = vld [vmem:[%s9522_s23 + $0x18c] ss:$28 sps:$4 sm:$0xff]   ;;  %v8052_v13 = vld [vmem:[%s9522_s23 + $0x1c4] ss:$28 sps:$4 sm:$0xff]  }
  0x26   : > { %v8075_v3 = vld [vmem:[%s12120_s1 + $0x1b4] ss:$8 sps:$4 sm:$0xff]   ;;  %v8073_v4 = vld [vmem:[%s12120_s1 + $0x1b0] ss:$8 sps:$4 sm:$0xff]   ;;  %v8093_v11 = vld [vmem:[%s12120_s1 + $0x1e4] ss:$8 sps:$4 sm:$0xff]  }
  0x27   : > { %1851 = vmatpush1.bf16.msra.mxu0 %v7976_v14  ;;  %v8042_v6 = vld [vmem:[%s9522_s23 + $0x150] ss:$28 sps:$4 sm:$0xff]   ;;  %v8087_v9 = vld [vmem:[%s12120_s1 + $0x1d4] ss:$8 sps:$4 sm:$0xff]   ;;  %v8048_v12 = vld [vmem:[%s9522_s23 + $0x188] ss:$28 sps:$4 sm:$0xff]  }
  0x28   : > { %1852 = vmatprep.subr.bf16.mxu0 %v7977_v15  ;;  %v8085_v10 = vld [vmem:[%s12120_s1 + $0x1d0] ss:$8 sps:$4 sm:$0xff]   ;;  %v8091_v14 = vld [vmem:[%s12120_s1 + $0x1e0] ss:$8 sps:$4 sm:$0xff]   ;;  %v8099_v15 = vld [vmem:[%s12120_s1 + $0x1f4] ss:$8 sps:$4 sm:$0xff]  }
  0x29   : > { %s7946_s24 = smul.u32 56, %s12246_s20 }
  0x2b   : > { %1853 = vmatpush1.bf16.msra.mxu0 %v7979_v16  ;;  %v8097_v16 = vld [vmem:[%s12120_s1 + $0x1f0] ss:$8 sps:$4 sm:$0xff]   ;;  %s11005_s28 = scalar_lea.vmem %s12132_s13, %s7946_s24 }
  0x2c   : > { %1854 = vmatprep.subr.bf16.mxu0 %v7980_v17  ;;  %v8105_v17 = vld [vmem:[%s12120_s1 + $0x204] ss:$8 sps:$4 sm:$0xff]  }
  0x2f   : > { %1855 = vmatpush1.bf16.msra.mxu0 %v7982_v18  ;;  %v8054_v18 = vld [vmem:[%s9522_s23 + $0x1c0] ss:$28 sps:$4 sm:$0xff]  }
  0x30   : > { %1856 = vmatprep.subr.bf16.mxu0 %v7983_v19  ;;  %v8058_v19 = vld [vmem:[%s9522_s23 + $0x1fc] ss:$28 sps:$4 sm:$0xff]  }
  0x33   : > { %1857 = vmatpush1.bf16.msra.mxu0 %v7985_v20  ;;  %v8060_v20 = vld [vmem:[%s9522_s23 + $0x1f8] ss:$28 sps:$4 sm:$0xff]  }
  0x34   : > { %1858 = vmatprep.subr.bf16.mxu0 %v7986_v21  ;;  %v8064_v21 = vld [vmem:[%s9522_s23 + $0x234] ss:$28 sps:$4 sm:$0xff]  }
  0x37   : > { %1859 = vmatpush1.bf16.msra.mxu0 %v7988_v22  ;;  %v8066_v22 = vld [vmem:[%s9522_s23 + $0x230] ss:$28 sps:$4 sm:$0xff]  }
  0x38   : > { %1860 = vmatprep.subr.bf16.mxu0 %v7989_v23  ;;  %v8070_v23 = vld [vmem:[%s9522_s23 + $0x26c] ss:$28 sps:$4 sm:$0xff]  }
  0x3b   : > { %1861 = vmatpush1.bf16.msra.mxu0 %v7991_v24  ;;  %v8072_v24 = vld [vmem:[%s9522_s23 + $0x268] ss:$28 sps:$4 sm:$0xff]  }
  0x3c   : > { %1862 = vmatprep.subr.bf16.mxu0 %v7992_v25  ;;  %v8076_v25 = vld [vmem:[%s9522_s23 + $0x2a4] ss:$28 sps:$4 sm:$0xff]  }
  0x3f   : > { %1863 = vmatpush1.bf16.msra.mxu0 %v7994_v26  ;;  %v8078_v26 = vld [vmem:[%s9522_s23 + $0x2a0] ss:$28 sps:$4 sm:$0xff]  }
  0x40   : > { %1864 = vmatprep.subr.bf16.mxu0 %v7995_v27  ;;  %v8082_v27 = vld [vmem:[%s9522_s23 + $0x2dc] ss:$28 sps:$4 sm:$0xff]  }
  0x43   : > { %1865 = vmatpush1.bf16.msra.mxu0 %v7997_v28  ;;  %v8084_v28 = vld [vmem:[%s9522_s23 + $0x2d8] ss:$28 sps:$4 sm:$0xff]  }
  0x44   : > { %1866 = vmatprep.subr.bf16.mxu0 %v7998_v29  ;;  %v8088_v29 = vld [vmem:[%s9522_s23 + $0x314] ss:$28 sps:$4 sm:$0xff]  }
  0x47   : > { %1867 = vmatpush1.bf16.msra.mxu0 %v8000_v30  ;;  %v8090_v30 = vld [vmem:[%s9522_s23 + $0x310] ss:$28 sps:$4 sm:$0xff]  }
  0x48   : > { %1868 = vmatprep.subr.bf16.mxu0 %v8001_v31  ;;  %v8094_v31 = vld [vmem:[%s9522_s23 + $0x34c] ss:$28 sps:$4 sm:$0xff]  }
  0x4b   : > { %1869 = vmatpush1.bf16.msra.mxu0 %v8003_v32  ;;  %v8096_v32 = vld [vmem:[%s9522_s23 + $0x348] ss:$28 sps:$4 sm:$0xff]  }
  0x4c   : > { %2031 = vmatprep.subr.bf16.mxu0 %v8009_v33  ;;  %v8102_v33 = vld [vmem:[%s9522_s23 + $0xc] ss:$28 sps:$4 sm:$0xff]  }
  0x4e   : > { %1871 = vmatmul.mubr.bf16.vlgmr.msra.gmra.mrb[0].mxu0 %v8004_v34  ;;  %v8100_v34 = vld [vmem:[%s9522_s23 + $0x8] ss:$28 sps:$4 sm:$0xff]  }
  0x4f   : > { %2032 = vmatpush1.bf16.msra.mxu0 %v8007_v35  ;;  %1880 = vmatprep.mubr.bf16.mxu0 %v8010_v36  ;;  %v8103_v35 = vld [vmem:[%s12120_s1 + $0x200] ss:$8 sps:$4 sm:$0xff]  }
  0x50   : > { %2033 = vmatprep.subr.bf16.mxu0 %v8015_v37  ;;  %v8106_v36 = vld [vmem:[%s9522_s23 + $0x44] ss:$28 sps:$4 sm:$0xff]   ;;  %v8111_v37 = vld [vmem:[%s12120_s1 + $0x214] ss:$8 sps:$4 sm:$0xff]  }
  0x53   : > { %2034 = vmatpush1.bf16.msra.mxu0 %v8013_v38  ;;  %v8109_v38 = vld [vmem:[%s12120_s1 + $0x210] ss:$8 sps:$4 sm:$0xff]  }
  0x54   : > { %2035 = vmatprep.subr.bf16.mxu0 %v8021_v39  ;;  %v8117_v39 = vld [vmem:[%s12120_s1 + $0x224] ss:$8 sps:$4 sm:$0xff]  }
  0x56   : > { %1881 = vmatmul.mubr.bf16.gmra.mrb[4].mxu0 %v8012_v40  ;;  %v8108_v40 = vld [vmem:[%s9522_s23 + $0x40] ss:$28 sps:$4 sm:$0xff]  }
  0x57   : > { %1890 = vmatprep.mubr.bf16.mxu0 %v8016_v41  ;;  %2036 = vmatpush1.bf16.msra.mxu0 %v8019_v42  ;;  %v8112_v41 = vld [vmem:[%s9522_s23 + $0x7c] ss:$28 sps:$4 sm:$0xff]   ;;  %v8115_v42 = vld [vmem:[%s12120_s1 + $0x220] ss:$8 sps:$4 sm:$0xff]  }
  0x58   : > { %2037 = vmatprep.subr.bf16.mxu0 %v8027_v43  ;;  %v8123_v43 = vld [vmem:[%s12120_s1 + $0x234] ss:$8 sps:$4 sm:$0xff]  }
  0x5b   : > { %2038 = vmatpush1.bf16.msra.mxu0 %v8025_v44  ;;  %v8121_v44 = vld [vmem:[%s12120_s1 + $0x230] ss:$8 sps:$4 sm:$0xff]  }
  0x5c   : > { %2039 = vmatprep.subr.bf16.mxu0 %v8033_v45  ;;  %v8129_v45 = vld [vmem:[%s12120_s1 + $0x244] ss:$8 sps:$4 sm:$0xff]  }
  0x5e   : > { %1891 = vmatmul.mubr.bf16.gmra.mrb[8].mxu0 %v8018_v46  ;;  %v8114_v46 = vld [vmem:[%s9522_s23 + $0x78] ss:$28 sps:$4 sm:$0xff]  }
  0x5f   : > { %1900 = vmatprep.mubr.bf16.mxu0 %v8022_v47  ;;  %2040 = vmatpush1.bf16.msra.mxu0 %v8031_v48  ;;  %v8118_v47 = vld [vmem:[%s9522_s23 + $0xb4] ss:$28 sps:$4 sm:$0xff]   ;;  %v8127_v48 = vld [vmem:[%s12120_s1 + $0x240] ss:$8 sps:$4 sm:$0xff]  }
  0x60   : > { %2041 = vmatprep.subr.bf16.mxu0 %v8039_v49  ;;  %v8135_v49 = vld [vmem:[%s12120_s1 + $0x254] ss:$8 sps:$4 sm:$0xff]  }
  0x63   : > { %2042 = vmatpush1.bf16.msra.mxu0 %v8037_v50  ;;  %v8133_v50 = vld [vmem:[%s12120_s1 + $0x250] ss:$8 sps:$4 sm:$0xff]  }
  0x64   : > { %2043 = vmatprep.subr.bf16.mxu0 %v8045_v51  ;;  %v8141_v51 = vld [vmem:[%s12120_s1 + $0x264] ss:$8 sps:$4 sm:$0xff]  }
  0x66   : > { %1901 = vmatmul.mubr.bf16.gmra.mrb[12].mxu0 %v8024_v52  ;;  %v8120_v52 = vld [vmem:[%s9522_s23 + $0xb0] ss:$28 sps:$4 sm:$0xff]  }
  0x67   : > { %1910 = vmatprep.mubr.bf16.mxu0 %v8028_v53  ;;  %2044 = vmatpush1.bf16.msra.mxu0 %v8043_v54  ;;  %v8124_v53 = vld [vmem:[%s9522_s23 + $0xec] ss:$28 sps:$4 sm:$0xff]  }
  0x68   : > { %2045 = vmatprep.subr.bf16.mxu0 %v8051_v55  ;;  %v8139_v54 = vld [vmem:[%s12120_s1 + $0x260] ss:$8 sps:$4 sm:$0xff]   ;;  %v8147_v55 = vld [vmem:[%s12120_s1 + $0x274] ss:$8 sps:$4 sm:$0xff]  }
  0x6b   : > { %2046 = vmatpush1.bf16.msra.mxu0 %v8049_v56  ;;  %v8145_v56 = vld [vmem:[%s12120_s1 + $0x270] ss:$8 sps:$4 sm:$0xff]  }
  0x6c   : > { %2047 = vmatprep.subr.bf16.mxu0 %v8057_v57  ;;  %v8153_v57 = vld [vmem:[%s12120_s1 + $0x284] ss:$8 sps:$4 sm:$0xff]  }
  0x6e   : > { %1911 = vmatmul.mubr.bf16.gmra.mrb[16].mxu0 %v8030_v58  ;;  %v8126_v58 = vld [vmem:[%s9522_s23 + $0xe8] ss:$28 sps:$4 sm:$0xff]  }
  0x6f   : > { %1920 = vmatprep.mubr.bf16.mxu0 %v8034_v59  ;;  %2048 = vmatpush1.bf16.msra.mxu0 %v8055_v60  ;;  %v8130_v59 = vld [vmem:[%s9522_s23 + $0x124] ss:$28 sps:$4 sm:$0xff]  }
  0x70   : > { %2049 = vmatprep.subr.bf16.mxu0 %v8063_v61  ;;  %v8151_v60 = vld [vmem:[%s12120_s1 + $0x280] ss:$8 sps:$4 sm:$0xff]   ;;  %v8159_v61 = vld [vmem:[%s12120_s1 + $0x294] ss:$8 sps:$4 sm:$0xff]  }
  0x73   : > { %2050 = vmatpush1.bf16.msra.mxu0 %v8061_v62  ;;  %v8157_v62 = vld [vmem:[%s12120_s1 + $0x290] ss:$8 sps:$4 sm:$0xff]  }
  0x74   : > { %2051 = vmatprep.subr.bf16.mxu0 %v8069_v63  ;;  %v8165_v63 = vld [vmem:[%s12120_s1 + $0x2a4] ss:$8 sps:$4 sm:$0xff]  }
  0x76   : > { %1921 = vmatmul.mubr.bf16.gmra.mrb[20].mxu0 %v8036_v0  ;;  %v8132_v0 = vld [vmem:[%s9522_s23 + $0x120] ss:$28 sps:$4 sm:$0xff]  }
  0x77   : > { %1930 = vmatprep.mubr.bf16.mxu0 %v8040_v1  ;;  %2052 = vmatpush1.bf16.msra.mxu0 %v8067_v2  ;;  %v8136_v1 = vld [vmem:[%s9522_s23 + $0x15c] ss:$28 sps:$4 sm:$0xff]   ;;  %v8163_v2 = vld [vmem:[%s12120_s1 + $0x2a0] ss:$8 sps:$4 sm:$0xff]  }
  0x78   : > { %2053 = vmatprep.subr.bf16.mxu0 %v8075_v3  ;;  %v8171_v3 = vld [vmem:[%s12120_s1 + $0x2b4] ss:$8 sps:$4 sm:$0xff]  }
  0x7b   : > { %2054 = vmatpush1.bf16.msra.mxu0 %v8073_v4  ;;  %v8169_v4 = vld [vmem:[%s12120_s1 + $0x2b0] ss:$8 sps:$4 sm:$0xff]  }
  0x7c   : > { %2055 = vmatprep.subr.bf16.mxu0 %v8081_v5  ;;  %v8177_v5 = vld [vmem:[%s12120_s1 + $0x2c4] ss:$8 sps:$4 sm:$0xff]  }
  0x7e   : > { %1931 = vmatmul.mubr.bf16.gmra.mrb[24].mxu0 %v8042_v6  ;;  %v8138_v6 = vld [vmem:[%s9522_s23 + $0x158] ss:$28 sps:$4 sm:$0xff]  }
  0x7f   : > { %1940 = vmatprep.mubr.bf16.mxu0 %v8046_v7  ;;  %2056 = vmatpush1.bf16.msra.mxu0 %v8079_v8  ;;  %v8142_v7 = vld [vmem:[%s9522_s23 + $0x194] ss:$28 sps:$4 sm:$0xff]   ;;  %v8175_v8 = vld [vmem:[%s12120_s1 + $0x2c0] ss:$8 sps:$4 sm:$0xff]  }
  0x80   : > { %2057 = vmatprep.subr.bf16.mxu0 %v8087_v9  ;;  %v8183_v9 = vld [vmem:[%s12120_s1 + $0x2d4] ss:$8 sps:$4 sm:$0xff]  }
  0x83   : > { %2058 = vmatpush1.bf16.msra.mxu0 %v8085_v10  ;;  %v8181_v10 = vld [vmem:[%s12120_s1 + $0x2d0] ss:$8 sps:$4 sm:$0xff]  }
  0x84   : > { %2059 = vmatprep.subr.bf16.mxu0 %v8093_v11  ;;  %v8189_v11 = vld [vmem:[%s12120_s1 + $0x2e4] ss:$8 sps:$4 sm:$0xff]  }
  0x86   : > { %1941 = vmatmul.mubr.bf16.gmra.mrb[28].mxu0 %v8048_v12  ;;  %v8144_v12 = vld [vmem:[%s9522_s23 + $0x190] ss:$28 sps:$4 sm:$0xff]  }
  0x87   : > { %1950 = vmatprep.mubr.bf16.mxu0 %v8052_v13  ;;  %2060 = vmatpush1.bf16.msra.mxu0 %v8091_v14  ;;  %v8148_v13 = vld [vmem:[%s9522_s23 + $0x1cc] ss:$28 sps:$4 sm:$0xff]  }
  0x88   : > { %2061 = vmatprep.subr.bf16.mxu0 %v8099_v15  ;;  %v8187_v14 = vld [vmem:[%s12120_s1 + $0x2e0] ss:$8 sps:$4 sm:$0xff]   ;;  %v8195_v15 = vld [vmem:[%s12120_s1 + $0x2f4] ss:$8 sps:$4 sm:$0xff]  }
  0x8b   : > { %2062 = vmatpush1.bf16.msra.mxu0 %v8097_v16  ;;  %v8193_v16 = vld [vmem:[%s12120_s1 + $0x2f0] ss:$8 sps:$4 sm:$0xff]  }
  0x8c   : > { %2224 = vmatprep.subr.bf16.mxu0 %v8105_v17  ;;  %v8201_v17 = vld [vmem:[%s12120_s1 + $0x304] ss:$8 sps:$4 sm:$0xff]  }
  0x8e   : > { %1951 = vmatmul.mubr.bf16.gmra.mrb[32].mxu0 %v8054_v18  ;;  %v8150_v18 = vld [vmem:[%s9522_s23 + $0x1c8] ss:$28 sps:$4 sm:$0xff]  }
  0x8f   : > { %1960 = vmatprep.mubr.bf16.mxu0 %v8058_v19  ;;  %v8154_v19 = vld [vmem:[%s9522_s23 + $0x204] ss:$28 sps:$4 sm:$0xff]  }
  0x96   : > { %1961 = vmatmul.mubr.bf16.gmra.mrb[36].mxu0 %v8060_v20  ;;  %v8156_v20 = vld [vmem:[%s9522_s23 + $0x200] ss:$28 sps:$4 sm:$0xff]  }
  0x97   : > { %1970 = vmatprep.mubr.bf16.mxu0 %v8064_v21  ;;  %v8160_v21 = vld [vmem:[%s9522_s23 + $0x23c] ss:$28 sps:$4 sm:$0xff]  }
  0x9e   : > { %1971 = vmatmul.mubr.bf16.gmra.mrb[40].mxu0 %v8066_v22  ;;  %v8162_v22 = vld [vmem:[%s9522_s23 + $0x238] ss:$28 sps:$4 sm:$0xff]  }
  0x9f   : > { %1980 = vmatprep.mubr.bf16.mxu0 %v8070_v23  ;;  %v8166_v23 = vld [vmem:[%s9522_s23 + $0x274] ss:$28 sps:$4 sm:$0xff]  }
  0xa6   : > { %1981 = vmatmul.mubr.bf16.gmra.mrb[44].mxu0 %v8072_v24  ;;  %v8168_v24 = vld [vmem:[%s9522_s23 + $0x270] ss:$28 sps:$4 sm:$0xff]  }
  0xa7   : > { %1990 = vmatprep.mubr.bf16.mxu0 %v8076_v25  ;;  %v8172_v25 = vld [vmem:[%s9522_s23 + $0x2ac] ss:$28 sps:$4 sm:$0xff]  }
  0xae   : > { %1991 = vmatmul.mubr.bf16.gmra.mrb[48].mxu0 %v8078_v26  ;;  %v8174_v26 = vld [vmem:[%s9522_s23 + $0x2a8] ss:$28 sps:$4 sm:$0xff]  }
  0xaf   : > { %2000 = vmatprep.mubr.bf16.mxu0 %v8082_v27  ;;  %v8178_v27 = vld [vmem:[%s9522_s23 + $0x2e4] ss:$28 sps:$4 sm:$0xff]  }
  0xb6   : > { %2001 = vmatmul.mubr.bf16.gmra.mrb[52].mxu0 %v8084_v28  ;;  %v8180_v28 = vld [vmem:[%s9522_s23 + $0x2e0] ss:$28 sps:$4 sm:$0xff]  }
  0xb7   : > { %2010 = vmatprep.mubr.bf16.mxu0 %v8088_v29  ;;  %v8184_v29 = vld [vmem:[%s9522_s23 + $0x31c] ss:$28 sps:$4 sm:$0xff]  }
  0xbe   : > { %2011 = vmatmul.mubr.bf16.gmra.mrb[56].mxu0 %v8090_v30  ;;  %v8186_v30 = vld [vmem:[%s9522_s23 + $0x318] ss:$28 sps:$4 sm:$0xff]  }
  0xbf   : > { %2020 = vmatprep.mubr.bf16.mxu0 %v8094_v31  ;;  %v8190_v31 = vld [vmem:[%s9522_s23 + $0x354] ss:$28 sps:$4 sm:$0xff]  }
  0xc6   : > { %2021 = vmatmul.mubr.bf16.gmra.mrb[60].mxu0 %v8096_v32  ;;  %v8192_v32 = vld [vmem:[%s9522_s23 + $0x350] ss:$28 sps:$4 sm:$0xff]  }
  0xc7   : > { %2063 = vmatprep.mubr.bf16.mxu0 %v8102_v33  ;;  %v8198_v33 = vld [vmem:[%s9522_s23 + $0x14] ss:$28 sps:$4 sm:$0xff]  }
  0xce   : > { %2064 = vmatmul.mubr.bf16.vlgmr.msra.gmra.mrb[0].mxu0 %v8100_v34  ;;  %v8196_v34 = vld [vmem:[%s9522_s23 + $0x10] ss:$28 sps:$4 sm:$0xff]  }
  0xcf   : > { %2225 = vmatpush1.bf16.msra.mxu0 %v8103_v35  ;;  %2073 = vmatprep.mubr.bf16.mxu0 %v8106_v36  ;;  %v8199_v35 = vld [vmem:[%s12120_s1 + $0x300] ss:$8 sps:$4 sm:$0xff]  }
  0xd0   : > { %2226 = vmatprep.subr.bf16.mxu0 %v8111_v37  ;;  %v8202_v36 = vld [vmem:[%s9522_s23 + $0x4c] ss:$28 sps:$4 sm:$0xff]   ;;  %v8210_v37 = vld [vmem:[%s12120_s1 + $0x314] ss:$8 sps:$4 sm:$0xff]  }
  0xd3   : > { %2227 = vmatpush1.bf16.msra.mxu0 %v8109_v38  ;;  %v8208_v38 = vld [vmem:[%s12120_s1 + $0x310] ss:$8 sps:$4 sm:$0xff]  }
  0xd4   : > { %2228 = vmatprep.subr.bf16.mxu0 %v8117_v39  ;;  %v8219_v39 = vld [vmem:[%s12120_s1 + $0x324] ss:$8 sps:$4 sm:$0xff]  }
  0xd6   : > { %2074 = vmatmul.mubr.bf16.gmra.mrb[4].mxu0 %v8108_v40  ;;  %v8204_v40 = vld [vmem:[%s9522_s23 + $0x48] ss:$28 sps:$4 sm:$0xff]  }
  0xd7   : > { %2083 = vmatprep.mubr.bf16.mxu0 %v8112_v41  ;;  %2229 = vmatpush1.bf16.msra.mxu0 %v8115_v42  ;;  %v8205_v41 = vld [vmem:[%s9522_s23 + $0x84] ss:$28 sps:$4 sm:$0xff]  }
  0xd8   : > { %2230 = vmatprep.subr.bf16.mxu0 %v8123_v43  ;;  %v8217_v42 = vld [vmem:[%s12120_s1 + $0x320] ss:$8 sps:$4 sm:$0xff]   ;;  %v8228_v43 = vld [vmem:[%s12120_s1 + $0x334] ss:$8 sps:$4 sm:$0xff]  }
  0xdb   : > { %2231 = vmatpush1.bf16.msra.mxu0 %v8121_v44  ;;  %v8226_v44 = vld [vmem:[%s12120_s1 + $0x330] ss:$8 sps:$4 sm:$0xff]  }
  0xdc   : > { %2232 = vmatprep.subr.bf16.mxu0 %v8129_v45  ;;  %v8237_v45 = vld [vmem:[%s12120_s1 + $0x344] ss:$8 sps:$4 sm:$0xff]  }
  0xde   : > { %2084 = vmatmul.mubr.bf16.gmra.mrb[8].mxu0 %v8114_v46  ;;  %v8207_v46 = vld [vmem:[%s9522_s23 + $0x80] ss:$28 sps:$4 sm:$0xff]  }
  0xdf   : > { %2093 = vmatprep.mubr.bf16.mxu0 %v8118_v47  ;;  %2233 = vmatpush1.bf16.msra.mxu0 %v8127_v48  ;;  %v8211_v47 = vld [vmem:[%s9522_s23 + $0xbc] ss:$28 sps:$4 sm:$0xff]   ;;  %v8235_v48 = vld [vmem:[%s12120_s1 + $0x340] ss:$8 sps:$4 sm:$0xff]  }
  0xe0   : > { %2234 = vmatprep.subr.bf16.mxu0 %v8135_v49  ;;  %v8246_v49 = vld [vmem:[%s12120_s1 + $0x354] ss:$8 sps:$4 sm:$0xff]  }
  0xe3   : > { %2235 = vmatpush1.bf16.msra.mxu0 %v8133_v50  ;;  %v8244_v50 = vld [vmem:[%s12120_s1 + $0x350] ss:$8 sps:$4 sm:$0xff]  }
  0xe4   : > { %2236 = vmatprep.subr.bf16.mxu0 %v8141_v51  ;;  %v8255_v51 = vld [vmem:[%s12120_s1 + $0x364] ss:$8 sps:$4 sm:$0xff]  }
  0xe6   : > { %2094 = vmatmul.mubr.bf16.gmra.mrb[12].mxu0 %v8120_v52  ;;  %v8213_v52 = vld [vmem:[%s9522_s23 + $0xb8] ss:$28 sps:$4 sm:$0xff]  }
  0xe7   : > { %2103 = vmatprep.mubr.bf16.mxu0 %v8124_v53  ;;  %2237 = vmatpush1.bf16.msra.mxu0 %v8139_v54  ;;  %v8214_v53 = vld [vmem:[%s9522_s23 + $0xf4] ss:$28 sps:$4 sm:$0xff]   ;;  %v8253_v54 = vld [vmem:[%s12120_s1 + $0x360] ss:$8 sps:$4 sm:$0xff]  }
  0xe8   : > { %2238 = vmatprep.subr.bf16.mxu0 %v8147_v55  ;;  %v8264_v55 = vld [vmem:[%s12120_s1 + $0x374] ss:$8 sps:$4 sm:$0xff]  }
  0xeb   : > { %2239 = vmatpush1.bf16.msra.mxu0 %v8145_v56  ;;  %v8262_v56 = vld [vmem:[%s12120_s1 + $0x370] ss:$8 sps:$4 sm:$0xff]  }
  0xec   : > { %2240 = vmatprep.subr.bf16.mxu0 %v8153_v57  ;;  %v8216_v57 = vld [vmem:[%s9522_s23 + $0xf0] ss:$28 sps:$4 sm:$0xff]  }
  0xee   : > { %2104 = vmatmul.mubr.bf16.gmra.mrb[16].mxu0 %v8126_v58  ;;  %v8220_v58 = vld [vmem:[%s9522_s23 + $0x12c] ss:$28 sps:$4 sm:$0xff]  }
  0xef   : > { %2113 = vmatprep.mubr.bf16.mxu0 %v8130_v59  ;;  %2241 = vmatpush1.bf16.msra.mxu0 %v8151_v60  ;;  %v8222_v59 = vld [vmem:[%s9522_s23 + $0x128] ss:$28 sps:$4 sm:$0xff]  }
  0xf0   : > { %2242 = vmatprep.subr.bf16.mxu0 %v8159_v61  ;;  %v8223_v60 = vld [vmem:[%s9522_s23 + $0x164] ss:$28 sps:$4 sm:$0xff]  }
  0xf1   : > { %v8225_v61 = vld [vmem:[%s9522_s23 + $0x160] ss:$28 sps:$4 sm:$0xff]  }
  0xf3   : > { %2243 = vmatpush1.bf16.msra.mxu0 %v8157_v62  ;;  %v8229_v62 = vld [vmem:[%s9522_s23 + $0x19c] ss:$28 sps:$4 sm:$0xff]  }
  0xf4   : > { %2244 = vmatprep.subr.bf16.mxu0 %v8165_v63  ;;  %v8231_v63 = vld [vmem:[%s9522_s23 + $0x198] ss:$28 sps:$4 sm:$0xff]  }
  0xf6   : > { %2114 = vmatmul.mubr.bf16.gmra.mrb[20].mxu0 %v8132_v0  ;;  %v8232_v0 = vld [vmem:[%s9522_s23 + $0x1d4] ss:$28 sps:$4 sm:$0xff]  }
  0xf7   : > { %2123 = vmatprep.mubr.bf16.mxu0 %v8136_v1  ;;  %2245 = vmatpush1.bf16.msra.mxu0 %v8163_v2  ;;  %v8234_v1 = vld [vmem:[%s9522_s23 + $0x1d0] ss:$28 sps:$4 sm:$0xff]  }
  0xf8   : > { %2246 = vmatprep.subr.bf16.mxu0 %v8171_v3  ;;  %v8238_v2 = vld [vmem:[%s9522_s23 + $0x20c] ss:$28 sps:$4 sm:$0xff]  }
  0xf9   : > { %v8240_v3 = vld [vmem:[%s9522_s23 + $0x208] ss:$28 sps:$4 sm:$0xff]  }
  0xfb   : > { %2247 = vmatpush1.bf16.msra.mxu0 %v8169_v4  ;;  %v8241_v4 = vld [vmem:[%s9522_s23 + $0x244] ss:$28 sps:$4 sm:$0xff]  }
  0xfc   : > { %2248 = vmatprep.subr.bf16.mxu0 %v8177_v5  ;;  %v8243_v5 = vld [vmem:[%s9522_s23 + $0x240] ss:$28 sps:$4 sm:$0xff]  }
  0xfe   : > { %2124 = vmatmul.mubr.bf16.gmra.mrb[24].mxu0 %v8138_v6  ;;  %v8247_v6 = vld [vmem:[%s9522_s23 + $0x27c] ss:$28 sps:$4 sm:$0xff]  }
  0xff   : > { %2133 = vmatprep.mubr.bf16.mxu0 %v8142_v7  ;;  %2249 = vmatpush1.bf16.msra.mxu0 %v8175_v8  ;;  %v8249_v7 = vld [vmem:[%s9522_s23 + $0x278] ss:$28 sps:$4 sm:$0xff]  }
 0x100   : > { %2250 = vmatprep.subr.bf16.mxu0 %v8183_v9  ;;  %v8250_v8 = vld [vmem:[%s9522_s23 + $0x2b4] ss:$28 sps:$4 sm:$0xff]  }
 0x101   : > { %v8252_v9 = vld [vmem:[%s9522_s23 + $0x2b0] ss:$28 sps:$4 sm:$0xff]  }
 0x103   : > { %2251 = vmatpush1.bf16.msra.mxu0 %v8181_v10  ;;  %v8256_v10 = vld [vmem:[%s9522_s23 + $0x2ec] ss:$28 sps:$4 sm:$0xff]  }
 0x104   : > { %2252 = vmatprep.subr.bf16.mxu0 %v8189_v11  ;;  %v8258_v11 = vld [vmem:[%s9522_s23 + $0x2e8] ss:$28 sps:$4 sm:$0xff]  }
 0x106   : > { %2134 = vmatmul.mubr.bf16.gmra.mrb[28].mxu0 %v8144_v12  ;;  %v8259_v12 = vld [vmem:[%s9522_s23 + $0x324] ss:$28 sps:$4 sm:$0xff]  }
 0x107   : > { %2143 = vmatprep.mubr.bf16.mxu0 %v8148_v13  ;;  %2253 = vmatpush1.bf16.msra.mxu0 %v8187_v14  ;;  %v8261_v13 = vld [vmem:[%s9522_s23 + $0x320] ss:$28 sps:$4 sm:$0xff]  }
 0x108   : > { %2254 = vmatprep.subr.bf16.mxu0 %v8195_v15  ;;  %v8265_v14 = vld [vmem:[%s9522_s23 + $0x35c] ss:$28 sps:$4 sm:$0xff]  }
 0x109   : > { %v8267_v15 = vld [vmem:[%s9522_s23 + $0x358] ss:$28 sps:$4 sm:$0xff]  }
 0x10b   : > { %2255 = vmatpush1.bf16.msra.mxu0 %v8193_v16  ;;  %v8284_v16 = vld [vmem:[%s12122_s3 + $0x40] sm:$0xff]  }
 0x10c   : > { %2417 = vmatprep.subr.bf16.mxu0 %v8201_v17  ;;  %v8285_v17 = vld [vmem:[%s12122_s3] sm:$0xff]   ;;  %7317 = vmatprep.subr.bf16.mxu1 %v8284_v16 }
 0x10d   : > { %7318 = vmatpush3.bf16.msra.mxu1 %v8285_v17 }
 0x10e   : > { %2144 = vmatmul.mubr.bf16.gmra.mrb[32].mxu0 %v8150_v18  ;;  %v8286_v18 = vld [vmem:[%s12122_s3 + $0x48] sm:$0xff]  }
 0x10f   : > { %2153 = vmatprep.mubr.bf16.mxu0 %v8154_v19  ;;  %v9401_v19 = vmov 0   ;;  %7319 = vmatprep.subr.bf16.mxu1 %v8286_v18  ;;  %v8302_v18 = vld [vmem:[%s12124_s5 + $0x10] sm:$0xff]  }
 0x116   : > { %2154 = vmatmul.mubr.bf16.gmra.mrb[36].mxu0 %v8156_v20  ;;  %v8287_v20 = vld [vmem:[%s12122_s3 + $0x8] sm:$0xff]  }
 0x117   : > { %2163 = vmatprep.mubr.bf16.mxu0 %v8160_v21  ;;  %v8268_v21 = vld [vmem:[%s9522_s23 + $0x18] ss:$28 sps:$4 sm:$0xff]   ;;  %7320 = vmatpush3.bf16.msra.mxu1 %v8287_v20 }
 0x11e   : > { %2164 = vmatmul.mubr.bf16.gmra.mrb[40].mxu0 %v8162_v22  ;;  %v8288_v22 = vld [vmem:[%s12122_s3 + $0x50] sm:$0xff]  }
 0x11f   : > { %2173 = vmatprep.mubr.bf16.mxu0 %v8166_v23  ;;  %v8289_v23 = vld [vmem:[%s12122_s3 + $0x10] sm:$0xff]   ;;  %7321 = vmatprep.subr.bf16.mxu1 %v8288_v22 }
 0x120   : > { %7322 = vmatpush3.bf16.msra.mxu1 %v8289_v23 }
 0x126   : > { %2174 = vmatmul.mubr.bf16.gmra.mrb[44].mxu0 %v8168_v24  ;;  %v8290_v24 = vld [vmem:[%s12122_s3 + $0x58] sm:$0xff]  }
 0x127   : > { %2183 = vmatprep.mubr.bf16.mxu0 %v8172_v25  ;;  %v8291_v25 = vld [vmem:[%s12122_s3 + $0x18] sm:$0xff]   ;;  %7323 = vmatprep.subr.bf16.mxu1 %v8290_v24 }
 0x128   : > { %7324 = vmatpush3.bf16.msra.mxu1 %v8291_v25 }
 0x12e   : > { %2184 = vmatmul.mubr.bf16.gmra.mrb[48].mxu0 %v8174_v26  ;;  %v8269_v26 = vld [vmem:[%s9522_s23 + $0x50] ss:$28 sps:$4 sm:$0xff]  }
 0x12f   : > { %2193 = vmatprep.mubr.bf16.mxu0 %v8178_v27  ;;  %v8292_v27 = vld [vmem:[%s12122_s3 + $0x60] sm:$0xff]  }
 0x130   : > { %7325 = vmatprep.subr.bf16.mxu1 %v8292_v27  ;;  %v8303_v27 = vld [vmem:[%s12124_s5 + $0x18] sm:$0xff]  }
 0x136   : > { %2194 = vmatmul.mubr.bf16.gmra.mrb[52].mxu0 %v8180_v28  ;;  %v8293_v28 = vld [vmem:[%s12122_s3 + $0x20] sm:$0xff]  }
 0x137   : > { %2203 = vmatprep.mubr.bf16.mxu0 %v8184_v29  ;;  %v8294_v29 = vld [vmem:[%s12122_s3 + $0x68] sm:$0xff]   ;;  %7326 = vmatpush3.bf16.msra.mxu1 %v8293_v28 }
 0x138   : > { %7327 = vmatprep.subr.bf16.mxu1 %v8294_v29 }
 0x13e   : > { %2204 = vmatmul.mubr.bf16.gmra.mrb[56].mxu0 %v8186_v30  ;;  %v8270_v30 = vld [vmem:[%s9522_s23 + $0x88] ss:$28 sps:$4 sm:$0xff]  }
 0x13f   : > { %2213 = vmatprep.mubr.bf16.mxu0 %v8190_v31  ;;  %v8271_v31 = vld [vmem:[%s9522_s23 + $0xc0] ss:$28 sps:$4 sm:$0xff]  }
 0x146   : > { %2214 = vmatmul.mubr.bf16.gmra.mrb[60].mxu0 %v8192_v32  ;;  %v8272_v32 = vld [vmem:[%s9522_s23 + $0xf8] ss:$28 sps:$4 sm:$0xff]  }
 0x147   : > { %2256 = vmatprep.mubr.bf16.mxu0 %v8198_v33  ;;  %v8273_v33 = vld [vmem:[%s9522_s23 + $0x130] ss:$28 sps:$4 sm:$0xff]  }
 0x14e   : > { %2257 = vmatmul.mubr.bf16.vlgmr.msra.gmra.mrb[0].mxu0 %v8196_v34  ;;  %v8274_v34 = vld [vmem:[%s9522_s23 + $0x168] ss:$28 sps:$4 sm:$0xff]  }
 0x14f   : > { %2418 = vmatpush1.bf16.msra.mxu0 %v8199_v35  ;;  %2266 = vmatprep.mubr.bf16.mxu0 %v8202_v36  ;;  %v8275_v35 = vld [vmem:[%s9522_s23 + $0x1a0] ss:$28 sps:$4 sm:$0xff]   ;;  %v8276_v36 = vld [vmem:[%s9522_s23 + $0x1d8] ss:$28 sps:$4 sm:$0xff]  }
 0x150   : > { %2419 = vmatprep.subr.bf16.mxu0 %v8210_v37  ;;  %v8277_v37 = vld [vmem:[%s9522_s23 + $0x210] ss:$28 sps:$4 sm:$0xff]  }
 0x153   : > { %2420 = vmatpush1.bf16.msra.mxu0 %v8208_v38  ;;  %v8278_v38 = vld [vmem:[%s9522_s23 + $0x248] ss:$28 sps:$4 sm:$0xff]  }
 0x154   : > { %2421 = vmatprep.subr.bf16.mxu0 %v8219_v39  ;;  %v8295_v39 = vld [vmem:[%s12122_s3 + $0x28] sm:$0xff]  }
 0x155   : > { %7328 = vmatpush3.bf16.msra.mxu1 %v8295_v39 }
 0x156   : > { %2267 = vmatmul.mubr.bf16.gmra.mrb[4].mxu0 %v8204_v40  ;;  %v8279_v40 = vld [vmem:[%s9522_s23 + $0x280] ss:$28 sps:$4 sm:$0xff]  }
 0x157   : > { %2276 = vmatprep.mubr.bf16.mxu0 %v8205_v41  ;;  %2422 = vmatpush1.bf16.msra.mxu0 %v8217_v42  ;;  %v8296_v41 = vld [vmem:[%s12122_s3 + $0x70] sm:$0xff]  }
 0x158   : > { %2423 = vmatprep.subr.bf16.mxu0 %v8228_v43  ;;  %v8297_v42 = vld [vmem:[%s12122_s3 + $0x30] sm:$0xff]   ;;  %7329 = vmatprep.subr.bf16.mxu1 %v8296_v41  ;;  %v8298_v43 = vld [vmem:[%s12122_s3 + $0x78] sm:$0xff]  }
 0x159   : > { %7330 = vmatpush3.bf16.msra.mxu1 %v8297_v42 }
 0x15a   : > { %7331 = vmatprep.subr.bf16.mxu1 %v8298_v43  ;;  %v8305_v43 = vld [vmem:[%s12124_s5 + $0x28] sm:$0xff]  }
 0x15b   : > { %2424 = vmatpush1.bf16.msra.mxu0 %v8226_v44  ;;  %v8299_v44 = vld [vmem:[%s12122_s3 + $0x38] sm:$0xff]  }
 0x15c   : > { %2425 = vmatprep.subr.bf16.mxu0 %v8237_v45  ;;  %v8280_v45 = vld [vmem:[%s9522_s23 + $0x2b8] ss:$28 sps:$4 sm:$0xff]  }
 0x15d   : > { %7332 = vmatpush3.bf16.msra.mxu1 %v8299_v44 }
 0x15e   : > { %2277 = vmatmul.mubr.bf16.gmra.mrb[8].mxu0 %v8207_v46  ;;  %v8281_v46 = vld [vmem:[%s9522_s23 + $0x2f0] ss:$28 sps:$4 sm:$0xff]  }
 0x15f   : > { %2286 = vmatprep.mubr.bf16.mxu0 %v8211_v47  ;;  %2426 = vmatpush1.bf16.msra.mxu0 %v8235_v48  ;;  %v8282_v47 = vld [vmem:[%s9522_s23 + $0x328] ss:$28 sps:$4 sm:$0xff]   ;;  %v8283_v48 = vld [vmem:[%s9522_s23 + $0x360] ss:$28 sps:$4 sm:$0xff]  }
 0x160   : > { %2427 = vmatprep.subr.bf16.mxu0 %v8246_v49  ;;  %v692_v49 = vlaneseq }
 0x163   : > { %2428 = vmatpush1.bf16.msra.mxu0 %v8244_v50  ;;  %v10000_v50 = vshrl.u32 %v692_v49, 7 }
 0x164   : > { %2429 = vmatprep.subr.bf16.mxu0 %v8255_v51  ;;  %v8300_v51 = vld [vmem:[%s12124_s5] sm:$0xff]  }
 0x165   : > { %12137 = vst [vmem:[#allocation2_spill] sm:$0xff] %v10000_v50  ;;  %7585 = vmatprep.subr.bf16.mxu1 %v8300_v51 }
 0x166   : > { %2287 = vmatmul.mubr.bf16.gmra.mrb[12].mxu0 %v8213_v52  ;;  %v10006_v52 = vsub.s32 0, %v10000_v50 }
 0x167   : > { %2296 = vmatprep.mubr.bf16.mxu0 %v8214_v53  ;;  %2430 = vmatpush1.bf16.msra.mxu0 %v8253_v54  ;;  %v690_v53 = vld [vmem:[%s12121_s2] sm:$0x3]  ;;  %v10012_v54 = vsub.s32 1, %v10000_v50 }
 0x168   : > { %2431 = vmatprep.subr.bf16.mxu0 %v8264_v55  ;;  %v10015_v55 = vrot.slane %v690_v53, %v10006_v52 }
 0x16b   : > { %2432 = vmatpush1.bf16.msra.mxu0 %v8262_v56  ;;  %v10018_v56 = vrot.slane %v690_v53, %v10012_v54  ;;  %v8306_v53 = vld [vmem:[%s12124_s5 + $0x30] sm:$0xff]  }
 0x16e   : > { %2297 = vmatmul.mubr.bf16.gmra.mrb[16].mxu0 %v8216_v57 }
 0x16f   : > { %2306 = vmatprep.mubr.bf16.mxu0 %v8220_v58 }
 0x176   : > { %2307 = vmatmul.mubr.bf16.gmra.mrb[20].mxu0 %v8222_v59 }
 0x177   : > { %2316 = vmatprep.mubr.bf16.mxu0 %v8223_v60 }
 0x17e   : > { %2317 = vmatmul.mubr.bf16.gmra.mrb[24].mxu0 %v8225_v61 }
 0x17f   : > { %2326 = vmatprep.mubr.bf16.mxu0 %v8229_v62 }
 0x186   : > { %2327 = vmatmul.mubr.bf16.gmra.mrb[28].mxu0 %v8231_v63 }
 0x187   : > { %2336 = vmatprep.mubr.bf16.mxu0 %v8232_v0 }
 0x18e   : > { %2337 = vmatmul.mubr.bf16.gmra.mrb[32].mxu0 %v8234_v1 }
 0x18f   : > { %2346 = vmatprep.mubr.bf16.mxu0 %v8238_v2 }
 0x196   : > { %2347 = vmatmul.mubr.bf16.gmra.mrb[36].mxu0 %v8240_v3 }
 0x197   : > { %2356 = vmatprep.mubr.bf16.mxu0 %v8241_v4 }
 0x19e   : > { %2357 = vmatmul.mubr.bf16.gmra.mrb[40].mxu0 %v8243_v5 }
 0x19f   : > { %2366 = vmatprep.mubr.bf16.mxu0 %v8247_v6 }
 0x1a6   : > { %2367 = vmatmul.mubr.bf16.gmra.mrb[44].mxu0 %v8249_v7 }
 0x1a7   : > { %2376 = vmatprep.mubr.bf16.mxu0 %v8250_v8 }
 0x1ae   : > { %2377 = vmatmul.mubr.bf16.gmra.mrb[48].mxu0 %v8252_v9 }
 0x1af   : > { %2386 = vmatprep.mubr.bf16.mxu0 %v8256_v10  ;;  %v8301_v10 = vld [vmem:[%s12124_s5 + $0x8] sm:$0xff]  }
 0x1b6   : > { %2387 = vmatmul.mubr.bf16.gmra.mrb[52].mxu0 %v8258_v11 }
 0x1b7   : > { %2396 = vmatprep.mubr.bf16.mxu0 %v8259_v12 }
 0x1be   : > { %2397 = vmatmul.mubr.bf16.gmra.mrb[56].mxu0 %v8261_v13 }
 0x1bf   : > { %2406 = vmatprep.mubr.bf16.mxu0 %v8265_v14 }
 0x1c6   : > { %2407 = vmatmul.mubr.bf16.gmra.mrb[60].mxu0 %v8267_v15 }
 0x1c7   : > { %2449 = vmatprep.mubr.bf16.mxu0 %v9401_v19 }
 0x1ce   : > { %2450 = vmatmul.mubr.bf16.vlgmr.msra.gmra.mrb[0].mxu0 %v8268_v21 }
 0x1cf   : > { %2459 = vmatprep.mubr.bf16.mxu0 %v9401_v19 }
 0x1d6   : > { %2460 = vmatmul.mubr.bf16.gmra.mrb[4].mxu0 %v8269_v26 }
 0x1d7   : > { %2469 = vmatprep.mubr.bf16.mxu0 %v9401_v19 }
 0x1de   : > { %2470 = vmatmul.mubr.bf16.gmra.mrb[8].mxu0 %v8270_v30 }
 0x1df   : > { %2479 = vmatprep.mubr.bf16.mxu0 %v9401_v19 }
 0x1e6   : > { %2480 = vmatmul.mubr.bf16.gmra.mrb[12].mxu0 %v8271_v31 }
 0x1e7   : > { %2489 = vmatprep.mubr.bf16.mxu0 %v9401_v19 }
 0x1ee   : > { %2490 = vmatmul.mubr.bf16.gmra.mrb[16].mxu0 %v8272_v32 }
 0x1ef   : > { %2499 = vmatprep.mubr.bf16.mxu0 %v9401_v19 }
 0x1f6   : > { %2500 = vmatmul.mubr.bf16.gmra.mrb[20].mxu0 %v8273_v33 }
 0x1f7   : > { %2509 = vmatprep.mubr.bf16.mxu0 %v9401_v19 }
 0x1fe   : > { %2510 = vmatmul.mubr.bf16.gmra.mrb[24].mxu0 %v8274_v34 }
 0x1ff   : > { %2519 = vmatprep.mubr.bf16.mxu0 %v9401_v19 }
 0x206   : > { %2520 = vmatmul.mubr.bf16.gmra.mrb[28].mxu0 %v8275_v35  ;;  %v8304_v35 = vld [vmem:[%s12124_s5 + $0x20] sm:$0xff]  }
 0x207   : > { %2529 = vmatprep.mubr.bf16.mxu0 %v9401_v19 }
 0x20e   : > { %2530 = vmatmul.mubr.bf16.gmra.mrb[32].mxu0 %v8276_v36 }
 0x20f   : > { %2539 = vmatprep.mubr.bf16.mxu0 %v9401_v19 }
 0x216   : > { %2540 = vmatmul.mubr.bf16.gmra.mrb[36].mxu0 %v8277_v37 }
 0x217   : > { %2549 = vmatprep.mubr.bf16.mxu0 %v9401_v19 }
 0x21e   : > { %2550 = vmatmul.mubr.bf16.gmra.mrb[40].mxu0 %v8278_v38 }
 0x21f   : > { %2559 = vmatprep.mubr.bf16.mxu0 %v9401_v19 }
 0x226   : > { %2560 = vmatmul.mubr.bf16.gmra.mrb[44].mxu0 %v8279_v40 }
 0x227   : > { %2569 = vmatprep.mubr.bf16.mxu0 %v9401_v19 }
 0x22e   : > { %2570 = vmatmul.mubr.bf16.gmra.mrb[48].mxu0 %v8280_v45 }
 0x22f   : > { %2579 = vmatprep.mubr.bf16.mxu0 %v9401_v19 }
 0x236   : > { %2580 = vmatmul.mubr.bf16.gmra.mrb[52].mxu0 %v8281_v46 }
 0x237   : > { %2589 = vmatprep.mubr.bf16.mxu0 %v9401_v19 }
 0x23e   : > { %2590 = vmatmul.mubr.bf16.gmra.mrb[56].mxu0 %v8282_v47 }
 0x23f   : > { %2599 = vmatprep.mubr.bf16.mxu0 %v9401_v19 }
 0x246   : > { %2600 = vmatmul.mubr.bf16.gmra.mrb[60].mxu0 %v8283_v48 }
 0x2a1   : > { %v2451_v57 = vpop.f32.mrb[0].mxu0 }
 0x2a2   : > { %v7689_v58 = vadd.f32 %v2451_v57, %v10015_v55  ;;  %v2453_v59 = vpop.f32.mrb[1].mxu0 }
 0x2a3   : > { %v7690_v60 = vadd.f32 %v2453_v59, %v10018_v56  ;;  %v2455_v61 = vpop.f32.mrb[2].mxu0 }
 0x2a4   : > { %v7691_v62 = vadd.f32 %v2455_v61, %v10015_v55  ;;  %v2457_v63 = vpop.f32.mrb[3].mxu0  ;;  %v2610_v1 = vmax.f32 %v7689_v58, 0.0 }
 0x2a5   : > { %v7692_v0 = vadd.f32 %v2457_v63, %v10018_v56  ;;  %v2611_v3 = vmax.f32 %v7690_v60, 0.0 }
 0x2a6   : > { %v2612_v2 = vmax.f32 %v7691_v62, 0.0 }
 0x2a7   : > { %v2613_v4 = vmax.f32 %v7692_v0, 0.0 }
 0x2a8   : > { %v2674_v5 = vpack.c.bf16 %v2612_v2, %v2610_v1 }
 0x2a9   : > { %v2461_v6 = vpop.f32.mrb[4].mxu0  ;;  %v2675_v7 = vpack.c.bf16 %v2613_v4, %v2611_v3 }
 0x2aa   : > { %v7693_v8 = vadd.f32 %v2461_v6, %v10015_v55  ;;  %v2463_v9 = vpop.f32.mrb[5].mxu0 }
 0x2ab   : > { %v7694_v11 = vadd.f32 %v2463_v9, %v10018_v56  ;;  %v2465_v12 = vpop.f32.mrb[6].mxu0  ;;  %2873 = vmatprep.mubr.bf16.mxu1 %v2675_v7 }
 0x2ac   : > { %v7695_v13 = vadd.f32 %v2465_v12, %v10015_v55  ;;  %v2467_v14 = vpop.f32.mrb[7].mxu0  ;;  %2874 = vmatmul.mubr.bf16.vlgmr.msra.gmra.mrb[0].mxu1 %v2674_v5  ;;  %v2614_v16 = vmax.f32 %v7693_v8, 0.0 }
 0x2ad   : > { %v7696_v15 = vadd.f32 %v2467_v14, %v10018_v56  ;;  %7586 = vmatpush3.bf16.msra.mxu1 %v8300_v51  ;;  %v2615_v20 = vmax.f32 %v7694_v11, 0.0 }
 0x2ae   : > { %v2616_v17 = vmax.f32 %v7695_v13, 0.0  ;;  %7587 = vmatprep.subr.bf16.mxu1 %v8301_v10 }
 0x2af   : > { %v2617_v21 = vmax.f32 %v7696_v15, 0.0 }
 0x2b0   : > { %v2676_v22 = vpack.c.bf16 %v2616_v17, %v2614_v16 }
 0x2b1   : > { %v2677_v23 = vpack.c.bf16 %v2617_v21, %v2615_v20  ;;  %v2471_v24 = vpop.f32.mrb[8].mxu0  ;;  %7588 = vmatpush3.bf16.msra.mxu1 %v8301_v10 }
 0x2b2   : > { %v7697_v25 = vadd.f32 %v2471_v24, %v10015_v55  ;;  %v2473_v26 = vpop.f32.mrb[9].mxu0  ;;  %7589 = vmatprep.subr.bf16.mxu1 %v8302_v18 }
 0x2b3   : > { %v7698_v28 = vadd.f32 %v2473_v26, %v10018_v56  ;;  %v2475_v29 = vpop.f32.mrb[10].mxu0  ;;  %2881 = vmatprep.mubr.bf16.mxu1 %v2677_v23 }
 0x2b4   : > { %v7699_v30 = vadd.f32 %v2475_v29, %v10015_v55  ;;  %v2477_v31 = vpop.f32.mrb[11].mxu0  ;;  %2882 = vmatmul.mubr.bf16.gmra.mrb[4].mxu1 %v2676_v22  ;;  %v2618_v33 = vmax.f32 %v7697_v25, 0.0 }
 0x2b5   : > { %v7700_v32 = vadd.f32 %v2477_v31, %v10018_v56  ;;  %7590 = vmatpush3.bf16.msra.mxu1 %v8302_v18  ;;  %v2619_v36 = vmax.f32 %v7698_v28, 0.0 }
 0x2b6   : > { %v2620_v34 = vmax.f32 %v7699_v30, 0.0  ;;  %7591 = vmatprep.subr.bf16.mxu1 %v8303_v27 }
 0x2b7   : > { %v2621_v37 = vmax.f32 %v7700_v32, 0.0 }
 0x2b8   : > { %v2678_v38 = vpack.c.bf16 %v2620_v34, %v2618_v33 }
 0x2b9   : > { %v2679_v39 = vpack.c.bf16 %v2621_v37, %v2619_v36  ;;  %v2481_v40 = vpop.f32.mrb[12].mxu0  ;;  %7592 = vmatpush3.bf16.msra.mxu1 %v8303_v27 }
 0x2ba   : > { %v7701_v41 = vadd.f32 %v2481_v40, %v10015_v55  ;;  %v2483_v42 = vpop.f32.mrb[13].mxu0  ;;  %7593 = vmatprep.subr.bf16.mxu1 %v8304_v35 }
 0x2bb   : > { %v7702_v44 = vadd.f32 %v2483_v42, %v10018_v56  ;;  %v2485_v45 = vpop.f32.mrb[14].mxu0  ;;  %2889 = vmatprep.mubr.bf16.mxu1 %v2679_v39 }
 0x2bc   : > { %v7703_v46 = vadd.f32 %v2485_v45, %v10015_v55  ;;  %v2487_v47 = vpop.f32.mrb[15].mxu0  ;;  %2890 = vmatmul.mubr.bf16.gmra.mrb[8].mxu1 %v2678_v38  ;;  %v2622_v49 = vmax.f32 %v7701_v41, 0.0 }
 0x2bd   : > { %v7704_v48 = vadd.f32 %v2487_v47, %v10018_v56  ;;  %7594 = vmatpush3.bf16.msra.mxu1 %v8304_v35  ;;  %v2623_v57 = vmax.f32 %v7702_v44, 0.0 }
 0x2be   : > { %v2624_v51 = vmax.f32 %v7703_v46, 0.0  ;;  %7595 = vmatprep.subr.bf16.mxu1 %v8305_v43 }
 0x2bf   : > { %v2625_v58 = vmax.f32 %v7704_v48, 0.0 }
 0x2c0   : > { %v2680_v59 = vpack.c.bf16 %v2624_v51, %v2622_v49 }
 0x2c1   : > { %v2681_v60 = vpack.c.bf16 %v2625_v58, %v2623_v57  ;;  %v2491_v61 = vpop.f32.mrb[16].mxu0  ;;  %7596 = vmatpush3.bf16.msra.mxu1 %v8305_v43 }
 0x2c2   : > { %v7705_v62 = vadd.f32 %v2491_v61, %v10015_v55  ;;  %v2493_v63 = vpop.f32.mrb[17].mxu0  ;;  %7597 = vmatprep.subr.bf16.mxu1 %v8306_v53 }
 0x2c3   : > { %v7706_v0 = vadd.f32 %v2493_v63, %v10018_v56  ;;  %v2495_v1 = vpop.f32.mrb[18].mxu0  ;;  %2897 = vmatprep.mubr.bf16.mxu1 %v2681_v60 }
 0x2c4   : > { %v7707_v2 = vadd.f32 %v2495_v1, %v10015_v55  ;;  %v2497_v3 = vpop.f32.mrb[19].mxu0  ;;  %2898 = vmatmul.mubr.bf16.gmra.mrb[12].mxu1 %v2680_v59  ;;  %v2626_v5 = vmax.f32 %v7705_v62, 0.0 }
 0x2c5   : > { %v7708_v4 = vadd.f32 %v2497_v3, %v10018_v56  ;;  %7598 = vmatpush3.bf16.msra.mxu1 %v8306_v53  ;;  %v2627_v7 = vmax.f32 %v7706_v0, 0.0 }
 0x2c6   : > { %v2628_v6 = vmax.f32 %v7707_v2, 0.0 }
 0x2c7   : > { %v2629_v8 = vmax.f32 %v7708_v4, 0.0 }
 0x2c8   : > { %v2682_v9 = vpack.c.bf16 %v2628_v6, %v2626_v5 }
 0x2c9   : > { %v2683_v10 = vpack.c.bf16 %v2629_v8, %v2627_v7  ;;  %v2501_v11 = vpop.f32.mrb[20].mxu0 }
 0x2ca   : > { %v7709_v12 = vadd.f32 %v2501_v11, %v10015_v55  ;;  %v2503_v13 = vpop.f32.mrb[21].mxu0 }
 0x2cb   : > { %v7710_v14 = vadd.f32 %v2503_v13, %v10018_v56  ;;  %v2505_v15 = vpop.f32.mrb[22].mxu0  ;;  %2905 = vmatprep.mubr.bf16.mxu1 %v2683_v10 }
 0x2cc   : > { %v7711_v16 = vadd.f32 %v2505_v15, %v10015_v55  ;;  %v2507_v17 = vpop.f32.mrb[23].mxu0  ;;  %2906 = vmatmul.mubr.bf16.gmra.mrb[16].mxu1 %v2682_v9  ;;  %v2630_v20 = vmax.f32 %v7709_v12, 0.0 }
 0x2cd   : > { %v7712_v18 = vadd.f32 %v2507_v17, %v10018_v56  ;;  %v2631_v22 = vmax.f32 %v7710_v14, 0.0 }
 0x2ce   : > { %v2632_v21 = vmax.f32 %v7711_v16, 0.0 }
 0x2cf   : > { %v2633_v23 = vmax.f32 %v7712_v18, 0.0 }
 0x2d0   : > { %v2684_v24 = vpack.c.bf16 %v2632_v21, %v2630_v20 }
 0x2d1   : > { %v2685_v25 = vpack.c.bf16 %v2633_v23, %v2631_v22  ;;  %v2511_v26 = vpop.f32.mrb[24].mxu0 }
 0x2d2   : > { %v7713_v27 = vadd.f32 %v2511_v26, %v10015_v55  ;;  %v2513_v28 = vpop.f32.mrb[25].mxu0 }
 0x2d3   : > { %v7714_v29 = vadd.f32 %v2513_v28, %v10018_v56  ;;  %v2515_v30 = vpop.f32.mrb[26].mxu0  ;;  %2913 = vmatprep.mubr.bf16.mxu1 %v2685_v25 }
 0x2d4   : > { %v7715_v31 = vadd.f32 %v2515_v30, %v10015_v55  ;;  %v2517_v32 = vpop.f32.mrb[27].mxu0  ;;  %2914 = vmatmul.mubr.bf16.gmra.mrb[20].mxu1 %v2684_v24  ;;  %v2634_v34 = vmax.f32 %v7713_v27, 0.0 }
 0x2d5   : > { %v7716_v33 = vadd.f32 %v2517_v32, %v10018_v56  ;;  %v2635_v36 = vmax.f32 %v7714_v29, 0.0 }
 0x2d6   : > { %v2636_v35 = vmax.f32 %v7715_v31, 0.0 }
 0x2d7   : > { %v2637_v37 = vmax.f32 %v7716_v33, 0.0 }
 0x2d8   : > { %v2686_v38 = vpack.c.bf16 %v2636_v35, %v2634_v34 }
 0x2d9   : > { %v2687_v39 = vpack.c.bf16 %v2637_v37, %v2635_v36  ;;  %v2521_v40 = vpop.f32.mrb[28].mxu0 }
 0x2da   : > { %v7717_v41 = vadd.f32 %v2521_v40, %v10015_v55  ;;  %v2523_v42 = vpop.f32.mrb[29].mxu0 }
 0x2db   : > { %v7718_v43 = vadd.f32 %v2523_v42, %v10018_v56  ;;  %v2525_v44 = vpop.f32.mrb[30].mxu0  ;;  %2921 = vmatprep.mubr.bf16.mxu1 %v2687_v39 }
 0x2dc   : > { %v7719_v45 = vadd.f32 %v2525_v44, %v10015_v55  ;;  %v2527_v46 = vpop.f32.mrb[31].mxu0  ;;  %2922 = vmatmul.mubr.bf16.gmra.mrb[24].mxu1 %v2686_v38  ;;  %v2638_v48 = vmax.f32 %v7717_v41, 0.0 }
 0x2dd   : > { %v7720_v47 = vadd.f32 %v2527_v46, %v10018_v56  ;;  %v2639_v51 = vmax.f32 %v7718_v43, 0.0 }
 0x2de   : > { %v2640_v49 = vmax.f32 %v7719_v45, 0.0 }
 0x2df   : > { %v2641_v53 = vmax.f32 %v7720_v47, 0.0 }
 0x2e0   : > { %v2688_v57 = vpack.c.bf16 %v2640_v49, %v2638_v48 }
 0x2e1   : > { %v2689_v58 = vpack.c.bf16 %v2641_v53, %v2639_v51  ;;  %v2531_v59 = vpop.f32.mrb[32].mxu0 }
 0x2e2   : > { %v7721_v60 = vadd.f32 %v2531_v59, %v10015_v55  ;;  %v2533_v61 = vpop.f32.mrb[33].mxu0 }
 0x2e3   : > { %v7722_v62 = vadd.f32 %v2533_v61, %v10018_v56  ;;  %v2535_v63 = vpop.f32.mrb[34].mxu0  ;;  %2929 = vmatprep.mubr.bf16.mxu1 %v2689_v58 }
 0x2e4   : > { %v7723_v0 = vadd.f32 %v2535_v63, %v10015_v55  ;;  %v2537_v1 = vpop.f32.mrb[35].mxu0  ;;  %2930 = vmatmul.mubr.bf16.gmra.mrb[28].mxu1 %v2688_v57  ;;  %v2642_v3 = vmax.f32 %v7721_v60, 0.0 }
 0x2e5   : > { %v7724_v2 = vadd.f32 %v2537_v1, %v10018_v56  ;;  %v2643_v5 = vmax.f32 %v7722_v62, 0.0  ;;  %v8307_v1 = vld [vmem:[%s12124_s5 + $0x38] sm:$0xff]  }
 0x2e6   : > { %v2644_v4 = vmax.f32 %v7723_v0, 0.0  ;;  %7599 = vmatprep.subr.bf16.mxu1 %v8307_v1 }
 0x2e7   : > { %v2645_v6 = vmax.f32 %v7724_v2, 0.0  ;;  %7600 = vmatpush3.bf16.msra.mxu1 %v8307_v1 }
 0x2e8   : > { %v2690_v7 = vpack.c.bf16 %v2644_v4, %v2642_v3 }
 0x2e9   : > { %v2691_v8 = vpack.c.bf16 %v2645_v6, %v2643_v5  ;;  %v2541_v9 = vpop.f32.mrb[36].mxu0 }
 0x2ea   : > { %v7725_v10 = vadd.f32 %v2541_v9, %v10015_v55  ;;  %v2543_v11 = vpop.f32.mrb[37].mxu0 }
 0x2eb   : > { %v7726_v12 = vadd.f32 %v2543_v11, %v10018_v56  ;;  %v2545_v13 = vpop.f32.mrb[38].mxu0  ;;  %2937 = vmatprep.mubr.bf16.mxu1 %v2691_v8 }
 0x2ec   : > { %v7727_v14 = vadd.f32 %v2545_v13, %v10015_v55  ;;  %v2547_v15 = vpop.f32.mrb[39].mxu0  ;;  %2938 = vmatmul.mubr.bf16.gmra.mrb[32].mxu1 %v2690_v7  ;;  %v2646_v17 = vmax.f32 %v7725_v10, 0.0 }
 0x2ed   : > { %v7728_v16 = vadd.f32 %v2547_v15, %v10018_v56  ;;  %v2647_v20 = vmax.f32 %v7726_v12, 0.0 }
 0x2ee   : > { %v2648_v18 = vmax.f32 %v7727_v14, 0.0 }
 0x2ef   : > { %v2649_v21 = vmax.f32 %v7728_v16, 0.0 }
 0x2f0   : > { %v2692_v22 = vpack.c.bf16 %v2648_v18, %v2646_v17 }
 0x2f1   : > { %v2693_v23 = vpack.c.bf16 %v2649_v21, %v2647_v20  ;;  %v2551_v24 = vpop.f32.mrb[40].mxu0 }
 0x2f2   : > { %v7729_v25 = vadd.f32 %v2551_v24, %v10015_v55  ;;  %v2553_v26 = vpop.f32.mrb[41].mxu0 }
 0x2f3   : > { %v7730_v27 = vadd.f32 %v2553_v26, %v10018_v56  ;;  %v2555_v28 = vpop.f32.mrb[42].mxu0  ;;  %2945 = vmatprep.mubr.bf16.mxu1 %v2693_v23 }
 0x2f4   : > { %v7731_v29 = vadd.f32 %v2555_v28, %v10015_v55  ;;  %v2557_v30 = vpop.f32.mrb[43].mxu0  ;;  %2946 = vmatmul.mubr.bf16.gmra.mrb[36].mxu1 %v2692_v22  ;;  %v2650_v32 = vmax.f32 %v7729_v25, 0.0 }
 0x2f5   : > { %v7732_v31 = vadd.f32 %v2557_v30, %v10018_v56  ;;  %v2651_v34 = vmax.f32 %v7730_v27, 0.0 }
 0x2f6   : > { %v2652_v33 = vmax.f32 %v7731_v29, 0.0 }
 0x2f7   : > { %v2653_v35 = vmax.f32 %v7732_v31, 0.0 }
 0x2f8   : > { %v2694_v36 = vpack.c.bf16 %v2652_v33, %v2650_v32 }
 0x2f9   : > { %v2695_v37 = vpack.c.bf16 %v2653_v35, %v2651_v34  ;;  %v2561_v38 = vpop.f32.mrb[44].mxu0 }
 0x2fa   : > { %v7733_v39 = vadd.f32 %v2561_v38, %v10015_v55  ;;  %v2563_v40 = vpop.f32.mrb[45].mxu0 }
 0x2fb   : > { %v7734_v41 = vadd.f32 %v2563_v40, %v10018_v56  ;;  %v2565_v42 = vpop.f32.mrb[46].mxu0  ;;  %2953 = vmatprep.mubr.bf16.mxu1 %v2695_v37 }
 0x2fc   : > { %v7735_v43 = vadd.f32 %v2565_v42, %v10015_v55  ;;  %v2567_v44 = vpop.f32.mrb[47].mxu0  ;;  %2954 = vmatmul.mubr.bf16.gmra.mrb[40].mxu1 %v2694_v36  ;;  %v2654_v46 = vmax.f32 %v7733_v39, 0.0 }
 0x2fd   : > { %v7736_v45 = vadd.f32 %v2567_v44, %v10018_v56  ;;  %v2655_v48 = vmax.f32 %v7734_v41, 0.0 }
 0x2fe   : > { %v2656_v47 = vmax.f32 %v7735_v43, 0.0 }
 0x2ff   : > { %v2657_v49 = vmax.f32 %v7736_v45, 0.0 }
 0x300   : > { %v2696_v51 = vpack.c.bf16 %v2656_v47, %v2654_v46 }
 0x301   : > { %v2697_v53 = vpack.c.bf16 %v2657_v49, %v2655_v48  ;;  %v2571_v57 = vpop.f32.mrb[48].mxu0 }
 0x302   : > { %v7737_v58 = vadd.f32 %v2571_v57, %v10015_v55  ;;  %v2573_v59 = vpop.f32.mrb[49].mxu0  ;;  %v10108_v57 = vld [vmem:[%s12123_s4] ss:$0 sm:$0xff] }
 0x303   : > { %v7738_v60 = vadd.f32 %v2573_v59, %v10018_v56  ;;  %v2575_v61 = vpop.f32.mrb[50].mxu0  ;;  %2961 = vmatprep.mubr.bf16.mxu1 %v2697_v53 }
 0x304   : > { %v7739_v62 = vadd.f32 %v2575_v61, %v10015_v55  ;;  %v2577_v63 = vpop.f32.mrb[51].mxu0  ;;  %2962 = vmatmul.mubr.bf16.gmra.mrb[44].mxu1 %v2696_v51  ;;  %v2658_v2 = vmax.f32 %v7737_v58, 0.0 }
 0x305   : > { %v7740_v0 = vadd.f32 %v2577_v63, %v10018_v56  ;;  %v2659_v4 = vmax.f32 %v7738_v60, 0.0 }
 0x306   : > { %v2660_v3 = vmax.f32 %v7739_v62, 0.0  ;;  %v8308_v62 = vld [vmem:[%s12126_s7] sm:$0xff]  }
 0x307   : > { %v2661_v5 = vmax.f32 %v7740_v0, 0.0  ;;  %7633 = vmatprep.subr.bf16.mxu1 %v8308_v62 }
 0x308   : > { %v2698_v6 = vpack.c.bf16 %v2660_v3, %v2658_v2 }
 0x309   : > { %v2699_v7 = vpack.c.bf16 %v2661_v5, %v2659_v4  ;;  %v2581_v8 = vpop.f32.mrb[52].mxu0 }
 0x30a   : > { %v7741_v9 = vadd.f32 %v2581_v8, %v10015_v55  ;;  %v2583_v10 = vpop.f32.mrb[53].mxu0 }
 0x30b   : > { %v7742_v11 = vadd.f32 %v2583_v10, %v10018_v56  ;;  %v2585_v12 = vpop.f32.mrb[54].mxu0  ;;  %2969 = vmatprep.mubr.bf16.mxu1 %v2699_v7 }
 0x30c   : > { %v7743_v13 = vadd.f32 %v2585_v12, %v10015_v55  ;;  %v2587_v14 = vpop.f32.mrb[55].mxu0  ;;  %2970 = vmatmul.mubr.bf16.gmra.mrb[48].mxu1 %v2698_v6  ;;  %v2662_v16 = vmax.f32 %v7741_v9, 0.0 }
 0x30d   : > { %v7744_v15 = vadd.f32 %v2587_v14, %v10018_v56  ;;  %v2663_v18 = vmax.f32 %v7742_v11, 0.0 }
 0x30e   : > { %v2664_v17 = vmax.f32 %v7743_v13, 0.0 }
 0x30f   : > { %v2665_v20 = vmax.f32 %v7744_v15, 0.0 }
 0x310   : > { %v2700_v21 = vpack.c.bf16 %v2664_v17, %v2662_v16 }
 0x311   : > { %v2701_v22 = vpack.c.bf16 %v2665_v20, %v2663_v18  ;;  %v2591_v23 = vpop.f32.mrb[56].mxu0  ;;  %v8309_v18 = vld [vmem:[%s12126_s7 + $0x8] sm:$0xff]  }
 0x312   : > { %v7745_v24 = vadd.f32 %v2591_v23, %v10015_v55  ;;  %v2593_v25 = vpop.f32.mrb[57].mxu0 }
 0x313   : > { %v7746_v26 = vadd.f32 %v2593_v25, %v10018_v56  ;;  %v2595_v27 = vpop.f32.mrb[58].mxu0  ;;  %2977 = vmatprep.mubr.bf16.mxu1 %v2701_v22 }
 0x314   : > { %v7747_v28 = vadd.f32 %v2595_v27, %v10015_v55  ;;  %v2597_v29 = vpop.f32.mrb[59].mxu0  ;;  %2978 = vmatmul.mubr.bf16.gmra.mrb[52].mxu1 %v2700_v21  ;;  %v2666_v31 = vmax.f32 %v7745_v24, 0.0  ;;  %v8310_v24 = vld [vmem:[%s12126_s7 + $0x10] sm:$0xff]  }
 0x315   : > { %v7748_v30 = vadd.f32 %v2597_v29, %v10018_v56  ;;  %v2667_v33 = vmax.f32 %v7746_v26, 0.0 }
 0x316   : > { %v2668_v32 = vmax.f32 %v7747_v28, 0.0 }
 0x317   : > { %v2669_v34 = vmax.f32 %v7748_v30, 0.0 }
 0x318   : > { %v2702_v35 = vpack.c.bf16 %v2668_v32, %v2666_v31  ;;  %v8311_v32 = vld [vmem:[%s12126_s7 + $0x18] sm:$0xff]  }
 0x319   : > { %v2703_v36 = vpack.c.bf16 %v2669_v34, %v2667_v33  ;;  %v2601_v37 = vpop.f32.mrb[60].mxu0 }
 0x31a   : > { %v7749_v38 = vadd.f32 %v2601_v37, %v10015_v55  ;;  %v2603_v39 = vpop.f32.mrb[61].mxu0 }
 0x31b   : > { %v7750_v40 = vadd.f32 %v2603_v39, %v10018_v56  ;;  %v2605_v41 = vpop.f32.mrb[62].mxu0  ;;  %2985 = vmatprep.mubr.bf16.mxu1 %v2703_v36 }
 0x31c   : > { %v7751_v42 = vadd.f32 %v2605_v41, %v10015_v55  ;;  %v2607_v43 = vpop.f32.mrb[63].mxu0  ;;  %2986 = vmatmul.mubr.bf16.gmra.mrb[56].mxu1 %v2702_v35  ;;  %v2670_v45 = vmax.f32 %v7749_v38, 0.0 }
 0x31d   : > { %v7752_v44 = vadd.f32 %v2607_v43, %v10018_v56  ;;  %v2671_v47 = vmax.f32 %v7750_v40, 0.0 }
 0x31e   : > { %v2672_v46 = vmax.f32 %v7751_v42, 0.0 }
 0x31f   : > { %v2673_v48 = vmax.f32 %v7752_v44, 0.0 }
 0x320   : > { %v2704_v49 = vpack.c.bf16 %v2672_v46, %v2670_v45 }
 0x321   : > { %v2705_v51 = vpack.c.bf16 %v2673_v48, %v2671_v47 }
 0x323   : > { %2993 = vmatprep.mubr.bf16.mxu1 %v2705_v51 }
 0x324   : > { %2994 = vmatmul.mubr.bf16.gmra.mrb[60].mxu1 %v2704_v49 }
 0x37f   : > { %v7333_v53 = vpop.f32.mrb[0].mxu1 }
 0x380   : > { %v7334_v58 = vpop.f32.mrb[1].mxu1 }
 0x381   : > { %v7335_v55 = vadd.f32 %v7334_v58, %v7333_v53  ;;  %v7336_v59 = vpop.f32.mrb[2].mxu1 }
 0x382   : > { %v7337_v60 = vpop.f32.mrb[3].mxu1 }
 0x383   : > { %v2876_v56 = vadd.f32 %v7335_v55, %v10108_v57  ;;  %v7338_v61 = vadd.f32 %v7337_v60, %v7336_v59 }
 0x385   : > { %v2879_v63 = vadd.f32 %v7338_v61, %v10108_v57  ;;  %v3002_v1 = vmax.f32 %v2876_v56, 0.0 }
 0x387   : > { %v7339_v0 = vpop.f32.mrb[4].mxu1  ;;  %v3003_v2 = vmax.f32 %v2879_v63, 0.0 }
 0x388   : > { %v7340_v3 = vpop.f32.mrb[5].mxu1 }
 0x389   : > { %v7341_v4 = vadd.f32 %v7340_v3, %v7339_v0  ;;  %v7342_v5 = vpop.f32.mrb[6].mxu1  ;;  %v3034_v6 = vpack.c.bf16 %v3003_v2, %v3002_v1 }
 0x38a   : > { %v7343_v7 = vpop.f32.mrb[7].mxu1 }
 0x38b   : > { %v2884_v8 = vadd.f32 %v7341_v4, %v10108_v57  ;;  %v7344_v9 = vadd.f32 %v7343_v7, %v7342_v5  ;;  %7601 = vmatprep.mubr.bf16.mxu1 %v3034_v6 }
 0x38d   : > { %v2887_v10 = vadd.f32 %v7344_v9, %v10108_v57  ;;  %v3004_v11 = vmax.f32 %v2884_v8, 0.0 }
 0x38f   : > { %v3005_v12 = vmax.f32 %v2887_v10, 0.0  ;;  %v7345_v13 = vpop.f32.mrb[8].mxu1 }
 0x390   : > { %v7346_v14 = vpop.f32.mrb[9].mxu1 }
 0x391   : > { %v3035_v15 = vpack.c.bf16 %v3005_v12, %v3004_v11  ;;  %v7347_v16 = vadd.f32 %v7346_v14, %v7345_v13  ;;  %v7348_v17 = vpop.f32.mrb[10].mxu1 }
 0x392   : > { %v7349_v20 = vpop.f32.mrb[11].mxu1 }
 0x393   : > { %v2892_v21 = vadd.f32 %v7347_v16, %v10108_v57  ;;  %v7350_v22 = vadd.f32 %v7349_v20, %v7348_v17  ;;  %7602 = vmatmul.mubr.bf16.vlgmr.msra.gmra.mrb[64].mxu1 %v3035_v15 }
 0x394   : > { %7634 = vmatpush3.bf16.msra.mxu1 %v8308_v62 }
 0x395   : > { %v2895_v23 = vadd.f32 %v7350_v22, %v10108_v57  ;;  %7635 = vmatprep.subr.bf16.mxu1 %v8309_v18  ;;  %v3006_v26 = vmax.f32 %v2892_v21, 0.0 }
 0x397   : > { %v7351_v25 = vpop.f32.mrb[12].mxu1  ;;  %v3007_v27 = vmax.f32 %v2895_v23, 0.0 }
 0x398   : > { %v7352_v28 = vpop.f32.mrb[13].mxu1  ;;  %7636 = vmatpush3.bf16.msra.mxu1 %v8309_v18 }
 0x399   : > { %v7353_v29 = vadd.f32 %v7352_v28, %v7351_v25  ;;  %v7354_v30 = vpop.f32.mrb[14].mxu1  ;;  %v3036_v31 = vpack.c.bf16 %v3007_v27, %v3006_v26  ;;  %7637 = vmatprep.subr.bf16.mxu1 %v8310_v24 }
 0x39a   : > { %v7355_v33 = vpop.f32.mrb[15].mxu1 }
 0x39b   : > { %v2900_v34 = vadd.f32 %v7353_v29, %v10108_v57  ;;  %v7356_v35 = vadd.f32 %v7355_v33, %v7354_v30  ;;  %7605 = vmatprep.mubr.bf16.mxu1 %v3036_v31 }
 0x39c   : > { %7638 = vmatpush3.bf16.msra.mxu1 %v8310_v24 }
 0x39d   : > { %v2903_v36 = vadd.f32 %v7356_v35, %v10108_v57  ;;  %7639 = vmatprep.subr.bf16.mxu1 %v8311_v32  ;;  %v3008_v38 = vmax.f32 %v2900_v34, 0.0 }
 0x39f   : > { %v7357_v37 = vpop.f32.mrb[16].mxu1  ;;  %v3009_v39 = vmax.f32 %v2903_v36, 0.0 }
 0x3a0   : > { %v7358_v40 = vpop.f32.mrb[17].mxu1  ;;  %7640 = vmatpush3.bf16.msra.mxu1 %v8311_v32 }
 0x3a1   : > { %v7359_v41 = vadd.f32 %v7358_v40, %v7357_v37  ;;  %v7360_v42 = vpop.f32.mrb[18].mxu1  ;;  %v3037_v43 = vpack.c.bf16 %v3009_v39, %v3008_v38 }
 0x3a2   : > { %v7361_v44 = vpop.f32.mrb[19].mxu1 }
 0x3a3   : > { %v2908_v45 = vadd.f32 %v7359_v41, %v10108_v57  ;;  %v7362_v46 = vadd.f32 %v7361_v44, %v7360_v42  ;;  %7606 = vmatmul.mubr.bf16.gmra.mrb[68].mxu1 %v3037_v43 }
 0x3a5   : > { %v2911_v47 = vadd.f32 %v7362_v46, %v10108_v57  ;;  %v3010_v49 = vmax.f32 %v2908_v45, 0.0 }
 0x3a7   : > { %v7363_v48 = vpop.f32.mrb[20].mxu1  ;;  %v3011_v51 = vmax.f32 %v2911_v47, 0.0 }
 0x3a8   : > { %v7364_v53 = vpop.f32.mrb[21].mxu1 }
 0x3a9   : > { %v7365_v58 = vadd.f32 %v7364_v53, %v7363_v48  ;;  %v7366_v55 = vpop.f32.mrb[22].mxu1  ;;  %v3038_v59 = vpack.c.bf16 %v3011_v51, %v3010_v49 }
 0x3aa   : > { %v7367_v60 = vpop.f32.mrb[23].mxu1 }
 0x3ab   : > { %v2916_v56 = vadd.f32 %v7365_v58, %v10108_v57  ;;  %v7368_v61 = vadd.f32 %v7367_v60, %v7366_v55  ;;  %7609 = vmatprep.mubr.bf16.mxu1 %v3038_v59 }
 0x3ad   : > { %v2919_v62 = vadd.f32 %v7368_v61, %v10108_v57  ;;  %v3012_v0 = vmax.f32 %v2916_v56, 0.0 }
 0x3af   : > { %v7369_v63 = vpop.f32.mrb[24].mxu1  ;;  %v3013_v1 = vmax.f32 %v2919_v62, 0.0 }
 0x3b0   : > { %v7370_v2 = vpop.f32.mrb[25].mxu1 }
 0x3b1   : > { %v7371_v3 = vadd.f32 %v7370_v2, %v7369_v63  ;;  %v7372_v4 = vpop.f32.mrb[26].mxu1  ;;  %v3039_v5 = vpack.c.bf16 %v3013_v1, %v3012_v0 }
 0x3b2   : > { %v7373_v6 = vpop.f32.mrb[27].mxu1 }
 0x3b3   : > { %v2924_v7 = vadd.f32 %v7371_v3, %v10108_v57  ;;  %v7374_v8 = vadd.f32 %v7373_v6, %v7372_v4  ;;  %7610 = vmatmul.mubr.bf16.gmra.mrb[72].mxu1 %v3039_v5 }
 0x3b5   : > { %v2927_v9 = vadd.f32 %v7374_v8, %v10108_v57  ;;  %v3014_v11 = vmax.f32 %v2924_v7, 0.0 }
 0x3b7   : > { %v7375_v10 = vpop.f32.mrb[28].mxu1  ;;  %v3015_v12 = vmax.f32 %v2927_v9, 0.0 }
 0x3b8   : > { %v7376_v13 = vpop.f32.mrb[29].mxu1 }
 0x3b9   : > { %v7377_v14 = vadd.f32 %v7376_v13, %v7375_v10  ;;  %v7378_v15 = vpop.f32.mrb[30].mxu1  ;;  %v3040_v16 = vpack.c.bf16 %v3015_v12, %v3014_v11 }
 0x3ba   : > { %v7379_v17 = vpop.f32.mrb[31].mxu1 }
 0x3bb   : > { %v2932_v18 = vadd.f32 %v7377_v14, %v10108_v57  ;;  %v7380_v20 = vadd.f32 %v7379_v17, %v7378_v15  ;;  %7613 = vmatprep.mubr.bf16.mxu1 %v3040_v16 }
 0x3bd   : > { %v2935_v21 = vadd.f32 %v7380_v20, %v10108_v57  ;;  %v3016_v23 = vmax.f32 %v2932_v18, 0.0 }
 0x3bf   : > { %v7381_v22 = vpop.f32.mrb[32].mxu1  ;;  %v3017_v24 = vmax.f32 %v2935_v21, 0.0 }
 0x3c0   : > { %v7382_v25 = vpop.f32.mrb[33].mxu1 }
 0x3c1   : > { %v7383_v26 = vadd.f32 %v7382_v25, %v7381_v22  ;;  %v7384_v27 = vpop.f32.mrb[34].mxu1  ;;  %v3041_v28 = vpack.c.bf16 %v3017_v24, %v3016_v23 }
 0x3c2   : > { %v7385_v29 = vpop.f32.mrb[35].mxu1 }
 0x3c3   : > { %v2940_v30 = vadd.f32 %v7383_v26, %v10108_v57  ;;  %v7386_v31 = vadd.f32 %v7385_v29, %v7384_v27  ;;  %7614 = vmatmul.mubr.bf16.gmra.mrb[76].mxu1 %v3041_v28 }
 0x3c5   : > { %v2943_v32 = vadd.f32 %v7386_v31, %v10108_v57  ;;  %v3018_v34 = vmax.f32 %v2940_v30, 0.0 }
 0x3c7   : > { %v7387_v33 = vpop.f32.mrb[36].mxu1  ;;  %v3019_v35 = vmax.f32 %v2943_v32, 0.0 }
 0x3c8   : > { %v7388_v36 = vpop.f32.mrb[37].mxu1 }
 0x3c9   : > { %v7389_v37 = vadd.f32 %v7388_v36, %v7387_v33  ;;  %v7390_v38 = vpop.f32.mrb[38].mxu1  ;;  %v3042_v39 = vpack.c.bf16 %v3019_v35, %v3018_v34 }
 0x3ca   : > { %v7391_v40 = vpop.f32.mrb[39].mxu1 }
 0x3cb   : > { %v2948_v41 = vadd.f32 %v7389_v37, %v10108_v57  ;;  %v7392_v42 = vadd.f32 %v7391_v40, %v7390_v38  ;;  %7617 = vmatprep.mubr.bf16.mxu1 %v3042_v39 }
 0x3cd   : > { %v2951_v43 = vadd.f32 %v7392_v42, %v10108_v57  ;;  %v3020_v45 = vmax.f32 %v2948_v41, 0.0 }
 0x3cf   : > { %v7393_v44 = vpop.f32.mrb[40].mxu1  ;;  %v3021_v46 = vmax.f32 %v2951_v43, 0.0 }
 0x3d0   : > { %v7394_v47 = vpop.f32.mrb[41].mxu1 }
 0x3d1   : > { %v7395_v48 = vadd.f32 %v7394_v47, %v7393_v44  ;;  %v7396_v49 = vpop.f32.mrb[42].mxu1  ;;  %v3043_v51 = vpack.c.bf16 %v3021_v46, %v3020_v45 }
 0x3d2   : > { %v7397_v53 = vpop.f32.mrb[43].mxu1 }
 0x3d3   : > { %v2956_v58 = vadd.f32 %v7395_v48, %v10108_v57  ;;  %v7398_v55 = vadd.f32 %v7397_v53, %v7396_v49  ;;  %7618 = vmatmul.mubr.bf16.gmra.mrb[80].mxu1 %v3043_v51 }
 0x3d5   : > { %v2959_v59 = vadd.f32 %v7398_v55, %v10108_v57  ;;  %v3022_v56 = vmax.f32 %v2956_v58, 0.0 }
 0x3d7   : > { %v7399_v60 = vpop.f32.mrb[44].mxu1  ;;  %v3023_v61 = vmax.f32 %v2959_v59, 0.0  ;;  %v8314_v59 = vld [vmem:[%s12128_s9 + $0x4] ss:$8 sps:$4 sm:$0xff]  }
 0x3d8   : > { %v7400_v62 = vpop.f32.mrb[45].mxu1  ;;  %3735 = vmatprep.subr.bf16.mxu1 %v8314_v59 }
 0x3d9   : > { %v7401_v63 = vadd.f32 %v7400_v62, %v7399_v60  ;;  %v7402_v0 = vpop.f32.mrb[46].mxu1  ;;  %v3044_v1 = vpack.c.bf16 %v3023_v61, %v3022_v56  ;;  %v10160_v60 = vld [vmem:[%s12125_s6] ss:$0 sm:$0xff] }
 0x3da   : > { %v7403_v2 = vpop.f32.mrb[47].mxu1 }
 0x3db   : > { %v2964_v3 = vadd.f32 %v7401_v63, %v10108_v57  ;;  %v7404_v4 = vadd.f32 %v7403_v2, %v7402_v0  ;;  %7621 = vmatprep.mubr.bf16.mxu1 %v3044_v1 }
 0x3dd   : > { %v2967_v5 = vadd.f32 %v7404_v4, %v10108_v57  ;;  %v3024_v7 = vmax.f32 %v2964_v3, 0.0 }
 0x3df   : > { %v7405_v6 = vpop.f32.mrb[48].mxu1  ;;  %v3025_v8 = vmax.f32 %v2967_v5, 0.0 }
 0x3e0   : > { %v7406_v9 = vpop.f32.mrb[49].mxu1 }
 0x3e1   : > { %v7407_v10 = vadd.f32 %v7406_v9, %v7405_v6  ;;  %v7408_v11 = vpop.f32.mrb[50].mxu1  ;;  %v3045_v12 = vpack.c.bf16 %v3025_v8, %v3024_v7  ;;  %v8312_v9 = vld [vmem:[%s12128_s9] ss:$8 sps:$4 sm:$0xff]  }
 0x3e2   : > { %v7409_v13 = vpop.f32.mrb[51].mxu1 }
 0x3e3   : > { %v2972_v14 = vadd.f32 %v7407_v10, %v10108_v57  ;;  %v7410_v15 = vadd.f32 %v7409_v13, %v7408_v11  ;;  %7622 = vmatmul.mubr.bf16.gmra.mrb[84].mxu1 %v3045_v12  ;;  %v8317_v10 = vld [vmem:[%s12128_s9 + $0x14] ss:$8 sps:$4 sm:$0xff]   ;;  %v8315_v11 = vld [vmem:[%s12128_s9 + $0x10] ss:$8 sps:$4 sm:$0xff]   ;;  %v8320_v12 = vld [vmem:[%s12128_s9 + $0x24] ss:$8 sps:$4 sm:$0xff]  }
 0x3e5   : > { %v2975_v16 = vadd.f32 %v7410_v15, %v10108_v57  ;;  %v3026_v18 = vmax.f32 %v2972_v14, 0.0  ;;  %v8318_v14 = vld [vmem:[%s12128_s9 + $0x20] ss:$8 sps:$4 sm:$0xff]  }
 0x3e7   : > { %v7411_v17 = vpop.f32.mrb[52].mxu1  ;;  %v3027_v20 = vmax.f32 %v2975_v16, 0.0 }
 0x3e8   : > { %v7412_v21 = vpop.f32.mrb[53].mxu1 }
 0x3e9   : > { %v7413_v22 = vadd.f32 %v7412_v21, %v7411_v17  ;;  %v7414_v23 = vpop.f32.mrb[54].mxu1  ;;  %v3046_v24 = vpack.c.bf16 %v3027_v20, %v3026_v18  ;;  %v8323_v17 = vld [vmem:[%s12128_s9 + $0x34] ss:$8 sps:$4 sm:$0xff]  }
 0x3ea   : > { %v7415_v25 = vpop.f32.mrb[55].mxu1 }
 0x3eb   : > { %v2980_v26 = vadd.f32 %v7413_v22, %v10108_v57  ;;  %v7416_v27 = vadd.f32 %v7415_v25, %v7414_v23  ;;  %7625 = vmatprep.mubr.bf16.mxu1 %v3046_v24  ;;  %v8321_v24 = vld [vmem:[%s12128_s9 + $0x30] ss:$8 sps:$4 sm:$0xff]  }
 0x3ed   : > { %v2983_v28 = vadd.f32 %v7416_v27, %v10108_v57  ;;  %v3028_v30 = vmax.f32 %v2980_v26, 0.0  ;;  %v8326_v27 = vld [vmem:[%s12128_s9 + $0x44] ss:$8 sps:$4 sm:$0xff]  }
 0x3ef   : > { %v7417_v29 = vpop.f32.mrb[56].mxu1  ;;  %v3029_v31 = vmax.f32 %v2983_v28, 0.0 }
 0x3f0   : > { %v7418_v32 = vpop.f32.mrb[57].mxu1 }
 0x3f1   : > { %v7419_v33 = vadd.f32 %v7418_v32, %v7417_v29  ;;  %v7420_v34 = vpop.f32.mrb[58].mxu1  ;;  %v3047_v35 = vpack.c.bf16 %v3029_v31, %v3028_v30  ;;  %v8324_v32 = vld [vmem:[%s12128_s9 + $0x40] ss:$8 sps:$4 sm:$0xff]  }
 0x3f2   : > { %v7421_v36 = vpop.f32.mrb[59].mxu1 }
 0x3f3   : > { %v2988_v37 = vadd.f32 %v7419_v33, %v10108_v57  ;;  %v7422_v38 = vadd.f32 %v7421_v36, %v7420_v34  ;;  %7626 = vmatmul.mubr.bf16.gmra.mrb[88].mxu1 %v3047_v35  ;;  %v8329_v33 = vld [vmem:[%s12128_s9 + $0x54] ss:$8 sps:$4 sm:$0xff]   ;;  %v8327_v34 = vld [vmem:[%s12128_s9 + $0x50] ss:$8 sps:$4 sm:$0xff]   ;;  %v8332_v35 = vld [vmem:[%s12128_s9 + $0x64] ss:$8 sps:$4 sm:$0xff]  }
 0x3f5   : > { %v2991_v39 = vadd.f32 %v7422_v38, %v10108_v57  ;;  %v3030_v41 = vmax.f32 %v2988_v37, 0.0  ;;  %v8330_v37 = vld [vmem:[%s12128_s9 + $0x60] ss:$8 sps:$4 sm:$0xff]  }
 0x3f7   : > { %v7423_v40 = vpop.f32.mrb[60].mxu1  ;;  %v3031_v42 = vmax.f32 %v2991_v39, 0.0 }
 0x3f8   : > { %v7424_v43 = vpop.f32.mrb[61].mxu1 }
 0x3f9   : > { %v7425_v44 = vadd.f32 %v7424_v43, %v7423_v40  ;;  %v7426_v45 = vpop.f32.mrb[62].mxu1  ;;  %v3048_v46 = vpack.c.bf16 %v3031_v42, %v3030_v41 }
 0x3fa   : > { %v7427_v47 = vpop.f32.mrb[63].mxu1 }
 0x3fb   : > { %v2996_v48 = vadd.f32 %v7425_v44, %v10108_v57  ;;  %v7428_v49 = vadd.f32 %v7427_v47, %v7426_v45  ;;  %7629 = vmatprep.mubr.bf16.mxu1 %v3048_v46 }
 0x3fd   : > { %v2999_v51 = vadd.f32 %v7428_v49, %v10108_v57  ;;  %v3032_v53 = vmax.f32 %v2996_v48, 0.0 }
 0x3ff   : > { %v3033_v58 = vmax.f32 %v2999_v51, 0.0 }
 0x401   : > { %v3049_v55 = vpack.c.bf16 %v3033_v58, %v3032_v53 }
 0x403   : > { %7630 = vmatmul.mubr.bf16.gmra.mrb[92].mxu1 %v3049_v55 }
 0x466   : > { %v7603_v56 = vpop.f32.mrb[64].mxu1 }
 0x467   : > { %v3164_v61 = vadd.f32 %v7603_v56, %v10160_v60  ;;  %v3155_v62 = vpop.f32.mrb[65].mxu1 }
 0x468   : > { %v3156_v57 = vadd.f32 %v10160_v60, %v3155_v62  ;;  %v7604_v63 = vpop.f32.mrb[66].mxu1 }
 0x469   : > { %v3167_v0 = vadd.f32 %v7604_v63, %v10160_v60  ;;  %v3158_v1 = vpop.f32.mrb[67].mxu1  ;;  %v3284_v3 = vmax.f32 %v3164_v61, 0.0 }
 0x46a   : > { %v3159_v2 = vadd.f32 %v10160_v60, %v3158_v1  ;;  %v3282_v5 = vmax.f32 %v3156_v57, 0.0 }
 0x46b   : > { %v3285_v4 = vmax.f32 %v3167_v0, 0.0 }
 0x46c   : > { %v3283_v6 = vmax.f32 %v3159_v2, 0.0 }
 0x46d   : > { %v3315_v7 = vpack.c.bf16 %v3285_v4, %v3284_v3 }
 0x46e   : > { %v3314_v8 = vpack.c.bf16 %v3283_v6, %v3282_v5 }
 0x470   : > { %7641 = vmatprep.mubr.msk.bf16.mxu1 %vm3369_vm0, %v3314_v8 }
 0x471   : > { %7642 = vmatmul.mubr.msk.bf16.vlgmr.msra.gmra.mrb[96].mxu1 %vm3369_vm0, %v3315_v7 }
 0x472   : > { %3736 = vmatpush1.bf16.msra.mxu1 %v8312_v9 }
 0x473   : > { %3737 = vmatprep.subr.bf16.mxu1 %v8317_v10 }
 0x476   : > { %v7607_v13 = vpop.f32.mrb[68].mxu1  ;;  %3738 = vmatpush1.bf16.msra.mxu1 %v8315_v11 }
 0x477   : > { %v3180_v15 = vadd.f32 %v7607_v13, %v10160_v60  ;;  %v3171_v16 = vpop.f32.mrb[69].mxu1  ;;  %3739 = vmatprep.subr.bf16.mxu1 %v8320_v12 }
 0x478   : > { %v3172_v18 = vadd.f32 %v10160_v60, %v3171_v16  ;;  %v7608_v20 = vpop.f32.mrb[70].mxu1 }
 0x479   : > { %v3183_v21 = vadd.f32 %v7608_v20, %v10160_v60  ;;  %v3174_v22 = vpop.f32.mrb[71].mxu1  ;;  %v3288_v25 = vmax.f32 %v3180_v15, 0.0 }
 0x47a   : > { %v3175_v23 = vadd.f32 %v10160_v60, %v3174_v22  ;;  %3740 = vmatpush1.bf16.msra.mxu1 %v8318_v14  ;;  %v3286_v28 = vmax.f32 %v3172_v18, 0.0 }
 0x47b   : > { %v3289_v26 = vmax.f32 %v3183_v21, 0.0  ;;  %3741 = vmatprep.subr.bf16.mxu1 %v8323_v17 }
 0x47c   : > { %v3287_v29 = vmax.f32 %v3175_v23, 0.0 }
 0x47d   : > { %v3317_v30 = vpack.c.bf16 %v3289_v26, %v3288_v25 }
 0x47e   : > { %v3316_v31 = vpack.c.bf16 %v3287_v29, %v3286_v28  ;;  %3742 = vmatpush1.bf16.msra.mxu1 %v8321_v24 }
 0x47f   : > { %3743 = vmatprep.subr.bf16.mxu1 %v8326_v27 }
 0x480   : > { %7645 = vmatprep.mubr.msk.bf16.mxu1 %vm3369_vm0, %v3316_v31 }
 0x481   : > { %7646 = vmatmul.mubr.msk.bf16.gmra.mrb[100].mxu1 %vm3369_vm0, %v3317_v30 }
 0x482   : > { %3744 = vmatpush1.bf16.msra.mxu1 %v8324_v32 }
 0x483   : > { %3745 = vmatprep.subr.bf16.mxu1 %v8329_v33 }
 0x486   : > { %v7611_v36 = vpop.f32.mrb[72].mxu1  ;;  %3746 = vmatpush1.bf16.msra.mxu1 %v8327_v34 }
 0x487   : > { %v3196_v38 = vadd.f32 %v7611_v36, %v10160_v60  ;;  %v3187_v39 = vpop.f32.mrb[73].mxu1  ;;  %3747 = vmatprep.subr.bf16.mxu1 %v8332_v35 }
 0x488   : > { %v3188_v40 = vadd.f32 %v10160_v60, %v3187_v39  ;;  %v7612_v41 = vpop.f32.mrb[74].mxu1  ;;  %v8335_v39 = vld [vmem:[%s12128_s9 + $0x74] ss:$8 sps:$4 sm:$0xff]  }
 0x489   : > { %v3199_v42 = vadd.f32 %v7612_v41, %v10160_v60  ;;  %v3190_v43 = vpop.f32.mrb[75].mxu1  ;;  %v3292_v45 = vmax.f32 %v3196_v38, 0.0 }
 0x48a   : > { %v3191_v44 = vadd.f32 %v10160_v60, %v3190_v43  ;;  %3748 = vmatpush1.bf16.msra.mxu1 %v8330_v37  ;;  %v3290_v47 = vmax.f32 %v3188_v40, 0.0 }
 0x48b   : > { %v3293_v46 = vmax.f32 %v3199_v42, 0.0  ;;  %v8333_v42 = vld [vmem:[%s12128_s9 + $0x70] ss:$8 sps:$4 sm:$0xff]   ;;  %3749 = vmatprep.subr.bf16.mxu1 %v8335_v39 }
 0x48c   : > { %v3291_v48 = vmax.f32 %v3191_v44, 0.0 }
 0x48d   : > { %v3319_v49 = vpack.c.bf16 %v3293_v46, %v3292_v45 }
 0x48e   : > { %v3318_v51 = vpack.c.bf16 %v3291_v48, %v3290_v47  ;;  %3750 = vmatpush1.bf16.msra.mxu1 %v8333_v42  ;;  %v8383_v42 = vld [vmem:[%s12130_s11 + $0xf4] ss:$28 sps:$4 sm:$0xff]  }
 0x490   : > { %7649 = vmatprep.mubr.msk.bf16.mxu1 %vm3369_vm0, %v3318_v51 }
 0x491   : > { %7650 = vmatmul.mubr.msk.bf16.gmra.mrb[104].mxu1 %vm3369_vm0, %v3319_v49 }
 0x496   : > { %v7615_v53 = vpop.f32.mrb[76].mxu1 }
 0x497   : > { %v3212_v58 = vadd.f32 %v7615_v53, %v10160_v60  ;;  %v3203_v55 = vpop.f32.mrb[77].mxu1 }
 0x498   : > { %v3204_v59 = vadd.f32 %v10160_v60, %v3203_v55  ;;  %v7616_v56 = vpop.f32.mrb[78].mxu1 }
 0x499   : > { %v3215_v61 = vadd.f32 %v7616_v56, %v10160_v60  ;;  %v3206_v62 = vpop.f32.mrb[79].mxu1  ;;  %v3296_v63 = vmax.f32 %v3212_v58, 0.0 }
 0x49a   : > { %v3207_v57 = vadd.f32 %v10160_v60, %v3206_v62  ;;  %v3294_v1 = vmax.f32 %v3204_v59, 0.0 }
 0x49b   : > { %v3297_v0 = vmax.f32 %v3215_v61, 0.0 }
 0x49c   : > { %v3295_v2 = vmax.f32 %v3207_v57, 0.0 }
 0x49d   : > { %v3321_v3 = vpack.c.bf16 %v3297_v0, %v3296_v63 }
 0x49e   : > { %v3320_v4 = vpack.c.bf16 %v3295_v2, %v3294_v1 }
 0x4a0   : > { %7653 = vmatprep.mubr.msk.bf16.mxu1 %vm3369_vm0, %v3320_v4  ;;  %v8338_v4 = vld [vmem:[%s12130_s11 + $0x4] ss:$28 sps:$4 sm:$0xff]  }
 0x4a1   : > { %7654 = vmatmul.mubr.msk.bf16.gmra.mrb[108].mxu1 %vm3369_vm0, %v3321_v3  ;;  %4765 = vmatprep.subr.bf16.mxu1 %v8338_v4 }
 0x4a6   : > { %v7619_v5 = vpop.f32.mrb[80].mxu1 }
 0x4a7   : > { %v3228_v6 = vadd.f32 %v7619_v5, %v10160_v60  ;;  %v3219_v7 = vpop.f32.mrb[81].mxu1 }
 0x4a8   : > { %v3220_v8 = vadd.f32 %v10160_v60, %v3219_v7  ;;  %v7620_v9 = vpop.f32.mrb[82].mxu1 }
 0x4a9   : > { %v3231_v10 = vadd.f32 %v7620_v9, %v10160_v60  ;;  %v3222_v11 = vpop.f32.mrb[83].mxu1  ;;  %v3300_v13 = vmax.f32 %v3228_v6, 0.0 }
 0x4aa   : > { %v3223_v12 = vadd.f32 %v10160_v60, %v3222_v11  ;;  %v3298_v15 = vmax.f32 %v3220_v8, 0.0 }
 0x4ab   : > { %v3301_v14 = vmax.f32 %v3231_v10, 0.0 }
 0x4ac   : > { %v3299_v16 = vmax.f32 %v3223_v12, 0.0 }
 0x4ad   : > { %v3323_v17 = vpack.c.bf16 %v3301_v14, %v3300_v13 }
 0x4ae   : > { %v3322_v18 = vpack.c.bf16 %v3299_v16, %v3298_v15 }
 0x4b0   : > { %7657 = vmatprep.mubr.msk.bf16.mxu1 %vm3369_vm0, %v3322_v18  ;;  %v8336_v18 = vld [vmem:[%s12130_s11] ss:$28 sps:$4 sm:$0xff]  }
 0x4b1   : > { %7658 = vmatmul.mubr.msk.bf16.gmra.mrb[112].mxu1 %vm3369_vm0, %v3323_v17 }
 0x4b6   : > { %v7623_v20 = vpop.f32.mrb[84].mxu1 }
 0x4b7   : > { %v3244_v21 = vadd.f32 %v7623_v20, %v10160_v60  ;;  %v3235_v22 = vpop.f32.mrb[85].mxu1  ;;  %v8363_v20 = vld [vmem:[%s12130_s11 + $0x10] ss:$28 sps:$4 sm:$0xff]  }
 0x4b8   : > { %v3236_v23 = vadd.f32 %v10160_v60, %v3235_v22  ;;  %v7624_v24 = vpop.f32.mrb[86].mxu1 }
 0x4b9   : > { %v3247_v25 = vadd.f32 %v7624_v24, %v10160_v60  ;;  %v3238_v26 = vpop.f32.mrb[87].mxu1  ;;  %v3304_v28 = vmax.f32 %v3244_v21, 0.0  ;;  %v8365_v21 = vld [vmem:[%s12130_s11 + $0x14] ss:$28 sps:$4 sm:$0xff]   ;;  %v8368_v24 = vld [vmem:[%s12130_s11 + $0x4c] ss:$28 sps:$4 sm:$0xff]  }
 0x4ba   : > { %v3239_v27 = vadd.f32 %v10160_v60, %v3238_v26  ;;  %v3302_v30 = vmax.f32 %v3236_v23, 0.0  ;;  %v8341_v23 = vld [vmem:[%s12130_s11 + $0x3c] ss:$28 sps:$4 sm:$0xff]   ;;  %5151 = vmatprep.subr.bf16.mxu0 %v8365_v21 }
 0x4bb   : > { %v3305_v29 = vmax.f32 %v3247_v25, 0.0  ;;  %5152 = vmatpush1.bf16.msra.mxu0 %v8363_v20  ;;  %v8366_v25 = vld [vmem:[%s12130_s11 + $0x48] ss:$28 sps:$4 sm:$0xff]   ;;  %v8339_v26 = vld [vmem:[%s12130_s11 + $0x38] ss:$28 sps:$4 sm:$0xff]  }
 0x4bc   : > { %v3303_v31 = vmax.f32 %v3239_v27, 0.0  ;;  %v8374_v27 = vld [vmem:[%s12130_s11 + $0x84] ss:$28 sps:$4 sm:$0xff]   ;;  %5153 = vmatprep.subr.bf16.mxu0 %v8368_v24  ;;  %v8399_v20 = vld [vmem:[%s12130_s11 + $0x1d0] ss:$28 sps:$4 sm:$0xff]  }
 0x4bd   : > { %v3325_v32 = vpack.c.bf16 %v3305_v29, %v3304_v28  ;;  %v8344_v28 = vld [vmem:[%s12130_s11 + $0x74] ss:$28 sps:$4 sm:$0xff]   ;;  %v8372_v29 = vld [vmem:[%s12130_s11 + $0x80] ss:$28 sps:$4 sm:$0xff]  }
 0x4be   : > { %v3324_v33 = vpack.c.bf16 %v3303_v31, %v3302_v30  ;;  %v8342_v30 = vld [vmem:[%s12130_s11 + $0x70] ss:$28 sps:$4 sm:$0xff]   ;;  %v8371_v24 = vld [vmem:[%s12130_s11 + $0x1fc] ss:$28 sps:$4 sm:$0xff]  }
 0x4bf   : > { %5154 = vmatpush1.bf16.msra.mxu0 %v8366_v25  ;;  %v8404_v25 = vld [vmem:[%s12130_s11 + $0x20c] ss:$28 sps:$4 sm:$0xff]  }
 0x4c0   : > { %7661 = vmatprep.mubr.msk.bf16.mxu1 %vm3369_vm0, %v3324_v33  ;;  %5155 = vmatprep.subr.bf16.mxu0 %v8374_v27  ;;  %v8377_v33 = vld [vmem:[%s12130_s11 + $0xbc] ss:$28 sps:$4 sm:$0xff]  }
 0x4c1   : > { %7662 = vmatmul.mubr.msk.bf16.gmra.mrb[116].mxu1 %vm3369_vm0, %v3325_v32  ;;  %v8347_v32 = vld [vmem:[%s12130_s11 + $0xac] ss:$28 sps:$4 sm:$0xff]   ;;  %v8369_v27 = vld [vmem:[%s12130_s11 + $0x1f8] ss:$28 sps:$4 sm:$0xff]  }
 0x4c3   : > { %5156 = vmatpush1.bf16.msra.mxu0 %v8372_v29  ;;  %v8380_v29 = vld [vmem:[%s12130_s11 + $0x234] ss:$28 sps:$4 sm:$0xff]  }
 0x4c4   : > { %5157 = vmatprep.subr.bf16.mxu0 %v8377_v33  ;;  %v8389_v33 = vld [vmem:[%s12130_s11 + $0x26c] ss:$28 sps:$4 sm:$0xff]  }
 0x4c6   : > { %v7627_v34 = vpop.f32.mrb[88].mxu1 }
 0x4c7   : > { %v3260_v35 = vadd.f32 %v7627_v34, %v10160_v60  ;;  %v3251_v36 = vpop.f32.mrb[89].mxu1 }
 0x4c8   : > { %v3252_v37 = vadd.f32 %v10160_v60, %v3251_v36  ;;  %v7628_v38 = vpop.f32.mrb[90].mxu1 }
 0x4c9   : > { %v3263_v40 = vadd.f32 %v7628_v38, %v10160_v60  ;;  %v3254_v41 = vpop.f32.mrb[91].mxu1  ;;  %v3308_v44 = vmax.f32 %v3260_v35, 0.0  ;;  %v8375_v38 = vld [vmem:[%s12130_s11 + $0xb8] ss:$28 sps:$4 sm:$0xff]  }
 0x4ca   : > { %v3255_v43 = vadd.f32 %v10160_v60, %v3254_v41  ;;  %v3306_v46 = vmax.f32 %v3252_v37, 0.0  ;;  %v8345_v41 = vld [vmem:[%s12130_s11 + $0xa8] ss:$28 sps:$4 sm:$0xff]   ;;  %5158 = vmatpush1.bf16.msra.mxu0 %v8375_v38 }
 0x4cb   : > { %v3309_v45 = vmax.f32 %v3263_v40, 0.0  ;;  %5159 = vmatprep.subr.bf16.mxu0 %v8383_v42  ;;  %v8387_v42 = vld [vmem:[%s12130_s11 + $0x268] ss:$28 sps:$4 sm:$0xff]  }
 0x4cc   : > { %v3307_v47 = vmax.f32 %v3255_v43, 0.0 }
 0x4cd   : > { %v3327_v48 = vpack.c.bf16 %v3309_v45, %v3308_v44  ;;  %v8350_v44 = vld [vmem:[%s12130_s11 + $0xe4] ss:$28 sps:$4 sm:$0xff]  }
 0x4ce   : > { %v3326_v49 = vpack.c.bf16 %v3307_v47, %v3306_v46 }
 0x4d0   : > { %7665 = vmatprep.mubr.msk.bf16.mxu1 %vm3369_vm0, %v3326_v49  ;;  %v8381_v49 = vld [vmem:[%s12130_s11 + $0xf0] ss:$28 sps:$4 sm:$0xff]  }
 0x4d1   : > { %7666 = vmatmul.mubr.msk.bf16.gmra.mrb[120].mxu1 %vm3369_vm0, %v3327_v48  ;;  %5160 = vmatpush1.bf16.msra.mxu0 %v8381_v49 }
 0x4d6   : > { %v7631_v51 = vpop.f32.mrb[92].mxu1 }
 0x4d7   : > { %v3276_v53 = vadd.f32 %v7631_v51, %v10160_v60  ;;  %v3267_v58 = vpop.f32.mrb[93].mxu1 }
 0x4d8   : > { %v3268_v55 = vadd.f32 %v10160_v60, %v3267_v58  ;;  %v7632_v59 = vpop.f32.mrb[94].mxu1 }
 0x4d9   : > { %v3279_v56 = vadd.f32 %v7632_v59, %v10160_v60  ;;  %v3270_v61 = vpop.f32.mrb[95].mxu1  ;;  %v3312_v57 = vmax.f32 %v3276_v53, 0.0  ;;  %v8348_v53 = vld [vmem:[%s12130_s11 + $0xe0] ss:$28 sps:$4 sm:$0xff]   ;;  %v8386_v59 = vld [vmem:[%s12130_s11 + $0x12c] ss:$28 sps:$4 sm:$0xff]  }
 0x4da   : > { %v3271_v62 = vadd.f32 %v10160_v60, %v3270_v61  ;;  %v3310_v0 = vmax.f32 %v3268_v55, 0.0  ;;  %v10262_v60 = vld [vmem:[%s12127_s8] ss:$0 sm:$0xff]  ;;  %v8353_v55 = vld [vmem:[%s12130_s11 + $0x11c] ss:$28 sps:$4 sm:$0xff]   ;;  %5161 = vmatprep.subr.bf16.mxu0 %v8386_v59 }
 0x4db   : > { %v3313_v63 = vmax.f32 %v3279_v56, 0.0  ;;  %v8384_v56 = vld [vmem:[%s12130_s11 + $0x128] ss:$28 sps:$4 sm:$0xff]   ;;  %v8351_v61 = vld [vmem:[%s12130_s11 + $0x118] ss:$28 sps:$4 sm:$0xff]  }
 0x4dc   : > { %v3311_v1 = vmax.f32 %v3271_v62, 0.0  ;;  %v8392_v62 = vld [vmem:[%s12130_s11 + $0x164] ss:$28 sps:$4 sm:$0xff]   ;;  %5162 = vmatpush1.bf16.msra.mxu0 %v8384_v56  ;;  %v8407_v59 = vld [vmem:[%s12130_s11 + $0x2dc] ss:$28 sps:$4 sm:$0xff]  }
 0x4dd   : > { %v3329_v2 = vpack.c.bf16 %v3313_v63, %v3312_v57  ;;  %v8356_v57 = vld [vmem:[%s12130_s11 + $0x154] ss:$28 sps:$4 sm:$0xff]   ;;  %v8390_v63 = vld [vmem:[%s12130_s11 + $0x160] ss:$28 sps:$4 sm:$0xff]   ;;  %5163 = vmatprep.subr.bf16.mxu0 %v8392_v62  ;;  %v8422_v56 = vld [vmem:[%s12130_s11 + $0x2ec] ss:$28 sps:$4 sm:$0xff]  }
 0x4de   : > { %v3328_v3 = vpack.c.bf16 %v3311_v1, %v3310_v0  ;;  %v8354_v0 = vld [vmem:[%s12130_s11 + $0x150] ss:$28 sps:$4 sm:$0xff]   ;;  %v8405_v62 = vld [vmem:[%s12130_s11 + $0x2d8] ss:$28 sps:$4 sm:$0xff]  }
 0x4e0   : > { %7669 = vmatprep.mubr.msk.bf16.mxu1 %vm3369_vm0, %v3328_v3  ;;  %v8395_v3 = vld [vmem:[%s12130_s11 + $0x19c] ss:$28 sps:$4 sm:$0xff]   ;;  %5164 = vmatpush1.bf16.msra.mxu0 %v8390_v63  ;;  %v8414_v63 = vld [vmem:[%s12130_s11 + $0x310] ss:$28 sps:$4 sm:$0xff]  }
 0x4e1   : > { %7670 = vmatmul.mubr.msk.bf16.gmra.mrb[124].mxu1 %vm3369_vm0, %v3329_v2  ;;  %v8359_v2 = vld [vmem:[%s12130_s11 + $0x18c] ss:$28 sps:$4 sm:$0xff]   ;;  %5165 = vmatprep.subr.bf16.mxu0 %v8395_v3 }
 0x4e2   : > { %3767 = vmatprep.mubr.bf16.mxu1 %v9401_v19 }
 0x544   : > { %v7643_v5 = vpop.f32.mrb[96].mxu1 }
 0x545   : > { %v3461_v6 = vadd.f32 %v7643_v5, %v10262_v60  ;;  %v3452_v7 = vpop.f32.mrb[97].mxu1 }
 0x546   : > { %v3453_v8 = vadd.f32 %v10262_v60, %v3452_v7  ;;  %v7644_v9 = vpop.f32.mrb[98].mxu1 }
 0x547   : > { %v3464_v10 = vadd.f32 %v7644_v9, %v10262_v60  ;;  %v3455_v11 = vpop.f32.mrb[99].mxu1  ;;  %v3581_v13 = vmax.f32 %v3461_v6, 0.0 }
 0x548   : > { %v3456_v12 = vadd.f32 %v10262_v60, %v3455_v11  ;;  %v3579_v15 = vmax.f32 %v3453_v8, 0.0  ;;  %v8393_v8 = vld [vmem:[%s12130_s11 + $0x198] ss:$28 sps:$4 sm:$0xff]   ;;  %v8357_v11 = vld [vmem:[%s12130_s11 + $0x188] ss:$28 sps:$4 sm:$0xff]  }
 0x549   : > { %v3582_v14 = vmax.f32 %v3464_v10, 0.0  ;;  %5166 = vmatpush1.bf16.msra.mxu0 %v8393_v8 }
 0x54a   : > { %v3580_v16 = vmax.f32 %v3456_v12, 0.0  ;;  %v8401_v12 = vld [vmem:[%s12130_s11 + $0x1d4] ss:$28 sps:$4 sm:$0xff]  }
 0x54b   : > { %v3612_v17 = vpack.c.bf16 %v3582_v14, %v3581_v13  ;;  %v8362_v14 = vld [vmem:[%s12130_s11 + $0x1c4] ss:$28 sps:$4 sm:$0xff]   ;;  %5167 = vmatprep.subr.bf16.mxu0 %v8401_v12 }
 0x54c   : > { %v3611_v22 = vpack.c.bf16 %v3580_v16, %v3579_v15 }
 0x54d   : > { %5168 = vmatpush1.bf16.msra.mxu0 %v8399_v20 }
 0x54e   : > { %3768 = vmatmul.mubr.bf16.vlgmr.msra.gmra.mrb[128].mxu1 %v3611_v22  ;;  %v8360_v22 = vld [vmem:[%s12130_s11 + $0x1c0] ss:$28 sps:$4 sm:$0xff]   ;;  %5169 = vmatprep.subr.bf16.mxu0 %v8404_v25 }
 0x54f   : > { %3777 = vmatprep.mubr.bf16.mxu1 %v9401_v19  ;;  %4766 = vmatpush1.bf16.msra.mxu1 %v8336_v18 }
 0x550   : > { %4767 = vmatprep.subr.bf16.mxu1 %v8341_v23 }
 0x553   : > { %4768 = vmatpush1.bf16.msra.mxu1 %v8339_v26  ;;  %v8402_v26 = vld [vmem:[%s12130_s11 + $0x208] ss:$28 sps:$4 sm:$0xff]  }
 0x554   : > { %v7647_v31 = vpop.f32.mrb[100].mxu1  ;;  %4769 = vmatprep.subr.bf16.mxu1 %v8344_v28  ;;  %v8410_v28 = vld [vmem:[%s12130_s11 + $0x244] ss:$28 sps:$4 sm:$0xff]   ;;  %5170 = vmatpush1.bf16.msra.mxu0 %v8402_v26 }
 0x555   : > { %v3477_v34 = vadd.f32 %v7647_v31, %v10262_v60  ;;  %v3468_v35 = vpop.f32.mrb[101].mxu1  ;;  %v8378_v31 = vld [vmem:[%s12130_s11 + $0x230] ss:$28 sps:$4 sm:$0xff]   ;;  %5171 = vmatprep.subr.bf16.mxu0 %v8410_v28 }
 0x556   : > { %v3469_v36 = vadd.f32 %v10262_v60, %v3468_v35  ;;  %v7648_v37 = vpop.f32.mrb[102].mxu1  ;;  %3778 = vmatmul.mubr.bf16.gmra.mrb[132].mxu1 %v3612_v17 }
 0x557   : > { %v3480_v39 = vadd.f32 %v7648_v37, %v10262_v60  ;;  %v3471_v40 = vpop.f32.mrb[103].mxu1  ;;  %3787 = vmatprep.mubr.bf16.mxu1 %v9401_v19  ;;  %4770 = vmatpush1.bf16.msra.mxu1 %v8342_v30  ;;  %v3585_v45 = vmax.f32 %v3477_v34, 0.0  ;;  %v8408_v30 = vld [vmem:[%s12130_s11 + $0x240] ss:$28 sps:$4 sm:$0xff]  }
 0x558   : > { %v3472_v43 = vadd.f32 %v10262_v60, %v3471_v40  ;;  %4771 = vmatprep.subr.bf16.mxu1 %v8347_v32  ;;  %v3583_v47 = vmax.f32 %v3469_v36, 0.0  ;;  %v8413_v34 = vld [vmem:[%s12130_s11 + $0x27c] ss:$28 sps:$4 sm:$0xff]   ;;  %5172 = vmatpush1.bf16.msra.mxu0 %v8408_v30 }
 0x559   : > { %v3586_v46 = vmax.f32 %v3480_v39, 0.0  ;;  %v8411_v39 = vld [vmem:[%s12130_s11 + $0x278] ss:$28 sps:$4 sm:$0xff]   ;;  %5173 = vmatprep.subr.bf16.mxu0 %v8413_v34  ;;  %v8426_v30 = vld [vmem:[%s12130_s11 + $0x320] ss:$28 sps:$4 sm:$0xff]  }
 0x55a   : > { %v3584_v48 = vmax.f32 %v3472_v43, 0.0  ;;  %v8419_v43 = vld [vmem:[%s12130_s11 + $0x2b4] ss:$28 sps:$4 sm:$0xff]  }
 0x55b   : > { %v3614_v51 = vpack.c.bf16 %v3586_v46, %v3585_v45  ;;  %4772 = vmatpush1.bf16.msra.mxu1 %v8345_v41  ;;  %v8398_v45 = vld [vmem:[%s12130_s11 + $0x2a4] ss:$28 sps:$4 sm:$0xff]  }
 0x55c   : > { %v3613_v58 = vpack.c.bf16 %v3584_v48, %v3583_v47  ;;  %4773 = vmatprep.subr.bf16.mxu1 %v8350_v44  ;;  %5174 = vmatpush1.bf16.msra.mxu0 %v8411_v39 }
 0x55d   : > { %5175 = vmatprep.subr.bf16.mxu0 %v8419_v43 }
 0x55e   : > { %3788 = vmatmul.mubr.bf16.gmra.mrb[136].mxu1 %v3613_v58  ;;  %v8396_v58 = vld [vmem:[%s12130_s11 + $0x2a0] ss:$28 sps:$4 sm:$0xff]  }
 0x55f   : > { %3797 = vmatprep.mubr.bf16.mxu1 %v9401_v19  ;;  %4774 = vmatpush1.bf16.msra.mxu1 %v8348_v53 }
 0x560   : > { %4775 = vmatprep.subr.bf16.mxu1 %v8353_v55 }
 0x563   : > { %4776 = vmatpush1.bf16.msra.mxu1 %v8351_v61  ;;  %v8420_v61 = vld [vmem:[%s12130_s11 + $0x2e8] ss:$28 sps:$4 sm:$0xff]  }
 0x564   : > { %v7651_v1 = vpop.f32.mrb[104].mxu1  ;;  %4777 = vmatprep.subr.bf16.mxu1 %v8356_v57  ;;  %v8416_v57 = vld [vmem:[%s12130_s11 + $0x314] ss:$28 sps:$4 sm:$0xff]  }
 0x565   : > { %v3493_v4 = vadd.f32 %v7651_v1, %v10262_v60  ;;  %v3484_v5 = vpop.f32.mrb[105].mxu1 }
 0x566   : > { %v3485_v6 = vadd.f32 %v10262_v60, %v3484_v5  ;;  %v7652_v7 = vpop.f32.mrb[106].mxu1  ;;  %3798 = vmatmul.mubr.bf16.gmra.mrb[140].mxu1 %v3614_v51  ;;  %v8417_v51 = vld [vmem:[%s12130_s11 + $0x2b0] ss:$28 sps:$4 sm:$0xff]  }
 0x567   : > { %v3496_v9 = vadd.f32 %v7652_v7, %v10262_v60  ;;  %v3487_v10 = vpop.f32.mrb[107].mxu1  ;;  %3807 = vmatprep.mubr.bf16.mxu1 %v9401_v19  ;;  %4778 = vmatpush1.bf16.msra.mxu1 %v8354_v0  ;;  %v3589_v15 = vmax.f32 %v3493_v4, 0.0 }
 0x568   : > { %v3488_v13 = vadd.f32 %v10262_v60, %v3487_v10  ;;  %4779 = vmatprep.subr.bf16.mxu1 %v8359_v2  ;;  %v3587_v17 = vmax.f32 %v3485_v6, 0.0  ;;  %5176 = vmatpush1.bf16.msra.mxu0 %v8417_v51 }
 0x569   : > { %v3590_v16 = vmax.f32 %v3496_v9, 0.0  ;;  %5177 = vmatprep.subr.bf16.mxu0 %v8422_v56 }
 0x56a   : > { %v3588_v18 = vmax.f32 %v3488_v13, 0.0 }
 0x56b   : > { %v3616_v21 = vpack.c.bf16 %v3590_v16, %v3589_v15  ;;  %4780 = vmatpush1.bf16.msra.mxu1 %v8357_v11 }
 0x56c   : > { %v3615_v23 = vpack.c.bf16 %v3588_v18, %v3587_v17  ;;  %4781 = vmatprep.subr.bf16.mxu1 %v8362_v14  ;;  %5178 = vmatpush1.bf16.msra.mxu0 %v8420_v61 }
 0x56e   : > { %3808 = vmatmul.mubr.bf16.gmra.mrb[144].mxu1 %v3615_v23 }
 0x56f   : > { %3817 = vmatprep.mubr.bf16.mxu1 %v9401_v19  ;;  %4782 = vmatpush1.bf16.msra.mxu1 %v8360_v22 }
 0x570   : > { %4783 = vmatprep.subr.bf16.mxu1 %v8371_v24 }
 0x573   : > { %4784 = vmatpush1.bf16.msra.mxu1 %v8369_v27 }
 0x574   : > { %v7655_v32 = vpop.f32.mrb[108].mxu1  ;;  %4785 = vmatprep.subr.bf16.mxu1 %v8380_v29  ;;  %v8428_v29 = vld [vmem:[%s12130_s11 + $0x324] ss:$28 sps:$4 sm:$0xff]  }
 0x575   : > { %v3509_v35 = vadd.f32 %v7655_v32, %v10262_v60  ;;  %v3500_v36 = vpop.f32.mrb[109].mxu1  ;;  %5179 = vmatprep.subr.bf16.mxu0 %v8428_v29 }
 0x576   : > { %v3501_v37 = vadd.f32 %v10262_v60, %v3500_v36  ;;  %v7656_v38 = vpop.f32.mrb[110].mxu1  ;;  %3818 = vmatmul.mubr.bf16.gmra.mrb[148].mxu1 %v3616_v21  ;;  %5180 = vmatpush1.bf16.msra.mxu0 %v8426_v30  ;;  %v8425_v36 = vld [vmem:[%s12130_s11 + $0x34c] ss:$28 sps:$4 sm:$0xff]  }
 0x577   : > { %v3512_v40 = vadd.f32 %v7656_v38, %v10262_v60  ;;  %v3503_v41 = vpop.f32.mrb[111].mxu1  ;;  %3827 = vmatprep.mubr.bf16.mxu1 %v9401_v19  ;;  %4786 = vmatpush1.bf16.msra.mxu1 %v8378_v31  ;;  %v3593_v46 = vmax.f32 %v3509_v35, 0.0 }
 0x578   : > { %v3504_v44 = vadd.f32 %v10262_v60, %v3503_v41  ;;  %4787 = vmatprep.subr.bf16.mxu1 %v8389_v33  ;;  %v3591_v48 = vmax.f32 %v3501_v37, 0.0  ;;  %v8431_v37 = vld [vmem:[%s12130_s11 + $0x35c] ss:$28 sps:$4 sm:$0xff]  }
 0x579   : > { %v3594_v47 = vmax.f32 %v3512_v40, 0.0  ;;  %v8423_v40 = vld [vmem:[%s12130_s11 + $0x348] ss:$28 sps:$4 sm:$0xff]   ;;  %v8429_v41 = vld [vmem:[%s12130_s11 + $0x358] ss:$28 sps:$4 sm:$0xff]   ;;  %5181 = vmatprep.subr.bf16.mxu0 %v8431_v37 }
 0x57a   : > { %v3592_v49 = vmax.f32 %v3504_v44, 0.0  ;;  %5182 = vmatpush1.bf16.msra.mxu0 %v8429_v41  ;;  %v8440_v37 = vld [vmem:[%s12130_s11 + $0x7c] ss:$28 sps:$4 sm:$0xff]  }
 0x57b   : > { %v3618_v53 = vpack.c.bf16 %v3594_v47, %v3593_v46  ;;  %4788 = vmatpush1.bf16.msra.mxu1 %v8387_v42 }
 0x57c   : > { %v3617_v55 = vpack.c.bf16 %v3592_v49, %v3591_v48  ;;  %4789 = vmatprep.subr.bf16.mxu1 %v8398_v45  ;;  %v8434_v49 = vld [vmem:[%s12130_s11 + $0xc] ss:$28 sps:$4 sm:$0xff]  }
 0x57e   : > { %3828 = vmatmul.mubr.bf16.gmra.mrb[152].mxu1 %v3617_v55 }
 0x57f   : > { %3837 = vmatprep.mubr.bf16.mxu1 %v9401_v19  ;;  %4790 = vmatpush1.bf16.msra.mxu1 %v8396_v58 }
 0x580   : > { %4791 = vmatprep.subr.bf16.mxu1 %v8407_v59 }
 0x583   : > { %4792 = vmatpush1.bf16.msra.mxu1 %v8405_v62 }
 0x584   : > { %v7659_v0 = vpop.f32.mrb[112].mxu1  ;;  %4793 = vmatprep.subr.bf16.mxu1 %v8416_v57 }
 0x585   : > { %v3525_v1 = vadd.f32 %v7659_v0, %v10262_v60  ;;  %v3516_v2 = vpop.f32.mrb[113].mxu1 }
 0x586   : > { %v3517_v3 = vadd.f32 %v10262_v60, %v3516_v2  ;;  %v7660_v4 = vpop.f32.mrb[114].mxu1  ;;  %3838 = vmatmul.mubr.bf16.gmra.mrb[156].mxu1 %v3618_v53 }
 0x587   : > { %v3528_v5 = vadd.f32 %v7660_v4, %v10262_v60  ;;  %v3519_v6 = vpop.f32.mrb[115].mxu1  ;;  %3847 = vmatprep.mubr.bf16.mxu1 %v9401_v19  ;;  %4794 = vmatpush1.bf16.msra.mxu1 %v8414_v63  ;;  %v3597_v8 = vmax.f32 %v3525_v1, 0.0  ;;  %v10506_v4 = vld [vmem:[%s12130_s11 + $0x1d8] ss:$28 sps:$4 sm:$0xff]  }
 0x588   : > { %v3520_v7 = vadd.f32 %v10262_v60, %v3519_v6  ;;  %v3595_v10 = vmax.f32 %v3517_v3, 0.0  ;;  %4795 = vmatprep.subr.bf16.mxu1 %v8425_v36  ;;  %7473 = vmatprep.subr.bf16.mxu0 %v10506_v4 }
 0x589   : > { %v3598_v9 = vmax.f32 %v3528_v5, 0.0 }
 0x58a   : > { %v3596_v11 = vmax.f32 %v3520_v7, 0.0 }
 0x58b   : > { %v3620_v12 = vpack.c.bf16 %v3598_v9, %v3597_v8  ;;  %4796 = vmatpush1.bf16.msra.mxu1 %v8423_v40 }
 0x58c   : > { %v3619_v13 = vpack.c.bf16 %v3596_v11, %v3595_v10  ;;  %4958 = vmatprep.subr.bf16.mxu1 %v8434_v49  ;;  %v10589_v49 = vld [vmem:[%s12130_s11 + $0x280] ss:$28 sps:$4 sm:$0xff]  }
 0x58e   : > { %3848 = vmatmul.mubr.bf16.gmra.mrb[160].mxu1 %v3619_v13 }
 0x58f   : > { %3857 = vmatprep.mubr.bf16.mxu1 %v9401_v19 }
 0x594   : > { %v7663_v14 = vpop.f32.mrb[116].mxu1 }
 0x595   : > { %v3541_v15 = vadd.f32 %v7663_v14, %v10262_v60  ;;  %v3532_v16 = vpop.f32.mrb[117].mxu1 }
 0x596   : > { %v3533_v17 = vadd.f32 %v10262_v60, %v3532_v16  ;;  %v7664_v18 = vpop.f32.mrb[118].mxu1  ;;  %3858 = vmatmul.mubr.bf16.gmra.mrb[164].mxu1 %v3620_v12 }
 0x597   : > { %v3544_v20 = vadd.f32 %v7664_v18, %v10262_v60  ;;  %v3535_v21 = vpop.f32.mrb[119].mxu1  ;;  %3867 = vmatprep.mubr.bf16.mxu1 %v9401_v19  ;;  %v3601_v23 = vmax.f32 %v3541_v15, 0.0 }
 0x598   : > { %v3536_v22 = vadd.f32 %v10262_v60, %v3535_v21  ;;  %v3599_v25 = vmax.f32 %v3533_v17, 0.0 }
 0x599   : > { %v3602_v24 = vmax.f32 %v3544_v20, 0.0 }
 0x59a   : > { %v3600_v26 = vmax.f32 %v3536_v22, 0.0  ;;  %v8432_v22 = vld [vmem:[%s12130_s11 + $0x8] ss:$28 sps:$4 sm:$0xff]  }
 0x59b   : > { %v3622_v27 = vpack.c.bf16 %v3602_v24, %v3601_v23  ;;  %v10532_v23 = vld [vmem:[%s12130_s11 + $0x18] ss:$28 sps:$4 sm:$0xff]  }
 0x59c   : > { %v3621_v28 = vpack.c.bf16 %v3600_v26, %v3599_v25  ;;  %v8437_v26 = vld [vmem:[%s12130_s11 + $0x44] ss:$28 sps:$4 sm:$0xff]  }
 0x59e   : > { %3868 = vmatmul.mubr.bf16.gmra.mrb[168].mxu1 %v3621_v28 }
 0x59f   : > { %3877 = vmatprep.mubr.bf16.mxu1 %v9401_v19 }
 0x5a4   : > { %v7667_v31 = vpop.f32.mrb[120].mxu1 }
 0x5a5   : > { %v3557_v32 = vadd.f32 %v7667_v31, %v10262_v60  ;;  %v3548_v33 = vpop.f32.mrb[121].mxu1 }
 0x5a6   : > { %v3549_v34 = vadd.f32 %v10262_v60, %v3548_v33  ;;  %v7668_v35 = vpop.f32.mrb[122].mxu1  ;;  %3878 = vmatmul.mubr.bf16.gmra.mrb[172].mxu1 %v3622_v27  ;;  %v10541_v27 = vld [vmem:[%s12130_s11 + $0x210] ss:$28 sps:$4 sm:$0xff]   ;;  %v8435_v33 = vld [vmem:[%s12130_s11 + $0x40] ss:$28 sps:$4 sm:$0xff]  }
 0x5a7   : > { %v3560_v38 = vadd.f32 %v7668_v35, %v10262_v60  ;;  %v3551_v39 = vpop.f32.mrb[123].mxu1  ;;  %3887 = vmatprep.mubr.bf16.mxu1 %v9401_v19  ;;  %v3605_v43 = vmax.f32 %v3557_v32, 0.0 }
 0x5a8   : > { %v3552_v42 = vadd.f32 %v10262_v60, %v3551_v39  ;;  %v3603_v45 = vmax.f32 %v3549_v34, 0.0  ;;  %v10557_v34 = vld [vmem:[%s12130_s11 + $0x50] ss:$28 sps:$4 sm:$0xff]  }
 0x5a9   : > { %v3606_v44 = vmax.f32 %v3560_v38, 0.0  ;;  %v10566_v38 = vld [vmem:[%s12130_s11 + $0x248] ss:$28 sps:$4 sm:$0xff]  }
 0x5aa   : > { %v3604_v46 = vmax.f32 %v3552_v42, 0.0 }
 0x5ab   : > { %v3624_v47 = vpack.c.bf16 %v3606_v44, %v3605_v43  ;;  %v8438_v44 = vld [vmem:[%s12130_s11 + $0x78] ss:$28 sps:$4 sm:$0xff]  }
 0x5ac   : > { %v3623_v48 = vpack.c.bf16 %v3604_v46, %v3603_v45  ;;  %v10579_v45 = vld [vmem:[%s12130_s11 + $0x88] ss:$28 sps:$4 sm:$0xff]  }
 0x5ae   : > { %3888 = vmatmul.mubr.bf16.gmra.mrb[176].mxu1 %v3623_v48  ;;  %v8443_v48 = vld [vmem:[%s12130_s11 + $0xb4] ss:$28 sps:$4 sm:$0xff]  }
 0x5af   : > { %3897 = vmatprep.mubr.bf16.mxu1 %v9401_v19 }
 0x5b4   : > { %v7671_v51 = vpop.f32.mrb[124].mxu1 }
 0x5b5   : > { %v3573_v53 = vadd.f32 %v7671_v51, %v10262_v60  ;;  %v3564_v58 = vpop.f32.mrb[125].mxu1 }
 0x5b6   : > { %v3565_v55 = vadd.f32 %v10262_v60, %v3564_v58  ;;  %v7672_v59 = vpop.f32.mrb[126].mxu1  ;;  %3898 = vmatmul.mubr.bf16.gmra.mrb[180].mxu1 %v3624_v47 }
 0x5b7   : > { %v3576_v56 = vadd.f32 %v7672_v59, %v10262_v60  ;;  %v3567_v61 = vpop.f32.mrb[127].mxu1  ;;  %3907 = vmatprep.mubr.bf16.mxu1 %v9401_v19  ;;  %v3609_v57 = vmax.f32 %v3573_v53, 0.0 }
 0x5b8   : > { %v3568_v62 = vadd.f32 %v10262_v60, %v3567_v61  ;;  %v3607_v0 = vmax.f32 %v3565_v55, 0.0  ;;  %v3643_v60 = vld [vmem:[%s12129_s10] sm:$0x3] }
 0x5b9   : > { %v3610_v63 = vmax.f32 %v3576_v56, 0.0  ;;  %v10513_v5 = vrot.slane %v3643_v60, %v10006_v52  ;;  %v10516_v6 = vrot.slane %v3643_v60, %v10012_v54  ;;  %v8441_v56 = vld [vmem:[%s12130_s11 + $0xb0] ss:$28 sps:$4 sm:$0xff]   ;;  %v10605_v61 = vld [vmem:[%s12130_s11 + $0xc0] ss:$28 sps:$4 sm:$0xff]  }
 0x5ba   : > { %v3608_v1 = vmax.f32 %v3568_v62, 0.0 }
 0x5bb   : > { %v3626_v2 = vpack.c.bf16 %v3610_v63, %v3609_v57  ;;  %v8446_v63 = vld [vmem:[%s12130_s11 + $0xec] ss:$28 sps:$4 sm:$0xff]  }
 0x5bc   : > { %v3625_v3 = vpack.c.bf16 %v3608_v1, %v3607_v0  ;;  %v10614_v0 = vld [vmem:[%s12130_s11 + $0x2b8] ss:$28 sps:$4 sm:$0xff]  }
 0x5be   : > { %3908 = vmatmul.mubr.bf16.gmra.mrb[184].mxu1 %v3625_v3 }
 0x5bf   : > { %3917 = vmatprep.mubr.bf16.mxu1 %v9401_v19 }
 0x5c6   : > { %3918 = vmatmul.mubr.bf16.gmra.mrb[188].mxu1 %v3626_v2 }
 0x621   : > { %v3769_v7 = vpop.f32.mrb[128].mxu1 }
 0x622   : > { %v3770_v19 = vadd.f32 %v3769_v7, %v10513_v5  ;;  %v3771_v8 = vpop.f32.mrb[129].mxu1 }
 0x623   : > { %v3772_v9 = vadd.f32 %v3771_v8, %v10516_v6  ;;  %v3773_v10 = vpop.f32.mrb[130].mxu1  ;;  %v10627_v8 = vld [vmem:[%s12130_s11 + $0xf8] ss:$28 sps:$4 sm:$0xff]  }
 0x624   : > { %v3774_v11 = vadd.f32 %v3773_v10, %v10513_v5  ;;  %v3775_v12 = vpop.f32.mrb[131].mxu1  ;;  %v3928_v14 = vmax.f32 %v3770_v19, 0.0  ;;  %v8444_v19 = vld [vmem:[%s12130_s11 + $0xe8] ss:$28 sps:$4 sm:$0xff]  }
 0x625   : > { %v3776_v13 = vadd.f32 %v3775_v12, %v10516_v6  ;;  %v3929_v16 = vmax.f32 %v3772_v9, 0.0  ;;  %v10637_v12 = vld [vmem:[%s12130_s11 + $0x2f0] ss:$28 sps:$4 sm:$0xff]  }
 0x626   : > { %v3930_v15 = vmax.f32 %v3774_v11, 0.0  ;;  %v8449_v11 = vld [vmem:[%s12130_s11 + $0x124] ss:$28 sps:$4 sm:$0xff]  }
 0x627   : > { %v3931_v17 = vmax.f32 %v3776_v13, 0.0 }
 0x628   : > { %v10522_v18 = vpack.c.bf16 %v3930_v15, %v3928_v14 }
 0x629   : > { %v10524_v20 = vpack.c.bf16 %v3931_v17, %v3929_v16  ;;  %v3779_v21 = vpop.f32.mrb[132].mxu1 }
 0x62a   : > { %v3780_v24 = vadd.f32 %v3779_v21, %v10513_v5  ;;  %v3781_v25 = vpop.f32.mrb[133].mxu1  ;;  %v8447_v21 = vld [vmem:[%s12130_s11 + $0x120] ss:$28 sps:$4 sm:$0xff]  }
 0x62b   : > { %v3782_v28 = vadd.f32 %v3781_v25, %v10516_v6  ;;  %v3783_v29 = vpop.f32.mrb[134].mxu1  ;;  %4797 = vmatprep.mubr.bf16.mxu1 %v10524_v20  ;;  %5183 = vmatprep.mubr.bf16.mxu0 %v10524_v20 }
 0x62c   : > { %v3784_v30 = vadd.f32 %v3783_v29, %v10513_v5  ;;  %v3785_v31 = vpop.f32.mrb[135].mxu1  ;;  %4798 = vmatmul.mubr.bf16.vlgmr.msra.gmra.mrb[192].mxu1 %v10522_v18  ;;  %5184 = vmatmul.mubr.bf16.vlgmr.msra.gmra.mrb[64].mxu0 %v10522_v18  ;;  %v3932_v35 = vmax.f32 %v3780_v24, 0.0 }
 0x62d   : > { %v3786_v32 = vadd.f32 %v3785_v31, %v10516_v6  ;;  %4959 = vmatpush1.bf16.msra.mxu1 %v8432_v22  ;;  %7474 = vmatpush3.bf16.msra.mxu0 %v10532_v23  ;;  %v3933_v39 = vmax.f32 %v3782_v28, 0.0  ;;  %v10653_v22 = vld [vmem:[%s12130_s11 + $0x130] ss:$28 sps:$4 sm:$0xff]   ;;  %v10662_v28 = vld [vmem:[%s12130_s11 + $0x328] ss:$28 sps:$4 sm:$0xff]  }
 0x62e   : > { %v3934_v36 = vmax.f32 %v3784_v30, 0.0  ;;  %4960 = vmatprep.subr.bf16.mxu1 %v8437_v26  ;;  %7475 = vmatprep.subr.bf16.mxu0 %v10541_v27  ;;  %v8452_v26 = vld [vmem:[%s12130_s11 + $0x15c] ss:$28 sps:$4 sm:$0xff]  }
 0x62f   : > { %v3935_v40 = vmax.f32 %v3786_v32, 0.0 }
 0x630   : > { %v10568_v41 = vpack.c.bf16 %v3934_v36, %v3932_v35  ;;  %v8450_v35 = vld [vmem:[%s12130_s11 + $0x158] ss:$28 sps:$4 sm:$0xff]   ;;  %v10675_v36 = vld [vmem:[%s12130_s11 + $0x168] ss:$28 sps:$4 sm:$0xff]  }
 0x631   : > { %v10570_v42 = vpack.c.bf16 %v3935_v40, %v3933_v39  ;;  %v3789_v43 = vpop.f32.mrb[136].mxu1  ;;  %4961 = vmatpush1.bf16.msra.mxu1 %v8435_v33  ;;  %7476 = vmatpush3.bf16.msra.mxu0 %v10557_v34  ;;  %v8455_v40 = vld [vmem:[%s12130_s11 + $0x194] ss:$28 sps:$4 sm:$0xff]  }
 0x632   : > { %v3790_v46 = vadd.f32 %v3789_v43, %v10513_v5  ;;  %v3791_v47 = vpop.f32.mrb[137].mxu1  ;;  %4962 = vmatprep.subr.bf16.mxu1 %v8440_v37  ;;  %7477 = vmatprep.subr.bf16.mxu0 %v10566_v38  ;;  %v10685_v43 = vld [vmem:[%s12130_s11 + $0x360] ss:$28 sps:$4 sm:$0xff]  }
 0x633   : > { %v3792_v51 = vadd.f32 %v3791_v47, %v10516_v6  ;;  %v3793_v53 = vpop.f32.mrb[138].mxu1  ;;  %4807 = vmatprep.mubr.bf16.mxu1 %v10570_v42  ;;  %5193 = vmatprep.mubr.bf16.mxu0 %v10570_v42 }
 0x634   : > { %v3794_v58 = vadd.f32 %v3793_v53, %v10513_v5  ;;  %v3795_v55 = vpop.f32.mrb[139].mxu1  ;;  %4808 = vmatmul.mubr.bf16.gmra.mrb[196].mxu1 %v10568_v41  ;;  %5194 = vmatmul.mubr.bf16.gmra.mrb[68].mxu0 %v10568_v41  ;;  %v3936_v62 = vmax.f32 %v3790_v46, 0.0  ;;  %v8453_v53 = vld [vmem:[%s12130_s11 + $0x190] ss:$28 sps:$4 sm:$0xff]  }
 0x635   : > { %v3796_v59 = vadd.f32 %v3795_v55, %v10516_v6  ;;  %4963 = vmatpush1.bf16.msra.mxu1 %v8438_v44  ;;  %7478 = vmatpush3.bf16.msra.mxu0 %v10579_v45  ;;  %v3937_v1 = vmax.f32 %v3792_v51, 0.0 }
 0x636   : > { %v3938_v57 = vmax.f32 %v3794_v58, 0.0  ;;  %4964 = vmatprep.subr.bf16.mxu1 %v8443_v48  ;;  %7479 = vmatprep.subr.bf16.mxu0 %v10589_v49  ;;  %v10701_v58 = vld [vmem:[%s12130_s11 + $0x1a0] ss:$28 sps:$4 sm:$0xff]  }
 0x637   : > { %v3939_v2 = vmax.f32 %v3796_v59, 0.0 }
 0x638   : > { %v10616_v3 = vpack.c.bf16 %v3938_v57, %v3936_v62 }
 0x639   : > { %v10618_v60 = vpack.c.bf16 %v3939_v2, %v3937_v1  ;;  %v3799_v7 = vpop.f32.mrb[140].mxu1  ;;  %4965 = vmatpush1.bf16.msra.mxu1 %v8441_v56  ;;  %7480 = vmatpush3.bf16.msra.mxu0 %v10605_v61  ;;  %v8458_v56 = vld [vmem:[%s12130_s11 + $0x1cc] ss:$28 sps:$4 sm:$0xff]  }
 0x63a   : > { %v3800_v9 = vadd.f32 %v3799_v7, %v10513_v5  ;;  %v3801_v10 = vpop.f32.mrb[141].mxu1  ;;  %4966 = vmatprep.subr.bf16.mxu1 %v8446_v63  ;;  %7481 = vmatprep.subr.bf16.mxu0 %v10614_v0  ;;  %v8456_v7 = vld [vmem:[%s12130_s11 + $0x1c8] ss:$28 sps:$4 sm:$0xff]  }
 0x63b   : > { %v3802_v13 = vadd.f32 %v3801_v10, %v10516_v6  ;;  %v3803_v14 = vpop.f32.mrb[142].mxu1  ;;  %4817 = vmatprep.mubr.bf16.mxu1 %v10618_v60  ;;  %5203 = vmatprep.mubr.bf16.mxu0 %v10618_v60  ;;  %v8461_v10 = vld [vmem:[%s12130_s11 + $0x204] ss:$28 sps:$4 sm:$0xff]  }
 0x63c   : > { %v3804_v15 = vadd.f32 %v3803_v14, %v10513_v5  ;;  %v3805_v16 = vpop.f32.mrb[143].mxu1  ;;  %4818 = vmatmul.mubr.bf16.gmra.mrb[200].mxu1 %v10616_v3  ;;  %5204 = vmatmul.mubr.bf16.gmra.mrb[72].mxu0 %v10616_v3  ;;  %v3940_v24 = vmax.f32 %v3800_v9, 0.0 }
 0x63d   : > { %v3806_v17 = vadd.f32 %v3805_v16, %v10516_v6  ;;  %4967 = vmatpush1.bf16.msra.mxu1 %v8444_v19  ;;  %7482 = vmatpush3.bf16.msra.mxu0 %v10627_v8  ;;  %v3941_v29 = vmax.f32 %v3802_v13, 0.0 }
 0x63e   : > { %v3942_v25 = vmax.f32 %v3804_v15, 0.0  ;;  %4968 = vmatprep.subr.bf16.mxu1 %v8449_v11  ;;  %7483 = vmatprep.subr.bf16.mxu0 %v10637_v12 }
 0x63f   : > { %v3943_v30 = vmax.f32 %v3806_v17, 0.0  ;;  %v8459_v17 = vld [vmem:[%s12130_s11 + $0x200] ss:$28 sps:$4 sm:$0xff]  }
 0x640   : > { %v10664_v31 = vpack.c.bf16 %v3942_v25, %v3940_v24  ;;  %v8464_v25 = vld [vmem:[%s12130_s11 + $0x23c] ss:$28 sps:$4 sm:$0xff]  }
 0x641   : > { %v10666_v32 = vpack.c.bf16 %v3943_v30, %v3941_v29  ;;  %v3809_v33 = vpop.f32.mrb[144].mxu1  ;;  %4969 = vmatpush1.bf16.msra.mxu1 %v8447_v21  ;;  %7484 = vmatpush3.bf16.msra.mxu0 %v10653_v22 }
 0x642   : > { %v3810_v37 = vadd.f32 %v3809_v33, %v10513_v5  ;;  %v3811_v39 = vpop.f32.mrb[145].mxu1  ;;  %4970 = vmatprep.subr.bf16.mxu1 %v8452_v26  ;;  %7485 = vmatprep.subr.bf16.mxu0 %v10662_v28 }
 0x643   : > { %v3812_v44 = vadd.f32 %v3811_v39, %v10516_v6  ;;  %v3813_v46 = vpop.f32.mrb[146].mxu1  ;;  %4827 = vmatprep.mubr.bf16.mxu1 %v10666_v32  ;;  %5213 = vmatprep.mubr.bf16.mxu0 %v10666_v32 }
 0x644   : > { %v3814_v47 = vadd.f32 %v3813_v46, %v10513_v5  ;;  %v3815_v48 = vpop.f32.mrb[147].mxu1  ;;  %4828 = vmatmul.mubr.bf16.gmra.mrb[204].mxu1 %v10664_v31  ;;  %5214 = vmatmul.mubr.bf16.gmra.mrb[76].mxu0 %v10664_v31  ;;  %v3944_v55 = vmax.f32 %v3810_v37, 0.0  ;;  %v8462_v37 = vld [vmem:[%s12130_s11 + $0x238] ss:$28 sps:$4 sm:$0xff]  }
 0x645   : > { %v3816_v51 = vadd.f32 %v3815_v48, %v10516_v6  ;;  %4971 = vmatpush1.bf16.msra.mxu1 %v8450_v35  ;;  %7486 = vmatpush3.bf16.msra.mxu0 %v10675_v36  ;;  %v3945_v62 = vmax.f32 %v3812_v44, 0.0  ;;  %v8467_v44 = vld [vmem:[%s12130_s11 + $0x274] ss:$28 sps:$4 sm:$0xff]  }
 0x646   : > { %v3946_v59 = vmax.f32 %v3814_v47, 0.0  ;;  %4972 = vmatprep.subr.bf16.mxu1 %v8455_v40  ;;  %7487 = vmatprep.subr.bf16.mxu0 %v10685_v43 }
 0x647   : > { %v3947_v57 = vmax.f32 %v3816_v51, 0.0 }
 0x648   : > { %v10707_v63 = vpack.c.bf16 %v3946_v59, %v3944_v55  ;;  %v8465_v55 = vld [vmem:[%s12130_s11 + $0x270] ss:$28 sps:$4 sm:$0xff]  }
 0x649   : > { %v10709_v1 = vpack.c.bf16 %v3947_v57, %v3945_v62  ;;  %v3819_v2 = vpop.f32.mrb[148].mxu1  ;;  %4973 = vmatpush1.bf16.msra.mxu1 %v8453_v53  ;;  %7488 = vmatpush3.bf16.msra.mxu0 %v10701_v58  ;;  %v8470_v62 = vld [vmem:[%s12130_s11 + $0x2ac] ss:$28 sps:$4 sm:$0xff]  }
 0x64a   : > { %v3820_v19 = vadd.f32 %v3819_v2, %v10513_v5  ;;  %v3821_v9 = vpop.f32.mrb[149].mxu1  ;;  %4974 = vmatprep.subr.bf16.mxu1 %v8458_v56 }
 0x64b   : > { %v3822_v11 = vadd.f32 %v3821_v9, %v10516_v6  ;;  %v3823_v13 = vpop.f32.mrb[150].mxu1  ;;  %4837 = vmatprep.mubr.bf16.mxu1 %v10709_v1  ;;  %5223 = vmatprep.mubr.bf16.mxu0 %v10709_v1 }
 0x64c   : > { %v3824_v14 = vadd.f32 %v3823_v13, %v10513_v5  ;;  %v3825_v15 = vpop.f32.mrb[151].mxu1  ;;  %4838 = vmatmul.mubr.bf16.gmra.mrb[208].mxu1 %v10707_v63  ;;  %5224 = vmatmul.mubr.bf16.gmra.mrb[80].mxu0 %v10707_v63  ;;  %v3948_v21 = vmax.f32 %v3820_v19, 0.0 }
 0x64d   : > { %v3826_v16 = vadd.f32 %v3825_v15, %v10516_v6  ;;  %4975 = vmatpush1.bf16.msra.mxu1 %v8456_v7  ;;  %v3949_v26 = vmax.f32 %v3822_v11, 0.0 }
 0x64e   : > { %v3950_v24 = vmax.f32 %v3824_v14, 0.0  ;;  %4976 = vmatprep.subr.bf16.mxu1 %v8461_v10  ;;  %v8468_v10 = vld [vmem:[%s12130_s11 + $0x2a8] ss:$28 sps:$4 sm:$0xff]  }
 0x64f   : > { %v3951_v29 = vmax.f32 %v3826_v16, 0.0  ;;  %v8477_v14 = vld [vmem:[%s12130_s11 + $0x2e4] ss:$28 sps:$4 sm:$0xff]  }
 0x650   : > { %v10732_v30 = vpack.c.bf16 %v3950_v24, %v3948_v21 }
 0x651   : > { %v10734_v33 = vpack.c.bf16 %v3951_v29, %v3949_v26  ;;  %v3829_v35 = vpop.f32.mrb[152].mxu1  ;;  %4977 = vmatpush1.bf16.msra.mxu1 %v8459_v17 }
 0x652   : > { %v3830_v39 = vadd.f32 %v3829_v35, %v10513_v5  ;;  %v3831_v40 = vpop.f32.mrb[153].mxu1  ;;  %4978 = vmatprep.subr.bf16.mxu1 %v8464_v25  ;;  %v8475_v25 = vld [vmem:[%s12130_s11 + $0x2e0] ss:$28 sps:$4 sm:$0xff]  }
 0x653   : > { %v3832_v46 = vadd.f32 %v3831_v40, %v10516_v6  ;;  %v3833_v47 = vpop.f32.mrb[154].mxu1  ;;  %4847 = vmatprep.mubr.bf16.mxu1 %v10734_v33  ;;  %5233 = vmatprep.mubr.bf16.mxu0 %v10734_v33  ;;  %v8484_v35 = vld [vmem:[%s12130_s11 + $0x31c] ss:$28 sps:$4 sm:$0xff]  }
 0x654   : > { %v3834_v48 = vadd.f32 %v3833_v47, %v10513_v5  ;;  %v3835_v51 = vpop.f32.mrb[155].mxu1  ;;  %4848 = vmatmul.mubr.bf16.gmra.mrb[212].mxu1 %v10732_v30  ;;  %5234 = vmatmul.mubr.bf16.gmra.mrb[84].mxu0 %v10732_v30  ;;  %v3952_v59 = vmax.f32 %v3830_v39, 0.0  ;;  %v8482_v47 = vld [vmem:[%s12130_s11 + $0x318] ss:$28 sps:$4 sm:$0xff]  }
 0x655   : > { %v3836_v53 = vadd.f32 %v3835_v51, %v10516_v6  ;;  %4979 = vmatpush1.bf16.msra.mxu1 %v8462_v37  ;;  %v3953_v57 = vmax.f32 %v3832_v46, 0.0 }
 0x656   : > { %v3954_v56 = vmax.f32 %v3834_v48, 0.0  ;;  %4980 = vmatprep.subr.bf16.mxu1 %v8467_v44 }
 0x657   : > { %v3955_v2 = vmax.f32 %v3836_v53, 0.0  ;;  %v8491_v53 = vld [vmem:[%s12130_s11 + $0x354] ss:$28 sps:$4 sm:$0xff]  }
 0x658   : > { %v10756_v7 = vpack.c.bf16 %v3954_v56, %v3952_v59 }
 0x659   : > { %v10758_v19 = vpack.c.bf16 %v3955_v2, %v3953_v57  ;;  %v3839_v9 = vpop.f32.mrb[156].mxu1  ;;  %4981 = vmatpush1.bf16.msra.mxu1 %v8465_v55  ;;  %v8489_v2 = vld [vmem:[%s12130_s11 + $0x350] ss:$28 sps:$4 sm:$0xff]  }
 0x65a   : > { %v3840_v11 = vadd.f32 %v3839_v9, %v10513_v5  ;;  %v3841_v13 = vpop.f32.mrb[157].mxu1  ;;  %4982 = vmatprep.subr.bf16.mxu1 %v8470_v62 }
 0x65b   : > { %v3842_v15 = vadd.f32 %v3841_v13, %v10516_v6  ;;  %v3843_v16 = vpop.f32.mrb[158].mxu1  ;;  %4857 = vmatprep.mubr.bf16.mxu1 %v10758_v19  ;;  %5243 = vmatprep.mubr.bf16.mxu0 %v10758_v19 }
 0x65c   : > { %v3844_v17 = vadd.f32 %v3843_v16, %v10513_v5  ;;  %v3845_v21 = vpop.f32.mrb[159].mxu1  ;;  %4858 = vmatmul.mubr.bf16.gmra.mrb[216].mxu1 %v10756_v7  ;;  %5244 = vmatmul.mubr.bf16.gmra.mrb[88].mxu0 %v10756_v7  ;;  %v3956_v26 = vmax.f32 %v3840_v11, 0.0 }
 0x65d   : > { %v3846_v24 = vadd.f32 %v3845_v21, %v10516_v6  ;;  %4983 = vmatpush1.bf16.msra.mxu1 %v8468_v10  ;;  %v3957_v37 = vmax.f32 %v3842_v15, 0.0 }
 0x65e   : > { %v3958_v29 = vmax.f32 %v3844_v17, 0.0  ;;  %4984 = vmatprep.subr.bf16.mxu1 %v8477_v14 }
 0x65f   : > { %v3959_v39 = vmax.f32 %v3846_v24, 0.0 }
 0x660   : > { %v10780_v40 = vpack.c.bf16 %v3958_v29, %v3956_v26 }
 0x661   : > { %v10782_v44 = vpack.c.bf16 %v3959_v39, %v3957_v37  ;;  %v3849_v46 = vpop.f32.mrb[160].mxu1  ;;  %4985 = vmatpush1.bf16.msra.mxu1 %v8475_v25 }
 0x662   : > { %v3850_v48 = vadd.f32 %v3849_v46, %v10513_v5  ;;  %v3851_v51 = vpop.f32.mrb[161].mxu1  ;;  %4986 = vmatprep.subr.bf16.mxu1 %v8484_v35 }
 0x663   : > { %v3852_v55 = vadd.f32 %v3851_v51, %v10516_v6  ;;  %v3853_v59 = vpop.f32.mrb[162].mxu1  ;;  %4867 = vmatprep.mubr.bf16.mxu1 %v10782_v44  ;;  %5253 = vmatprep.mubr.bf16.mxu0 %v10782_v44 }
 0x664   : > { %v3854_v56 = vadd.f32 %v3853_v59, %v10513_v5  ;;  %v3855_v62 = vpop.f32.mrb[163].mxu1  ;;  %4868 = vmatmul.mubr.bf16.gmra.mrb[220].mxu1 %v10780_v40  ;;  %5254 = vmatmul.mubr.bf16.gmra.mrb[92].mxu0 %v10780_v40  ;;  %v3960_v9 = vmax.f32 %v3850_v48, 0.0 }
 0x665   : > { %v3856_v57 = vadd.f32 %v3855_v62, %v10516_v6  ;;  %4987 = vmatpush1.bf16.msra.mxu1 %v8482_v47  ;;  %v3961_v11 = vmax.f32 %v3852_v55, 0.0 }
 0x666   : > { %v3962_v10 = vmax.f32 %v3854_v56, 0.0  ;;  %4988 = vmatprep.subr.bf16.mxu1 %v8491_v53 }
 0x667   : > { %v3963_v13 = vmax.f32 %v3856_v57, 0.0 }
 0x668   : > { %v10801_v14 = vpack.c.bf16 %v3962_v10, %v3960_v9 }
 0x669   : > { %v10803_v15 = vpack.c.bf16 %v3963_v13, %v3961_v11  ;;  %v3859_v16 = vpop.f32.mrb[164].mxu1  ;;  %4989 = vmatpush1.bf16.msra.mxu1 %v8489_v2 }
 0x66a   : > { %v3860_v17 = vadd.f32 %v3859_v16, %v10513_v5  ;;  %v3861_v21 = vpop.f32.mrb[165].mxu1  ;;  %7673 = vmatprep.subr.bf16.mxu1 %v10506_v4 }
 0x66b   : > { %v3862_v24 = vadd.f32 %v3861_v21, %v10516_v6  ;;  %v3863_v25 = vpop.f32.mrb[166].mxu1  ;;  %4877 = vmatprep.mubr.bf16.mxu1 %v10803_v15  ;;  %5263 = vmatprep.mubr.bf16.mxu0 %v10803_v15 }
 0x66c   : > { %v3864_v26 = vadd.f32 %v3863_v25, %v10513_v5  ;;  %v3865_v29 = vpop.f32.mrb[167].mxu1  ;;  %4878 = vmatmul.mubr.bf16.gmra.mrb[224].mxu1 %v10801_v14  ;;  %5264 = vmatmul.mubr.bf16.gmra.mrb[96].mxu0 %v10801_v14  ;;  %v3964_v37 = vmax.f32 %v3860_v17, 0.0 }
 0x66d   : > { %v3866_v35 = vadd.f32 %v3865_v29, %v10516_v6  ;;  %v3965_v46 = vmax.f32 %v3862_v24, 0.0 }
 0x66e   : > { %v3966_v39 = vmax.f32 %v3864_v26, 0.0 }
 0x66f   : > { %v3967_v4 = vmax.f32 %v3866_v35, 0.0 }
 0x670   : > { %v10814_v47 = vpack.c.bf16 %v3966_v39, %v3964_v37 }
 0x671   : > { %v10816_v48 = vpack.c.bf16 %v3967_v4, %v3965_v46  ;;  %v3869_v51 = vpop.f32.mrb[168].mxu1 }
 0x672   : > { %v3870_v53 = vadd.f32 %v3869_v51, %v10513_v5  ;;  %v3871_v55 = vpop.f32.mrb[169].mxu1 }
 0x673   : > { %v3872_v59 = vadd.f32 %v3871_v55, %v10516_v6  ;;  %v3873_v56 = vpop.f32.mrb[170].mxu1  ;;  %4887 = vmatprep.mubr.bf16.mxu1 %v10816_v48  ;;  %5273 = vmatprep.mubr.bf16.mxu0 %v10816_v48 }
 0x674   : > { %v3874_v62 = vadd.f32 %v3873_v56, %v10513_v5  ;;  %v3875_v57 = vpop.f32.mrb[171].mxu1  ;;  %4888 = vmatmul.mubr.bf16.gmra.mrb[228].mxu1 %v10814_v47  ;;  %5274 = vmatmul.mubr.bf16.gmra.mrb[100].mxu0 %v10814_v47  ;;  %v3968_v9 = vmax.f32 %v3870_v53, 0.0 }
 0x675   : > { %v3876_v2 = vadd.f32 %v3875_v57, %v10516_v6  ;;  %v3969_v11 = vmax.f32 %v3872_v59, 0.0 }
 0x676   : > { %v3970_v10 = vmax.f32 %v3874_v62, 0.0 }
 0x677   : > { %v3971_v13 = vmax.f32 %v3876_v2, 0.0 }
 0x678   : > { %v10826_v16 = vpack.c.bf16 %v3970_v10, %v3968_v9 }
 0x679   : > { %v10828_v17 = vpack.c.bf16 %v3971_v13, %v3969_v11  ;;  %v3879_v21 = vpop.f32.mrb[172].mxu1 }
 0x67a   : > { %v3880_v24 = vadd.f32 %v3879_v21, %v10513_v5  ;;  %v3881_v25 = vpop.f32.mrb[173].mxu1 }
 0x67b   : > { %v3882_v26 = vadd.f32 %v3881_v25, %v10516_v6  ;;  %v3883_v29 = vpop.f32.mrb[174].mxu1  ;;  %4897 = vmatprep.mubr.bf16.mxu1 %v10828_v17  ;;  %5283 = vmatprep.mubr.bf16.mxu0 %v10828_v17 }
 0x67c   : > { %v3884_v35 = vadd.f32 %v3883_v29, %v10513_v5  ;;  %v3885_v37 = vpop.f32.mrb[175].mxu1  ;;  %4898 = vmatmul.mubr.bf16.gmra.mrb[232].mxu1 %v10826_v16  ;;  %5284 = vmatmul.mubr.bf16.gmra.mrb[104].mxu0 %v10826_v16  ;;  %v3972_v46 = vmax.f32 %v3880_v24, 0.0 }
 0x67d   : > { %v3886_v39 = vadd.f32 %v3885_v37, %v10516_v6  ;;  %v3973_v51 = vmax.f32 %v3882_v26, 0.0 }
 0x67e   : > { %v3974_v4 = vmax.f32 %v3884_v35, 0.0 }
 0x67f   : > { %v3975_v53 = vmax.f32 %v3886_v39, 0.0 }
 0x680   : > { %v10838_v55 = vpack.c.bf16 %v3974_v4, %v3972_v46 }
 0x681   : > { %v10840_v59 = vpack.c.bf16 %v3975_v53, %v3973_v51  ;;  %v3889_v56 = vpop.f32.mrb[176].mxu1 }
 0x682   : > { %v3890_v62 = vadd.f32 %v3889_v56, %v10513_v5  ;;  %v3891_v57 = vpop.f32.mrb[177].mxu1 }
 0x683   : > { %v3892_v2 = vadd.f32 %v3891_v57, %v10516_v6  ;;  %v3893_v9 = vpop.f32.mrb[178].mxu1  ;;  %4907 = vmatprep.mubr.bf16.mxu1 %v10840_v59  ;;  %5293 = vmatprep.mubr.bf16.mxu0 %v10840_v59 }
 0x684   : > { %v3894_v10 = vadd.f32 %v3893_v9, %v10513_v5  ;;  %v3895_v11 = vpop.f32.mrb[179].mxu1  ;;  %4908 = vmatmul.mubr.bf16.gmra.mrb[236].mxu1 %v10838_v55  ;;  %5294 = vmatmul.mubr.bf16.gmra.mrb[108].mxu0 %v10838_v55  ;;  %v3976_v21 = vmax.f32 %v3890_v62, 0.0 }
 0x685   : > { %v3896_v13 = vadd.f32 %v3895_v11, %v10516_v6  ;;  %v3977_v25 = vmax.f32 %v3892_v2, 0.0 }
 0x686   : > { %v3978_v24 = vmax.f32 %v3894_v10, 0.0 }
 0x687   : > { %v3979_v26 = vmax.f32 %v3896_v13, 0.0 }
 0x688   : > { %v10850_v29 = vpack.c.bf16 %v3978_v24, %v3976_v21 }
 0x689   : > { %v10852_v35 = vpack.c.bf16 %v3979_v26, %v3977_v25  ;;  %v3899_v37 = vpop.f32.mrb[180].mxu1 }
 0x68a   : > { %v3900_v39 = vadd.f32 %v3899_v37, %v10513_v5  ;;  %v3901_v46 = vpop.f32.mrb[181].mxu1 }
 0x68b   : > { %v3902_v4 = vadd.f32 %v3901_v46, %v10516_v6  ;;  %v3903_v51 = vpop.f32.mrb[182].mxu1  ;;  %4917 = vmatprep.mubr.bf16.mxu1 %v10852_v35  ;;  %5303 = vmatprep.mubr.bf16.mxu0 %v10852_v35 }
 0x68c   : > { %v3904_v53 = vadd.f32 %v3903_v51, %v10513_v5  ;;  %v3905_v56 = vpop.f32.mrb[183].mxu1  ;;  %4918 = vmatmul.mubr.bf16.gmra.mrb[240].mxu1 %v10850_v29  ;;  %5304 = vmatmul.mubr.bf16.gmra.mrb[112].mxu0 %v10850_v29  ;;  %v3980_v57 = vmax.f32 %v3900_v39, 0.0 }
 0x68d   : > { %v3906_v62 = vadd.f32 %v3905_v56, %v10516_v6  ;;  %v3981_v9 = vmax.f32 %v3902_v4, 0.0 }
 0x68e   : > { %v3982_v2 = vmax.f32 %v3904_v53, 0.0 }
 0x68f   : > { %v3983_v10 = vmax.f32 %v3906_v62, 0.0 }
 0x690   : > { %v10862_v11 = vpack.c.bf16 %v3982_v2, %v3980_v57 }
 0x691   : > { %v10864_v13 = vpack.c.bf16 %v3983_v10, %v3981_v9  ;;  %v3909_v21 = vpop.f32.mrb[184].mxu1 }
 0x692   : > { %v3910_v24 = vadd.f32 %v3909_v21, %v10513_v5  ;;  %v3911_v25 = vpop.f32.mrb[185].mxu1 }
 0x693   : > { %v3912_v26 = vadd.f32 %v3911_v25, %v10516_v6  ;;  %v3913_v37 = vpop.f32.mrb[186].mxu1  ;;  %4927 = vmatprep.mubr.bf16.mxu1 %v10864_v13  ;;  %5313 = vmatprep.mubr.bf16.mxu0 %v10864_v13 }
 0x694   : > { %v3914_v39 = vadd.f32 %v3913_v37, %v10513_v5  ;;  %v3915_v46 = vpop.f32.mrb[187].mxu1  ;;  %4928 = vmatmul.mubr.bf16.gmra.mrb[244].mxu1 %v10862_v11  ;;  %5314 = vmatmul.mubr.bf16.gmra.mrb[116].mxu0 %v10862_v11  ;;  %v3984_v51 = vmax.f32 %v3910_v24, 0.0 }
 0x695   : > { %v3916_v4 = vadd.f32 %v3915_v46, %v10516_v6  ;;  %v3985_v56 = vmax.f32 %v3912_v26, 0.0 }
 0x696   : > { %v3986_v53 = vmax.f32 %v3914_v39, 0.0 }
 0x697   : > { %v3987_v62 = vmax.f32 %v3916_v4, 0.0 }
 0x698   : > { %v10874_v57 = vpack.c.bf16 %v3986_v53, %v3984_v51 }
 0x699   : > { %v10876_v2 = vpack.c.bf16 %v3987_v62, %v3985_v56  ;;  %v3919_v9 = vpop.f32.mrb[188].mxu1 }
 0x69a   : > { %v3920_v10 = vadd.f32 %v3919_v9, %v10513_v5  ;;  %v3921_v21 = vpop.f32.mrb[189].mxu1 }
 0x69b   : > { %v3922_v25 = vadd.f32 %v3921_v21, %v10516_v6  ;;  %v3923_v37 = vpop.f32.mrb[190].mxu1  ;;  %4937 = vmatprep.mubr.bf16.mxu1 %v10876_v2  ;;  %5323 = vmatprep.mubr.bf16.mxu0 %v10876_v2 }
 0x69c   : > { %v3924_v24 = vadd.f32 %v3923_v37, %v10513_v5  ;;  %v3925_v39 = vpop.f32.mrb[191].mxu1  ;;  %4938 = vmatmul.mubr.bf16.gmra.mrb[248].mxu1 %v10874_v57  ;;  %5324 = vmatmul.mubr.bf16.gmra.mrb[120].mxu0 %v10874_v57  ;;  %v3988_v46 = vmax.f32 %v3920_v10, 0.0  ;;  %v4172_v5 = vsub.s32 4, %v10000_v50 }
 0x69d   : > { %v3926_v26 = vadd.f32 %v3925_v39, %v10516_v6  ;;  %v3989_v51 = vmax.f32 %v3922_v25, 0.0  ;;  %v4152_v6 = vld [vmem:[%s12131_s12] sm:$0xff] }
 0x69e   : > { %v3990_v4 = vmax.f32 %v3924_v24, 0.0 }
 0x69f   : > { %v3991_v53 = vmax.f32 %v3926_v26, 0.0 }
 0x6a0   : > { %v10886_v56 = vpack.c.bf16 %v3990_v4, %v3988_v46 }
 0x6a1   : > { %v10888_v62 = vpack.c.bf16 %v3991_v53, %v3989_v51 }
 0x6a2   : > { %12138 = vst [vmem:[#allocation3_spill] sm:$0xff] %v10886_v56 }
 0x6a3   : > { %12139 = vst [vmem:[#allocation4_spill] sm:$0xff] %v10888_v62  ;;  %4947 = vmatprep.mubr.bf16.mxu1 %v10888_v62  ;;  %5333 = vmatprep.mubr.bf16.mxu0 %v10888_v62 }
 0x6a4   : > { %4948 = vmatmul.mubr.bf16.gmra.mrb[252].mxu1 %v10886_v56  ;;  %5334 = vmatmul.mubr.bf16.gmra.mrb[124].mxu0 %v10886_v56 }
 0x6a5   : > { %4990 = vmatprep.mubr.bf16.mxu1 %v10524_v20  ;;  %5376 = vmatprep.mubr.bf16.mxu0 %v10524_v20  ;;  %v10949_v20 = vrot.slane %v4152_v6, %v10006_v52 }
 0x6ac   : > { %4991 = vmatmul.mubr.bf16.vlgmr.msra.gmra.mrb[0].mxu1 %v10522_v18  ;;  %5377 = vmatmul.mubr.bf16.vlgmr.msra.gmra.mrb[128].mxu0 %v10522_v18  ;;  %v4176_v18 = vsub.s32 5, %v10000_v50 }
 0x6ad   : > { %5000 = vmatprep.mubr.bf16.mxu1 %v10570_v42  ;;  %7681 = vmatpush3.bf16.msra.mxu1 %v10532_v23  ;;  %v10951_v23 = vrot.slane %v4152_v6, %v4172_v5 }
 0x6ae   : > { %5384 = vmatprep.mubr.bf16.mxu0 %v10570_v42  ;;  %7674 = vmatprep.subr.bf16.mxu1 %v10541_v27  ;;  %v10955_v27 = vrot.slane %v4152_v6, %v10012_v54 }
 0x6b1   : > { %7682 = vmatpush3.bf16.msra.mxu1 %v10557_v34  ;;  %v10957_v34 = vrot.slane %v4152_v6, %v4176_v18 }
 0x6b2   : > { %7675 = vmatprep.subr.bf16.mxu1 %v10566_v38 }
 0x6b4   : > { %5001 = vmatmul.mubr.bf16.gmra.mrb[4].mxu1 %v10568_v41  ;;  %5385 = vmatmul.mubr.bf16.gmra.mrb[132].mxu0 %v10568_v41 }
 0x6b5   : > { %5010 = vmatprep.mubr.bf16.mxu1 %v10618_v60  ;;  %5392 = vmatprep.mubr.bf16.mxu0 %v10618_v60 }
 0x6b6   : > { %7683 = vmatpush3.bf16.msra.mxu1 %v10579_v45 }
 0x6b7   : > { %7676 = vmatprep.subr.bf16.mxu1 %v10589_v49 }
 0x6ba   : > { %7684 = vmatpush3.bf16.msra.mxu1 %v10605_v61 }
 0x6bb   : > { %7677 = vmatprep.subr.bf16.mxu1 %v10614_v0 }
 0x6bc   : > { %5011 = vmatmul.mubr.bf16.gmra.mrb[8].mxu1 %v10616_v3  ;;  %5393 = vmatmul.mubr.bf16.gmra.mrb[136].mxu0 %v10616_v3 }
 0x6bd   : > { %5020 = vmatprep.mubr.bf16.mxu1 %v10666_v32  ;;  %5400 = vmatprep.mubr.bf16.mxu0 %v10666_v32 }
 0x6be   : > { %7685 = vmatpush3.bf16.msra.mxu1 %v10627_v8 }
 0x6bf   : > { %7678 = vmatprep.subr.bf16.mxu1 %v10637_v12 }
 0x6c2   : > { %7686 = vmatpush3.bf16.msra.mxu1 %v10653_v22 }
 0x6c3   : > { %7679 = vmatprep.subr.bf16.mxu1 %v10662_v28 }
 0x6c4   : > { %5021 = vmatmul.mubr.bf16.gmra.mrb[12].mxu1 %v10664_v31  ;;  %5401 = vmatmul.mubr.bf16.gmra.mrb[140].mxu0 %v10664_v31 }
 0x6c5   : > { %5030 = vmatprep.mubr.bf16.mxu1 %v10709_v1  ;;  %5408 = vmatprep.mubr.bf16.mxu0 %v10709_v1 }
 0x6c6   : > { %7687 = vmatpush3.bf16.msra.mxu1 %v10675_v36 }
 0x6c7   : > { %7680 = vmatprep.subr.bf16.mxu1 %v10685_v43 }
 0x6ca   : > { %7688 = vmatpush3.bf16.msra.mxu1 %v10701_v58 }
 0x6cc   : > { %5031 = vmatmul.mubr.bf16.gmra.mrb[16].mxu1 %v10707_v63  ;;  %5409 = vmatmul.mubr.bf16.gmra.mrb[144].mxu0 %v10707_v63 }
 0x6cd   : > { %5040 = vmatprep.mubr.bf16.mxu1 %v10734_v33  ;;  %5416 = vmatprep.mubr.bf16.mxu0 %v10734_v33 }
 0x6d4   : > { %5041 = vmatmul.mubr.bf16.gmra.mrb[20].mxu1 %v10732_v30  ;;  %5417 = vmatmul.mubr.bf16.gmra.mrb[148].mxu0 %v10732_v30 }
 0x6d5   : > { %5050 = vmatprep.mubr.bf16.mxu1 %v10758_v19 }
 0x6dc   : > { %5051 = vmatmul.mubr.bf16.gmra.mrb[24].mxu1 %v10756_v7 }
 0x6dd   : > { %5060 = vmatprep.mubr.bf16.mxu1 %v10782_v44 }
 0x6e4   : > { %5061 = vmatmul.mubr.bf16.gmra.mrb[28].mxu1 %v10780_v40 }
 0x6e5   : > { %5070 = vmatprep.mubr.bf16.mxu1 %v10803_v15 }
 0x6ec   : > { %5071 = vmatmul.mubr.bf16.gmra.mrb[32].mxu1 %v10801_v14 }
 0x6ed   : > { %5080 = vmatprep.mubr.bf16.mxu1 %v10816_v48 }
 0x6f4   : > { %5081 = vmatmul.mubr.bf16.gmra.mrb[36].mxu1 %v10814_v47 }
 0x6f5   : > { %5090 = vmatprep.mubr.bf16.mxu1 %v10828_v17 }
 0x6fc   : > { %5091 = vmatmul.mubr.bf16.gmra.mrb[40].mxu1 %v10826_v16 }
 0x6fd   : > { %5100 = vmatprep.mubr.bf16.mxu1 %v10840_v59 }
 0x6ff   : > { %v4799_v38 = vpop.f32.mrb[192].mxu1  ;;  %v5185_v41 = vpop.f32.mrb[64].mxu0 }
 0x700   : > { %v4800_v42 = vadd.f32 %v4799_v38, %v10949_v20  ;;  %v5186_v45 = vadd.f32 %v5185_v41, %v10951_v23  ;;  %v4801_v49 = vpop.f32.mrb[193].mxu1  ;;  %v5187_v61 = vpop.f32.mrb[65].mxu0 }
 0x701   : > { %v4802_v52 = vadd.f32 %v4801_v49, %v10955_v27  ;;  %v5188_v0 = vadd.f32 %v5187_v61, %v10957_v34  ;;  %v4803_v3 = vpop.f32.mrb[194].mxu1  ;;  %v5189_v60 = vpop.f32.mrb[66].mxu0 }
 0x702   : > { %v5505_v8 = vsub.f32 0.0, %v4800_v42  ;;  %v5509_v12 = vsub.f32 0.0, %v5186_v45  ;;  %v4804_v54 = vadd.f32 %v4803_v3, %v10949_v20  ;;  %v5190_v22 = vadd.f32 %v5189_v60, %v10951_v23  ;;  %v4805_v28 = vpop.f32.mrb[195].mxu1  ;;  %v5191_v31 = vpop.f32.mrb[67].mxu0 }
 0x703   : > { %v5506_v32 = vsub.f32 0.0, %v4802_v52  ;;  %v5510_v36 = vsub.f32 0.0, %v5188_v0  ;;  %v4806_v43 = vadd.f32 %v4805_v28, %v10955_v27  ;;  %v5192_v58 = vadd.f32 %v5191_v31, %v10957_v34 }
 0x704   : > { %v5729_v63 = vmul.f32 1.442695, %v5505_v8  ;;  %v5737_v1 = vmul.f32 1.442695, %v5509_v12  ;;  %v5512_v30 = vsub.f32 0.0, %v4804_v54  ;;  %v5516_v33 = vsub.f32 0.0, %v5190_v22  ;;  %5101 = vmatmul.mubr.bf16.gmra.mrb[44].mxu1 %v10838_v55 }
 0x705   : > { %v5731_v9 = vmul.f32 1.442695, %v5506_v32  ;;  %v5739_v10 = vmul.f32 1.442695, %v5510_v36  ;;  %v5513_v21 = vsub.f32 0.0, %v4806_v43  ;;  %v5517_v25 = vsub.f32 0.0, %v5192_v58  ;;  %5110 = vmatprep.mubr.bf16.mxu1 %v10852_v35 }
 0x706   : > { %8496 = vpow2.f32 %v5729_v63  ;;  %v5743_v37 = vmul.f32 1.442695, %v5512_v30  ;;  %v5751_v24 = vmul.f32 1.442695, %v5516_v33 }
 0x707   : > { %8498 = vpow2.f32 %v5737_v1  ;;  %v4809_v39 = vpop.f32.mrb[196].mxu1  ;;  %v5195_v26 = vpop.f32.mrb[68].mxu0  ;;  %v5745_v46 = vmul.f32 1.442695, %v5513_v21  ;;  %v5753_v6 = vmul.f32 1.442695, %v5517_v25 }
 0x708   : > { %8500 = vpow2.f32 %v5731_v9  ;;  %v4810_v4 = vadd.f32 %v4809_v39, %v10949_v20  ;;  %v5196_v51 = vadd.f32 %v5195_v26, %v10951_v23  ;;  %v4811_v53 = vpop.f32.mrb[197].mxu1  ;;  %v5197_v5 = vpop.f32.mrb[69].mxu0 }
 0x709   : > { %8502 = vpow2.f32 %v5739_v10  ;;  %v4812_v18 = vadd.f32 %v4811_v53, %v10955_v27  ;;  %v5198_v38 = vadd.f32 %v5197_v5, %v10957_v34  ;;  %v4813_v41 = vpop.f32.mrb[198].mxu1  ;;  %v5199_v42 = vpop.f32.mrb[70].mxu0 }
 0x70a   : > { %8504 = vpow2.f32 %v5743_v37  ;;  %v5519_v45 = vsub.f32 0.0, %v4810_v4  ;;  %v5523_v49 = vsub.f32 0.0, %v5196_v51  ;;  %v4814_v61 = vadd.f32 %v4813_v41, %v10949_v20  ;;  %v4815_v52 = vpop.f32.mrb[199].mxu1  ;;  %v5201_v0 = vpop.f32.mrb[71].mxu0 }
 0x70b   : > { %8506 = vpow2.f32 %v5751_v24  ;;  %v5520_v3 = vsub.f32 0.0, %v4812_v18  ;;  %v5524_v60 = vsub.f32 0.0, %v5198_v38  ;;  %v5200_v58 = vadd.f32 %v5199_v42, %v10951_v23 }
 0x70c   : > { %8508 = vpow2.f32 %v5745_v46  ;;  %v5757_v8 = vmul.f32 1.442695, %v5519_v45  ;;  %v5765_v12 = vmul.f32 1.442695, %v5523_v49  ;;  %v5526_v54 = vsub.f32 0.0, %v4814_v61  ;;  %5111 = vmatmul.mubr.bf16.gmra.mrb[48].mxu1 %v10850_v29 }
 0x70d   : > { %8510 = vpow2.f32 %v5753_v6  ;;  %v5759_v22 = vmul.f32 1.442695, %v5520_v3  ;;  %v5767_v28 = vmul.f32 1.442695, %v5524_v60  ;;  %5120 = vmatprep.mubr.bf16.mxu1 %v10864_v13  ;;  %v4816_v37 = vadd.f32 %v4815_v52, %v10955_v27 }
 0x70e   : > { %8512 = vpow2.f32 %v5757_v8  ;;  %v5771_v31 = vmul.f32 1.442695, %v5526_v54  ;;  %v5530_v53 = vsub.f32 0.0, %v5200_v58  ;;  %v5202_v18 = vadd.f32 %v5201_v0, %v10957_v34 }
 0x70f   : > { %8514 = vpow2.f32 %v5765_v12  ;;  %v4819_v32 = vpop.f32.mrb[200].mxu1  ;;  %v5205_v36 = vpop.f32.mrb[72].mxu0  ;;  %v5527_v42 = vsub.f32 0.0, %v4816_v37 }
 0x710   : > { %v8497_v43 = vpop.eup %8496  ;;  %8516 = vpow2.f32 %v5759_v22  ;;  %v4821_v63 = vpop.f32.mrb[201].mxu1  ;;  %v4820_v61 = vadd.f32 %v4819_v32, %v10949_v20  ;;  %v5779_v12 = vmul.f32 1.442695, %v5530_v53  ;;  %v5206_v0 = vadd.f32 %v5205_v36, %v10951_v23 }
 0x711   : > { %v5207_v1 = vpop.f32.mrb[73].mxu0  ;;  %v8499_v30 = vpop.eup %8498  ;;  %v6177_v33 = vadd.f32 1.0, %v8497_v43  ;;  %8518 = vpow2.f32 %v5767_v28  ;;  %v5531_v43 = vsub.f32 0.0, %v5202_v18  ;;  %v4822_v58 = vadd.f32 %v4821_v63, %v10955_v27 }
 0x712   : > { %v4823_v9 = vpop.f32.mrb[202].mxu1  ;;  %v5209_v10 = vpop.f32.mrb[74].mxu0  ;;  %v6181_v25 = vadd.f32 1.0, %v8499_v30  ;;  %8520 = vpow2.f32 %v5771_v31  ;;  %v5208_v36 = vadd.f32 %v5207_v1, %v10957_v34  ;;  %v5537_v1 = vsub.f32 0.0, %v5206_v0 }
 0x713   : > { %v8501_v21 = vpop.eup %8500  ;;  %v10978_v24 = vpop.f32.mrb[203].mxu1  ;;  %8522 = vrcp.f32 %v6177_v33 }
 0x714   : > { %v8503_v39 = vpop.eup %8502  ;;  %v6178_v26 = vadd.f32 1.0, %v8501_v21  ;;  %v10980_v46 = vpop.f32.mrb[75].mxu0  ;;  %8524 = vrcp.f32 %v6181_v25  ;;  %5121 = vmatmul.mubr.bf16.gmra.mrb[52].mxu1 %v10862_v11  ;;  %v5773_v25 = vmul.f32 1.442695, %v5527_v42  ;;  %v4826_v42 = vadd.f32 %v10978_v24, %v10955_v27 }
 0x715   : > { %v8505_v4 = vpop.eup %8504  ;;  %v6182_v51 = vadd.f32 1.0, %v8503_v39  ;;  %5130 = vmatprep.mubr.bf16.mxu1 %v10876_v2 }
 0x716   : > { %v8507_v5 = vpop.eup %8506  ;;  %8526 = vrcp.f32 %v6178_v26  ;;  %v6184_v6 = vadd.f32 1.0, %v8505_v4  ;;  %v5533_v4 = vsub.f32 0.0, %v4820_v61 }
 0x717   : > { %v8509_v38 = vpop.eup %8508  ;;  %8528 = vrcp.f32 %v6182_v51  ;;  %v6188_v41 = vadd.f32 1.0, %v8507_v5  ;;  %v4829_v52 = vpop.f32.mrb[204].mxu1  ;;  %v4824_v51 = vadd.f32 %v4823_v9, %v10949_v20 }
 0x718   : > { %v8511_v45 = vpop.eup %8510  ;;  %8530 = vrcp.f32 %v6184_v6  ;;  %v6185_v49 = vadd.f32 1.0, %v8509_v38  ;;  %v5215_v3 = vpop.f32.mrb[76].mxu0  ;;  %v5210_v6 = vadd.f32 %v5209_v10, %v10951_v23  ;;  %v5212_v10 = vadd.f32 %v10980_v46, %v10957_v34 }
 0x719   : > { %v8513_v60 = vpop.eup %8512  ;;  %8532 = vrcp.f32 %v6188_v41  ;;  %v6189_v8 = vadd.f32 1.0, %v8511_v45  ;;  %v10988_v54 = vpop.f32.mrb[205].mxu1  ;;  %v5534_v41 = vsub.f32 0.0, %v4822_v58  ;;  %v5781_v45 = vmul.f32 1.442695, %v5531_v43 }
 0x71a   : > { %v10990_v22 = vpop.f32.mrb[77].mxu0  ;;  %v8515_v28 = vpop.eup %8514  ;;  %8534 = vrcp.f32 %v6185_v49  ;;  %v6191_v31 = vadd.f32 1.0, %v8513_v60  ;;  %v5538_v49 = vsub.f32 0.0, %v5208_v36  ;;  %v5785_v60 = vmul.f32 1.442695, %v5533_v4 }
 0x71b   : > { %v10993_v30 = vpop.f32.mrb[206].mxu1  ;;  %v10995_v32 = vpop.f32.mrb[78].mxu0  ;;  %8536 = vrcp.f32 %v6189_v8  ;;  %v6195_v21 = vadd.f32 1.0, %v8515_v28  ;;  %v5540_v8 = vsub.f32 0.0, %v4824_v51  ;;  %v4830_v0 = vadd.f32 %v4829_v52, %v10949_v20 }
 0x71c   : > { %v8517_v33 = vpop.eup %8516  ;;  %v10998_v37 = vpop.f32.mrb[207].mxu1  ;;  %8538 = vrcp.f32 %v6191_v31  ;;  %5131 = vmatmul.mubr.bf16.gmra.mrb[56].mxu1 %v10874_v57  ;;  %v5793_v43 = vmul.f32 1.442695, %v5537_v1  ;;  %v5544_v58 = vsub.f32 0.0, %v5210_v6  ;;  %v5216_v46 = vadd.f32 %v5215_v3, %v10951_v23 }
 0x71d   : > { %v11000_v39 = vpop.f32.mrb[79].mxu0  ;;  %v8519_v26 = vpop.eup %8518  ;;  %v6192_v63 = vadd.f32 1.0, %v8517_v33  ;;  %8540 = vrcp.f32 %v6195_v21  ;;  %5140 = vmatprep.mubr.bf16.mxu1 %v10888_v62  ;;  %v5787_v52 = vmul.f32 1.442695, %v5534_v41  ;;  %v5545_v51 = vsub.f32 0.0, %v5212_v10 }
 0x71e   : > { %v8521_v53 = vpop.eup %8520  ;;  %v6196_v5 = vadd.f32 1.0, %v8519_v26  ;;  %v5541_v26 = vsub.f32 0.0, %v4826_v42  ;;  %v5547_v1 = vsub.f32 0.0, %v4830_v0  ;;  %v5551_v41 = vsub.f32 0.0, %v5216_v46 }
 0x71f   : > { %v8523_v18 = vpop.eup %8522  ;;  %8542 = vrcp.f32 %v6192_v63  ;;  %v6198_v38 = vadd.f32 1.0, %v8521_v53  ;;  %v11018_v24 = vpop.f32.mrb[208].mxu1 }
 0x720   : > { %v8525_v9 = vpop.eup %8524  ;;  %6625 = vst [vmem:[%s11005_s28] sm:$0xff] %v8523_v18  ;;  %8544 = vrcp.f32 %v6196_v5  ;;  %v11020_v28 = vpop.f32.mrb[80].mxu0  ;;  %v5799_v5 = vmul.f32 1.442695, %v5540_v8  ;;  %v5821_v0 = vmul.f32 1.442695, %v5551_v41 }
 0x721   : > { %v8527_v61 = vpop.eup %8526  ;;  %6629 = vst [vmem:[%s11005_s28 + $0x20] sm:$0xff] %v8525_v9  ;;  %8546 = vrcp.f32 %v6198_v38  ;;  %v11024_v33 = vpop.f32.mrb[209].mxu1  ;;  %v5807_v38 = vmul.f32 1.442695, %v5544_v58  ;;  %v5801_v9 = vmul.f32 1.442695, %v5541_v26 }
 0x722   : > { %v8529_v31 = vpop.eup %8528  ;;  %6626 = vst [vmem:[%s11005_s28 + $0x8] sm:$0xff] %v8527_v61  ;;  %8548 = vpow2.f32 %v5779_v12  ;;  %v11026_v21 = vpop.f32.mrb[81].mxu0  ;;  %v5795_v12 = vmul.f32 1.442695, %v5538_v49  ;;  %v5809_v49 = vmul.f32 1.442695, %v5545_v51 }
 0x723   : > { %v8531_v36 = vpop.eup %8530  ;;  %6630 = vst [vmem:[%s11005_s28 + $0x28] sm:$0xff] %v8529_v31  ;;  %8550 = vpow2.f32 %v5773_v25  ;;  %v11029_v63 = vpop.f32.mrb[210].mxu1  ;;  %v5813_v61 = vmul.f32 1.442695, %v5547_v1 }
 0x724   : > { %v8533_v4 = vpop.eup %8532  ;;  %6632 = vst [vmem:[%s11005_s28 + $0x38] sm:$0xff] %v8531_v36  ;;  %8552 = vpow2.f32 %v5781_v45  ;;  %v11032_v3 = vpop.f32.mrb[82].mxu0  ;;  %5141 = vmatmul.mubr.bf16.gmra.mrb[60].mxu1 %v10886_v56 }
 0x725   : > { %v8535_v53 = vpop.eup %8534  ;;  %6636 = vst [vmem:[%s11005_s28 + $0x58] sm:$0xff] %v8533_v4  ;;  %8554 = vpow2.f32 %v5785_v60  ;;  %v11035_v25 = vpop.f32.mrb[211].mxu1  ;;  %5424 = vmatprep.mubr.bf16.mxu1 %v10758_v19 }
 0x726   : > { %v11037_v6 = vpop.f32.mrb[83].mxu0  ;;  %v8537_v18 = vpop.eup %8536  ;;  %6633 = vst [vmem:[%s11005_s28 + $0x40] sm:$0xff] %v8535_v53  ;;  %8556 = vpow2.f32 %v5793_v43 }
 0x727   : > { %v8539_v42 = vpop.eup %8538  ;;  %6637 = vst [vmem:[%s11005_s28 + $0x60] sm:$0xff] %v8537_v18  ;;  %8558 = vpow2.f32 %v5787_v52  ;;  %v11045_v60 = vpop.f32.mrb[212].mxu1  ;;  %v5218_v18 = vadd.f32 %v10990_v22, %v10957_v34 }
 0x728   : > { %v8541_v45 = vpop.eup %8540  ;;  %6639 = vst [vmem:[%s11005_s28 + $0x70] sm:$0xff] %v8539_v42  ;;  %8560 = vpow2.f32 %v5795_v12  ;;  %v11048_v31 = vpop.f32.mrb[84].mxu0  ;;  %v4832_v12 = vadd.f32 %v10988_v54, %v10955_v27 }
 0x729   : > { %v8543_v10 = vpop.eup %8542  ;;  %6643 = vst [vmem:[%s11005_s28 + $0x90] sm:$0xff] %v8541_v45  ;;  %8562 = vpow2.f32 %v5799_v5  ;;  %v11051_v19 = vpop.f32.mrb[213].mxu1 }
 0x72a   : > { %v8545_v8 = vpop.eup %8544  ;;  %6640 = vst [vmem:[%s11005_s28 + $0x78] sm:$0xff] %v8543_v10  ;;  %8564 = vpow2.f32 %v5807_v38  ;;  %v11053_v58 = vpop.f32.mrb[85].mxu0  ;;  %v5548_v10 = vsub.f32 0.0, %v4832_v12 }
 0x72b   : > { %v8547_v43 = vpop.eup %8546  ;;  %6644 = vst [vmem:[%s11005_s28 + $0x98] sm:$0xff] %v8545_v8  ;;  %8566 = vpow2.f32 %v5801_v9  ;;  %v11056_v36 = vpop.f32.mrb[214].mxu1  ;;  %v4834_v9 = vadd.f32 %v10993_v30, %v10949_v20  ;;  %v5220_v30 = vadd.f32 %v10995_v32, %v10951_v23  ;;  %v5222_v32 = vadd.f32 %v11000_v39, %v10957_v34 }
 0x72c   : > { %v8549_v46 = vpop.eup %8548  ;;  %6646 = vst [vmem:[%s11005_s28 + $0xa8] sm:$0xff] %v8547_v43  ;;  %8568 = vpow2.f32 %v5809_v49  ;;  %v11058_v52 = vpop.f32.mrb[86].mxu0  ;;  %5425 = vmatmul.mubr.bf16.vlgmr.msra.gmra.mrb[64].mxu1 %v10756_v7 }
 0x72d   : > { %v8551_v26 = vpop.eup %8550  ;;  %v6202_v4 = vadd.f32 1.0, %v8549_v46  ;;  %8570 = vpow2.f32 %v5813_v61  ;;  %v11062_v51 = vpop.f32.mrb[215].mxu1  ;;  %5432 = vmatprep.mubr.bf16.mxu1 %v10782_v44  ;;  %v5558_v56 = vsub.f32 0.0, %v5220_v30  ;;  %v5228_v30 = vadd.f32 %v11026_v21, %v10957_v34 }
 0x72e   : > { %v11064_v53 = vpop.f32.mrb[87].mxu0  ;;  %v8553_v5 = vpop.eup %8552  ;;  %v6199_v1 = vadd.f32 1.0, %v8551_v26  ;;  %8572 = vpow2.f32 %v5821_v0  ;;  %v5552_v0 = vsub.f32 0.0, %v5218_v18  ;;  %v4836_v18 = vadd.f32 %v10998_v37, %v10955_v27 }
 0x72f   : > { %v8555_v38 = vpop.eup %8554  ;;  %8574 = vrcp.f32 %v6202_v4  ;;  %v6203_v41 = vadd.f32 1.0, %v8553_v5  ;;  %v11072_v61 = vpop.f32.mrb[216].mxu1  ;;  %v5835_v21 = vmul.f32 1.442695, %v5558_v56 }
 0x730   : > { %v8557_v42 = vpop.eup %8556  ;;  %8576 = vrcp.f32 %v6199_v1  ;;  %v6205_v54 = vadd.f32 1.0, %v8555_v38  ;;  %v11074_v22 = vpop.f32.mrb[88].mxu0  ;;  %v5554_v38 = vsub.f32 0.0, %v4834_v9  ;;  %v4840_v9 = vadd.f32 %v11018_v24, %v10949_v20 }
 0x731   : > { %v8559_v45 = vpop.eup %8558  ;;  %8578 = vrcp.f32 %v6203_v41  ;;  %v6209_v49 = vadd.f32 1.0, %v8557_v42  ;;  %v11076_v43 = vpop.f32.mrb[217].mxu1 }
 0x732   : > { %v8561_v7 = vpop.eup %8560  ;;  %8580 = vrcp.f32 %v6205_v54  ;;  %v6206_v8 = vadd.f32 1.0, %v8559_v45  ;;  %v11078_v44 = vpop.f32.mrb[89].mxu0 }
 0x733   : > { %v8563_v46 = vpop.eup %8562  ;;  %8582 = vrcp.f32 %v6209_v49  ;;  %v6210_v26 = vadd.f32 1.0, %v8561_v7  ;;  %v11082_v4 = vpop.f32.mrb[218].mxu1  ;;  %v5815_v49 = vmul.f32 1.442695, %v5548_v10  ;;  %v5226_v10 = vadd.f32 %v11020_v28, %v10951_v23 }
 0x734   : > { %v11084_v12 = vpop.f32.mrb[90].mxu0  ;;  %v8565_v5 = vpop.eup %8564  ;;  %8584 = vrcp.f32 %v6206_v8  ;;  %v6212_v1 = vadd.f32 1.0, %v8563_v46  ;;  %v5823_v8 = vmul.f32 1.442695, %v5552_v0  ;;  %5433 = vmatmul.mubr.bf16.gmra.mrb[68].mxu1 %v10780_v40  ;;  %v4842_v0 = vadd.f32 %v11024_v33, %v10955_v27 }
 0x735   : > { %v11088_v41 = vpop.f32.mrb[219].mxu1  ;;  %v11090_v42 = vpop.f32.mrb[91].mxu0  ;;  %8586 = vrcp.f32 %v6210_v26  ;;  %v6216_v45 = vadd.f32 1.0, %v8565_v5  ;;  %5440 = vmatprep.mubr.bf16.mxu1 %v10803_v15  ;;  %v5555_v5 = vsub.f32 0.0, %v4836_v18  ;;  %v5561_v18 = vsub.f32 0.0, %v4840_v9 }
 0x736   : > { %v8567_v54 = vpop.eup %8566  ;;  %8588 = vrcp.f32 %v6212_v1  ;;  %v5559_v1 = vsub.f32 0.0, %v5222_v32  ;;  %v4844_v33 = vadd.f32 %v11029_v63, %v10949_v20 }
 0x737   : > { %v8569_v7 = vpop.eup %8568  ;;  %v6213_v50 = vadd.f32 1.0, %v8567_v54  ;;  %8590 = vrcp.f32 %v6216_v45  ;;  %v11104_v54 = vpop.f32.mrb[220].mxu1  ;;  %v5829_v63 = vmul.f32 1.442695, %v5555_v5 }
 0x738   : > { %v8571_v37 = vpop.eup %8570  ;;  %v6217_v46 = vadd.f32 1.0, %v8569_v7  ;;  %v11106_v28 = vpop.f32.mrb[92].mxu0  ;;  %v5568_v5 = vsub.f32 0.0, %v4844_v33 }
 0x739   : > { %v8573_v39 = vpop.eup %8572  ;;  %8592 = vrcp.f32 %v6213_v50  ;;  %v6219_v26 = vadd.f32 1.0, %v8571_v37  ;;  %v5827_v50 = vmul.f32 1.442695, %v5554_v38  ;;  %v11111_v45 = vpop.f32.mrb[221].mxu1  ;;  %v5565_v37 = vsub.f32 0.0, %v5226_v10 }
 0x73a   : > { %v8575_v24 = vpop.eup %8574  ;;  %8594 = vrcp.f32 %v6217_v46  ;;  %v6223_v40 = vadd.f32 1.0, %v8573_v39  ;;  %v11113_v7 = vpop.f32.mrb[93].mxu0  ;;  %v5230_v46 = vadd.f32 %v11032_v3, %v10951_v23  ;;  %v5837_v3 = vmul.f32 1.442695, %v5559_v1 }
 0x73b   : > { %v8577_v15 = vpop.eup %8576  ;;  %6650 = vst [vmem:[%s11005_s28 + $0xc8] sm:$0xff] %v8575_v24  ;;  %8596 = vrcp.f32 %v6219_v26  ;;  %v11118_v39 = vpop.f32.mrb[222].mxu1  ;;  %v5562_v26 = vsub.f32 0.0, %v4842_v0  ;;  %v4846_v24 = vadd.f32 %v11035_v25, %v10955_v27  ;;  %v5566_v10 = vsub.f32 0.0, %v5228_v30 }
 0x73c   : > { %v8579_v32 = vpop.eup %8578  ;;  %6647 = vst [vmem:[%s11005_s28 + $0xb0] sm:$0xff] %v8577_v15  ;;  %8598 = vrcp.f32 %v6223_v40  ;;  %v11120_v38 = vpop.f32.mrb[94].mxu0  ;;  %5441 = vmatmul.mubr.bf16.gmra.mrb[72].mxu1 %v10801_v14  ;;  %v5849_v25 = vmul.f32 1.442695, %v5565_v37 }
 0x73d   : > { %v8581_v9 = vpop.eup %8580  ;;  %6651 = vst [vmem:[%s11005_s28 + $0xd0] sm:$0xff] %v8579_v32  ;;  %8600 = vpow2.f32 %v5815_v49  ;;  %v11125_v40 = vpop.f32.mrb[223].mxu1  ;;  %v5841_v49 = vmul.f32 1.442695, %v5561_v18  ;;  %v5572_v32 = vsub.f32 0.0, %v5230_v46  ;;  %5448 = vmatprep.mubr.bf16.mxu1 %v10816_v48  ;;  %v5569_v30 = vsub.f32 0.0, %v4846_v24 }
 0x73e   : > { %v8583_v56 = vpop.eup %8582  ;;  %6653 = vst [vmem:[%s11005_s28 + $0xe0] sm:$0xff] %v8581_v9  ;;  %8602 = vpow2.f32 %v5823_v8  ;;  %v11128_v15 = vpop.f32.mrb[95].mxu0  ;;  %v5843_v1 = vmul.f32 1.442695, %v5562_v26  ;;  %v5851_v18 = vmul.f32 1.442695, %v5566_v10 }
 0x73f   : > { %v8585_v62 = vpop.eup %8584  ;;  %6657 = vst [vmem:[%s11005_s28 + $0x100] sm:$0xff] %v8583_v56  ;;  %8604 = vpow2.f32 %v5827_v50  ;;  %v11136_v14 = vpop.f32.mrb[224].mxu1  ;;  %v5855_v48 = vmul.f32 1.442695, %v5568_v5  ;;  %v5863_v46 = vmul.f32 1.442695, %v5572_v32 }
 0x740   : > { %v8587_v0 = vpop.eup %8586  ;;  %6654 = vst [vmem:[%s11005_s28 + $0xe8] sm:$0xff] %v8585_v62  ;;  %8606 = vpow2.f32 %v5835_v21  ;;  %v11138_v62 = vpop.f32.mrb[96].mxu0  ;;  %v5857_v24 = vmul.f32 1.442695, %v5569_v30 }
 0x741   : > { %v8589_v8 = vpop.eup %8588  ;;  %6658 = vst [vmem:[%s11005_s28 + $0x108] sm:$0xff] %v8587_v0  ;;  %8608 = vpow2.f32 %v5829_v63  ;;  %v11141_v21 = vpop.f32.mrb[225].mxu1  ;;  %v5232_v0 = vadd.f32 %v11037_v6, %v10957_v34 }
 0x742   : > { %v8591_v50 = vpop.eup %8590  ;;  %6660 = vst [vmem:[%s11005_s28 + $0x118] sm:$0xff] %v8589_v8  ;;  %8610 = vpow2.f32 %v5837_v3  ;;  %v11144_v9 = vpop.f32.mrb[97].mxu0 }
 0x743   : > { %v8593_v33 = vpop.eup %8592  ;;  %6664 = vst [vmem:[%s11005_s28 + $0x138] sm:$0xff] %v8591_v50  ;;  %8612 = vpow2.f32 %v5841_v49  ;;  %v11146_v63 = vpop.f32.mrb[226].mxu1 }
 0x744   : > { %v8595_v37 = vpop.eup %8594  ;;  %6661 = vst [vmem:[%s11005_s28 + $0x120] sm:$0xff] %v8593_v33  ;;  %8614 = vpow2.f32 %v5849_v25  ;;  %v11149_v56 = vpop.f32.mrb[98].mxu0  ;;  %5449 = vmatmul.mubr.bf16.gmra.mrb[76].mxu1 %v10814_v47  ;;  %v4850_v47 = vadd.f32 %v11045_v60, %v10949_v20  ;;  %v4852_v60 = vadd.f32 %v11051_v19, %v10955_v27 }
 0x745   : > { %v8597_v26 = vpop.eup %8596  ;;  %6665 = vst [vmem:[%s11005_s28 + $0x140] sm:$0xff] %v8595_v37  ;;  %8616 = vpow2.f32 %v5843_v1  ;;  %v11151_v3 = vpop.f32.mrb[227].mxu1  ;;  %5456 = vmatprep.mubr.bf16.mxu1 %v10828_v17  ;;  %v5573_v37 = vsub.f32 0.0, %v5232_v0 }
 0x746   : > { %v8599_v10 = vpop.eup %8598  ;;  %6667 = vst [vmem:[%s11005_s28 + $0x150] sm:$0xff] %v8597_v26  ;;  %8618 = vpow2.f32 %v5851_v18  ;;  %v11154_v49 = vpop.f32.mrb[99].mxu0 }
 0x747   : > { %v8601_v5 = vpop.eup %8600  ;;  %6671 = vst [vmem:[%s11005_s28 + $0x170] sm:$0xff] %v8599_v10  ;;  %8620 = vpow2.f32 %v5855_v48  ;;  %v11161_v18 = vpop.f32.mrb[228].mxu1  ;;  %v5236_v10 = vadd.f32 %v11048_v31, %v10951_v23  ;;  %v5238_v31 = vadd.f32 %v11053_v58, %v10957_v34  ;;  %v5576_v58 = vsub.f32 0.0, %v4852_v60 }
 0x748   : > { %v8603_v25 = vpop.eup %8602  ;;  %v6220_v32 = vadd.f32 1.0, %v8601_v5  ;;  %8622 = vpow2.f32 %v5863_v46  ;;  %v11163_v33 = vpop.f32.mrb[100].mxu0  ;;  %v5242_v60 = vadd.f32 %v11064_v53, %v10957_v34 }
 0x749   : > { %v8605_v8 = vpop.eup %8604  ;;  %v6224_v1 = vadd.f32 1.0, %v8603_v25  ;;  %8624 = vpow2.f32 %v5857_v24  ;;  %v11167_v46 = vpop.f32.mrb[229].mxu1 }
 0x74a   : > { %v8607_v30 = vpop.eup %8606  ;;  %8626 = vrcp.f32 %v6220_v32  ;;  %v6226_v50 = vadd.f32 1.0, %v8605_v8  ;;  %v11169_v17 = vpop.f32.mrb[101].mxu0 }
 0x74b   : > { %v8609_v48 = vpop.eup %8608  ;;  %8628 = vrcp.f32 %v6224_v1  ;;  %v6230_v6 = vadd.f32 1.0, %v8607_v30  ;;  %12140 = vst [vmem:[#allocation5_spill] sm:$0xff] %v11169_v17  ;;  %v11173_v5 = vpop.f32.mrb[230].mxu1  ;;  %v5575_v17 = vsub.f32 0.0, %v4850_v47 }
 0x74c   : > { %v8611_v26 = vpop.eup %8610  ;;  %8630 = vrcp.f32 %v6226_v50  ;;  %v6227_v24 = vadd.f32 1.0, %v8609_v48  ;;  %12141 = vst [vmem:[#allocation6_spill] sm:$0xff] %v11173_v5  ;;  %v11175_v25 = vpop.f32.mrb[102].mxu0  ;;  %5457 = vmatmul.mubr.bf16.gmra.mrb[80].mxu1 %v10826_v16  ;;  %v5580_v16 = vsub.f32 0.0, %v5238_v31 }
 0x74d   : > { %12142 = vst [vmem:[#allocation7_spill] sm:$0xff] %v11175_v25  ;;  %v8613_v32 = vpop.eup %8612  ;;  %8632 = vrcp.f32 %v6230_v6  ;;  %v6231_v0 = vadd.f32 1.0, %v8611_v26  ;;  %v11179_v8 = vpop.f32.mrb[231].mxu1  ;;  %v5865_v25 = vmul.f32 1.442695, %v5573_v37  ;;  %v5579_v26 = vsub.f32 0.0, %v5236_v10  ;;  %5464 = vmatprep.mubr.bf16.mxu1 %v10840_v59 }
 0x74e   : > { %v11181_v1 = vpop.f32.mrb[103].mxu0  ;;  %v8615_v30 = vpop.eup %8614  ;;  %8634 = vrcp.f32 %v6227_v24  ;;  %v6233_v50 = vadd.f32 1.0, %v8613_v32 }
 0x74f   : > { %12143 = vst [vmem:[#allocation8_spill] sm:$0xff] %v11181_v1  ;;  %v8617_v48 = vpop.eup %8616  ;;  %8636 = vrcp.f32 %v6231_v0  ;;  %v6237_v5 = vadd.f32 1.0, %v8615_v30  ;;  %v4854_v1 = vadd.f32 %v11056_v36, %v10949_v20  ;;  %v5240_v0 = vadd.f32 %v11058_v52, %v10951_v23  ;;  %v11193_v10 = vpop.f32.mrb[232].mxu1 }
 0x750   : > { %v8619_v6 = vpop.eup %8618  ;;  %8638 = vrcp.f32 %v6233_v50  ;;  %v6234_v19 = vadd.f32 1.0, %v8617_v48  ;;  %v4856_v30 = vadd.f32 %v11062_v51, %v10955_v27  ;;  %v11195_v50 = vpop.f32.mrb[104].mxu0  ;;  %v5877_v53 = vmul.f32 1.442695, %v5579_v26 }
 0x751   : > { %v8621_v24 = vpop.eup %8620  ;;  %8640 = vrcp.f32 %v6237_v5  ;;  %v6238_v32 = vadd.f32 1.0, %v8619_v6  ;;  %v5869_v5 = vmul.f32 1.442695, %v5575_v17  ;;  %v11199_v52 = vpop.f32.mrb[233].mxu1  ;;  %v5582_v6 = vsub.f32 0.0, %v4854_v1 }
 0x752   : > { %v8623_v37 = vpop.eup %8622  ;;  %8642 = vrcp.f32 %v6234_v19  ;;  %v6240_v47 = vadd.f32 1.0, %v8621_v24  ;;  %12144 = vst [vmem:[#allocation9_spill] sm:$0xff] %v11199_v52  ;;  %v11201_v48 = vpop.f32.mrb[105].mxu0  ;;  %v4860_v19 = vadd.f32 %v11072_v61, %v10949_v20  ;;  %v5871_v61 = vmul.f32 1.442695, %v5576_v58 }
 0x753   : > { %v8625_v59 = vpop.eup %8624  ;;  %8644 = vrcp.f32 %v6238_v32  ;;  %v6244_v36 = vadd.f32 1.0, %v8623_v37  ;;  %12145 = vst [vmem:[#allocation10_spill] sm:$0xff] %v11201_v48  ;;  %v11205_v24 = vpop.f32.mrb[234].mxu1  ;;  %v5586_v37 = vsub.f32 0.0, %v5240_v0  ;;  %v5246_v48 = vadd.f32 %v11074_v22, %v10951_v23 }
 0x754   : > { %v8627_v31 = vpop.eup %8626  ;;  %8646 = vrcp.f32 %v6240_v47  ;;  %v6241_v51 = vadd.f32 1.0, %v8625_v59  ;;  %v11207_v32 = vpop.f32.mrb[106].mxu0  ;;  %v5583_v59 = vsub.f32 0.0, %v4856_v30  ;;  %v5879_v26 = vmul.f32 1.442695, %v5580_v16  ;;  %5465 = vmatmul.mubr.bf16.gmra.mrb[84].mxu1 %v10838_v55 }
 0x755   : > { %v8629_v17 = vpop.eup %8628  ;;  %6668 = vst [vmem:[%s11005_s28 + $0x158] sm:$0xff] %v8627_v31  ;;  %8648 = vrcp.f32 %v6244_v36  ;;  %v11212_v52 = vpop.f32.mrb[235].mxu1  ;;  %v4862_v31 = vadd.f32 %v11076_v43, %v10955_v27  ;;  %v5587_v22 = vsub.f32 0.0, %v5242_v60  ;;  %v5248_v0 = vadd.f32 %v11078_v44, %v10957_v34  ;;  %5472 = vmatprep.mubr.bf16.mxu1 %v10852_v35 }
 0x756   : > { %v11214_v1 = vpop.f32.mrb[107].mxu0  ;;  %v8631_v47 = vpop.eup %8630  ;;  %6672 = vst [vmem:[%s11005_s28 + $0x178] sm:$0xff] %v8629_v17  ;;  %8650 = vrcp.f32 %v6241_v51  ;;  %v5883_v58 = vmul.f32 1.442695, %v5582_v6  ;;  %v5589_v30 = vsub.f32 0.0, %v4860_v19  ;;  %v5593_v16 = vsub.f32 0.0, %v5246_v48 }
 0x757   : > { %12146 = vst [vmem:[#allocation11_spill] sm:$0xff] %v11214_v1  ;;  %v8633_v36 = vpop.eup %8632  ;;  %6674 = vst [vmem:[%s11005_s28 + $0x188] sm:$0xff] %v8631_v47  ;;  %8652 = vpow2.f32 %v5865_v25  ;;  %v5891_v25 = vmul.f32 1.442695, %v5586_v37  ;;  %v5885_v44 = vmul.f32 1.442695, %v5583_v59 }
 0x758   : > { %v8635_v1 = vpop.eup %8634  ;;  %6678 = vst [vmem:[%s11005_s28 + $0x1a8] sm:$0xff] %v8633_v36  ;;  %8654 = vpow2.f32 %v5869_v5  ;;  %v5590_v51 = vsub.f32 0.0, %v4862_v31  ;;  %v11227_v55 = vpop.f32.mrb[236].mxu1  ;;  %v5893_v35 = vmul.f32 1.442695, %v5587_v22  ;;  %v5594_v19 = vsub.f32 0.0, %v5248_v0 }
 0x759   : > { %v8637_v43 = vpop.eup %8636  ;;  %6675 = vst [vmem:[%s11005_s28 + $0x190] sm:$0xff] %v8635_v1  ;;  %8656 = vpow2.f32 %v5877_v53  ;;  %v11229_v5 = vpop.f32.mrb[108].mxu0  ;;  %v5897_v37 = vmul.f32 1.442695, %v5589_v30  ;;  %v5905_v59 = vmul.f32 1.442695, %v5593_v16 }
 0x75a   : > { %v8639_v60 = vpop.eup %8638  ;;  %6679 = vst [vmem:[%s11005_s28 + $0x1b0] sm:$0xff] %v8637_v43  ;;  %8658 = vpow2.f32 %v5871_v61  ;;  %v11232_v17 = vpop.f32.mrb[237].mxu1  ;;  %v5899_v22 = vmul.f32 1.442695, %v5590_v51 }
 0x75b   : > { %v8641_v6 = vpop.eup %8640  ;;  %6681 = vst [vmem:[%s11005_s28 + $0x1c0] sm:$0xff] %v8639_v60  ;;  %8660 = vpow2.f32 %v5879_v26  ;;  %v11234_v48 = vpop.f32.mrb[109].mxu0 }
 0x75c   : > { %v8643_v53 = vpop.eup %8642  ;;  %6685 = vst [vmem:[%s11005_s28 + $0x1e0] sm:$0xff] %v8641_v6  ;;  %8662 = vpow2.f32 %v5883_v58  ;;  %v11237_v1 = vpop.f32.mrb[238].mxu1  ;;  %v5907_v58 = vmul.f32 1.442695, %v5594_v19  ;;  %5473 = vmatmul.mubr.bf16.gmra.mrb[88].mxu1 %v10850_v29 }
 0x75d   : > { %v11239_v47 = vpop.f32.mrb[110].mxu0  ;;  %v8645_v61 = vpop.eup %8644  ;;  %6682 = vst [vmem:[%s11005_s28 + $0x1c8] sm:$0xff] %v8643_v53  ;;  %8664 = vpow2.f32 %v5891_v25  ;;  %5480 = vmatprep.mubr.bf16.mxu1 %v10864_v13  ;;  %v4864_v25 = vadd.f32 %v11082_v4, %v10949_v20 }
 0x75e   : > { %v11242_v31 = vpop.f32.mrb[239].mxu1  ;;  %v11244_v36 = vpop.f32.mrb[111].mxu0  ;;  %6686 = vst [vmem:[%s11005_s28 + $0x1e8] sm:$0xff] %v8645_v61  ;;  %8666 = vpow2.f32 %v5885_v44  ;;  %v5250_v44 = vadd.f32 %v11084_v12, %v10951_v23 }
 0x75f   : > { %v8647_v26 = vpop.eup %8646  ;;  %8668 = vpow2.f32 %v5893_v35  ;;  %v11256_v51 = vpop.f32.mrb[240].mxu1 }
 0x760   : > { %v8649_v0 = vpop.eup %8648  ;;  %6688 = vst [vmem:[%s11005_s28 + $0x1f8] sm:$0xff] %v8647_v26  ;;  %8670 = vpow2.f32 %v5897_v37  ;;  %v11258_v29 = vpop.f32.mrb[112].mxu0  ;;  %v5596_v26 = vsub.f32 0.0, %v4864_v25  ;;  %v5252_v25 = vadd.f32 %v11090_v42, %v10957_v34 }
 0x761   : > { %v8651_v30 = vpop.eup %8650  ;;  %6692 = vst [vmem:[%s11005_s28 + $0x218] sm:$0xff] %v8649_v0  ;;  %8672 = vpow2.f32 %v5905_v59  ;;  %v11260_v13 = vpop.f32.mrb[241].mxu1 }
 0x762   : > { %v8653_v43 = vpop.eup %8652  ;;  %6689 = vst [vmem:[%s11005_s28 + $0x200] sm:$0xff] %v8651_v30  ;;  %8674 = vpow2.f32 %v5899_v22  ;;  %v11262_v19 = vpop.f32.mrb[113].mxu0 }
 0x763   : > { %v8655_v16 = vpop.eup %8654  ;;  %v6245_v60 = vadd.f32 1.0, %v8653_v43  ;;  %8676 = vpow2.f32 %v5907_v58  ;;  %v11264_v37 = vpop.f32.mrb[242].mxu1  ;;  %v5600_v43 = vsub.f32 0.0, %v5250_v44  ;;  %v5911_v44 = vmul.f32 1.442695, %v5596_v26 }
 0x764   : > { %v8657_v6 = vpop.eup %8656  ;;  %v6247_v35 = vadd.f32 1.0, %v8655_v16  ;;  %v11266_v61 = vpop.f32.mrb[114].mxu0  ;;  %5481 = vmatmul.mubr.bf16.gmra.mrb[92].mxu1 %v10862_v11  ;;  %v5256_v11 = vadd.f32 %v11106_v28, %v10951_v23  ;;  %v5258_v28 = vadd.f32 %v11113_v7, %v10957_v34 }
 0x765   : > { %v8659_v53 = vpop.eup %8658  ;;  %8678 = vrcp.f32 %v6245_v60  ;;  %v6251_v4 = vadd.f32 1.0, %v8657_v6  ;;  %12147 = vst [vmem:[#allocation12_spill] sm:$0xff] %v11266_v61  ;;  %v11268_v22 = vpop.f32.mrb[243].mxu1  ;;  %v4866_v6 = vadd.f32 %v11088_v41, %v10955_v27  ;;  %5488 = vmatprep.mubr.bf16.mxu1 %v10876_v2 }
 0x766   : > { %v8661_v59 = vpop.eup %8660  ;;  %8680 = vrcp.f32 %v6247_v35  ;;  %v6248_v12 = vadd.f32 1.0, %v8659_v53  ;;  %v11270_v0 = vpop.f32.mrb[115].mxu0 }
 0x767   : > { %v8663_v58 = vpop.eup %8662  ;;  %8682 = vrcp.f32 %v6251_v4  ;;  %v6252_v30 = vadd.f32 1.0, %v8661_v59  ;;  %v4870_v59 = vadd.f32 %v11104_v54, %v10949_v20 }
 0x768   : > { %v8665_v16 = vpop.eup %8664  ;;  %8684 = vrcp.f32 %v6248_v12  ;;  %v6254_v60 = vadd.f32 1.0, %v8663_v58  ;;  %v5919_v58 = vmul.f32 1.442695, %v5600_v43 }
 0x769   : > { %v8667_v61 = vpop.eup %8666  ;;  %8686 = vrcp.f32 %v6252_v30  ;;  %v6258_v35 = vadd.f32 1.0, %v8665_v16  ;;  %v11282_v30 = vpop.f32.mrb[244].mxu1 }
 0x76a   : > { %v8669_v53 = vpop.eup %8668  ;;  %8688 = vrcp.f32 %v6254_v60  ;;  %v6255_v4 = vadd.f32 1.0, %v8667_v61  ;;  %v11284_v16 = vpop.f32.mrb[116].mxu0  ;;  %v5597_v60 = vsub.f32 0.0, %v4866_v6  ;;  %v4872_v61 = vadd.f32 %v11111_v45, %v10955_v27 }
 0x76b   : > { %v8671_v12 = vpop.eup %8670  ;;  %8690 = vrcp.f32 %v6258_v35  ;;  %v6259_v41 = vadd.f32 1.0, %v8669_v53  ;;  %12148 = vst [vmem:[#allocation13_spill] sm:$0xff] %v11284_v16  ;;  %v11288_v26 = vpop.f32.mrb[245].mxu1  ;;  %v5601_v53 = vsub.f32 0.0, %v5252_v25  ;;  %v5603_v45 = vsub.f32 0.0, %v4870_v59 }
 0x76c   : > { %v8673_v42 = vpop.eup %8672  ;;  %8692 = vrcp.f32 %v6255_v4  ;;  %v6261_v2 = vadd.f32 1.0, %v8671_v12  ;;  %12149 = vst [vmem:[#allocation14_spill] sm:$0xff] %v11288_v26  ;;  %v11290_v54 = vpop.f32.mrb[117].mxu0  ;;  %v4874_v26 = vadd.f32 %v11118_v39, %v10949_v20  ;;  %v5913_v59 = vmul.f32 1.442695, %v5597_v60  ;;  %5489 = vmatmul.mubr.bf16.gmra.mrb[96].mxu1 %v10874_v57 }
 0x76d   : > { %12150 = vst [vmem:[#allocation15_spill] sm:$0xff] %v11290_v54  ;;  %v8675_v35 = vpop.eup %8674  ;;  %8694 = vrcp.f32 %v6259_v41  ;;  %v6265_v43 = vadd.f32 1.0, %v8673_v42  ;;  %v11294_v16 = vpop.f32.mrb[246].mxu1  ;;  %v5607_v42 = vsub.f32 0.0, %v5256_v11  ;;  %v4876_v39 = vadd.f32 %v11125_v40, %v10955_v27 }
 0x76e   : > { %12151 = vst [vmem:[#allocation16_spill] sm:$0xff] %v11294_v16  ;;  %v11296_v4 = vpop.f32.mrb[118].mxu0  ;;  %v8677_v6 = vpop.eup %8676  ;;  %8696 = vrcp.f32 %v6261_v2  ;;  %v6262_v12 = vadd.f32 1.0, %v8675_v35  ;;  %v5260_v16 = vadd.f32 %v11120_v38, %v10951_v23  ;;  %v5604_v2 = vsub.f32 0.0, %v4872_v61 }
 0x76f   : > { %12152 = vst [vmem:[#allocation17_spill] sm:$0xff] %v11296_v4  ;;  %v11300_v54 = vpop.f32.mrb[247].mxu1  ;;  %v11302_v41 = vpop.f32.mrb[119].mxu0  ;;  %8698 = vrcp.f32 %v6265_v43  ;;  %v6266_v7 = vadd.f32 1.0, %v8677_v6  ;;  %v5921_v43 = vmul.f32 1.442695, %v5601_v53  ;;  %v5262_v38 = vadd.f32 %v11128_v15, %v10957_v34 }
 0x770   : > { %v8679_v25 = vpop.eup %8678  ;;  %8700 = vrcp.f32 %v6262_v12  ;;  %v5608_v11 = vsub.f32 0.0, %v5258_v28  ;;  %v12153_v6 = vld [vmem:[#allocation4_spill] sm:$0xff]  ;;  %v5925_v60 = vmul.f32 1.442695, %v5603_v45  ;;  %v5610_v61 = vsub.f32 0.0, %v4874_v26  ;;  %v11320_v15 = vpop.f32.mrb[120].mxu0 }
 0x771   : > { %v8681_v4 = vpop.eup %8680  ;;  %6693 = vst [vmem:[%s11005_s28 + $0x220] sm:$0xff] %v8679_v25  ;;  %8702 = vrcp.f32 %v6266_v7  ;;  %5496 = vmatprep.mubr.bf16.mxu1 %v12153_v6  ;;  %v4880_v40 = vadd.f32 %v11136_v14, %v10949_v20  ;;  %v5933_v53 = vmul.f32 1.442695, %v5607_v42  ;;  %v5614_v28 = vsub.f32 0.0, %v5260_v16  ;;  %v11325_v7 = vpop.f32.mrb[121].mxu0 }
 0x772   : > { %v8683_v35 = vpop.eup %8682  ;;  %6695 = vst [vmem:[%s11005_s28 + $0x230] sm:$0xff] %v8681_v4  ;;  %8704 = vpow2.f32 %v5911_v44  ;;  %v11318_v4 = vpop.f32.mrb[248].mxu1  ;;  %v5927_v44 = vmul.f32 1.442695, %v5604_v2  ;;  %v5611_v45 = vsub.f32 0.0, %v4876_v39  ;;  %v5615_v16 = vsub.f32 0.0, %v5262_v38 }
 0x773   : > { %v8685_v12 = vpop.eup %8684  ;;  %6699 = vst [vmem:[%s11005_s28 + $0x250] sm:$0xff] %v8683_v35  ;;  %8706 = vpow2.f32 %v5919_v58  ;;  %v11323_v26 = vpop.f32.mrb[249].mxu1  ;;  %v5935_v58 = vmul.f32 1.442695, %v5608_v11  ;;  %v5617_v2 = vsub.f32 0.0, %v4880_v40 }
 0x774   : > { %v8687_v57 = vpop.eup %8686  ;;  %6696 = vst [vmem:[%s11005_s28 + $0x238] sm:$0xff] %v8685_v12  ;;  %8708 = vpow2.f32 %v5913_v59  ;;  %v11328_v42 = vpop.f32.mrb[250].mxu1  ;;  %v5939_v59 = vmul.f32 1.442695, %v5610_v61  ;;  %v5941_v38 = vmul.f32 1.442695, %v5611_v45 }
 0x775   : > { %v8689_v25 = vpop.eup %8688  ;;  %6700 = vst [vmem:[%s11005_s28 + $0x258] sm:$0xff] %v8687_v57  ;;  %8710 = vpow2.f32 %v5921_v43  ;;  %v11330_v35 = vpop.f32.mrb[122].mxu0  ;;  %v5947_v43 = vmul.f32 1.442695, %v5614_v28  ;;  %v5949_v61 = vmul.f32 1.442695, %v5615_v16 }
 0x776   : > { %v8691_v14 = vpop.eup %8690  ;;  %6702 = vst [vmem:[%s11005_s28 + $0x268] sm:$0xff] %v8689_v25  ;;  %8712 = vpow2.f32 %v5925_v60  ;;  %v11333_v39 = vpop.f32.mrb[251].mxu1  ;;  %v12155_v25 = vld [vmem:[#allocation3_spill] sm:$0xff] }
 0x777   : > { %v8693_v6 = vpop.eup %8692  ;;  %6706 = vst [vmem:[%s11005_s28 + $0x288] sm:$0xff] %v8691_v14  ;;  %v11335_v12 = vpop.f32.mrb[123].mxu0  ;;  %8714 = vpow2.f32 %v5933_v53  ;;  %5497 = vmatmul.mubr.bf16.gmra.mrb[100].mxu1 %v12155_v25  ;;  %v5953_v14 = vmul.f32 1.442695, %v5617_v2 }
 0x778   : > { %12154 = vst [vmem:[#allocation4_spill] sm:$0xff] %v11335_v12  ;;  %v8695_v57 = vpop.eup %8694  ;;  %6703 = vst [vmem:[%s11005_s28 + $0x270] sm:$0xff] %v8693_v6  ;;  %8716 = vpow2.f32 %v5927_v44  ;;  %v11343_v53 = vpop.f32.mrb[252].mxu1 }
 0x779   : > { %v8697_v11 = vpop.eup %8696  ;;  %6707 = vst [vmem:[%s11005_s28 + $0x290] sm:$0xff] %v8695_v57  ;;  %8718 = vpow2.f32 %v5935_v58  ;;  %12156 = vst [vmem:[#allocation3_spill] sm:$0xff] %v11343_v53  ;;  %v11345_v28 = vpop.f32.mrb[124].mxu0 }
 0x77a   : > { %v8699_v60 = vpop.eup %8698  ;;  %6709 = vst [vmem:[%s11005_s28 + $0x2a0] sm:$0xff] %v8697_v11  ;;  %8720 = vpow2.f32 %v5939_v59  ;;  %12157 = vst [vmem:[#allocation18_spill] sm:$0xff] %v11345_v28  ;;  %v11348_v45 = vpop.f32.mrb[253].mxu1  ;;  %v5266_v59 = vadd.f32 %v11138_v62, %v10951_v23 }
 0x77b   : > { %v8701_v40 = vpop.eup %8700  ;;  %6713 = vst [vmem:[%s11005_s28 + $0x2c0] sm:$0xff] %v8699_v60  ;;  %8722 = vpow2.f32 %v5947_v43  ;;  %12158 = vst [vmem:[#allocation19_spill] sm:$0xff] %v11348_v45  ;;  %v11350_v6 = vpop.f32.mrb[125].mxu0 }
 0x77c   : > { %v8703_v12 = vpop.eup %8702  ;;  %6710 = vst [vmem:[%s11005_s28 + $0x2a8] sm:$0xff] %v8701_v40  ;;  %8724 = vpow2.f32 %v5941_v38  ;;  %12159 = vst [vmem:[#allocation20_spill] sm:$0xff] %v11350_v6  ;;  %v11354_v2 = vpop.f32.mrb[254].mxu1 }
 0x77d   : > { %v8705_v44 = vpop.eup %8704  ;;  %6714 = vst [vmem:[%s11005_s28 + $0x2c8] sm:$0xff] %v8703_v12  ;;  %8726 = vpow2.f32 %v5949_v61  ;;  %12160 = vst [vmem:[#allocation21_spill] sm:$0xff] %v11354_v2  ;;  %v11356_v57 = vpop.f32.mrb[126].mxu0  ;;  %v4882_v12 = vadd.f32 %v11141_v21, %v10955_v27 }
 0x77e   : > { %v8707_v58 = vpop.eup %8706  ;;  %v6268_v16 = vadd.f32 1.0, %v8705_v44  ;;  %12161 = vst [vmem:[#allocation22_spill] sm:$0xff] %v11356_v57  ;;  %8728 = vpow2.f32 %v5953_v14  ;;  %v11360_v38 = vpop.f32.mrb[255].mxu1  ;;  %v5268_v44 = vadd.f32 %v11144_v9, %v10957_v34  ;;  %v5621_v14 = vsub.f32 0.0, %v5266_v59 }
 0x77f   : > { %v8709_v43 = vpop.eup %8708  ;;  %v6272_v11 = vadd.f32 1.0, %v8707_v58  ;;  %12162 = vst [vmem:[#allocation23_spill] sm:$0xff] %v11360_v38  ;;  %v11362_v25 = vpop.f32.mrb[127].mxu0  ;;  %v5618_v6 = vsub.f32 0.0, %v4882_v12  ;;  %v5270_v59 = vadd.f32 %v11149_v56, %v10951_v23 }
 0x780   : > { %12163 = vst [vmem:[#allocation24_spill] sm:$0xff] %v11362_v25  ;;  %v8711_v60 = vpop.eup %8710  ;;  %8730 = vrcp.f32 %v6268_v16  ;;  %v6269_v61 = vadd.f32 1.0, %v8709_v43  ;;  %v4884_v16 = vadd.f32 %v11146_v63, %v10949_v20  ;;  %v11368_v43 = vpop.f32.mrb[0].mxu1  ;;  %v4886_v63 = vadd.f32 %v11151_v3, %v10955_v27 }
 0x781   : > { %v8713_v40 = vpop.eup %8712  ;;  %8732 = vrcp.f32 %v6272_v11  ;;  %v6273_v62 = vadd.f32 1.0, %v8711_v60  ;;  %12164 = vst [vmem:[#allocation25_spill] sm:$0xff] %v11368_v43  ;;  %v11370_v11 = vpop.f32.mrb[128].mxu0 }
 0x782   : > { %v8715_v57 = vpop.eup %8714  ;;  %8734 = vrcp.f32 %v6269_v61  ;;  %v6275_v58 = vadd.f32 1.0, %v8713_v40  ;;  %v5622_v61 = vsub.f32 0.0, %v5268_v44  ;;  %v11374_v40 = vpop.f32.mrb[1].mxu1  ;;  %v5624_v45 = vsub.f32 0.0, %v4884_v16 }
 0x783   : > { %v8717_v2 = vpop.eup %8716  ;;  %8736 = vrcp.f32 %v6273_v62  ;;  %v6279_v21 = vadd.f32 1.0, %v8715_v57  ;;  %12165 = vst [vmem:[#allocation26_spill] sm:$0xff] %v11374_v40  ;;  %v11376_v57 = vpop.f32.mrb[129].mxu0  ;;  %v5961_v62 = vmul.f32 1.442695, %v5621_v14  ;;  %v4892_v16 = vadd.f32 %v11167_v46, %v10955_v27 }
 0x784   : > { %v8719_v38 = vpop.eup %8718  ;;  %8738 = vrcp.f32 %v6275_v58  ;;  %v6276_v25 = vadd.f32 1.0, %v8717_v2  ;;  %v11382_v44 = vpop.f32.mrb[2].mxu1 }
 0x785   : > { %v8721_v60 = vpop.eup %8720  ;;  %8740 = vrcp.f32 %v6279_v21  ;;  %v6280_v9 = vadd.f32 1.0, %v8719_v38  ;;  %v5955_v21 = vmul.f32 1.442695, %v5618_v6  ;;  %v5272_v38 = vadd.f32 %v11154_v49, %v10957_v34  ;;  %12166 = vst [vmem:[#allocation27_spill] sm:$0xff] %v11382_v44 }
 0x786   : > { %v8723_v12 = vpop.eup %8722  ;;  %8742 = vrcp.f32 %v6276_v25  ;;  %v6282_v2 = vadd.f32 1.0, %v8721_v60  ;;  %v4890_v25 = vadd.f32 %v11161_v18, %v10949_v20  ;;  %v5628_v60 = vsub.f32 0.0, %v5270_v59 }
 0x787   : > { %v8725_v58 = vpop.eup %8724  ;;  %8744 = vrcp.f32 %v6280_v9  ;;  %v6286_v43 = vadd.f32 1.0, %v8723_v12  ;;  %v5276_v6 = vadd.f32 %v11163_v33, %v10951_v23  ;;  %v11388_v9 = vpop.f32.mrb[130].mxu0  ;;  %v5963_v59 = vmul.f32 1.442695, %v5622_v61 }
 0x788   : > { %v8727_v56 = vpop.eup %8726  ;;  %8746 = vrcp.f32 %v6282_v2  ;;  %v6283_v40 = vadd.f32 1.0, %v8725_v58  ;;  %v5625_v2 = vsub.f32 0.0, %v4886_v63  ;;  %v11392_v58 = vpop.f32.mrb[3].mxu1  ;;  %v5629_v33 = vsub.f32 0.0, %v5272_v38  ;;  %v12170_v38 = vld [vmem:[#allocation7_spill] sm:$0xff] }
 0x789   : > { %v8729_v14 = vpop.eup %8728  ;;  %8748 = vrcp.f32 %v6286_v43  ;;  %v6287_v3 = vadd.f32 1.0, %v8727_v56  ;;  %12167 = vst [vmem:[#allocation28_spill] sm:$0xff] %v11392_v58  ;;  %v11394_v18 = vpop.f32.mrb[131].mxu0  ;;  %v12168_v56 = vld [vmem:[#allocation5_spill] sm:$0xff]  ;;  %v5967_v63 = vmul.f32 1.442695, %v5624_v45 }
 0x78a   : > { %v8731_v49 = vpop.eup %8730  ;;  %8750 = vrcp.f32 %v6283_v40  ;;  %v6289_v12 = vadd.f32 1.0, %v8729_v14  ;;  %v5278_v44 = vadd.f32 %v12168_v56, %v10957_v34  ;;  %v5631_v46 = vsub.f32 0.0, %v4890_v25  ;;  %v12169_v14 = vld [vmem:[#allocation6_spill] sm:$0xff] }
 0x78b   : > { %v8733_v43 = vpop.eup %8732  ;;  %6716 = vst [vmem:[%s11005_s28 + $0x2d8] sm:$0xff] %v8731_v49  ;;  %8752 = vrcp.f32 %v6287_v3  ;;  %v4894_v58 = vadd.f32 %v12169_v14, %v10949_v20  ;;  %v5975_v49 = vmul.f32 1.442695, %v5628_v60  ;;  %v5635_v61 = vsub.f32 0.0, %v5276_v6  ;;  %v11407_v14 = vpop.f32.mrb[4].mxu1 }
 0x78c   : > { %v8735_v40 = vpop.eup %8734  ;;  %6720 = vst [vmem:[%s11005_s28 + $0x2f8] sm:$0xff] %v8733_v43  ;;  %8754 = vrcp.f32 %v6289_v12  ;;  %v5280_v3 = vadd.f32 %v12170_v38, %v10951_v23  ;;  %v5969_v43 = vmul.f32 1.442695, %v5625_v2  ;;  %v5632_v12 = vsub.f32 0.0, %v4892_v16  ;;  %12171 = vst [vmem:[#allocation5_spill] sm:$0xff] %v11407_v14 }
 0x78d   : > { %v8737_v28 = vpop.eup %8736  ;;  %6717 = vst [vmem:[%s11005_s28 + $0x2e0] sm:$0xff] %v8735_v40  ;;  %8756 = vpow2.f32 %v5961_v62  ;;  %v5977_v25 = vmul.f32 1.442695, %v5629_v33  ;;  %v5636_v56 = vsub.f32 0.0, %v5278_v44  ;;  %v11409_v62 = vpop.f32.mrb[132].mxu0  ;;  %v5638_v40 = vsub.f32 0.0, %v4894_v58 }
 0x78e   : > { %v8739_v53 = vpop.eup %8738  ;;  %6721 = vst [vmem:[%s11005_s28 + $0x300] sm:$0xff] %v8737_v28  ;;  %8758 = vpow2.f32 %v5955_v21  ;;  %v5981_v6 = vmul.f32 1.442695, %v5631_v46  ;;  %v11412_v28 = vpop.f32.mrb[5].mxu1  ;;  %v5642_v44 = vsub.f32 0.0, %v5280_v3 }
 0x78f   : > { %v8741_v45 = vpop.eup %8740  ;;  %6723 = vst [vmem:[%s11005_s28 + $0x310] sm:$0xff] %v8739_v53  ;;  %8760 = vpow2.f32 %v5963_v59  ;;  %12172 = vst [vmem:[#allocation6_spill] sm:$0xff] %v11412_v28  ;;  %v11414_v21 = vpop.f32.mrb[133].mxu0  ;;  %v5989_v53 = vmul.f32 1.442695, %v5635_v61 }
 0x790   : > { %v8743_v60 = vpop.eup %8742  ;;  %6727 = vst [vmem:[%s11005_s28 + $0x330] sm:$0xff] %v8741_v45  ;;  %8762 = vpow2.f32 %v5967_v63  ;;  %v11417_v16 = vpop.f32.mrb[6].mxu1  ;;  %v5983_v58 = vmul.f32 1.442695, %v5632_v12  ;;  %v5995_v3 = vmul.f32 1.442695, %v5638_v40  ;;  %v4896_v12 = vadd.f32 %v11179_v8, %v10955_v27 }
 0x791   : > { %v8745_v2 = vpop.eup %8744  ;;  %6724 = vst [vmem:[%s11005_s28 + $0x318] sm:$0xff] %v8743_v60  ;;  %8764 = vpow2.f32 %v5975_v49  ;;  %12173 = vst [vmem:[#allocation7_spill] sm:$0xff] %v11417_v16  ;;  %v11419_v59 = vpop.f32.mrb[134].mxu0  ;;  %v5991_v49 = vmul.f32 1.442695, %v5636_v56 }
 0x792   : > { %v8747_v33 = vpop.eup %8746  ;;  %6728 = vst [vmem:[%s11005_s28 + $0x338] sm:$0xff] %v8745_v2  ;;  %8766 = vpow2.f32 %v5969_v43  ;;  %v11422_v63 = vpop.f32.mrb[7].mxu1  ;;  %v6003_v60 = vmul.f32 1.442695, %v5642_v44 }
 0x793   : > { %12174 = vst [vmem:[#allocation29_spill] sm:$0xff] %v11422_v63  ;;  %v11424_v46 = vpop.f32.mrb[135].mxu0  ;;  %v8749_v38 = vpop.eup %8748  ;;  %6730 = vst [vmem:[%s11005_s28 + $0x348] sm:$0xff] %v8747_v33  ;;  %8768 = vpow2.f32 %v5977_v25  ;;  %v12175_v25 = vld [vmem:[#allocation8_spill] sm:$0xff] }
 0x794   : > { %v8751_v61 = vpop.eup %8750  ;;  %6734 = vst [vmem:[%s11005_s28 + $0x368] sm:$0xff] %v8749_v38  ;;  %8770 = vpow2.f32 %v5981_v6  ;;  %v5282_v56 = vadd.f32 %v12175_v25, %v10957_v34  ;;  %v11435_v33 = vpop.f32.mrb[8].mxu1  ;;  %v4900_v25 = vadd.f32 %v11193_v10, %v10949_v20 }
 0x795   : > { %v8753_v45 = vpop.eup %8752  ;;  %6731 = vst [vmem:[%s11005_s28 + $0x350] sm:$0xff] %v8751_v61  ;;  %8772 = vpow2.f32 %v5989_v53  ;;  %12176 = vst [vmem:[#allocation8_spill] sm:$0xff] %v11435_v33  ;;  %v11437_v6 = vpop.f32.mrb[136].mxu0 }
 0x796   : > { %v8755_v43 = vpop.eup %8754  ;;  %6735 = vst [vmem:[%s11005_s28 + $0x370] sm:$0xff] %v8753_v45  ;;  %8774 = vpow2.f32 %v5983_v58  ;;  %v11439_v53 = vpop.f32.mrb[9].mxu1 }
 0x797   : > { %v8757_v2 = vpop.eup %8756  ;;  %6737 = vst [vmem:[%s11005_s28 + $0x380] sm:$0xff] %v8755_v43  ;;  %8776 = vpow2.f32 %v5991_v49  ;;  %12177 = vst [vmem:[#allocation30_spill] sm:$0xff] %v11439_v53  ;;  %v11441_v44 = vpop.f32.mrb[137].mxu0  ;;  %v5639_v43 = vsub.f32 0.0, %v4896_v12 }
 0x798   : > { %v8759_v40 = vpop.eup %8758  ;;  %v6293_v38 = vadd.f32 1.0, %v8757_v2  ;;  %8778 = vpow2.f32 %v5995_v3  ;;  %v11443_v8 = vpop.f32.mrb[10].mxu1  ;;  %v5643_v3 = vsub.f32 0.0, %v5282_v56  ;;  %v12179_v56 = vld [vmem:[#allocation9_spill] sm:$0xff] }
 0x799   : > { %v8761_v58 = vpop.eup %8760  ;;  %v6290_v61 = vadd.f32 1.0, %v8759_v40  ;;  %8780 = vpow2.f32 %v6003_v60  ;;  %12178 = vst [vmem:[#allocation31_spill] sm:$0xff] %v11443_v8  ;;  %v5286_v40 = vadd.f32 %v11195_v50, %v10951_v23  ;;  %v5997_v12 = vmul.f32 1.442695, %v5639_v43  ;;  %v12180_v50 = vld [vmem:[#allocation10_spill] sm:$0xff] }
 0x79a   : > { %v8763_v49 = vpop.eup %8762  ;;  %8782 = vrcp.f32 %v6293_v38  ;;  %v6294_v45 = vadd.f32 1.0, %v8761_v58  ;;  %v5645_v58 = vsub.f32 0.0, %v4900_v25  ;;  %v4904_v43 = vadd.f32 %v11205_v24, %v10949_v20 }
 0x79b   : > { %v8765_v33 = vpop.eup %8764  ;;  %8784 = vrcp.f32 %v6290_v61  ;;  %v6296_v2 = vadd.f32 1.0, %v8763_v49  ;;  %v6005_v61 = vmul.f32 1.442695, %v5643_v3  ;;  %v4902_v49 = vadd.f32 %v12179_v56, %v10955_v27 }
 0x79c   : > { %v8767_v63 = vpop.eup %8766  ;;  %8786 = vrcp.f32 %v6294_v45  ;;  %v6300_v53 = vadd.f32 1.0, %v8765_v33  ;;  %v5649_v14 = vsub.f32 0.0, %v5286_v40  ;;  %v6009_v3 = vmul.f32 1.442695, %v5645_v58  ;;  %v11461_v40 = vpop.f32.mrb[138].mxu0 }
 0x79d   : > { %v8769_v60 = vpop.eup %8768  ;;  %8788 = vrcp.f32 %v6296_v2  ;;  %v6297_v8 = vadd.f32 1.0, %v8767_v63  ;;  %v5288_v2 = vadd.f32 %v12180_v50, %v10957_v34  ;;  %v4906_v24 = vadd.f32 %v11212_v52, %v10955_v27 }
 0x79e   : > { %v8771_v16 = vpop.eup %8770  ;;  %8790 = vrcp.f32 %v6300_v53  ;;  %v6301_v38 = vadd.f32 1.0, %v8769_v60  ;;  %v4910_v52 = vadd.f32 %v11227_v55, %v10949_v20  ;;  %v4912_v55 = vadd.f32 %v11232_v17, %v10955_v27 }
 0x79f   : > { %v8773_v28 = vpop.eup %8772  ;;  %8792 = vrcp.f32 %v6297_v8  ;;  %v6303_v10 = vadd.f32 1.0, %v8771_v16  ;;  %v11457_v16 = vadd.f32 %v11376_v57, %v11370_v11  ;;  %v11465_v11 = vpop.f32.mrb[11].mxu1 }
 0x7a0   : > { %v8775_v45 = vpop.eup %8774  ;;  %8794 = vrcp.f32 %v6301_v38  ;;  %v6307_v33 = vadd.f32 1.0, %v8773_v28  ;;  %v5290_v28 = vadd.f32 %v11207_v32, %v10951_v23  ;;  %v11467_v57 = vpop.f32.mrb[139].mxu0  ;;  %v12181_v32 = vld [vmem:[#allocation11_spill] sm:$0xff] }
 0x7a1   : > { %v8777_v63 = vpop.eup %8776  ;;  %8796 = vrcp.f32 %v6303_v10  ;;  %v6304_v53 = vadd.f32 1.0, %v8775_v45  ;;  %v5646_v10 = vsub.f32 0.0, %v4902_v49  ;;  %v5650_v45 = vsub.f32 0.0, %v5288_v2 }
 0x7a2   : > { %v8779_v8 = vpop.eup %8778  ;;  %8798 = vrcp.f32 %v6307_v33  ;;  %v6308_v25 = vadd.f32 1.0, %v8777_v63  ;;  %v5292_v33 = vadd.f32 %v12181_v32, %v10957_v34  ;;  %v6017_v49 = vmul.f32 1.442695, %v5649_v14 }
 0x7a3   : > { %v8781_v60 = vpop.eup %8780  ;;  %8800 = vrcp.f32 %v6304_v53  ;;  %v6310_v38 = vadd.f32 1.0, %v8779_v8  ;;  %v5652_v63 = vsub.f32 0.0, %v4904_v43  ;;  %v5656_v8 = vsub.f32 0.0, %v5290_v28 }
 0x7a4   : > { %v8783_v56 = vpop.eup %8782  ;;  %8802 = vrcp.f32 %v6308_v25  ;;  %v6314_v58 = vadd.f32 1.0, %v8781_v60  ;;  %v5296_v25 = vadd.f32 %v11229_v5, %v10951_v23  ;;  %v11479_v2 = vadd.f32 %v11394_v18, %v11388_v9  ;;  %v11485_v5 = vpop.f32.mrb[12].mxu1 }
 0x7a5   : > { %v8785_v50 = vpop.eup %8784  ;;  %6741 = vst [vmem:[%s11005_s28 + $0x3a0] sm:$0xff] %v8783_v56  ;;  %8804 = vrcp.f32 %v6310_v38  ;;  %v6011_v14 = vmul.f32 1.442695, %v5646_v10  ;;  %v5653_v43 = vsub.f32 0.0, %v4906_v24  ;;  %v6019_v28 = vmul.f32 1.442695, %v5650_v45 }
 0x7a6   : > { %v8787_v53 = vpop.eup %8786  ;;  %6738 = vst [vmem:[%s11005_s28 + $0x388] sm:$0xff] %v8785_v50  ;;  %8806 = vrcp.f32 %v6314_v58  ;;  %v5657_v56 = vsub.f32 0.0, %v5292_v33  ;;  %v11487_v58 = vpop.f32.mrb[140].mxu0  ;;  %v6023_v18 = vmul.f32 1.442695, %v5652_v63  ;;  %v11492_v10 = vadd.f32 %v11414_v21, %v11409_v62 }
 0x7a7   : > { %v8789_v60 = vpop.eup %8788  ;;  %6742 = vst [vmem:[%s11005_s28 + $0x3a8] sm:$0xff] %v8787_v53  ;;  %8808 = vpow2.f32 %v5997_v12  ;;  %v5659_v12 = vsub.f32 0.0, %v4910_v52  ;;  %v11494_v17 = vpop.f32.mrb[13].mxu1  ;;  %v6031_v45 = vmul.f32 1.442695, %v5656_v8  ;;  %v5663_v32 = vsub.f32 0.0, %v5296_v25 }
 0x7a8   : > { %v8791_v38 = vpop.eup %8790  ;;  %6744 = vst [vmem:[%s11005_s28 + $0x3b8] sm:$0xff] %v8789_v60  ;;  %8810 = vpow2.f32 %v6005_v61  ;;  %v11496_v24 = vpop.f32.mrb[141].mxu0  ;;  %v6025_v62 = vmul.f32 1.442695, %v5653_v43  ;;  %v5660_v21 = vsub.f32 0.0, %v4912_v55  ;;  %v11511_v8 = vadd.f32 %v11424_v46, %v11419_v59 }
 0x7a9   : > { %v8793_v9 = vpop.eup %8792  ;;  %6748 = vst [vmem:[%s11005_s28 + $0x3d8] sm:$0xff] %v8791_v38  ;;  %8812 = vpow2.f32 %v6009_v3  ;;  %v11499_v33 = vpop.f32.mrb[14].mxu1  ;;  %v6037_v60 = vmul.f32 1.442695, %v5659_v12  ;;  %v6045_v43 = vmul.f32 1.442695, %v5663_v32  ;;  %v5298_v59 = vadd.f32 %v11234_v48, %v10957_v34 }
 0x7aa   : > { %v8795_v61 = vpop.eup %8794  ;;  %6745 = vst [vmem:[%s11005_s28 + $0x3c0] sm:$0xff] %v8793_v9  ;;  %8814 = vpow2.f32 %v6017_v49  ;;  %v11501_v3 = vpop.f32.mrb[142].mxu0  ;;  %v6033_v49 = vmul.f32 1.442695, %v5657_v56  ;;  %v6039_v38 = vmul.f32 1.442695, %v5660_v21  ;;  %v11521_v46 = vadd.f32 %v11441_v44, %v11437_v6 }
 0x7ab   : > { %v8797_v50 = vpop.eup %8796  ;;  %6749 = vst [vmem:[%s11005_s28 + $0x3e0] sm:$0xff] %v8795_v61  ;;  %8816 = vpow2.f32 %v6011_v14  ;;  %v11504_v63 = vpop.f32.mrb[15].mxu1  ;;  %v4914_v48 = vadd.f32 %v11237_v1, %v10949_v20  ;;  %v5300_v6 = vadd.f32 %v11239_v47, %v10951_v23 }
 0x7ac   : > { %v11506_v52 = vpop.f32.mrb[143].mxu0  ;;  %v8799_v53 = vpop.eup %8798  ;;  %6751 = vst [vmem:[%s11005_s28 + $0x3f0] sm:$0xff] %v8797_v50  ;;  %8818 = vpow2.f32 %v6019_v28 }
 0x7ad   : > { %v8801_v25 = vpop.eup %8800  ;;  %6755 = vst [vmem:[%s11005_s28 + $0x410] sm:$0xff] %v8799_v53  ;;  %8820 = vpow2.f32 %v6023_v18  ;;  %v11523_v56 = vpop.f32.mrb[16].mxu1 }
 0x7ae   : > { %v8803_v14 = vpop.eup %8802  ;;  %6752 = vst [vmem:[%s11005_s28 + $0x3f8] sm:$0xff] %v8801_v25  ;;  %8822 = vpow2.f32 %v6031_v45  ;;  %v11525_v9 = vpop.f32.mrb[144].mxu0 }
 0x7af   : > { %v8805_v55 = vpop.eup %8804  ;;  %6756 = vst [vmem:[%s11005_s28 + $0x418] sm:$0xff] %v8803_v14  ;;  %8824 = vpow2.f32 %v6025_v62  ;;  %v11528_v12 = vpop.f32.mrb[17].mxu1  ;;  %v11544_v14 = vadd.f32 %v11467_v57, %v11461_v40  ;;  %v5302_v40 = vadd.f32 %v11244_v36, %v10957_v34  ;;  %v5306_v36 = vadd.f32 %v11258_v29, %v10951_v23 }
 0x7b0   : > { %v8807_v28 = vpop.eup %8806  ;;  %6758 = vst [vmem:[%s11005_s28 + $0x428] sm:$0xff] %v8805_v55  ;;  %8826 = vpow2.f32 %v6033_v49  ;;  %v11530_v61 = vpop.f32.mrb[145].mxu0 }
 0x7b1   : > { %v8809_v18 = vpop.eup %8808  ;;  %6762 = vst [vmem:[%s11005_s28 + $0x448] sm:$0xff] %v8807_v28  ;;  %8828 = vpow2.f32 %v6037_v60  ;;  %v11536_v44 = vpop.f32.mrb[18].mxu1  ;;  %v5664_v60 = vsub.f32 0.0, %v5298_v59  ;;  %v5666_v28 = vsub.f32 0.0, %v4914_v48  ;;  %v4920_v48 = vadd.f32 %v11256_v51, %v10949_v20 }
 0x7b2   : > { %v8811_v45 = vpop.eup %8810  ;;  %v6311_v32 = vadd.f32 1.0, %v8809_v18  ;;  %8830 = vpow2.f32 %v6045_v43  ;;  %v11538_v21 = vpop.f32.mrb[146].mxu0 }
 0x7b3   : > { %v8813_v50 = vpop.eup %8812  ;;  %v6315_v62 = vadd.f32 1.0, %v8811_v45  ;;  %8832 = vpow2.f32 %v6039_v38  ;;  %v11540_v53 = vpop.f32.mrb[19].mxu1  ;;  %v5670_v38 = vsub.f32 0.0, %v5300_v6  ;;  %v11554_v6 = vadd.f32 %v11496_v24, %v11487_v58 }
 0x7b4   : > { %12182 = vst [vmem:[#allocation9_spill] sm:$0xff] %v11540_v53  ;;  %v8815_v49 = vpop.eup %8814  ;;  %8834 = vrcp.f32 %v6311_v32  ;;  %v6317_v25 = vadd.f32 1.0, %v8813_v50  ;;  %v4916_v32 = vadd.f32 %v11242_v31, %v10955_v27  ;;  %v6047_v53 = vmul.f32 1.442695, %v5664_v60  ;;  %v7517_v24 = vpop.f32.mrb[147].mxu0 }
 0x7b5   : > { %v8817_v1 = vpop.eup %8816  ;;  %8836 = vrcp.f32 %v6315_v62  ;;  %v6321_v47 = vadd.f32 1.0, %v8815_v49  ;;  %v4922_v58 = vadd.f32 %v11260_v13, %v10955_v27 }
 0x7b6   : > { %v8819_v43 = vpop.eup %8818  ;;  %8838 = vrcp.f32 %v6317_v25  ;;  %v6318_v55 = vadd.f32 1.0, %v8817_v1  ;;  %v6051_v25 = vmul.f32 1.442695, %v5666_v28  ;;  %v6059_v1 = vmul.f32 1.442695, %v5670_v38 }
 0x7b7   : > { %v8821_v18 = vpop.eup %8820  ;;  %8840 = vrcp.f32 %v6321_v47  ;;  %v6322_v45 = vadd.f32 1.0, %v8819_v43  ;;  %v5667_v43 = vsub.f32 0.0, %v4916_v32  ;;  %v5673_v38 = vsub.f32 0.0, %v4920_v48  ;;  %v12183_v48 = vld [vmem:[#allocation12_spill] sm:$0xff] }
 0x7b8   : > { %v8823_v50 = vpop.eup %8822  ;;  %8842 = vrcp.f32 %v6318_v55  ;;  %v6324_v59 = vadd.f32 1.0, %v8821_v18  ;;  %v5671_v18 = vsub.f32 0.0, %v5302_v40  ;;  %v5308_v32 = vadd.f32 %v11262_v19, %v10957_v34 }
 0x7b9   : > { %v8825_v57 = vpop.eup %8824  ;;  %8844 = vrcp.f32 %v6322_v45  ;;  %v6328_v62 = vadd.f32 1.0, %v8823_v50  ;;  %v11566_v40 = vadd.f32 %v11506_v52, %v11501_v3  ;;  %v5312_v52 = vadd.f32 %v11270_v0, %v10957_v34 }
 0x7ba   : > { %v8827_v49 = vpop.eup %8826  ;;  %8846 = vrcp.f32 %v6324_v59  ;;  %v6325_v31 = vadd.f32 1.0, %v8825_v57  ;;  %v4924_v59 = vadd.f32 %v11264_v37, %v10949_v20  ;;  %v6053_v57 = vmul.f32 1.442695, %v5667_v43 }
 0x7bb   : > { %v8829_v47 = vpop.eup %8828  ;;  %8848 = vrcp.f32 %v6328_v62  ;;  %v6329_v60 = vadd.f32 1.0, %v8827_v49  ;;  %v5677_v62 = vsub.f32 0.0, %v5306_v36  ;;  %v5310_v49 = vadd.f32 %v12183_v48, %v10951_v23  ;;  %v11581_v36 = vpop.f32.mrb[20].mxu1 }
 0x7bc   : > { %v8831_v55 = vpop.eup %8830  ;;  %8850 = vrcp.f32 %v6325_v31  ;;  %v6331_v51 = vadd.f32 1.0, %v8829_v47  ;;  %v6061_v31 = vmul.f32 1.442695, %v5671_v18  ;;  %v5674_v47 = vsub.f32 0.0, %v4922_v58  ;;  %v11584_v58 = vpop.f32.mrb[21].mxu1 }
 0x7bd   : > { %v8833_v45 = vpop.eup %8832  ;;  %8852 = vrcp.f32 %v6329_v60  ;;  %v6335_v28 = vadd.f32 1.0, %v8831_v55  ;;  %v4926_v37 = vadd.f32 %v11268_v22, %v10955_v27  ;;  %v5678_v3 = vsub.f32 0.0, %v5308_v32  ;;  %v7519_v55 = vpop.f32.mrb[148].mxu0 }
 0x7be   : > { %v8835_v50 = vpop.eup %8834  ;;  %8854 = vrcp.f32 %v6331_v51  ;;  %v6332_v29 = vadd.f32 1.0, %v8833_v45  ;;  %v11579_v43 = vadd.f32 %v11530_v61, %v11525_v9  ;;  %v6065_v22 = vmul.f32 1.442695, %v5673_v38  ;;  %v11587_v9 = vpop.f32.mrb[22].mxu1 }
 0x7bf   : > { %v8837_v13 = vpop.eup %8836  ;;  %6759 = vst [vmem:[%s11005_s28 + $0x430] sm:$0xff] %v8835_v50  ;;  %8856 = vrcp.f32 %v6335_v28  ;;  %v5680_v18 = vsub.f32 0.0, %v4924_v59  ;;  %v6073_v0 = vmul.f32 1.442695, %v5677_v62  ;;  %v5684_v28 = vsub.f32 0.0, %v5310_v49  ;;  %v11590_v50 = vpop.f32.mrb[23].mxu1 }
 0x7c0   : > { %v8839_v19 = vpop.eup %8838  ;;  %6763 = vst [vmem:[%s11005_s28 + $0x450] sm:$0xff] %v8837_v13  ;;  %8858 = vrcp.f32 %v6332_v29  ;;  %v5681_v38 = vsub.f32 0.0, %v4926_v37  ;;  %v6075_v59 = vmul.f32 1.442695, %v5678_v3  ;;  %v11594_v13 = vadd.f32 %v7517_v24, %v11538_v21 }
 0x7c1   : > { %v8841_v60 = vpop.eup %8840  ;;  %6765 = vst [vmem:[%s11005_s28 + $0x460] sm:$0xff] %v8839_v19  ;;  %8860 = vpow2.f32 %v6047_v53  ;;  %v7520_v53 = vpop.f32.mrb[149].mxu0  ;;  %v6087_v19 = vmul.f32 1.442695, %v5684_v28 }
 0x7c2   : > { %v8843_v51 = vpop.eup %8842  ;;  %6769 = vst [vmem:[%s11005_s28 + $0x480] sm:$0xff] %v8841_v60  ;;  %8862 = vpow2.f32 %v6051_v25  ;;  %v7522_v61 = vpop.f32.mrb[150].mxu0  ;;  %v6067_v25 = vmul.f32 1.442695, %v5674_v47  ;;  %v11599_v37 = vadd.f32 %v7520_v53, %v7519_v55 }
 0x7c3   : > { %v8845_v45 = vpop.eup %8844  ;;  %6766 = vst [vmem:[%s11005_s28 + $0x468] sm:$0xff] %v8843_v51  ;;  %8864 = vpow2.f32 %v6059_v1  ;;  %v5685_v1 = vsub.f32 0.0, %v5312_v52  ;;  %v7523_v62 = vpop.f32.mrb[151].mxu0 }
 0x7c4   : > { %v8847_v32 = vpop.eup %8846  ;;  %6770 = vst [vmem:[%s11005_s28 + $0x488] sm:$0xff] %v8845_v45  ;;  %8866 = vpow2.f32 %v6053_v57  ;;  %v6079_v57 = vmul.f32 1.442695, %v5680_v18  ;;  %v11602_v60 = vpop.f32.mrb[24].mxu1  ;;  %v11612_v45 = vadd.f32 %v7523_v62, %v7522_v61  ;;  %v12185_v61 = vld [vmem:[#allocation14_spill] sm:$0xff] }
 0x7c5   : > { %v8849_v29 = vpop.eup %8848  ;;  %6772 = vst [vmem:[%s11005_s28 + $0x498] sm:$0xff] %v8847_v32  ;;  %8868 = vpow2.f32 %v6061_v31  ;;  %v6081_v31 = vmul.f32 1.442695, %v5681_v38  ;;  %v6089_v24 = vmul.f32 1.442695, %v5685_v1  ;;  %v11605_v52 = vpop.f32.mrb[25].mxu1  ;;  %v4932_v62 = vadd.f32 %v12185_v61, %v10955_v27 }
 0x7c6   : > { %v8851_v48 = vpop.eup %8850  ;;  %6776 = vst [vmem:[%s11005_s28 + $0x4b8] sm:$0xff] %v8849_v29  ;;  %8870 = vpow2.f32 %v6065_v22  ;;  %v4930_v22 = vadd.f32 %v11282_v30, %v10949_v20  ;;  %v11610_v18 = vpop.f32.mrb[26].mxu1 }
 0x7c7   : > { %v8853_v49 = vpop.eup %8852  ;;  %6773 = vst [vmem:[%s11005_s28 + $0x4a0] sm:$0xff] %v8851_v48  ;;  %8872 = vpow2.f32 %v6073_v0  ;;  %v11614_v0 = vpop.f32.mrb[27].mxu1 }
 0x7c8   : > { %v8855_v47 = vpop.eup %8854  ;;  %6777 = vst [vmem:[%s11005_s28 + $0x4c0] sm:$0xff] %v8853_v49  ;;  %8874 = vpow2.f32 %v6067_v25  ;;  %v12184_v25 = vld [vmem:[#allocation13_spill] sm:$0xff]  ;;  %v5687_v48 = vsub.f32 0.0, %v4930_v22 }
 0x7c9   : > { %v8857_v21 = vpop.eup %8856  ;;  %6779 = vst [vmem:[%s11005_s28 + $0x4d0] sm:$0xff] %v8855_v47  ;;  %8876 = vpow2.f32 %v6075_v59  ;;  %v5316_v38 = vadd.f32 %v12184_v25, %v10951_v23  ;;  %v12187_v25 = vld [vmem:[#allocation16_spill] sm:$0xff] }
 0x7ca   : > { %v8859_v3 = vpop.eup %8858  ;;  %6783 = vst [vmem:[%s11005_s28 + $0x4f0] sm:$0xff] %v8857_v21  ;;  %8878 = vpow2.f32 %v6079_v57  ;;  %v11620_v21 = vpop.f32.mrb[28].mxu1 }
 0x7cb   : > { %v8861_v51 = vpop.eup %8860  ;;  %6780 = vst [vmem:[%s11005_s28 + $0x4d8] sm:$0xff] %v8859_v3  ;;  %8880 = vpow2.f32 %v6087_v19 }
 0x7cc   : > { %v8863_v55 = vpop.eup %8862  ;;  %v6336_v53 = vadd.f32 1.0, %v8861_v51  ;;  %8882 = vpow2.f32 %v6081_v31  ;;  %v5691_v31 = vsub.f32 0.0, %v5316_v38  ;;  %v12186_v51 = vld [vmem:[#allocation15_spill] sm:$0xff] }
 0x7cd   : > { %v8865_v28 = vpop.eup %8864  ;;  %v6338_v32 = vadd.f32 1.0, %v8863_v55  ;;  %8884 = vpow2.f32 %v6089_v24  ;;  %v5318_v55 = vadd.f32 %v12186_v51, %v10957_v34  ;;  %v4936_v51 = vadd.f32 %v11300_v54, %v10955_v27 }
 0x7ce   : > { %v8867_v29 = vpop.eup %8866  ;;  %8886 = vrcp.f32 %v6336_v53  ;;  %v6342_v59 = vadd.f32 1.0, %v8865_v28  ;;  %v11624_v53 = vpop.f32.mrb[29].mxu1 }
 0x7cf   : > { %v8869_v1 = vpop.eup %8868  ;;  %8888 = vrcp.f32 %v6338_v32  ;;  %v6339_v30 = vadd.f32 1.0, %v8867_v29  ;;  %v6093_v32 = vmul.f32 1.442695, %v5687_v48  ;;  %v4934_v29 = vadd.f32 %v12187_v25, %v10949_v20 }
 0x7d0   : > { %v8871_v57 = vpop.eup %8870  ;;  %8890 = vrcp.f32 %v6342_v59  ;;  %v6343_v49 = vadd.f32 1.0, %v8869_v1  ;;  %v5688_v1 = vsub.f32 0.0, %v4932_v62 }
 0x7d1   : > { %v8873_v19 = vpop.eup %8872  ;;  %8892 = vrcp.f32 %v6339_v30  ;;  %v6345_v47 = vadd.f32 1.0, %v8871_v57  ;;  %v12188_v30 = vld [vmem:[#allocation17_spill] sm:$0xff]  ;;  %v5694_v25 = vsub.f32 0.0, %v4934_v29 }
 0x7d2   : > { %v8875_v24 = vpop.eup %8874  ;;  %8894 = vrcp.f32 %v6343_v49  ;;  %v6349_v3 = vadd.f32 1.0, %v8873_v19  ;;  %v5320_v57 = vadd.f32 %v12188_v30, %v10951_v23  ;;  %v6101_v19 = vmul.f32 1.442695, %v5691_v31  ;;  %v11636_v31 = vpop.f32.mrb[30].mxu1 }
 0x7d3   : > { %v8877_v22 = vpop.eup %8876  ;;  %8896 = vrcp.f32 %v6345_v47  ;;  %v6346_v28 = vadd.f32 1.0, %v8875_v24  ;;  %v5692_v24 = vsub.f32 0.0, %v5318_v55  ;;  %v5326_v55 = vadd.f32 %v11320_v15, %v10951_v23  ;;  %v11640_v30 = vpop.f32.mrb[31].mxu1 }
 0x7d4   : > { %v8879_v59 = vpop.eup %8878  ;;  %8898 = vrcp.f32 %v6349_v3  ;;  %v6350_v38 = vadd.f32 1.0, %v8877_v22  ;;  %v5322_v3 = vadd.f32 %v11302_v41, %v10957_v34  ;;  %v6095_v29 = vmul.f32 1.442695, %v5688_v1 }
 0x7d5   : > { %v8881_v49 = vpop.eup %8880  ;;  %8900 = vrcp.f32 %v6346_v28  ;;  %v6352_v61 = vadd.f32 1.0, %v8879_v59  ;;  %v4940_v28 = vadd.f32 %v11318_v4, %v10949_v20  ;;  %v4942_v4 = vadd.f32 %v11323_v26, %v10955_v27 }
 0x7d6   : > { %v8883_v47 = vpop.eup %8882  ;;  %8902 = vrcp.f32 %v6350_v38  ;;  %v6356_v48 = vadd.f32 1.0, %v8881_v49  ;;  %v5698_v38 = vsub.f32 0.0, %v5320_v57  ;;  %v5695_v49 = vsub.f32 0.0, %v4936_v51 }
 0x7d7   : > { %v8885_v22 = vpop.eup %8884  ;;  %8904 = vrcp.f32 %v6352_v61  ;;  %v6353_v62 = vadd.f32 1.0, %v8883_v47  ;;  %v6103_v57 = vmul.f32 1.442695, %v5692_v24  ;;  %v5699_v47 = vsub.f32 0.0, %v5322_v3 }
 0x7d8   : > { %v8887_v59 = vpop.eup %8886  ;;  %8906 = vrcp.f32 %v6356_v48  ;;  %v6357_v54 = vadd.f32 1.0, %v8885_v22  ;;  %v5328_v15 = vadd.f32 %v11325_v7, %v10957_v34  ;;  %v6107_v22 = vmul.f32 1.442695, %v5694_v25 }
 0x7d9   : > { %v8889_v41 = vpop.eup %8888  ;;  %6784 = vst [vmem:[%s11005_s28 + $0x4f8] sm:$0xff] %v8887_v59  ;;  %8908 = vrcp.f32 %v6353_v62  ;;  %v5701_v1 = vsub.f32 0.0, %v4940_v28  ;;  %v4944_v51 = vadd.f32 %v11328_v42, %v10949_v20  ;;  %v6115_v26 = vmul.f32 1.442695, %v5698_v38 }
 0x7da   : > { %v8891_v61 = vpop.eup %8890  ;;  %6786 = vst [vmem:[%s11005_s28 + $0x508] sm:$0xff] %v8889_v41  ;;  %8910 = vrcp.f32 %v6357_v54  ;;  %v5705_v59 = vsub.f32 0.0, %v5326_v55  ;;  %v6109_v3 = vmul.f32 1.442695, %v5695_v49  ;;  %v5702_v7 = vsub.f32 0.0, %v4942_v4  ;;  %v11653_v54 = vpop.f32.mrb[32].mxu1 }
 0x7db   : > { %v8893_v48 = vpop.eup %8892  ;;  %6790 = vst [vmem:[%s11005_s28 + $0x528] sm:$0xff] %v8891_v61  ;;  %8912 = vpow2.f32 %v6093_v32  ;;  %v6117_v25 = vmul.f32 1.442695, %v5699_v47  ;;  %v5706_v42 = vsub.f32 0.0, %v5328_v15  ;;  %v11656_v28 = vpop.f32.mrb[33].mxu1  ;;  %v5708_v55 = vsub.f32 0.0, %v4944_v51 }
 0x7dc   : > { %v8895_v62 = vpop.eup %8894  ;;  %6787 = vst [vmem:[%s11005_s28 + $0x510] sm:$0xff] %v8893_v48  ;;  %8914 = vpow2.f32 %v6101_v19  ;;  %12189 = vst [vmem:[#allocation10_spill] sm:$0xff] %v11656_v28  ;;  %v6121_v38 = vmul.f32 1.442695, %v5701_v1  ;;  %v11659_v41 = vpop.f32.mrb[34].mxu1  ;;  %v5330_v1 = vadd.f32 %v11330_v35, %v10951_v23 }
 0x7dd   : > { %v8897_v24 = vpop.eup %8896  ;;  %6791 = vst [vmem:[%s11005_s28 + $0x530] sm:$0xff] %v8895_v62  ;;  %8916 = vpow2.f32 %v6095_v29  ;;  %12190 = vst [vmem:[#allocation11_spill] sm:$0xff] %v11659_v41  ;;  %v6129_v49 = vmul.f32 1.442695, %v5705_v59  ;;  %v11662_v4 = vpop.f32.mrb[35].mxu1 }
 0x7de   : > { %v8899_v32 = vpop.eup %8898  ;;  %6793 = vst [vmem:[%s11005_s28 + $0x540] sm:$0xff] %v8897_v24  ;;  %8918 = vpow2.f32 %v6103_v57  ;;  %12191 = vst [vmem:[#allocation12_spill] sm:$0xff] %v11662_v4  ;;  %v6123_v57 = vmul.f32 1.442695, %v5702_v7  ;;  %v6131_v15 = vmul.f32 1.442695, %v5706_v42 }
 0x7df   : > { %v8901_v19 = vpop.eup %8900  ;;  %6797 = vst [vmem:[%s11005_s28 + $0x560] sm:$0xff] %v8899_v32  ;;  %8920 = vpow2.f32 %v6107_v22  ;;  %v6135_v22 = vmul.f32 1.442695, %v5708_v55  ;;  %v11673_v59 = vpop.f32.mrb[36].mxu1  ;;  %v5712_v35 = vsub.f32 0.0, %v5330_v1  ;;  %v12195_v55 = vld [vmem:[#allocation4_spill] sm:$0xff] }
 0x7e0   : > { %v8903_v29 = vpop.eup %8902  ;;  %6794 = vst [vmem:[%s11005_s28 + $0x548] sm:$0xff] %v8901_v19  ;;  %8922 = vpow2.f32 %v6115_v26  ;;  %v4946_v26 = vadd.f32 %v11333_v39, %v10955_v27  ;;  %12192 = vst [vmem:[#allocation13_spill] sm:$0xff] %v11673_v59  ;;  %v11675_v7 = vpop.f32.mrb[37].mxu1 }
 0x7e1   : > { %v8905_v61 = vpop.eup %8904  ;;  %6798 = vst [vmem:[%s11005_s28 + $0x568] sm:$0xff] %v8903_v29  ;;  %8924 = vpow2.f32 %v6109_v3  ;;  %12193 = vst [vmem:[#allocation14_spill] sm:$0xff] %v11675_v7  ;;  %v11677_v42 = vpop.f32.mrb[38].mxu1  ;;  %v5332_v29 = vadd.f32 %v12195_v55, %v10957_v34 }
 0x7e2   : > { %v8907_v47 = vpop.eup %8906  ;;  %6800 = vst [vmem:[%s11005_s28 + $0x578] sm:$0xff] %v8905_v61  ;;  %8926 = vpow2.f32 %v6117_v25  ;;  %12194 = vst [vmem:[#allocation15_spill] sm:$0xff] %v11677_v42  ;;  %v11681_v39 = vpop.f32.mrb[39].mxu1 }
 0x7e3   : > { %v8909_v48 = vpop.eup %8908  ;;  %6804 = vst [vmem:[%s11005_s28 + $0x598] sm:$0xff] %v8907_v47  ;;  %8928 = vpow2.f32 %v6121_v38  ;;  %12196 = vst [vmem:[#allocation16_spill] sm:$0xff] %v11681_v39  ;;  %v5713_v39 = vsub.f32 0.0, %v5332_v29 }
 0x7e4   : > { %v8911_v51 = vpop.eup %8910  ;;  %6801 = vst [vmem:[%s11005_s28 + $0x580] sm:$0xff] %v8909_v48  ;;  %8930 = vpow2.f32 %v6129_v49  ;;  %v12197_v48 = vld [vmem:[#allocation3_spill] sm:$0xff] }
 0x7e5   : > { %v8913_v62 = vpop.eup %8912  ;;  %6805 = vst [vmem:[%s11005_s28 + $0x5a0] sm:$0xff] %v8911_v51  ;;  %8932 = vpow2.f32 %v6123_v57  ;;  %v5709_v57 = vsub.f32 0.0, %v4946_v26 }
 0x7e6   : > { %v8915_v24 = vpop.eup %8914  ;;  %v6359_v3 = vadd.f32 1.0, %v8913_v62  ;;  %8934 = vpow2.f32 %v6131_v15  ;;  %v6143_v62 = vmul.f32 1.442695, %v5712_v35 }
 0x7e7   : > { %v8917_v32 = vpop.eup %8916  ;;  %v6363_v25 = vadd.f32 1.0, %v8915_v24  ;;  %8936 = vpow2.f32 %v6135_v22  ;;  %v4950_v22 = vadd.f32 %v12197_v48, %v10949_v20  ;;  %v12198_v24 = vld [vmem:[#allocation18_spill] sm:$0xff]  ;;  %v11689_v48 = vpop.f32.mrb[40].mxu1 }
 0x7e8   : > { %v8919_v19 = vpop.eup %8918  ;;  %8938 = vrcp.f32 %v6359_v3  ;;  %v6360_v38 = vadd.f32 1.0, %v8917_v32  ;;  %v5336_v3 = vadd.f32 %v12198_v24, %v10951_v23  ;;  %12200 = vst [vmem:[#allocation17_spill] sm:$0xff] %v11689_v48  ;;  %v12201_v24 = vld [vmem:[#allocation19_spill] sm:$0xff] }
 0x7e9   : > { %v8921_v49 = vpop.eup %8920  ;;  %8940 = vrcp.f32 %v6363_v25  ;;  %v6364_v61 = vadd.f32 1.0, %v8919_v19  ;;  %v12199_v25 = vld [vmem:[#allocation2_spill] sm:$0xff]  ;;  %v4952_v7 = vadd.f32 %v12201_v24, %v10955_v27 }
 0x7ea   : > { %v8923_v47 = vpop.eup %8922  ;;  %8942 = vrcp.f32 %v6360_v38  ;;  %v6366_v15 = vadd.f32 1.0, %v8921_v49  ;;  %v4164_v19 = vsub.s32 2, %v12199_v25  ;;  %v6137_v49 = vmul.f32 1.442695, %v5709_v57  ;;  %v12206_v24 = vld [vmem:[#allocation22_spill] sm:$0xff] }
 0x7eb   : > { %v8925_v1 = vpop.eup %8924  ;;  %8944 = vrcp.f32 %v6364_v61  ;;  %v6370_v51 = vadd.f32 1.0, %v8923_v47  ;;  %v4168_v42 = vsub.s32 3, %v12199_v25  ;;  %v5715_v47 = vsub.f32 0.0, %v4950_v22 }
 0x7ec   : > { %v8927_v32 = vpop.eup %8926  ;;  %8946 = vrcp.f32 %v6366_v15  ;;  %v6367_v55 = vadd.f32 1.0, %v8925_v1  ;;  %v11693_v15 = vpop.f32.mrb[41].mxu1  ;;  %v5719_v59 = vsub.f32 0.0, %v5336_v3 }
 0x7ed   : > { %v8929_v26 = vpop.eup %8928  ;;  %8948 = vrcp.f32 %v6370_v51  ;;  %v6371_v38 = vadd.f32 1.0, %v8927_v32  ;;  %12202 = vst [vmem:[#allocation4_spill] sm:$0xff] %v11693_v15  ;;  %v12203_v51 = vld [vmem:[#allocation20_spill] sm:$0xff]  ;;  %v11697_v32 = vpop.f32.mrb[42].mxu1 }
 0x7ee   : > { %v8931_v61 = vpop.eup %8930  ;;  %8950 = vrcp.f32 %v6367_v55  ;;  %v6373_v35 = vadd.f32 1.0, %v8929_v26  ;;  %v5338_v57 = vadd.f32 %v12203_v51, %v10957_v34  ;;  %12204 = vst [vmem:[#allocation3_spill] sm:$0xff] %v11697_v32  ;;  %v12205_v55 = vld [vmem:[#allocation21_spill] sm:$0xff]  ;;  %v11704_v26 = vld [vmem:[%s12131_s12] sm:$0xff]  ;;  %v11714_v51 = vpop.f32.mrb[43].mxu1  ;;  %v5716_v32 = vsub.f32 0.0, %v4952_v7 }
 0x7ef   : > { %v8933_v29 = vpop.eup %8932  ;;  %8952 = vrcp.f32 %v6371_v38  ;;  %v6377_v1 = vadd.f32 1.0, %v8931_v61  ;;  %v4954_v22 = vadd.f32 %v12205_v55, %v10949_v20  ;;  %v11707_v38 = vrot.slane %v11704_v26, %v4164_v19  ;;  %12207 = vst [vmem:[#allocation18_spill] sm:$0xff] %v11714_v51  ;;  %v12208_v19 = vld [vmem:[#allocation23_spill] sm:$0xff]  ;;  %v12210_v7 = vld [vmem:[#allocation25_spill] sm:$0xff] }
 0x7f0   : > { %v8935_v4 = vpop.eup %8934  ;;  %8954 = vrcp.f32 %v6373_v35  ;;  %v6374_v48 = vadd.f32 1.0, %v8933_v29  ;;  %v5340_v35 = vadd.f32 %v12206_v24, %v10951_v23  ;;  %v11712_v29 = vrot.slane %v11704_v26, %v4168_v42  ;;  %v12209_v23 = vld [vmem:[#allocation24_spill] sm:$0xff] }
 0x7f1   : > { %v8937_v3 = vpop.eup %8936  ;;  %8956 = vrcp.f32 %v6377_v1  ;;  %v6378_v61 = vadd.f32 1.0, %v8935_v4  ;;  %v4956_v15 = vadd.f32 %v12208_v19, %v10955_v27  ;;  %v6145_v4 = vmul.f32 1.442695, %v5713_v39 }
 0x7f2   : > { %v8939_v20 = vpop.eup %8938  ;;  %8958 = vrcp.f32 %v6374_v48  ;;  %v6380_v55 = vadd.f32 1.0, %v8937_v3  ;;  %v5720_v1 = vsub.f32 0.0, %v5338_v57  ;;  %v5342_v42 = vadd.f32 %v12209_v23, %v10957_v34  ;;  %v12211_v57 = vld [vmem:[#allocation26_spill] sm:$0xff] }
 0x7f3   : > { %v8941_v41 = vpop.eup %8940  ;;  %6807 = vst [vmem:[%s11005_s28 + $0x5b0] sm:$0xff] %v8939_v20  ;;  %8960 = vrcp.f32 %v6378_v61  ;;  %v6149_v51 = vmul.f32 1.442695, %v5715_v47  ;;  %v5722_v48 = vsub.f32 0.0, %v4954_v22  ;;  %v4993_v3 = vadd.f32 %v12210_v7, %v11707_v38  ;;  %v11728_v47 = vpop.f32.mrb[44].mxu1 }
 0x7f4   : > { %v8943_v24 = vpop.eup %8942  ;;  %6811 = vst [vmem:[%s11005_s28 + $0x5d0] sm:$0xff] %v8941_v41  ;;  %8962 = vrcp.f32 %v6380_v55  ;;  %v6157_v27 = vmul.f32 1.442695, %v5719_v59  ;;  %v5726_v39 = vsub.f32 0.0, %v5340_v35  ;;  %v4995_v61 = vadd.f32 %v12211_v57, %v11712_v29  ;;  %v11731_v59 = vpop.f32.mrb[45].mxu1 }
 0x7f5   : > { %v8945_v28 = vpop.eup %8944  ;;  %6808 = vst [vmem:[%s11005_s28 + $0x5b8] sm:$0xff] %v8943_v24  ;;  %8964 = vpow2.f32 %v6143_v62  ;;  %v6151_v34 = vmul.f32 1.442695, %v5716_v32  ;;  %v5723_v41 = vsub.f32 0.0, %v4956_v15  ;;  %v6159_v55 = vmul.f32 1.442695, %v5720_v1 }
 0x7f6   : > { %v8947_v20 = vpop.eup %8946  ;;  %6812 = vst [vmem:[%s11005_s28 + $0x5d8] sm:$0xff] %v8945_v28  ;;  %8966 = vpow2.f32 %v6137_v49  ;;  %v5727_v19 = vsub.f32 0.0, %v5342_v42  ;;  %v6163_v35 = vmul.f32 1.442695, %v5722_v48  ;;  %v5507_v28 = vsub.f32 0.0, %v4993_v3  ;;  %v11734_v49 = vpop.f32.mrb[46].mxu1 }
 0x7f7   : > { %v8949_v22 = vpop.eup %8948  ;;  %6814 = vst [vmem:[%s11005_s28 + $0x5e8] sm:$0xff] %v8947_v20  ;;  %8968 = vpow2.f32 %v6145_v4  ;;  %v6171_v15 = vmul.f32 1.442695, %v5726_v39  ;;  %v5508_v23 = vsub.f32 0.0, %v4995_v61  ;;  %v4180_v4 = vsub.s32 6, %v12199_v25  ;;  %v11738_v1 = vpop.f32.mrb[47].mxu1 }
 0x7f8   : > { %v8951_v62 = vpop.eup %8950  ;;  %6818 = vst [vmem:[%s11005_s28 + $0x608] sm:$0xff] %v8949_v22  ;;  %8970 = vpow2.f32 %v6149_v51  ;;  %v6165_v51 = vmul.f32 1.442695, %v5723_v41  ;;  %v6173_v48 = vmul.f32 1.442695, %v5727_v19  ;;  %v11748_v61 = vpop.f32.mrb[48].mxu1 }
 0x7f9   : > { %v8953_v32 = vpop.eup %8952  ;;  %6815 = vst [vmem:[%s11005_s28 + $0x5f0] sm:$0xff] %v8951_v62  ;;  %8972 = vpow2.f32 %v6157_v27  ;;  %v5733_v3 = vmul.f32 1.442695, %v5507_v28  ;;  %v5735_v25 = vmul.f32 1.442695, %v5508_v23  ;;  %v11745_v39 = vrot.slane %v11704_v26, %v4180_v4  ;;  %v11753_v22 = vpop.f32.mrb[49].mxu1 }
 0x7fa   : > { %v8955_v42 = vpop.eup %8954  ;;  %6819 = vst [vmem:[%s11005_s28 + $0x610] sm:$0xff] %v8953_v32  ;;  %8974 = vpow2.f32 %v6151_v34  ;;  %v12212_v34 = vld [vmem:[#allocation27_spill] sm:$0xff]  ;;  %v11755_v62 = vpop.f32.mrb[50].mxu1 }
 0x7fb   : > { %v8957_v24 = vpop.eup %8956  ;;  %6821 = vst [vmem:[%s11005_s28 + $0x620] sm:$0xff] %v8955_v42  ;;  %8976 = vpow2.f32 %v6159_v55  ;;  %v4997_v41 = vadd.f32 %v12212_v34, %v11707_v38  ;;  %v5379_v28 = vadd.f32 %v11457_v16, %v11745_v39  ;;  %v11759_v32 = vpop.f32.mrb[51].mxu1  ;;  %v5382_v34 = vadd.f32 %v11479_v2, %v11745_v39 }
 0x7fc   : > { %v8959_v7 = vpop.eup %8958  ;;  %6825 = vst [vmem:[%s11005_s28 + $0x640] sm:$0xff] %v8957_v24  ;;  %8978 = vpow2.f32 %v6163_v35  ;;  %12213 = vst [vmem:[#allocation2_spill] sm:$0xff] %v11759_v32 }
 0x7fd   : > { %v8961_v27 = vpop.eup %8960  ;;  %6822 = vst [vmem:[%s11005_s28 + $0x628] sm:$0xff] %v8959_v7  ;;  %8980 = vpow2.f32 %v6171_v15  ;;  %v12214_v7 = vld [vmem:[#allocation28_spill] sm:$0xff] }
 0x7fe   : > { %v8963_v57 = vpop.eup %8962  ;;  %6826 = vst [vmem:[%s11005_s28 + $0x648] sm:$0xff] %v8961_v27  ;;  %8982 = vpow2.f32 %v6165_v51  ;;  %v5514_v51 = vsub.f32 0.0, %v4997_v41 }
 0x7ff   : > { %v8965_v20 = vpop.eup %8964  ;;  %6828 = vst [vmem:[%s11005_s28 + $0x658] sm:$0xff] %v8963_v57  ;;  %8984 = vpow2.f32 %v6173_v48  ;;  %v5511_v57 = vsub.f32 0.0, %v5379_v28 }
 0x800   : > { %v8967_v55 = vpop.eup %8966  ;;  %v6384_v19 = vadd.f32 1.0, %v8965_v20  ;;  %8986 = vpow2.f32 %v5733_v3  ;;  %v4999_v3 = vadd.f32 %v12214_v7, %v11712_v29 }
 0x801   : > { %v8969_v26 = vpop.eup %8968  ;;  %v6381_v35 = vadd.f32 1.0, %v8967_v55  ;;  %8988 = vpow2.f32 %v5735_v25  ;;  %v11765_v55 = vpop.f32.mrb[52].mxu1 }
 0x802   : > { %v8971_v15 = vpop.eup %8970  ;;  %8990 = vrcp.f32 %v6384_v19  ;;  %v6385_v23 = vadd.f32 1.0, %v8969_v26  ;;  %12215 = vst [vmem:[#allocation19_spill] sm:$0xff] %v11765_v55  ;;  %v5747_v26 = vmul.f32 1.442695, %v5514_v51  ;;  %v5387_v51 = vadd.f32 %v11492_v10, %v11745_v39 }
 0x803   : > { %v8973_v4 = vpop.eup %8972  ;;  %8992 = vrcp.f32 %v6381_v35  ;;  %v6387_v42 = vadd.f32 1.0, %v8971_v15  ;;  %v12216_v35 = vld [vmem:[#allocation5_spill] sm:$0xff] }
 0x804   : > { %v8975_v24 = vpop.eup %8974  ;;  %8994 = vrcp.f32 %v6385_v23  ;;  %v6391_v48 = vadd.f32 1.0, %v8973_v4  ;;  %v5003_v15 = vadd.f32 %v12216_v35, %v11707_v38  ;;  %v11769_v23 = vpop.f32.mrb[53].mxu1 }
 0x805   : > { %v8977_v27 = vpop.eup %8976  ;;  %8996 = vrcp.f32 %v6387_v42  ;;  %v6388_v25 = vadd.f32 1.0, %v8975_v24  ;;  %12217 = vst [vmem:[#allocation20_spill] sm:$0xff] %v11769_v23  ;;  %v5515_v42 = vsub.f32 0.0, %v4999_v3  ;;  %v12218_v24 = vld [vmem:[#allocation6_spill] sm:$0xff]  ;;  %v11773_v7 = vpop.f32.mrb[54].mxu1  ;;  %v12221_v3 = vld [vmem:[#allocation7_spill] sm:$0xff] }
 0x806   : > { %v8979_v16 = vpop.eup %8978  ;;  %8998 = vrcp.f32 %v6391_v48  ;;  %v6392_v20 = vadd.f32 1.0, %v8977_v27  ;;  %v5005_v48 = vadd.f32 %v12218_v24, %v11712_v29  ;;  %12219 = vst [vmem:[#allocation21_spill] sm:$0xff] %v11773_v7  ;;  %v5007_v23 = vadd.f32 %v12221_v3, %v11707_v38 }
 0x807   : > { %v8981_v19 = vpop.eup %8980  ;;  %9000 = vrcp.f32 %v6388_v25  ;;  %v6394_v41 = vadd.f32 1.0, %v8979_v16  ;;  %v5741_v25 = vmul.f32 1.442695, %v5511_v57  ;;  %v11777_v16 = vpop.f32.mrb[55].mxu1  ;;  %v12222_v57 = vld [vmem:[#allocation29_spill] sm:$0xff]  ;;  %v5525_v3 = vsub.f32 0.0, %v5387_v51 }
 0x808   : > { %v8983_v4 = vpop.eup %8982  ;;  %9002 = vrcp.f32 %v6392_v20  ;;  %v6398_v28 = vadd.f32 1.0, %v8981_v19  ;;  %12220 = vst [vmem:[#allocation22_spill] sm:$0xff] %v11777_v16  ;;  %v5518_v19 = vsub.f32 0.0, %v5382_v34  ;;  %v5522_v16 = vsub.f32 0.0, %v5005_v48 }
 0x809   : > { %v8985_v2 = vpop.eup %8984  ;;  %9004 = vrcp.f32 %v6394_v41  ;;  %v6395_v27 = vadd.f32 1.0, %v8983_v4  ;;  %v5521_v41 = vsub.f32 0.0, %v5003_v15  ;;  %v5009_v4 = vadd.f32 %v12222_v57, %v11712_v29 }
 0x80a   : > { %v8987_v35 = vpop.eup %8986  ;;  %9006 = vrcp.f32 %v6398_v28  ;;  %v6399_v20 = vadd.f32 1.0, %v8985_v2  ;;  %v5390_v28 = vadd.f32 %v11511_v8, %v11745_v39  ;;  %v5749_v2 = vmul.f32 1.442695, %v5515_v42 }
 0x80b   : > { %v8989_v24 = vpop.eup %8988  ;;  %9008 = vrcp.f32 %v6395_v27  ;;  %v6179_v7 = vadd.f32 1.0, %v8987_v35  ;;  %v12223_v27 = vld [vmem:[#allocation8_spill] sm:$0xff]  ;;  %v5755_v57 = vmul.f32 1.442695, %v5518_v19  ;;  %v5761_v8 = vmul.f32 1.442695, %v5521_v41 }
 0x80c   : > { %v8991_v55 = vpop.eup %8990  ;;  %9010 = vrcp.f32 %v6399_v20  ;;  %v6180_v10 = vadd.f32 1.0, %v8989_v24  ;;  %v5013_v15 = vadd.f32 %v12223_v27, %v11707_v38  ;;  %v5528_v20 = vsub.f32 0.0, %v5007_v23  ;;  %v12224_v24 = vld [vmem:[#allocation30_spill] sm:$0xff] }
 0x80d   : > { %v8993_v34 = vpop.eup %8992  ;;  %6832 = vst [vmem:[%s11005_s28 + $0x678] sm:$0xff] %v8991_v55  ;;  %9012 = vrcp.f32 %v6179_v7  ;;  %v5015_v48 = vadd.f32 %v12224_v24, %v11712_v29  ;;  %v5529_v55 = vsub.f32 0.0, %v5009_v4  ;;  %v5395_v42 = vadd.f32 %v11521_v46, %v11745_v39  ;;  %v11794_v7 = vpop.f32.mrb[56].mxu1 }
 0x80e   : > { %v8995_v35 = vpop.eup %8994  ;;  %6829 = vst [vmem:[%s11005_s28 + $0x660] sm:$0xff] %v8993_v34  ;;  %9014 = vrcp.f32 %v6180_v10  ;;  %v5763_v19 = vmul.f32 1.442695, %v5522_v16  ;;  %v5532_v23 = vsub.f32 0.0, %v5390_v28  ;;  %v11797_v10 = vpop.f32.mrb[57].mxu1  ;;  %v5535_v41 = vsub.f32 0.0, %v5013_v15 }
 0x80f   : > { %v8997_v32 = vpop.eup %8996  ;;  %6833 = vst [vmem:[%s11005_s28 + $0x680] sm:$0xff] %v8995_v35  ;;  %9016 = vpow2.f32 %v5741_v25  ;;  %v5769_v25 = vmul.f32 1.442695, %v5525_v3  ;;  %v11800_v4 = vpop.f32.mrb[58].mxu1  ;;  %v5775_v46 = vmul.f32 1.442695, %v5528_v20 }
 0x810   : > { %v8999_v51 = vpop.eup %8998  ;;  %6835 = vst [vmem:[%s11005_s28 + $0x690] sm:$0xff] %v8997_v32  ;;  %9018 = vpow2.f32 %v5747_v26  ;;  %v5536_v32 = vsub.f32 0.0, %v5015_v48  ;;  %v11803_v26 = vpop.f32.mrb[59].mxu1  ;;  %v5777_v28 = vmul.f32 1.442695, %v5529_v55  ;;  %v12225_v55 = vld [vmem:[#allocation31_spill] sm:$0xff] }
 0x811   : > { %v9001_v34 = vpop.eup %9000  ;;  %6839 = vst [vmem:[%s11005_s28 + $0x6b0] sm:$0xff] %v8999_v51  ;;  %9020 = vpow2.f32 %v5749_v2  ;;  %v5539_v2 = vsub.f32 0.0, %v5395_v42  ;;  %v5783_v3 = vmul.f32 1.442695, %v5532_v23  ;;  %v5017_v42 = vadd.f32 %v12225_v55, %v11707_v38  ;;  %v11812_v51 = vpop.f32.mrb[60].mxu1 }
 0x812   : > { %v9003_v27 = vpop.eup %9002  ;;  %6836 = vst [vmem:[%s11005_s28 + $0x698] sm:$0xff] %v9001_v34  ;;  %9022 = vpow2.f32 %v5755_v57  ;;  %v5789_v57 = vmul.f32 1.442695, %v5535_v41  ;;  %v5791_v24 = vmul.f32 1.442695, %v5536_v32  ;;  %v5019_v23 = vadd.f32 %v11465_v11, %v11712_v29  ;;  %v11817_v34 = vpop.f32.mrb[61].mxu1 }
 0x813   : > { %v9005_v16 = vpop.eup %9004  ;;  %6840 = vst [vmem:[%s11005_s28 + $0x6b8] sm:$0xff] %v9003_v27  ;;  %9024 = vpow2.f32 %v5761_v8  ;;  %v5797_v8 = vmul.f32 1.442695, %v5539_v2  ;;  %v11820_v41 = vpop.f32.mrb[62].mxu1  ;;  %v5542_v2 = vsub.f32 0.0, %v5017_v42 }
 0x814   : > { %v9007_v35 = vpop.eup %9006  ;;  %6842 = vst [vmem:[%s11005_s28 + $0x6c8] sm:$0xff] %v9005_v16  ;;  %9026 = vpow2.f32 %v5763_v19  ;;  %v11822_v32 = vpop.f32.mrb[63].mxu1  ;;  %v5543_v11 = vsub.f32 0.0, %v5019_v23 }
 0x815   : > { %v9009_v15 = vpop.eup %9008  ;;  %6846 = vst [vmem:[%s11005_s28 + $0x6e8] sm:$0xff] %v9007_v35  ;;  %9028 = vpow2.f32 %v5769_v25  ;;  %12226 = vst [vmem:[#allocation23_spill] sm:$0xff] %v11822_v32  ;;  %v5803_v42 = vmul.f32 1.442695, %v5542_v2 }
 0x816   : > { %v9011_v20 = vpop.eup %9010  ;;  %6843 = vst [vmem:[%s11005_s28 + $0x6d0] sm:$0xff] %v9009_v15  ;;  %9030 = vpow2.f32 %v5775_v46 }
 0x817   : > { %v9013_v48 = vpop.eup %9012  ;;  %6847 = vst [vmem:[%s11005_s28 + $0x6f0] sm:$0xff] %v9011_v20  ;;  %9032 = vpow2.f32 %v5777_v28 }
 0x818   : > { %v9015_v19 = vpop.eup %9014  ;;  %6627 = vst [vmem:[%s11005_s28 + $0x10] sm:$0xff] %v9013_v48  ;;  %9034 = vpow2.f32 %v5783_v3 }
 0x819   : > { %v9017_v25 = vpop.eup %9016  ;;  %6628 = vst [vmem:[%s11005_s28 + $0x18] sm:$0xff] %v9015_v19  ;;  %9036 = vpow2.f32 %v5789_v57  ;;  %v5398_v57 = vadd.f32 %v11544_v14, %v11745_v39 }
 0x81a   : > { %v9019_v27 = vpop.eup %9018  ;;  %v6183_v46 = vadd.f32 1.0, %v9017_v25  ;;  %9038 = vpow2.f32 %v5791_v24  ;;  %v5023_v24 = vadd.f32 %v11485_v5, %v11707_v38  ;;  %v7525_v25 = vpop.f32.mrb[64].mxu1 }
 0x81b   : > { %v9021_v16 = vpop.eup %9020  ;;  %v6186_v28 = vadd.f32 1.0, %v9019_v27  ;;  %9040 = vpow2.f32 %v5797_v8 }
 0x81c   : > { %v9023_v35 = vpop.eup %9022  ;;  %9042 = vrcp.f32 %v6183_v46  ;;  %v6187_v3 = vadd.f32 1.0, %v9021_v16  ;;  %v5805_v46 = vmul.f32 1.442695, %v5543_v11  ;;  %v5025_v16 = vadd.f32 %v11494_v17, %v11712_v29 }
 0x81d   : > { %v9025_v15 = vpop.eup %9024  ;;  %9044 = vrcp.f32 %v6186_v28  ;;  %v6190_v20 = vadd.f32 1.0, %v9023_v35  ;;  %v7526_v28 = vpop.f32.mrb[65].mxu1  ;;  %v5549_v2 = vsub.f32 0.0, %v5023_v24  ;;  %v5027_v17 = vadd.f32 %v11499_v33, %v11707_v38 }
 0x81e   : > { %v9027_v48 = vpop.eup %9026  ;;  %9046 = vrcp.f32 %v6187_v3  ;;  %v6193_v55 = vadd.f32 1.0, %v9025_v15  ;;  %v5546_v3 = vsub.f32 0.0, %v5398_v57  ;;  %v11830_v15 = vadd.f32 %v7526_v28, %v7525_v25  ;;  %v7528_v5 = vpop.f32.mrb[66].mxu1 }
 0x81f   : > { %v9029_v19 = vpop.eup %9028  ;;  %9048 = vrcp.f32 %v6190_v20  ;;  %v6194_v8 = vadd.f32 1.0, %v9027_v48  ;;  %v5403_v48 = vadd.f32 %v11554_v6, %v11745_v39  ;;  %v5029_v24 = vadd.f32 %v11504_v63, %v11712_v29 }
 0x820   : > { %v9031_v27 = vpop.eup %9030  ;;  %9050 = vrcp.f32 %v6193_v55  ;;  %v6197_v23 = vadd.f32 1.0, %v9029_v19  ;;  %v7529_v55 = vpop.f32.mrb[67].mxu1  ;;  %v5811_v28 = vmul.f32 1.442695, %v5546_v3  ;;  %v5817_v63 = vmul.f32 1.442695, %v5549_v2 }
 0x821   : > { %v9033_v14 = vpop.eup %9032  ;;  %9052 = vrcp.f32 %v6194_v8  ;;  %v6200_v35 = vadd.f32 1.0, %v9031_v27  ;;  %v11836_v8 = vadd.f32 %v7529_v55, %v7528_v5  ;;  %v5550_v27 = vsub.f32 0.0, %v5025_v16  ;;  %v7531_v3 = vpop.f32.mrb[68].mxu1 }
 0x822   : > { %v9035_v32 = vpop.eup %9034  ;;  %9054 = vrcp.f32 %v6197_v23  ;;  %v6201_v20 = vadd.f32 1.0, %v9033_v14  ;;  %v5033_v5 = vadd.f32 %v11523_v56, %v11707_v38  ;;  %v5035_v55 = vadd.f32 %v11528_v12, %v11712_v29  ;;  %v7532_v56 = vpop.f32.mrb[69].mxu1 }
 0x823   : > { %v9037_v11 = vpop.eup %9036  ;;  %9056 = vrcp.f32 %v6200_v35  ;;  %v6204_v19 = vadd.f32 1.0, %v9035_v32  ;;  %v5406_v32 = vadd.f32 %v11566_v40, %v11745_v39  ;;  %v5553_v35 = vsub.f32 0.0, %v5403_v48 }
 0x824   : > { %v9039_v57 = vpop.eup %9038  ;;  %9058 = vrcp.f32 %v6201_v20  ;;  %v6207_v25 = vadd.f32 1.0, %v9037_v11  ;;  %v5556_v20 = vsub.f32 0.0, %v5027_v17  ;;  %v5819_v40 = vmul.f32 1.442695, %v5550_v27 }
 0x825   : > { %v9041_v23 = vpop.eup %9040  ;;  %9060 = vrcp.f32 %v6204_v19  ;;  %v6208_v6 = vadd.f32 1.0, %v9039_v57  ;;  %v5557_v19 = vsub.f32 0.0, %v5029_v24  ;;  %v5411_v48 = vadd.f32 %v11579_v43, %v11745_v39 }
 0x826   : > { %v9043_v14 = vpop.eup %9042  ;;  %9062 = vrcp.f32 %v6207_v25  ;;  %v6211_v33 = vadd.f32 1.0, %v9041_v23  ;;  %v5560_v2 = vsub.f32 0.0, %v5406_v32  ;;  %v5037_v17 = vadd.f32 %v11536_v44, %v11707_v38  ;;  %v7534_v25 = vpop.f32.mrb[70].mxu1 }
 0x827   : > { %v9045_v16 = vpop.eup %9044  ;;  %6631 = vst [vmem:[%s11005_s28 + $0x30] sm:$0xff] %v9043_v14  ;;  %9064 = vrcp.f32 %v6208_v6  ;;  %v11853_v12 = vadd.f32 %v7532_v56, %v7531_v3  ;;  %v5825_v27 = vmul.f32 1.442695, %v5553_v35  ;;  %v5563_v24 = vsub.f32 0.0, %v5033_v5  ;;  %v7535_v43 = vpop.f32.mrb[71].mxu1 }
 0x828   : > { %v9047_v11 = vpop.eup %9046  ;;  %6634 = vst [vmem:[%s11005_s28 + $0x48] sm:$0xff] %v9045_v16  ;;  %9066 = vrcp.f32 %v6211_v33  ;;  %v5564_v32 = vsub.f32 0.0, %v5035_v55  ;;  %v11857_v14 = vadd.f32 %v7535_v43, %v7534_v25  ;;  %v5833_v33 = vmul.f32 1.442695, %v5557_v19  ;;  %v12227_v25 = vld [vmem:[#allocation9_spill] sm:$0xff] }
 0x829   : > { %v9049_v57 = vpop.eup %9048  ;;  %6635 = vst [vmem:[%s11005_s28 + $0x50] sm:$0xff] %v9047_v11  ;;  %9068 = vpow2.f32 %v5803_v42  ;;  %v5831_v42 = vmul.f32 1.442695, %v5556_v20  ;;  %v5567_v16 = vsub.f32 0.0, %v5411_v48  ;;  %v5839_v35 = vmul.f32 1.442695, %v5560_v2 }
 0x82a   : > { %v9051_v23 = vpop.eup %9050  ;;  %6638 = vst [vmem:[%s11005_s28 + $0x68] sm:$0xff] %v9049_v57  ;;  %9070 = vpow2.f32 %v5805_v46  ;;  %v5570_v5 = vsub.f32 0.0, %v5037_v17  ;;  %v5847_v55 = vmul.f32 1.442695, %v5564_v32  ;;  %v7537_v11 = vpop.f32.mrb[72].mxu1  ;;  %v5043_v32 = vadd.f32 %v11581_v36, %v11707_v38 }
 0x82b   : > { %v9053_v6 = vpop.eup %9052  ;;  %6641 = vst [vmem:[%s11005_s28 + $0x80] sm:$0xff] %v9051_v23  ;;  %9072 = vpow2.f32 %v5811_v28  ;;  %v5845_v28 = vmul.f32 1.442695, %v5563_v24  ;;  %v5853_v19 = vmul.f32 1.442695, %v5567_v16  ;;  %v7538_v48 = vpop.f32.mrb[73].mxu1  ;;  %v5039_v23 = vadd.f32 %v12227_v25, %v11712_v29 }
 0x82c   : > { %v9055_v44 = vpop.eup %9054  ;;  %6642 = vst [vmem:[%s11005_s28 + $0x88] sm:$0xff] %v9053_v6  ;;  %9074 = vpow2.f32 %v5817_v63  ;;  %v5859_v56 = vmul.f32 1.442695, %v5570_v5  ;;  %v11865_v57 = vadd.f32 %v7538_v48, %v7537_v11  ;;  %v7540_v2 = vpop.f32.mrb[74].mxu1  ;;  %v5045_v16 = vadd.f32 %v11584_v58, %v11712_v29 }
 0x82d   : > { %v9057_v46 = vpop.eup %9056  ;;  %6645 = vst [vmem:[%s11005_s28 + $0xa0] sm:$0xff] %v9055_v44  ;;  %9076 = vpow2.f32 %v5819_v40  ;;  %v5571_v5 = vsub.f32 0.0, %v5039_v23 }
 0x82e   : > { %v9059_v3 = vpop.eup %9058  ;;  %6648 = vst [vmem:[%s11005_s28 + $0xb8] sm:$0xff] %v9057_v46  ;;  %9078 = vpow2.f32 %v5825_v27  ;;  %v7541_v27 = vpop.f32.mrb[75].mxu1  ;;  %v5578_v58 = vsub.f32 0.0, %v5045_v16  ;;  %v5047_v16 = vadd.f32 %v11587_v9, %v11707_v38 }
 0x82f   : > { %v9061_v20 = vpop.eup %9060  ;;  %6649 = vst [vmem:[%s11005_s28 + $0xc0] sm:$0xff] %v9059_v3  ;;  %9080 = vpow2.f32 %v5831_v42  ;;  %v11871_v43 = vadd.f32 %v7541_v27, %v7540_v2  ;;  %v5861_v23 = vmul.f32 1.442695, %v5571_v5 }
 0x830   : > { %v9063_v63 = vpop.eup %9062  ;;  %6652 = vst [vmem:[%s11005_s28 + $0xd8] sm:$0xff] %v9061_v20  ;;  %9082 = vpow2.f32 %v5833_v33  ;;  %v5414_v20 = vadd.f32 %v11594_v13, %v11745_v39  ;;  %v5419_v13 = vadd.f32 %v11599_v37, %v11745_v39 }
 0x831   : > { %v9065_v40 = vpop.eup %9064  ;;  %6655 = vst [vmem:[%s11005_s28 + $0xf0] sm:$0xff] %v9063_v63  ;;  %9084 = vpow2.f32 %v5839_v35  ;;  %v5577_v63 = vsub.f32 0.0, %v5043_v32 }
 0x832   : > { %v9067_v17 = vpop.eup %9066  ;;  %6656 = vst [vmem:[%s11005_s28 + $0xf8] sm:$0xff] %v9065_v40  ;;  %9086 = vpow2.f32 %v5845_v28 }
 0x833   : > { %v9069_v24 = vpop.eup %9068  ;;  %6659 = vst [vmem:[%s11005_s28 + $0x110] sm:$0xff] %v9067_v17  ;;  %9088 = vpow2.f32 %v5847_v55  ;;  %v7543_v55 = vpop.f32.mrb[76].mxu1  ;;  %v5873_v37 = vmul.f32 1.442695, %v5577_v63 }
 0x834   : > { %v9071_v6 = vpop.eup %9070  ;;  %v6214_v42 = vadd.f32 1.0, %v9069_v24  ;;  %9090 = vpow2.f32 %v5853_v19  ;;  %v7544_v19 = vpop.f32.mrb[77].mxu1 }
 0x835   : > { %v9073_v44 = vpop.eup %9072  ;;  %v6215_v33 = vadd.f32 1.0, %v9071_v6  ;;  %9092 = vpow2.f32 %v5859_v56  ;;  %v11879_v56 = vadd.f32 %v7544_v19, %v7543_v55  ;;  %v7546_v2 = vpop.f32.mrb[78].mxu1 }
 0x836   : > { %v9075_v46 = vpop.eup %9074  ;;  %9094 = vrcp.f32 %v6214_v42  ;;  %v6218_v35 = vadd.f32 1.0, %v9073_v44  ;;  %v7547_v27 = vpop.f32.mrb[79].mxu1  ;;  %v5574_v42 = vsub.f32 0.0, %v5414_v20  ;;  %v5581_v20 = vsub.f32 0.0, %v5419_v13 }
 0x837   : > { %v9077_v3 = vpop.eup %9076  ;;  %9096 = vrcp.f32 %v6215_v33  ;;  %v6221_v28 = vadd.f32 1.0, %v9075_v46  ;;  %v11883_v32 = vadd.f32 %v7547_v27, %v7546_v2  ;;  %v5049_v46 = vadd.f32 %v11590_v50, %v11712_v29 }
 0x838   : > { %v9079_v11 = vpop.eup %9078  ;;  %9098 = vrcp.f32 %v6218_v35  ;;  %v6222_v36 = vadd.f32 1.0, %v9077_v3  ;;  %v5875_v3 = vmul.f32 1.442695, %v5578_v58  ;;  %v5867_v9 = vmul.f32 1.442695, %v5574_v42 }
 0x839   : > { %v9081_v48 = vpop.eup %9080  ;;  %9100 = vrcp.f32 %v6221_v28  ;;  %v6225_v40 = vadd.f32 1.0, %v9079_v11  ;;  %v5422_v11 = vadd.f32 %v11612_v45, %v11745_v39  ;;  %v5053_v50 = vadd.f32 %v11602_v60, %v11707_v38 }
 0x83a   : > { %v9083_v17 = vpop.eup %9082  ;;  %9102 = vrcp.f32 %v6222_v36  ;;  %v6228_v25 = vadd.f32 1.0, %v9081_v48  ;;  %v7549_v48 = vpop.f32.mrb[80].mxu1  ;;  %v5584_v58 = vsub.f32 0.0, %v5047_v16  ;;  %v5055_v2 = vadd.f32 %v11605_v52, %v11712_v29 }
 0x83b   : > { %v9085_v24 = vpop.eup %9084  ;;  %9104 = vrcp.f32 %v6225_v40  ;;  %v6229_v6 = vadd.f32 1.0, %v9083_v17  ;;  %v7550_v17 = vpop.f32.mrb[81].mxu1  ;;  %v5585_v45 = vsub.f32 0.0, %v5049_v46  ;;  %v5057_v13 = vadd.f32 %v11610_v18, %v11707_v38 }
 0x83c   : > { %v9087_v44 = vpop.eup %9086  ;;  %9106 = vrcp.f32 %v6228_v25  ;;  %v6232_v33 = vadd.f32 1.0, %v9085_v24  ;;  %v11898_v27 = vadd.f32 %v7550_v17, %v7549_v48  ;;  %v7552_v60 = vpop.f32.mrb[82].mxu1  ;;  %v5588_v42 = vsub.f32 0.0, %v5422_v11 }
 0x83d   : > { %v9089_v35 = vpop.eup %9088  ;;  %9108 = vrcp.f32 %v6229_v6  ;;  %v6235_v5 = vadd.f32 1.0, %v9087_v44  ;;  %v5881_v6 = vmul.f32 1.442695, %v5581_v20  ;;  %v5059_v52 = vadd.f32 %v11614_v0, %v11712_v29  ;;  %v7553_v44 = vpop.f32.mrb[83].mxu1 }
 0x83e   : > { %v9091_v28 = vpop.eup %9090  ;;  %9110 = vrcp.f32 %v6232_v33  ;;  %v6236_v55 = vadd.f32 1.0, %v9089_v35  ;;  %v5591_v16 = vsub.f32 0.0, %v5053_v50  ;;  %v5063_v18 = vadd.f32 %v11620_v21, %v11707_v38  ;;  %v7555_v50 = vpop.f32.mrb[84].mxu1 }
 0x83f   : > { %v9093_v36 = vpop.eup %9092  ;;  %9112 = vrcp.f32 %v6235_v5  ;;  %v6239_v19 = vadd.f32 1.0, %v9091_v28  ;;  %v11906_v46 = vadd.f32 %v7553_v44, %v7552_v60  ;;  %v5887_v5 = vmul.f32 1.442695, %v5584_v58 }
 0x840   : > { %v9095_v40 = vpop.eup %9094  ;;  %9114 = vrcp.f32 %v6236_v55  ;;  %v6242_v63 = vadd.f32 1.0, %v9093_v36  ;;  %v5592_v28 = vsub.f32 0.0, %v5055_v2  ;;  %v5889_v0 = vmul.f32 1.442695, %v5585_v45 }
 0x841   : > { %v9097_v25 = vpop.eup %9096  ;;  %6662 = vst [vmem:[%s11005_s28 + $0x128] sm:$0xff] %v9095_v40  ;;  %9116 = vrcp.f32 %v6239_v19  ;;  %v5598_v20 = vsub.f32 0.0, %v5057_v13  ;;  %v5599_v21 = vsub.f32 0.0, %v5059_v52  ;;  %v5901_v19 = vmul.f32 1.442695, %v5591_v16  ;;  %v7556_v40 = vpop.f32.mrb[85].mxu1 }
 0x842   : > { %v9099_v24 = vpop.eup %9098  ;;  %6663 = vst [vmem:[%s11005_s28 + $0x130] sm:$0xff] %v9097_v25  ;;  %9118 = vrcp.f32 %v6242_v63  ;;  %v7558_v2 = vpop.f32.mrb[86].mxu1  ;;  %v5067_v16 = vadd.f32 %v11636_v31, %v11707_v38 }
 0x843   : > { %v9101_v33 = vpop.eup %9100  ;;  %6666 = vst [vmem:[%s11005_s28 + $0x148] sm:$0xff] %v9099_v24  ;;  %9120 = vpow2.f32 %v5861_v23  ;;  %v5895_v23 = vmul.f32 1.442695, %v5588_v42  ;;  %v5915_v58 = vmul.f32 1.442695, %v5598_v20  ;;  %v7559_v45 = vpop.f32.mrb[87].mxu1  ;;  %v5065_v24 = vadd.f32 %v11624_v53, %v11712_v29 }
 0x844   : > { %v9103_v35 = vpop.eup %9102  ;;  %6669 = vst [vmem:[%s11005_s28 + $0x160] sm:$0xff] %v9101_v33  ;;  %9122 = vpow2.f32 %v5867_v9  ;;  %v5605_v9 = vsub.f32 0.0, %v5063_v18  ;;  %v5917_v25 = vmul.f32 1.442695, %v5599_v21  ;;  %v7561_v42 = vpop.f32.mrb[88].mxu1 }
 0x845   : > { %v9105_v55 = vpop.eup %9104  ;;  %6670 = vst [vmem:[%s11005_s28 + $0x168] sm:$0xff] %v9103_v35  ;;  %9124 = vpow2.f32 %v5873_v37  ;;  %v5903_v37 = vmul.f32 1.442695, %v5592_v28  ;;  %v7562_v44 = vpop.f32.mrb[89].mxu1  ;;  %v5606_v20 = vsub.f32 0.0, %v5065_v24 }
 0x846   : > { %v9107_v11 = vpop.eup %9106  ;;  %6673 = vst [vmem:[%s11005_s28 + $0x180] sm:$0xff] %v9105_v55  ;;  %9126 = vpow2.f32 %v5875_v3  ;;  %v11914_v3 = vadd.f32 %v7556_v40, %v7555_v50  ;;  %v5929_v60 = vmul.f32 1.442695, %v5605_v9  ;;  %v11926_v18 = vadd.f32 %v7562_v44, %v7561_v42  ;;  %v7564_v35 = vpop.f32.mrb[90].mxu1 }
 0x847   : > { %v9109_v36 = vpop.eup %9108  ;;  %6676 = vst [vmem:[%s11005_s28 + $0x198] sm:$0xff] %v9107_v11  ;;  %9128 = vpow2.f32 %v5881_v6  ;;  %v11920_v6 = vadd.f32 %v7559_v45, %v7558_v2  ;;  %v7565_v53 = vpop.f32.mrb[91].mxu1  ;;  %v5931_v42 = vmul.f32 1.442695, %v5606_v20 }
 0x848   : > { %v9111_v48 = vpop.eup %9110  ;;  %6677 = vst [vmem:[%s11005_s28 + $0x1a0] sm:$0xff] %v9109_v36  ;;  %9130 = vpow2.f32 %v5887_v5  ;;  %v7567_v11 = vpop.f32.mrb[92].mxu1  ;;  %v5069_v36 = vadd.f32 %v11640_v30, %v11712_v29  ;;  %v5073_v30 = vadd.f32 %v11653_v54, %v11707_v38 }
 0x849   : > { %v9113_v63 = vpop.eup %9112  ;;  %6680 = vst [vmem:[%s11005_s28 + $0x1b8] sm:$0xff] %v9111_v48  ;;  %9132 = vpow2.f32 %v5889_v0  ;;  %v7568_v31 = vpop.f32.mrb[93].mxu1  ;;  %v5612_v48 = vsub.f32 0.0, %v5067_v16 }
 0x84a   : > { %v9115_v17 = vpop.eup %9114  ;;  %6683 = vst [vmem:[%s11005_s28 + $0x1d0] sm:$0xff] %v9113_v63  ;;  %9134 = vpow2.f32 %v5895_v23  ;;  %v7570_v40 = vpop.f32.mrb[94].mxu1 }
 0x84b   : > { %v9117_v13 = vpop.eup %9116  ;;  %6684 = vst [vmem:[%s11005_s28 + $0x1d8] sm:$0xff] %v9115_v17  ;;  %9136 = vpow2.f32 %v5901_v19  ;;  %v11930_v19 = vadd.f32 %v7565_v53, %v7564_v35  ;;  %v7571_v2 = vpop.f32.mrb[95].mxu1  ;;  %v5943_v35 = vmul.f32 1.442695, %v5612_v48 }
 0x84c   : > { %v9119_v52 = vpop.eup %9118  ;;  %6687 = vst [vmem:[%s11005_s28 + $0x1f0] sm:$0xff] %v9117_v13  ;;  %9138 = vpow2.f32 %v5903_v37  ;;  %v11932_v37 = vadd.f32 %v7568_v31, %v7567_v11  ;;  %v11936_v45 = vadd.f32 %v7571_v2, %v7570_v40  ;;  %v7573_v13 = vpop.f32.mrb[96].mxu1  ;;  %v5619_v31 = vsub.f32 0.0, %v5073_v30 }
 0x84d   : > { %v9121_v33 = vpop.eup %9120  ;;  %6690 = vst [vmem:[%s11005_s28 + $0x208] sm:$0xff] %v9119_v52  ;;  %9140 = vpow2.f32 %v5915_v58  ;;  %v5613_v52 = vsub.f32 0.0, %v5069_v36  ;;  %v7574_v44 = vpop.f32.mrb[97].mxu1 }
 0x84e   : > { %v9123_v5 = vpop.eup %9122  ;;  %v6243_v28 = vadd.f32 1.0, %v9121_v33  ;;  %9142 = vpow2.f32 %v5917_v25  ;;  %v7576_v53 = vpop.f32.mrb[98].mxu1 }
 0x84f   : > { %v9125_v55 = vpop.eup %9124  ;;  %v6246_v0 = vadd.f32 1.0, %v9123_v5  ;;  %9144 = vpow2.f32 %v5929_v60  ;;  %v12228_v5 = vld [vmem:[#allocation10_spill] sm:$0xff] }
 0x850   : > { %v9127_v23 = vpop.eup %9126  ;;  %9146 = vrcp.f32 %v6243_v28  ;;  %v6249_v21 = vadd.f32 1.0, %v9125_v55  ;;  %v5075_v28 = vadd.f32 %v12228_v5, %v11712_v29 }
 0x851   : > { %v9129_v9 = vpop.eup %9128  ;;  %9148 = vrcp.f32 %v6246_v0  ;;  %v6250_v50 = vadd.f32 1.0, %v9127_v23  ;;  %v12229_v0 = vld [vmem:[#allocation11_spill] sm:$0xff]  ;;  %v11942_v23 = vadd.f32 %v7574_v44, %v7573_v13 }
 0x852   : > { %v9131_v63 = vpop.eup %9130  ;;  %9150 = vrcp.f32 %v6249_v21  ;;  %v6253_v58 = vadd.f32 1.0, %v9129_v9  ;;  %v5077_v11 = vadd.f32 %v12229_v0, %v11707_v38  ;;  %v7577_v21 = vpop.f32.mrb[99].mxu1  ;;  %v12230_v9 = vld [vmem:[#allocation12_spill] sm:$0xff]  ;;  %v5620_v13 = vsub.f32 0.0, %v5075_v28 }
 0x853   : > { %v9133_v17 = vpop.eup %9132  ;;  %9152 = vrcp.f32 %v6250_v50  ;;  %v6256_v25 = vadd.f32 1.0, %v9131_v63  ;;  %v5079_v50 = vadd.f32 %v12230_v9, %v11712_v29  ;;  %v12231_v63 = vld [vmem:[#allocation13_spill] sm:$0xff]  ;;  %v11948_v2 = vadd.f32 %v7577_v21, %v7576_v53  ;;  %v12234_v0 = vld [vmem:[#allocation16_spill] sm:$0xff] }
 0x854   : > { %v9135_v60 = vpop.eup %9134  ;;  %9154 = vrcp.f32 %v6253_v58  ;;  %v6257_v24 = vadd.f32 1.0, %v9133_v17  ;;  %v5083_v58 = vadd.f32 %v12231_v63, %v11707_v38  ;;  %v5945_v53 = vmul.f32 1.442695, %v5613_v52  ;;  %v12235_v9 = vld [vmem:[#allocation17_spill] sm:$0xff]  ;;  %v12236_v52 = vld [vmem:[#allocation4_spill] sm:$0xff] }
 0x855   : > { %v9137_v33 = vpop.eup %9136  ;;  %9156 = vrcp.f32 %v6256_v25  ;;  %v6260_v16 = vadd.f32 1.0, %v9135_v60  ;;  %v12232_v60 = vld [vmem:[#allocation14_spill] sm:$0xff]  ;;  %v5089_v28 = vadd.f32 %v12234_v0, %v11712_v29 }
 0x856   : > { %v9139_v55 = vpop.eup %9138  ;;  %9158 = vrcp.f32 %v6257_v24  ;;  %v6263_v54 = vadd.f32 1.0, %v9137_v33  ;;  %v5085_v30 = vadd.f32 %v12232_v60, %v11712_v29  ;;  %v5626_v33 = vsub.f32 0.0, %v5077_v11 }
 0x857   : > { %v9141_v20 = vpop.eup %9140  ;;  %9160 = vrcp.f32 %v6260_v16  ;;  %v6264_v36 = vadd.f32 1.0, %v9139_v55  ;;  %v12233_v16 = vld [vmem:[#allocation15_spill] sm:$0xff]  ;;  %v5093_v11 = vadd.f32 %v12235_v9, %v11707_v38 }
 0x858   : > { %v9143_v48 = vpop.eup %9142  ;;  %9162 = vrcp.f32 %v6263_v54  ;;  %v6270_v40 = vadd.f32 1.0, %v9141_v20  ;;  %v5087_v5 = vadd.f32 %v12233_v16, %v11707_v38  ;;  %v5627_v54 = vsub.f32 0.0, %v5079_v50 }
 0x859   : > { %v9145_v17 = vpop.eup %9144  ;;  %9164 = vrcp.f32 %v6264_v36  ;;  %v6271_v25 = vadd.f32 1.0, %v9143_v48  ;;  %v5957_v20 = vmul.f32 1.442695, %v5619_v31  ;;  %v5633_v36 = vsub.f32 0.0, %v5083_v58 }
 0x85a   : > { %v9147_v24 = vpop.eup %9146  ;;  %9166 = vrcp.f32 %v6270_v40  ;;  %v6277_v44 = vadd.f32 1.0, %v9145_v17  ;;  %v5959_v40 = vmul.f32 1.442695, %v5620_v13  ;;  %v5634_v63 = vsub.f32 0.0, %v5085_v30  ;;  %v7579_v17 = vpop.f32.mrb[100].mxu1 }
 0x85b   : > { %v9149_v55 = vpop.eup %9148  ;;  %6691 = vst [vmem:[%s11005_s28 + $0x210] sm:$0xff] %v9147_v24  ;;  %9168 = vrcp.f32 %v6271_v25  ;;  %v5095_v50 = vadd.f32 %v12236_v52, %v11712_v29  ;;  %v5971_v60 = vmul.f32 1.442695, %v5626_v33  ;;  %v5640_v31 = vsub.f32 0.0, %v5087_v5  ;;  %v7580_v58 = vpop.f32.mrb[101].mxu1 }
 0x85c   : > { %v9151_v21 = vpop.eup %9150  ;;  %6694 = vst [vmem:[%s11005_s28 + $0x228] sm:$0xff] %v9149_v55  ;;  %9170 = vrcp.f32 %v6277_v44  ;;  %v5973_v44 = vmul.f32 1.442695, %v5627_v54  ;;  %v5641_v16 = vsub.f32 0.0, %v5089_v28  ;;  %v7582_v13 = vpop.f32.mrb[102].mxu1  ;;  %v5647_v0 = vsub.f32 0.0, %v5093_v11 }
 0x85d   : > { %v9153_v48 = vpop.eup %9152  ;;  %6697 = vst [vmem:[%s11005_s28 + $0x240] sm:$0xff] %v9151_v21  ;;  %9172 = vpow2.f32 %v5931_v42  ;;  %v11965_v42 = vadd.f32 %v7580_v58, %v7579_v17  ;;  %v5985_v55 = vmul.f32 1.442695, %v5633_v36  ;;  %v5987_v5 = vmul.f32 1.442695, %v5634_v63 }
 0x85e   : > { %v9155_v25 = vpop.eup %9154  ;;  %6698 = vst [vmem:[%s11005_s28 + $0x248] sm:$0xff] %v9153_v48  ;;  %9174 = vpow2.f32 %v5943_v35  ;;  %v7583_v35 = vpop.f32.mrb[103].mxu1  ;;  %v5999_v21 = vmul.f32 1.442695, %v5640_v31  ;;  %v6013_v11 = vmul.f32 1.442695, %v5647_v0 }
 0x85f   : > { %v9157_v24 = vpop.eup %9156  ;;  %6701 = vst [vmem:[%s11005_s28 + $0x260] sm:$0xff] %v9155_v25  ;;  %9176 = vpow2.f32 %v5945_v53  ;;  %v5648_v53 = vsub.f32 0.0, %v5095_v50  ;;  %v11969_v54 = vadd.f32 %v7583_v35, %v7582_v13  ;;  %v12237_v50 = vld [vmem:[#allocation3_spill] sm:$0xff]  ;;  %v12238_v31 = vld [vmem:[#allocation18_spill] sm:$0xff] }
 0x860   : > { %v9159_v30 = vpop.eup %9158  ;;  %6704 = vst [vmem:[%s11005_s28 + $0x278] sm:$0xff] %v9157_v24  ;;  %9178 = vpow2.f32 %v5957_v20  ;;  %v6001_v20 = vmul.f32 1.442695, %v5641_v16  ;;  %v5097_v17 = vadd.f32 %v12237_v50, %v11707_v38  ;;  %v5099_v58 = vadd.f32 %v12238_v31, %v11712_v29 }
 0x861   : > { %v9161_v33 = vpop.eup %9160  ;;  %6705 = vst [vmem:[%s11005_s28 + $0x280] sm:$0xff] %v9159_v30  ;;  %9180 = vpow2.f32 %v5959_v40  ;;  %v6015_v40 = vmul.f32 1.442695, %v5648_v53 }
 0x862   : > { %v9163_v28 = vpop.eup %9162  ;;  %6708 = vst [vmem:[%s11005_s28 + $0x298] sm:$0xff] %v9161_v33  ;;  %9182 = vpow2.f32 %v5971_v60  ;;  %v5654_v0 = vsub.f32 0.0, %v5097_v17 }
 0x863   : > { %v9165_v9 = vpop.eup %9164  ;;  %6711 = vst [vmem:[%s11005_s28 + $0x2b0] sm:$0xff] %v9163_v28  ;;  %9184 = vpow2.f32 %v5973_v44 }
 0x864   : > { %v9167_v36 = vpop.eup %9166  ;;  %6712 = vst [vmem:[%s11005_s28 + $0x2b8] sm:$0xff] %v9165_v9  ;;  %9186 = vpow2.f32 %v5985_v55 }
 0x865   : > { %v9169_v48 = vpop.eup %9168  ;;  %6718 = vst [vmem:[%s11005_s28 + $0x2e8] sm:$0xff] %v9167_v36  ;;  %9188 = vpow2.f32 %v5987_v5  ;;  %v5655_v5 = vsub.f32 0.0, %v5099_v58  ;;  %v5105_v36 = vadd.f32 %v11731_v59, %v11712_v29  ;;  %v5113_v59 = vadd.f32 %v11748_v61, %v11707_v38 }
 0x866   : > { %v9171_v63 = vpop.eup %9170  ;;  %6719 = vst [vmem:[%s11005_s28 + $0x2f0] sm:$0xff] %v9169_v48  ;;  %9190 = vpow2.f32 %v5999_v21  ;;  %v5103_v21 = vadd.f32 %v11728_v47, %v11707_v38  ;;  %v5109_v47 = vadd.f32 %v11738_v1, %v11712_v29 }
 0x867   : > { %v9173_v52 = vpop.eup %9172  ;;  %6725 = vst [vmem:[%s11005_s28 + $0x320] sm:$0xff] %v9171_v63  ;;  %9192 = vpow2.f32 %v6001_v20  ;;  %v5107_v63 = vadd.f32 %v11734_v49, %v11707_v38  ;;  %v6029_v17 = vmul.f32 1.442695, %v5655_v5  ;;  %v5115_v49 = vadd.f32 %v11753_v22, %v11712_v29 }
 0x868   : > { %v9175_v25 = vpop.eup %9174  ;;  %v6278_v60 = vadd.f32 1.0, %v9173_v52  ;;  %9194 = vpow2.f32 %v6013_v11  ;;  %v5661_v31 = vsub.f32 0.0, %v5103_v21  ;;  %v5669_v61 = vsub.f32 0.0, %v5109_v47 }
 0x869   : > { %v9177_v24 = vpop.eup %9176  ;;  %v6284_v44 = vadd.f32 1.0, %v9175_v25  ;;  %9196 = vpow2.f32 %v6015_v40  ;;  %v6027_v40 = vmul.f32 1.442695, %v5654_v0  ;;  %v5668_v1 = vsub.f32 0.0, %v5107_v63 }
 0x86a   : > { %v9179_v16 = vpop.eup %9178  ;;  %9198 = vrcp.f32 %v6278_v60  ;;  %v6285_v13 = vadd.f32 1.0, %v9177_v24  ;;  %v6041_v22 = vmul.f32 1.442695, %v5661_v31 }
 0x86b   : > { %v9181_v30 = vpop.eup %9180  ;;  %9200 = vrcp.f32 %v6284_v44  ;;  %v6291_v55 = vadd.f32 1.0, %v9179_v16  ;;  %v5662_v44 = vsub.f32 0.0, %v5105_v36  ;;  %v12241_v36 = vld [vmem:[#allocation20_spill] sm:$0xff]  ;;  %v6055_v63 = vmul.f32 1.442695, %v5668_v1 }
 0x86c   : > { %v9183_v35 = vpop.eup %9182  ;;  %9202 = vrcp.f32 %v6285_v13  ;;  %v6292_v33 = vadd.f32 1.0, %v9181_v30  ;;  %v5117_v30 = vadd.f32 %v11755_v62, %v11707_v38 }
 0x86d   : > { %v9185_v53 = vpop.eup %9184  ;;  %9204 = vrcp.f32 %v6291_v55  ;;  %v6298_v28 = vadd.f32 1.0, %v9183_v35  ;;  %v12239_v35 = vld [vmem:[#allocation2_spill] sm:$0xff]  ;;  %v6043_v62 = vmul.f32 1.442695, %v5662_v44 }
 0x86e   : > { %v9187_v9 = vpop.eup %9186  ;;  %9206 = vrcp.f32 %v6292_v33  ;;  %v6299_v20 = vadd.f32 1.0, %v9185_v53  ;;  %v5119_v33 = vadd.f32 %v12239_v35, %v11712_v29  ;;  %v5675_v53 = vsub.f32 0.0, %v5113_v59 }
 0x86f   : > { %v9189_v11 = vpop.eup %9188  ;;  %9208 = vrcp.f32 %v6298_v28  ;;  %v6305_v48 = vadd.f32 1.0, %v9187_v9  ;;  %v12240_v28 = vld [vmem:[#allocation19_spill] sm:$0xff] }
 0x870   : > { %v9191_v52 = vpop.eup %9190  ;;  %9210 = vrcp.f32 %v6299_v20  ;;  %v6306_v50 = vadd.f32 1.0, %v9189_v11  ;;  %v5123_v21 = vadd.f32 %v12240_v28, %v11707_v38  ;;  %v5676_v20 = vsub.f32 0.0, %v5115_v49  ;;  %v12243_v28 = vld [vmem:[#allocation22_spill] sm:$0xff] }
 0x871   : > { %v9193_v25 = vpop.eup %9192  ;;  %9212 = vrcp.f32 %v6305_v48  ;;  %v6312_v60 = vadd.f32 1.0, %v9191_v52  ;;  %v5125_v11 = vadd.f32 %v12241_v36, %v11712_v29  ;;  %v5682_v52 = vsub.f32 0.0, %v5117_v30 }
 0x872   : > { %v9195_v58 = vpop.eup %9194  ;;  %9214 = vrcp.f32 %v6306_v50  ;;  %v6313_v24 = vadd.f32 1.0, %v9193_v25  ;;  %v12242_v50 = vld [vmem:[#allocation21_spill] sm:$0xff]  ;;  %v5683_v31 = vsub.f32 0.0, %v5119_v33 }
 0x873   : > { %v9197_v16 = vpop.eup %9196  ;;  %9216 = vrcp.f32 %v6312_v60  ;;  %v6319_v13 = vadd.f32 1.0, %v9195_v58  ;;  %v5127_v47 = vadd.f32 %v12242_v50, %v11707_v38  ;;  %v6057_v60 = vmul.f32 1.442695, %v5669_v61 }
 0x874   : > { %v9199_v55 = vpop.eup %9198  ;;  %9218 = vrcp.f32 %v6313_v24  ;;  %v6320_v0 = vadd.f32 1.0, %v9197_v16  ;;  %v6069_v58 = vmul.f32 1.442695, %v5675_v53  ;;  %v5689_v24 = vsub.f32 0.0, %v5123_v21 }
 0x875   : > { %v9201_v5 = vpop.eup %9200  ;;  %6726 = vst [vmem:[%s11005_s28 + $0x328] sm:$0xff] %v9199_v55  ;;  %9220 = vrcp.f32 %v6319_v13  ;;  %v5690_v49 = vsub.f32 0.0, %v5125_v11  ;;  %v5696_v13 = vsub.f32 0.0, %v5127_v47  ;;  %v6085_v30 = vmul.f32 1.442695, %v5683_v31 }
 0x876   : > { %v9203_v9 = vpop.eup %9202  ;;  %6732 = vst [vmem:[%s11005_s28 + $0x358] sm:$0xff] %v9201_v5  ;;  %9222 = vrcp.f32 %v6320_v0  ;;  %v6097_v0 = vmul.f32 1.442695, %v5689_v24  ;;  %v5129_v21 = vadd.f32 %v12243_v28, %v11712_v29  ;;  %v5133_v11 = vadd.f32 %v11794_v7, %v11707_v38 }
 0x877   : > { %v9205_v48 = vpop.eup %9204  ;;  %6733 = vst [vmem:[%s11005_s28 + $0x360] sm:$0xff] %v9203_v9  ;;  %9224 = vpow2.f32 %v6027_v40  ;;  %v6071_v40 = vmul.f32 1.442695, %v5676_v20  ;;  %v6099_v35 = vmul.f32 1.442695, %v5690_v49  ;;  %v5135_v31 = vadd.f32 %v11797_v10, %v11712_v29 }
 0x878   : > { %v9207_v25 = vpop.eup %9206  ;;  %6739 = vst [vmem:[%s11005_s28 + $0x390] sm:$0xff] %v9205_v48  ;;  %9226 = vpow2.f32 %v6029_v17  ;;  %v6083_v17 = vmul.f32 1.442695, %v5682_v52  ;;  %v6111_v5 = vmul.f32 1.442695, %v5696_v13  ;;  %v5697_v47 = vsub.f32 0.0, %v5129_v21 }
 0x879   : > { %v9209_v59 = vpop.eup %9208  ;;  %6740 = vst [vmem:[%s11005_s28 + $0x398] sm:$0xff] %v9207_v25  ;;  %9228 = vpow2.f32 %v6041_v22  ;;  %v5703_v24 = vsub.f32 0.0, %v5133_v11  ;;  %v5139_v13 = vadd.f32 %v11803_v26, %v11712_v29  ;;  %v5147_v26 = vadd.f32 %v11820_v41, %v11707_v38  ;;  %v12244_v21 = vld [vmem:[#allocation23_spill] sm:$0xff] }
 0x87a   : > { %v9211_v44 = vpop.eup %9210  ;;  %6746 = vst [vmem:[%s11005_s28 + $0x3c8] sm:$0xff] %v9209_v59  ;;  %9230 = vpow2.f32 %v6043_v62 }
 0x87b   : > { %v9213_v16 = vpop.eup %9212  ;;  %6747 = vst [vmem:[%s11005_s28 + $0x3d0] sm:$0xff] %v9211_v44  ;;  %9232 = vpow2.f32 %v6055_v63 }
 0x87c   : > { %v9215_v1 = vpop.eup %9214  ;;  %6753 = vst [vmem:[%s11005_s28 + $0x400] sm:$0xff] %v9213_v16  ;;  %9234 = vpow2.f32 %v6057_v60 }
 0x87d   : > { %v9217_v55 = vpop.eup %9216  ;;  %6754 = vst [vmem:[%s11005_s28 + $0x408] sm:$0xff] %v9215_v1  ;;  %9236 = vpow2.f32 %v6069_v58 }
 0x87e   : > { %v9219_v61 = vpop.eup %9218  ;;  %6760 = vst [vmem:[%s11005_s28 + $0x438] sm:$0xff] %v9217_v55  ;;  %9238 = vpow2.f32 %v6071_v40  ;;  %v5137_v40 = vadd.f32 %v11800_v4, %v11707_v38  ;;  %v5143_v55 = vadd.f32 %v11812_v51, %v11707_v38  ;;  %v5145_v4 = vadd.f32 %v11817_v34, %v11712_v29 }
 0x87f   : > { %v9221_v33 = vpop.eup %9220  ;;  %6761 = vst [vmem:[%s11005_s28 + $0x440] sm:$0xff] %v9219_v61  ;;  %9240 = vpow2.f32 %v6083_v17  ;;  %v6113_v17 = vmul.f32 1.442695, %v5697_v47  ;;  %v5711_v51 = vsub.f32 0.0, %v5139_v13 }
 0x880   : > { %v9223_v22 = vpop.eup %9222  ;;  %6767 = vst [vmem:[%s11005_s28 + $0x470] sm:$0xff] %v9221_v33  ;;  %9242 = vpow2.f32 %v6085_v30  ;;  %v5704_v30 = vsub.f32 0.0, %v5135_v31  ;;  %v5717_v34 = vsub.f32 0.0, %v5143_v55  ;;  %v5718_v41 = vsub.f32 0.0, %v5145_v4 }
 0x881   : > { %v9225_v53 = vpop.eup %9224  ;;  %6768 = vst [vmem:[%s11005_s28 + $0x478] sm:$0xff] %v9223_v22  ;;  %9244 = vpow2.f32 %v6097_v0  ;;  %v5710_v22 = vsub.f32 0.0, %v5137_v40 }
 0x882   : > { %v9227_v9 = vpop.eup %9226  ;;  %v6326_v62 = vadd.f32 1.0, %v9225_v53  ;;  %9246 = vpow2.f32 %v6099_v35  ;;  %v6125_v35 = vmul.f32 1.442695, %v5703_v24  ;;  %v6127_v38 = vmul.f32 1.442695, %v5704_v30 }
 0x883   : > { %v9229_v20 = vpop.eup %9228  ;;  %v6327_v36 = vadd.f32 1.0, %v9227_v9  ;;  %9248 = vpow2.f32 %v6111_v5  ;;  %v5149_v9 = vadd.f32 %v12244_v21, %v11712_v29  ;;  %v6139_v29 = vmul.f32 1.442695, %v5710_v22 }
 0x884   : > { %v9231_v48 = vpop.eup %9230  ;;  %9250 = vrcp.f32 %v6326_v62  ;;  %v6333_v63 = vadd.f32 1.0, %v9229_v20 }
 0x885   : > { %v9233_v52 = vpop.eup %9232  ;;  %9252 = vrcp.f32 %v6327_v36  ;;  %v6334_v50 = vadd.f32 1.0, %v9231_v48  ;;  %v5427_v36 = vadd.f32 %v11830_v15, %v11745_v39  ;;  %v5430_v48 = vadd.f32 %v11836_v8, %v11745_v39 }
 0x886   : > { %v9235_v25 = vpop.eup %9234  ;;  %9254 = vrcp.f32 %v6333_v63  ;;  %v6340_v60 = vadd.f32 1.0, %v9233_v52  ;;  %v5724_v52 = vsub.f32 0.0, %v5147_v26  ;;  %v6141_v15 = vmul.f32 1.442695, %v5711_v51 }
 0x887   : > { %v9237_v59 = vpop.eup %9236  ;;  %9256 = vrcp.f32 %v6334_v50  ;;  %v6341_v58 = vadd.f32 1.0, %v9235_v25  ;;  %v5435_v50 = vadd.f32 %v11853_v12, %v11745_v39  ;;  %v5725_v25 = vsub.f32 0.0, %v5149_v9 }
 0x888   : > { %v9239_v44 = vpop.eup %9238  ;;  %9258 = vrcp.f32 %v6340_v60  ;;  %v6347_v7 = vadd.f32 1.0, %v9237_v59  ;;  %v5438_v60 = vadd.f32 %v11857_v14, %v11745_v39  ;;  %v6153_v8 = vmul.f32 1.442695, %v5717_v34 }
 0x889   : > { %v9241_v49 = vpop.eup %9240  ;;  %9260 = vrcp.f32 %v6341_v58  ;;  %v6348_v16 = vadd.f32 1.0, %v9239_v44  ;;  %v5595_v59 = vsub.f32 0.0, %v5427_v36  ;;  %v6155_v12 = vmul.f32 1.442695, %v5718_v41 }
 0x88a   : > { %v9243_v1 = vpop.eup %9242  ;;  %9262 = vrcp.f32 %v6347_v7  ;;  %v6354_v10 = vadd.f32 1.0, %v9241_v49  ;;  %v5602_v24 = vsub.f32 0.0, %v5430_v48  ;;  %v6167_v7 = vmul.f32 1.442695, %v5724_v52 }
 0x88b   : > { %v9245_v0 = vpop.eup %9244  ;;  %9264 = vrcp.f32 %v6348_v16  ;;  %v6355_v61 = vadd.f32 1.0, %v9243_v1  ;;  %v5609_v40 = vsub.f32 0.0, %v5435_v50  ;;  %v6169_v49 = vmul.f32 1.442695, %v5725_v25 }
 0x88c   : > { %v9247_v33 = vpop.eup %9246  ;;  %9266 = vrcp.f32 %v6354_v10  ;;  %v6361_v5 = vadd.f32 1.0, %v9245_v0  ;;  %v5616_v16 = vsub.f32 0.0, %v5438_v60  ;;  %v5909_v13 = vmul.f32 1.442695, %v5595_v59 }
 0x88d   : > { %v9249_v53 = vpop.eup %9248  ;;  %9268 = vrcp.f32 %v6355_v61  ;;  %v6362_v28 = vadd.f32 1.0, %v9247_v33  ;;  %v5923_v10 = vmul.f32 1.442695, %v5602_v24  ;;  %v5937_v55 = vmul.f32 1.442695, %v5609_v40 }
 0x88e   : > { %v9251_v62 = vpop.eup %9250  ;;  %9270 = vrcp.f32 %v6361_v5  ;;  %v6368_v20 = vadd.f32 1.0, %v9249_v53  ;;  %v5951_v61 = vmul.f32 1.442695, %v5616_v16  ;;  %v5443_v33 = vadd.f32 %v11865_v57, %v11745_v39 }
 0x88f   : > { %v9253_v11 = vpop.eup %9252  ;;  %6774 = vst [vmem:[%s11005_s28 + $0x4a8] sm:$0xff] %v9251_v62  ;;  %9272 = vrcp.f32 %v6362_v28  ;;  %v5446_v26 = vadd.f32 %v11871_v43, %v11745_v39  ;;  %v5451_v43 = vadd.f32 %v11879_v56, %v11745_v39  ;;  %v5462_v56 = vadd.f32 %v11906_v46, %v11745_v39 }
 0x890   : > { %v9255_v63 = vpop.eup %9254  ;;  %6775 = vst [vmem:[%s11005_s28 + $0x4b0] sm:$0xff] %v9253_v11  ;;  %9274 = vrcp.f32 %v6368_v20  ;;  %v5623_v20 = vsub.f32 0.0, %v5443_v33  ;;  %v5475_v40 = vadd.f32 %v11926_v18, %v11745_v39  ;;  %v5478_v16 = vadd.f32 %v11930_v19, %v11745_v39 }
 0x891   : > { %v9257_v47 = vpop.eup %9256  ;;  %6781 = vst [vmem:[%s11005_s28 + $0x4e0] sm:$0xff] %v9255_v63  ;;  %9276 = vpow2.f32 %v6113_v17  ;;  %v5630_v57 = vsub.f32 0.0, %v5446_v26  ;;  %v5454_v63 = vadd.f32 %v11883_v32, %v11745_v39  ;;  %v5637_v59 = vsub.f32 0.0, %v5451_v43 }
 0x892   : > { %v9259_v31 = vpop.eup %9258  ;;  %6782 = vst [vmem:[%s11005_s28 + $0x4e8] sm:$0xff] %v9257_v47  ;;  %9278 = vpow2.f32 %v6125_v35  ;;  %v5965_v50 = vmul.f32 1.442695, %v5623_v20  ;;  %v5459_v47 = vadd.f32 %v11898_v27, %v11745_v39  ;;  %v5467_v32 = vadd.f32 %v11914_v3, %v11745_v39 }
 0x893   : > { %v9261_v58 = vpop.eup %9260  ;;  %6788 = vst [vmem:[%s11005_s28 + $0x518] sm:$0xff] %v9259_v31  ;;  %9280 = vpow2.f32 %v6127_v38  ;;  %v5979_v60 = vmul.f32 1.442695, %v5630_v57  ;;  %v5644_v24 = vsub.f32 0.0, %v5454_v63  ;;  %v5470_v27 = vadd.f32 %v11920_v6, %v11745_v39 }
 0x894   : > { %v9263_v44 = vpop.eup %9262  ;;  %6789 = vst [vmem:[%s11005_s28 + $0x520] sm:$0xff] %v9261_v58  ;;  %9282 = vpow2.f32 %v6139_v29  ;;  %v5651_v46 = vsub.f32 0.0, %v5459_v47  ;;  %v5658_v3 = vsub.f32 0.0, %v5462_v56  ;;  %v5993_v6 = vmul.f32 1.442695, %v5637_v59 }
 0x895   : > { %v9265_v14 = vpop.eup %9264  ;;  %6795 = vst [vmem:[%s11005_s28 + $0x550] sm:$0xff] %v9263_v44  ;;  %9284 = vpow2.f32 %v6141_v15  ;;  %v6007_v18 = vmul.f32 1.442695, %v5644_v24  ;;  %v5686_v33 = vsub.f32 0.0, %v5478_v16 }
 0x896   : > { %v9267_v17 = vpop.eup %9266  ;;  %6796 = vst [vmem:[%s11005_s28 + $0x558] sm:$0xff] %v9265_v14  ;;  %9286 = vpow2.f32 %v6153_v8  ;;  %v6021_v19 = vmul.f32 1.442695, %v5651_v46 }
 0x897   : > { %v9269_v1 = vpop.eup %9268  ;;  %6802 = vst [vmem:[%s11005_s28 + $0x588] sm:$0xff] %v9267_v17  ;;  %9288 = vpow2.f32 %v6155_v12 }
 0x898   : > { %v9271_v30 = vpop.eup %9270  ;;  %6803 = vst [vmem:[%s11005_s28 + $0x590] sm:$0xff] %v9269_v1  ;;  %9290 = vpow2.f32 %v6167_v7  ;;  %v5483_v1 = vadd.f32 %v11932_v37, %v11745_v39  ;;  %v6035_v37 = vmul.f32 1.442695, %v5658_v3 }
 0x899   : > { %v9273_v0 = vpop.eup %9272  ;;  %6809 = vst [vmem:[%s11005_s28 + $0x5c0] sm:$0xff] %v9271_v30  ;;  %9292 = vpow2.f32 %v6169_v49  ;;  %v5672_v30 = vsub.f32 0.0, %v5470_v27 }
 0x89a   : > { %v9275_v35 = vpop.eup %9274  ;;  %6810 = vst [vmem:[%s11005_s28 + $0x5c8] sm:$0xff] %v9273_v0  ;;  %9294 = vpow2.f32 %v5909_v13  ;;  %v5665_v13 = vsub.f32 0.0, %v5467_v32 }
 0x89b   : > { %v9277_v4 = vpop.eup %9276  ;;  %6816 = vst [vmem:[%s11005_s28 + $0x5f8] sm:$0xff] %v9275_v35  ;;  %9296 = vpow2.f32 %v5923_v10  ;;  %v5491_v35 = vadd.f32 %v11942_v23, %v11745_v39 }
 0x89c   : > { %v9279_v5 = vpop.eup %9278  ;;  %v6369_v22 = vadd.f32 1.0, %v9277_v4  ;;  %9298 = vpow2.f32 %v5937_v55  ;;  %v5486_v55 = vadd.f32 %v11936_v45, %v11745_v39  ;;  %v6049_v45 = vmul.f32 1.442695, %v5665_v13 }
 0x89d   : > { %v9281_v53 = vpop.eup %9280  ;;  %v6375_v28 = vadd.f32 1.0, %v9279_v5  ;;  %9300 = vpow2.f32 %v5951_v61  ;;  %v5679_v61 = vsub.f32 0.0, %v5475_v40 }
 0x89e   : > { %v9283_v51 = vpop.eup %9282  ;;  %9302 = vrcp.f32 %v6369_v22  ;;  %v6376_v21 = vadd.f32 1.0, %v9281_v53  ;;  %v5693_v22 = vsub.f32 0.0, %v5483_v1  ;;  %v6063_v53 = vmul.f32 1.442695, %v5672_v30 }
 0x89f   : > { %v9285_v9 = vpop.eup %9284  ;;  %9304 = vrcp.f32 %v6375_v28  ;;  %v6382_v62 = vadd.f32 1.0, %v9283_v51  ;;  %v5700_v28 = vsub.f32 0.0, %v5486_v55  ;;  %v6077_v51 = vmul.f32 1.442695, %v5679_v61 }
 0x8a0   : > { %v9287_v34 = vpop.eup %9286  ;;  %9306 = vrcp.f32 %v6376_v21  ;;  %v6383_v36 = vadd.f32 1.0, %v9285_v9  ;;  %v5707_v21 = vsub.f32 0.0, %v5491_v35 }
 0x8a1   : > { %v9289_v11 = vpop.eup %9288  ;;  %9308 = vrcp.f32 %v6382_v62  ;;  %v6389_v38 = vadd.f32 1.0, %v9287_v34  ;;  %v6091_v62 = vmul.f32 1.442695, %v5686_v33  ;;  %v6105_v34 = vmul.f32 1.442695, %v5693_v22 }
 0x8a2   : > { %v9291_v41 = vpop.eup %9290  ;;  %9310 = vrcp.f32 %v6383_v36  ;;  %v6390_v48 = vadd.f32 1.0, %v9289_v11  ;;  %v6119_v57 = vmul.f32 1.442695, %v5700_v28 }
 0x8a3   : > { %v9293_v29 = vpop.eup %9292  ;;  %9312 = vrcp.f32 %v6389_v38  ;;  %v6396_v52 = vadd.f32 1.0, %v9291_v41  ;;  %v6133_v38 = vmul.f32 1.442695, %v5707_v21 }
 0x8a4   : > { %v9295_v15 = vpop.eup %9294  ;;  %9314 = vrcp.f32 %v6390_v48  ;;  %v6397_v25 = vadd.f32 1.0, %v9293_v29 }
 0x8a5   : > { %v9297_v31 = vpop.eup %9296  ;;  %9316 = vrcp.f32 %v6396_v52  ;;  %v6267_v8 = vadd.f32 1.0, %v9295_v15 }
 0x8a6   : > { %v9299_v58 = vpop.eup %9298  ;;  %9318 = vrcp.f32 %v6397_v25  ;;  %v6274_v12 = vadd.f32 1.0, %v9297_v31 }
 0x8a7   : > { %v9301_v44 = vpop.eup %9300  ;;  %9320 = vrcp.f32 %v6267_v8  ;;  %v6281_v7 = vadd.f32 1.0, %v9299_v58  ;;  %v5499_v8 = vadd.f32 %v11965_v42, %v11745_v39  ;;  %v5502_v58 = vadd.f32 %v11969_v54, %v11745_v39 }
 0x8a8   : > { %v9303_v14 = vpop.eup %9302  ;;  %9322 = vrcp.f32 %v6274_v12  ;;  %v6288_v49 = vadd.f32 1.0, %v9301_v44 }
 0x8a9   : > { %v9305_v17 = vpop.eup %9304  ;;  %6817 = vst [vmem:[%s11005_s28 + $0x600] sm:$0xff] %v9303_v14  ;;  %9324 = vrcp.f32 %v6281_v7  ;;  %v5721_v40 = vsub.f32 0.0, %v5499_v8 }
 0x8aa   : > { %v9307_v10 = vpop.eup %9306  ;;  %6823 = vst [vmem:[%s11005_s28 + $0x630] sm:$0xff] %v9305_v17  ;;  %9326 = vrcp.f32 %v6288_v49  ;;  %v5728_v49 = vsub.f32 0.0, %v5502_v58 }
 0x8ab   : > { %v9309_v0 = vpop.eup %9308  ;;  %6824 = vst [vmem:[%s11005_s28 + $0x638] sm:$0xff] %v9307_v10  ;;  %9328 = vpow2.f32 %v5965_v50  ;;  %v6161_v1 = vmul.f32 1.442695, %v5721_v40 }
 0x8ac   : > { %v9311_v4 = vpop.eup %9310  ;;  %6830 = vst [vmem:[%s11005_s28 + $0x668] sm:$0xff] %v9309_v0  ;;  %9330 = vpow2.f32 %v5979_v60  ;;  %v5494_v60 = vadd.f32 %v11948_v2, %v11745_v39 }
 0x8ad   : > { %v9313_v5 = vpop.eup %9312  ;;  %6831 = vst [vmem:[%s11005_s28 + $0x670] sm:$0xff] %v9311_v4  ;;  %9332 = vpow2.f32 %v5993_v6 }
 0x8ae   : > { %v9315_v26 = vpop.eup %9314  ;;  %6837 = vst [vmem:[%s11005_s28 + $0x6a0] sm:$0xff] %v9313_v5  ;;  %9334 = vpow2.f32 %v6007_v18  ;;  %v5714_v7 = vsub.f32 0.0, %v5494_v60  ;;  %v6175_v18 = vmul.f32 1.442695, %v5728_v49 }
 0x8af   : > { %v9317_v23 = vpop.eup %9316  ;;  %6838 = vst [vmem:[%s11005_s28 + $0x6a8] sm:$0xff] %v9315_v26  ;;  %9336 = vpow2.f32 %v6021_v19 }
 0x8b0   : > { %v9319_v9 = vpop.eup %9318  ;;  %6844 = vst [vmem:[%s11005_s28 + $0x6d8] sm:$0xff] %v9317_v23  ;;  %9338 = vpow2.f32 %v6035_v37  ;;  %v6147_v17 = vmul.f32 1.442695, %v5714_v7 }
 0x8b1   : > { %v9321_v20 = vpop.eup %9320  ;;  %6845 = vst [vmem:[%s11005_s28 + $0x6e0] sm:$0xff] %v9319_v9  ;;  %9340 = vpow2.f32 %v6049_v45 }
 0x8b2   : > { %v9323_v36 = vpop.eup %9322  ;;  %6715 = vst [vmem:[%s11005_s28 + $0x2d0] sm:$0xff] %v9321_v20  ;;  %9342 = vpow2.f32 %v6063_v53 }
 0x8b3   : > { %v9325_v11 = vpop.eup %9324  ;;  %6722 = vst [vmem:[%s11005_s28 + $0x308] sm:$0xff] %v9323_v36  ;;  %9344 = vpow2.f32 %v6077_v51 }
 0x8b4   : > { %v9327_v43 = vpop.eup %9326  ;;  %6729 = vst [vmem:[%s11005_s28 + $0x340] sm:$0xff] %v9325_v11  ;;  %9346 = vpow2.f32 %v6091_v62 }
 0x8b5   : > { %v9329_v41 = vpop.eup %9328  ;;  %6736 = vst [vmem:[%s11005_s28 + $0x378] sm:$0xff] %v9327_v43  ;;  %9348 = vpow2.f32 %v6105_v34 }
 0x8b6   : > { %v9331_v48 = vpop.eup %9330  ;;  %v6295_v63 = vadd.f32 1.0, %v9329_v41  ;;  %9350 = vpow2.f32 %v6119_v57 }
 0x8b7   : > { %v9333_v29 = vpop.eup %9332  ;;  %v6302_v52 = vadd.f32 1.0, %v9331_v48  ;;  %9352 = vpow2.f32 %v6133_v38 }
 0x8b8   : > { %v9335_v50 = vpop.eup %9334  ;;  %9354 = vrcp.f32 %v6295_v63  ;;  %v6309_v47 = vadd.f32 1.0, %v9333_v29 }
 0x8b9   : > { %v9337_v15 = vpop.eup %9336  ;;  %9356 = vrcp.f32 %v6302_v52  ;;  %v6316_v25 = vadd.f32 1.0, %v9335_v50 }
 0x8ba   : > { %v9339_v56 = vpop.eup %9338  ;;  %9358 = vrcp.f32 %v6309_v47  ;;  %v6323_v31 = vadd.f32 1.0, %v9337_v15 }
 0x8bb   : > { %v9341_v59 = vpop.eup %9340  ;;  %9360 = vrcp.f32 %v6316_v25  ;;  %v6330_v32 = vadd.f32 1.0, %v9339_v56 }
 0x8bc   : > { %v9343_v12 = vpop.eup %9342  ;;  %9362 = vrcp.f32 %v6323_v31  ;;  %v6337_v24 = vadd.f32 1.0, %v9341_v59 }
 0x8bd   : > { %v9345_v27 = vpop.eup %9344  ;;  %9364 = vrcp.f32 %v6330_v32  ;;  %v6344_v44 = vadd.f32 1.0, %v9343_v12 }
 0x8be   : > { %v9347_v2 = vpop.eup %9346  ;;  %9366 = vrcp.f32 %v6337_v24  ;;  %v6351_v46 = vadd.f32 1.0, %v9345_v27 }
 0x8bf   : > { %v9349_v14 = vpop.eup %9348  ;;  %9368 = vrcp.f32 %v6344_v44  ;;  %v6358_v42 = vadd.f32 1.0, %v9347_v2 }
 0x8c0   : > { %v9351_v3 = vpop.eup %9350  ;;  %9370 = vrcp.f32 %v6351_v46  ;;  %v6365_v39 = vadd.f32 1.0, %v9349_v14 }
 0x8c1   : > { %v9353_v54 = vpop.eup %9352  ;;  %9372 = vrcp.f32 %v6358_v42  ;;  %v6372_v16 = vadd.f32 1.0, %v9351_v3 }
 0x8c2   : > { %v9355_v6 = vpop.eup %9354  ;;  %9374 = vrcp.f32 %v6365_v39  ;;  %v6379_v13 = vadd.f32 1.0, %v9353_v54 }
 0x8c3   : > { %v9357_v10 = vpop.eup %9356  ;;  %6743 = vst [vmem:[%s11005_s28 + $0x3b0] sm:$0xff] %v9355_v6  ;;  %9376 = vrcp.f32 %v6372_v16 }
 0x8c4   : > { %v9359_v30 = vpop.eup %9358  ;;  %6750 = vst [vmem:[%s11005_s28 + $0x3e8] sm:$0xff] %v9357_v10  ;;  %9378 = vrcp.f32 %v6379_v13 }
 0x8c5   : > { %v9361_v55 = vpop.eup %9360  ;;  %6757 = vst [vmem:[%s11005_s28 + $0x420] sm:$0xff] %v9359_v30  ;;  %9380 = vpow2.f32 %v6147_v17 }
 0x8c6   : > { %v9363_v0 = vpop.eup %9362  ;;  %6764 = vst [vmem:[%s11005_s28 + $0x458] sm:$0xff] %v9361_v55  ;;  %9382 = vpow2.f32 %v6161_v1 }
 0x8c7   : > { %v9365_v19 = vpop.eup %9364  ;;  %6771 = vst [vmem:[%s11005_s28 + $0x490] sm:$0xff] %v9363_v0  ;;  %9384 = vpow2.f32 %v6175_v18 }
 0x8c8   : > { %v9367_v61 = vpop.eup %9366  ;;  %6778 = vst [vmem:[%s11005_s28 + $0x4c8] sm:$0xff] %v9365_v19 }
 0x8c9   : > { %v9369_v35 = vpop.eup %9368  ;;  %6785 = vst [vmem:[%s11005_s28 + $0x500] sm:$0xff] %v9367_v61 }
 0x8ca   : > { %v9371_v4 = vpop.eup %9370  ;;  %6792 = vst [vmem:[%s11005_s28 + $0x538] sm:$0xff] %v9369_v35 }
 0x8cb   : > { %v9373_v37 = vpop.eup %9372  ;;  %6799 = vst [vmem:[%s11005_s28 + $0x570] sm:$0xff] %v9371_v4 }
 0x8cc   : > { %v9375_v33 = vpop.eup %9374  ;;  %6806 = vst [vmem:[%s11005_s28 + $0x5a8] sm:$0xff] %v9373_v37 }
 0x8cd   : > { %v9377_v5 = vpop.eup %9376  ;;  %6813 = vst [vmem:[%s11005_s28 + $0x5e0] sm:$0xff] %v9375_v33 }
 0x8ce   : > { %v9379_v45 = vpop.eup %9378  ;;  %6820 = vst [vmem:[%s11005_s28 + $0x618] sm:$0xff] %v9377_v5 }
 0x8cf   : > { %v9381_v22 = vpop.eup %9380  ;;  %6827 = vst [vmem:[%s11005_s28 + $0x650] sm:$0xff] %v9379_v45 }
 0x8d0   : > { %v9383_v26 = vpop.eup %9382  ;;  %v6386_v53 = vadd.f32 1.0, %v9381_v22 }
 0x8d1   : > { %v9385_v28 = vpop.eup %9384  ;;  %v6393_v23 = vadd.f32 1.0, %v9383_v26 }
 0x8d2   : > { %9386 = vrcp.f32 %v6386_v53  ;;  %v6400_v51 = vadd.f32 1.0, %v9385_v28 }
 0x8d3   : > { %9388 = vrcp.f32 %v6393_v23 }
 0x8d4   : > { %9390 = vrcp.f32 %v6400_v51 }
 0x8dc   : > { %v9387_v21 = vpop.eup %9386 }
 0x8dd   : > { %v9389_v9 = vpop.eup %9388  ;;  %6834 = vst [vmem:[%s11005_s28 + $0x688] sm:$0xff] %v9387_v21 }
 0x8de   : > { %v9391_v62 = vpop.eup %9390  ;;  %6841 = vst [vmem:[%s11005_s28 + $0x6c0] sm:$0xff] %v9389_v9 }
 0x8df   : > { %6848 = vst [vmem:[%s11005_s28 + $0x6f8] sm:$0xff] %v9391_v62 }
 0x8e0 PF: > { %s23_s25 = sadd.s32 1, %s9399_s25  }
 0x8e1   : > { %p20_p4 = scmp.ge.s32.totalorder %s23_s25, 4  }
 0x8e3   :  { %22 = sbr.rel (!%p20_p4) target bundleno = 1 (0x1), region = 102 }

</bundles_post_ra>
